<compile_context>
chip_gen: v7x
topology: tpu7x:2x2x1
jax: 0.10.0
libtpu: 0.0.40
codegen_flags: <defaults>
</compile_context>

<pallas_src>
import functools

import jax
import jax.numpy as jnp
from jax.experimental import pallas as pl
from jax.experimental.pallas import tpu as pltpu


def _round_up(x, m):
    return (x + m - 1) // m * m


# ----------------------------- Pallas kernel --------------------------------

def _matmul_bn_act_kernel(a_ref, b_ref, scale_ref, shift_ref, *rest,
                          relu, has_res):
    """out = relu?( (A @ B) * scale + shift (+ residual) ), f32 accumulate."""
    if has_res:
        res_ref, o_ref = rest
    else:
        (o_ref,) = rest
    acc = jnp.dot(a_ref[...], b_ref[...], preferred_element_type=jnp.float32)
    out = acc * scale_ref[...] + shift_ref[...]        # f32 epilogue (v5e-safe)
    if has_res:
        out = out + res_ref[...].astype(jnp.float32)
    if relu:
        out = jnp.maximum(out, 0.0)
    o_ref[...] = out.astype(o_ref.dtype)


def matmul_bn_act(a, b, scale, shift, relu, residual=None, *, tm=512):
    """[M, K](bf16) @ [K, Cout](bf16) with fused BN scale/shift, optional
    residual add and ReLU.  K and Cout are single blocks; 1-D grid over M."""
    M, K = a.shape
    _, cout = b.shape
    tm = min(tm, _round_up(M, 8))
    grid = (pl.cdiv(M, tm),)

    in_specs = [
        pl.BlockSpec((tm, K), lambda i: (i, 0)),       # A tile (bf16)
        pl.BlockSpec((K, cout), lambda i: (0, 0)),     # full weight (bf16)
        pl.BlockSpec((1, cout), lambda i: (0, 0)),     # BN scale (f32)
        pl.BlockSpec((1, cout), lambda i: (0, 0)),     # BN shift (f32)
    ]
    args = [a, b,
            scale.reshape(1, cout).astype(jnp.float32),
            shift.reshape(1, cout).astype(jnp.float32)]
    has_res = residual is not None
    if has_res:
        in_specs.append(pl.BlockSpec((tm, cout), lambda i: (i, 0)))
        args.append(residual)

    return pl.pallas_call(
        functools.partial(_matmul_bn_act_kernel, relu=relu, has_res=has_res),
        out_shape=jax.ShapeDtypeStruct((M, cout), jnp.bfloat16),
        grid_spec=pltpu.PrefetchScalarGridSpec(
            num_scalar_prefetch=0,
            grid=grid,
            in_specs=in_specs,
            out_specs=pl.BlockSpec((tm, cout), lambda i: (i, 0)),
        ),
        compiler_params=pltpu.CompilerParams(
            dimension_semantics=("parallel",)),
    )(*args)


# ------------------------------ conv via im2col ------------------------------

def _im2col_ndhwc(x, ksize, stride, padding, k_align=8):
    """x: [N, D, H, W, C] (bf16) -> [N*Do*Ho*Wo, K] with K = kd*kh*kw*C,
    zero-padded up to a multiple of `k_align` inside the same concatenate
    (emitted directly in the final bf16 [M, K] layout; no extra pad pass)."""
    N, D, H, W, C = x.shape
    kd, kh, kw = ksize
    sd, sh, sw = stride
    pd, ph, pw = padding
    if pd or ph or pw:
        x = jnp.pad(x, ((0, 0), (pd, pd), (ph, ph), (pw, pw), (0, 0)))
    Do = (D + 2 * pd - kd) // sd + 1
    Ho = (H + 2 * ph - kh) // sh + 1
    Wo = (W + 2 * pw - kw) // sw + 1
    taps = []
    for dz in range(kd):
        for dy in range(kh):
            for dx in range(kw):
                taps.append(x[:, dz:dz + sd * (Do - 1) + 1:sd,
                                dy:dy + sh * (Ho - 1) + 1:sh,
                                dx:dx + sw * (Wo - 1) + 1:sw, :])
    k = kd * kh * kw * C
    kp = _round_up(k, k_align) - k
    if kp:
        taps.append(jnp.zeros((N, Do, Ho, Wo, kp), x.dtype))
    cols = taps[0] if len(taps) == 1 else jnp.concatenate(taps, axis=-1)
    return cols.reshape(N * Do * Ho * Wo, k + kp), (Do, Ho, Wo), kp


def conv3d_bn_act(x, w, gamma, beta, stride, padding, relu,
                  residual=None, eps=1e-5):
    """Conv3d(bias=False) + BatchNorm3d (inference) + optional fused
    residual add + optional ReLU.  x is NDHWC bf16; returns NDHWC bf16."""
    cout = w.shape[0]
    ksize = tuple(int(s) for s in w.shape[2:])
    # inference BN with running_mean=0, running_var=1
    scale = gamma / jnp.sqrt(jnp.float32(1.0 + eps))
    shift = beta
    cols, (Do, Ho, Wo), kp = _im2col_ndhwc(x, ksize, stride, padding)
    # [Cout, Cin, kd, kh, kw] -> [kd*kh*kw*Cin (+pad), Cout]  (matches cols' K order)
    wmat = jnp.transpose(w, (2, 3, 4, 1, 0)).reshape(-1, cout)
    if kp:
        wmat = jnp.pad(wmat, ((0, kp), (0, 0)))
    wmat = wmat.astype(jnp.bfloat16)
    res2d = None if residual is None else residual.reshape(-1, cout)
    out = matmul_bn_act(cols, wmat, scale, shift, relu, residual=res2d)
    N = x.shape[0]
    return out.reshape(N, Do, Ho, Wo, cout)


# --------------------------------- maxpool -----------------------------------

def maxpool3d_133(x):
    """MaxPool3d(kernel=(1,3,3), stride=(1,2,2), padding=(0,1,1)) on NDHWC.

    TODO(synk): window gather left to XLA (pairwise maximum over the 9 strided
    taps, fused, no 9x stacked tensor); not a Pallas kernel.  The -inf padding
    assumes a floating-point feature map.
    """
    N, D, H, W, C = x.shape
    xp = jnp.pad(x, ((0, 0), (0, 0), (1, 1), (1, 1), (0, 0)),
                 constant_values=-jnp.inf)
    Ho = (H + 2 - 3) // 2 + 1
    Wo = (W + 2 - 3) // 2 + 1
    out = None
    for dy in range(3):
        for dx in range(3):
            tap = xp[:, :, dy:dy + 2 * (Ho - 1) + 1:2,
                     dx:dx + 2 * (Wo - 1) + 1:2, :]
            out = tap if out is None else jnp.maximum(out, tap)
    return out


# ------------------------------ parameters -----------------------------------

def _kaiming(key, cout, cin, ksize):
    kd, kh, kw = ksize
    fan_out = cout * kd * kh * kw
    std = (2.0 / fan_out) ** 0.5
    return jax.random.normal(key, (cout, cin, kd, kh, kw), jnp.float32) * std


def make_params(key, block_inplanes=(8, 16, 32, 64), layers=(1, 1, 1, 1),
                n_input_channels=3, conv1_t_size=7, widen_factor=1.0):
    block_inplanes = [int(c * widen_factor) for c in block_inplanes]
    keys = iter(jax.random.split(key, 64))
    params = {}
    in_planes = block_inplanes[0]
    params["conv1_w"] = _kaiming(next(keys), in_planes, n_input_channels,
                                 (conv1_t_size, 7, 7))
    params["bn1_g"] = jnp.ones((in_planes,), jnp.float32)
    params["bn1_b"] = jnp.zeros((in_planes,), jnp.float32)

    strides = [(1, 1, 1), (1, 2, 2), (1, 2, 2), (1, 2, 2)]
    has_ds = [False, True, True, True]
    params["layers"] = []
    for li in range(4):
        planes = block_inplanes[li]
        blocks = []
        for bi in range(layers[li]):
            stride = strides[li] if bi == 0 else (1, 1, 1)
            blk = {
                "stride": stride,
                "conv1_w": _kaiming(next(keys), planes, in_planes, (3, 3, 3)),
                "bn1_g": jnp.ones((planes,), jnp.float32),
                "bn1_b": jnp.zeros((planes,), jnp.float32),
                "conv2_w": _kaiming(next(keys), planes, planes, (3, 3, 3)),
                "bn2_g": jnp.ones((planes,), jnp.float32),
                "bn2_b": jnp.zeros((planes,), jnp.float32),
                "downsample": None,
            }
            if bi == 0 and has_ds[li]:
                blk["downsample"] = {
                    "w": _kaiming(next(keys), planes, in_planes, (1, 1, 1)),
                    "g": jnp.ones((planes,), jnp.float32),
                    "b": jnp.zeros((planes,), jnp.float32),
                }
            blocks.append(blk)
            in_planes = planes
        params["layers"].append(blocks)
    return params


# ------------------------------ forward pass ---------------------------------

def basic_block_forward(blk, x):
    if blk["downsample"] is not None:
        ds = blk["downsample"]
        identity = conv3d_bn_act(x, ds["w"], ds["g"], ds["b"],
                                 stride=blk["stride"], padding=(0, 0, 0),
                                 relu=False)
    else:
        identity = x
    out = conv3d_bn_act(x, blk["conv1_w"], blk["bn1_g"], blk["bn1_b"],
                        stride=blk["stride"], padding=(1, 1, 1), relu=True)
    # second conv: BN + residual add + ReLU fused into the matmul epilogue
    out = conv3d_bn_act(out, blk["conv2_w"], blk["bn2_g"], blk["bn2_b"],
                        stride=(1, 1, 1), padding=(1, 1, 1), relu=True,
                        residual=identity)
    return out


def resnet_forward(params, x):
    """x: NCDHW float32 input -> layer4 features in NCDHW (like forward())."""
    x = jnp.transpose(x.astype(jnp.bfloat16), (0, 2, 3, 4, 1))   # -> NDHWC
    x = conv3d_bn_act(x, params["conv1_w"], params["bn1_g"], params["bn1_b"],
                      stride=(1, 2, 2), padding=(3, 3, 3), relu=True)
    x = maxpool3d_133(x)
    for layer in params["layers"]:
        for blk in layer:
            x = basic_block_forward(blk, x)
    return jnp.transpose(x, (0, 4, 1, 2, 3)).astype(jnp.float32)  # -> NCDHW


# ---------------------------------- main --------------------------------------

if __name__ == "__main__":
    key = jax.random.PRNGKey(0)
    pkey, xkey = jax.random.split(key)
    params = make_params(pkey)
    # NCDHW input, small shapes: batch=2, channels=3, D=8, H=W=16
    x = jax.random.normal(xkey, (2, 3, 8, 16, 16), jnp.float32)
    fwd = jax.jit(functools.partial(resnet_forward, params))
    out = jax.block_until_ready(fwd(x))
    assert out.shape == (2, 64, 8, 1, 1), out.shape
    assert bool(jnp.all(jnp.isfinite(out)))
    print("KERNEL_OK")
</pallas_src>

<mosaic_0001>
module attributes {stable_mosaic.version = 11 : i64} {
  func.func @_matmul_bn_act_kernel(%arg0: i32, %arg1: memref<512x1032xbf16, #tpu.memory_space<vmem>>, %arg2: memref<1032x8xbf16, #tpu.memory_space<vmem>>, %arg3: memref<1x8xf32, #tpu.memory_space<vmem>>, %arg4: memref<1x8xf32, #tpu.memory_space<vmem>>, %arg5: memref<512x8xbf16, #tpu.memory_space<vmem>>) attributes {dimension_semantics = [#tpu.dimension_semantics<parallel>], iteration_bounds = array<i64: 2>, scalar_prefetch = 0 : i64, scratch_operands = 0 : i64, tpu.core_type = #tpu.core_type<tc>, window_params = [{transform_indices = @transform_0, window_bounds = array<i64: 512, 1032>}, {pipeline_mode = #tpu.pipeline_mode<synchronous>, transform_indices = @transform_1, window_bounds = array<i64: 1032, 8>}, {pipeline_mode = #tpu.pipeline_mode<synchronous>, transform_indices = @transform_2, window_bounds = array<i64: 1, 8>}, {pipeline_mode = #tpu.pipeline_mode<synchronous>, transform_indices = @transform_3, window_bounds = array<i64: 1, 8>}, {transform_indices = @transform_4, window_bounds = array<i64: 512, 8>}]} {
    %c0 = arith.constant 0 : index
    %c0_0 = arith.constant 0 : index
    %0 = vector.load %arg1[%c0, %c0_0] : memref<512x1032xbf16, #tpu.memory_space<vmem>>, vector<512x1032xbf16>
    %c0_1 = arith.constant 0 : index
    %c0_2 = arith.constant 0 : index
    %1 = vector.load %arg2[%c0_1, %c0_2] : memref<1032x8xbf16, #tpu.memory_space<vmem>>, vector<1032x8xbf16>
    %cst = arith.constant dense<0.000000e+00> : vector<512x8xf32>
    %2 = tpu.matmul %0, %1, %cst {dimension_numbers = #tpu.dot_dimension_numbers<[1], [0], [0], [1], [0, 0, 1, 1], [], []>} : vector<512x1032xbf16>, vector<1032x8xbf16>, vector<512x8xf32> -> vector<512x8xf32>
    %c0_3 = arith.constant 0 : index
    %c0_4 = arith.constant 0 : index
    %3 = vector.load %arg3[%c0_3, %c0_4] : memref<1x8xf32, #tpu.memory_space<vmem>>, vector<1x8xf32>
    %4 = vector.broadcast %3 : vector<1x8xf32> to vector<512x8xf32>
    %5 = arith.mulf %2, %4 : vector<512x8xf32>
    %c0_5 = arith.constant 0 : index
    %c0_6 = arith.constant 0 : index
    %6 = vector.load %arg4[%c0_5, %c0_6] : memref<1x8xf32, #tpu.memory_space<vmem>>, vector<1x8xf32>
    %7 = vector.broadcast %6 : vector<1x8xf32> to vector<512x8xf32>
    %8 = arith.addf %5, %7 : vector<512x8xf32>
    %cst_7 = arith.constant 0.000000e+00 : f32
    %9 = vector.broadcast %cst_7 : f32 to vector<512x8xf32>
    %10 = arith.maximumf %8, %9 : vector<512x8xf32>
    %11 = arith.truncf %10 : vector<512x8xf32> to vector<512x8xbf16>
    %c0_8 = arith.constant 0 : index
    %c0_9 = arith.constant 0 : index
    %12 = vector.load %arg5[%c0_8, %c0_9] : memref<512x8xbf16, #tpu.memory_space<vmem>>, vector<512x8xbf16>
    tpu.vector_store %arg5[%c0_8, %c0_9], %11 {strides = array<i32>} : memref<512x8xbf16, #tpu.memory_space<vmem>>, vector<512x8xbf16>,
    return
  }
  func.func @transform_0(%arg0: i32) -> (i32, i32) {
    %c0_i32 = arith.constant 0 : i32
    %c0_i32_0 = arith.constant 0 : i32
    return %arg0, %c0_i32 : i32, i32
  }
  func.func @transform_1(%arg0: i32) -> (i32, i32) {
    %c0_i32 = arith.constant 0 : i32
    %c0_i32_0 = arith.constant 0 : i32
    %c0_i32_1 = arith.constant 0 : i32
    return %c0_i32, %c0_i32_0 : i32, i32
  }
  func.func @transform_2(%arg0: i32) -> (i32, i32) {
    %c0_i32 = arith.constant 0 : i32
    %c0_i32_0 = arith.constant 0 : i32
    %c0_i32_1 = arith.constant 0 : i32
    return %c0_i32, %c0_i32_0 : i32, i32
  }
  func.func @transform_3(%arg0: i32) -> (i32, i32) {
    %c0_i32 = arith.constant 0 : i32
    %c0_i32_0 = arith.constant 0 : i32
    %c0_i32_1 = arith.constant 0 : i32
    return %c0_i32, %c0_i32_0 : i32, i32
  }
  func.func @transform_4(%arg0: i32) -> (i32, i32) {
    %c0_i32 = arith.constant 0 : i32
    %c0_i32_0 = arith.constant 0 : i32
    return %arg0, %c0_i32 : i32, i32
  }
}

module attributes {stable_mosaic.version = 11 : i64} {
  func.func @_matmul_bn_act_kernel(%arg0: i32, %arg1: memref<256x216xbf16, #tpu.memory_space<vmem>>, %arg2: memref<216x8xbf16, #tpu.memory_space<vmem>>, %arg3: memref<1x8xf32, #tpu.memory_space<vmem>>, %arg4: memref<1x8xf32, #tpu.memory_space<vmem>>, %arg5: memref<256x8xbf16, #tpu.memory_space<vmem>>) attributes {dimension_semantics = [#tpu.dimension_semantics<parallel>], iteration_bounds = array<i64: 1>, scalar_prefetch = 0 : i64, scratch_operands = 0 : i64, tpu.core_type = #tpu.core_type<tc>, window_params = [{transform_indices = @transform_0, window_bounds = array<i64: 256, 216>}, {pipeline_mode = #tpu.pipeline_mode<synchronous>, transform_indices = @transform_1, window_bounds = array<i64: 216, 8>}, {pipeline_mode = #tpu.pipeline_mode<synchronous>, transform_indices = @transform_2, window_bounds = array<i64: 1, 8>}, {pipeline_mode = #tpu.pipeline_mode<synchronous>, transform_indices = @transform_3, window_bounds = array<i64: 1, 8>}, {transform_indices = @transform_4, window_bounds = array<i64: 256, 8>}]} {
    %c0 = arith.constant 0 : index
    %c0_0 = arith.constant 0 : index
    %0 = vector.load %arg1[%c0, %c0_0] : memref<256x216xbf16, #tpu.memory_space<vmem>>, vector<256x216xbf16>
    %c0_1 = arith.constant 0 : index
    %c0_2 = arith.constant 0 : index
    %1 = vector.load %arg2[%c0_1, %c0_2] : memref<216x8xbf16, #tpu.memory_space<vmem>>, vector<216x8xbf16>
    %cst = arith.constant dense<0.000000e+00> : vector<256x8xf32>
    %2 = tpu.matmul %0, %1, %cst {dimension_numbers = #tpu.dot_dimension_numbers<[1], [0], [0], [1], [0, 0, 1, 1], [], []>} : vector<256x216xbf16>, vector<216x8xbf16>, vector<256x8xf32> -> vector<256x8xf32>
    %c0_3 = arith.constant 0 : index
    %c0_4 = arith.constant 0 : index
    %3 = vector.load %arg3[%c0_3, %c0_4] : memref<1x8xf32, #tpu.memory_space<vmem>>, vector<1x8xf32>
    %4 = vector.broadcast %3 : vector<1x8xf32> to vector<256x8xf32>
    %5 = arith.mulf %2, %4 : vector<256x8xf32>
    %c0_5 = arith.constant 0 : index
    %c0_6 = arith.constant 0 : index
    %6 = vector.load %arg4[%c0_5, %c0_6] : memref<1x8xf32, #tpu.memory_space<vmem>>, vector<1x8xf32>
    %7 = vector.broadcast %6 : vector<1x8xf32> to vector<256x8xf32>
    %8 = arith.addf %5, %7 : vector<256x8xf32>
    %cst_7 = arith.constant 0.000000e+00 : f32
    %9 = vector.broadcast %cst_7 : f32 to vector<256x8xf32>
    %10 = arith.maximumf %8, %9 : vector<256x8xf32>
    %11 = arith.truncf %10 : vector<256x8xf32> to vector<256x8xbf16>
    %c0_8 = arith.constant 0 : index
    %c0_9 = arith.constant 0 : index
    %12 = vector.load %arg5[%c0_8, %c0_9] : memref<256x8xbf16, #tpu.memory_space<vmem>>, vector<256x8xbf16>
    tpu.vector_store %arg5[%c0_8, %c0_9], %11 {strides = array<i32>} : memref<256x8xbf16, #tpu.memory_space<vmem>>, vector<256x8xbf16>,
    return
  }
  func.func @transform_0(%arg0: i32) -> (i32, i32) {
    %c0_i32 = arith.constant 0 : i32
    %c0_i32_0 = arith.constant 0 : i32
    return %arg0, %c0_i32 : i32, i32
  }
  func.func @transform_1(%arg0: i32) -> (i32, i32) {
    %c0_i32 = arith.constant 0 : i32
    %c0_i32_0 = arith.constant 0 : i32
    %c0_i32_1 = arith.constant 0 : i32
    return %c0_i32, %c0_i32_0 : i32, i32
  }
  func.func @transform_2(%arg0: i32) -> (i32, i32) {
    %c0_i32 = arith.constant 0 : i32
    %c0_i32_0 = arith.constant 0 : i32
    %c0_i32_1 = arith.constant 0 : i32
    return %c0_i32, %c0_i32_0 : i32, i32
  }
  func.func @transform_3(%arg0: i32) -> (i32, i32) {
    %c0_i32 = arith.constant 0 : i32
    %c0_i32_0 = arith.constant 0 : i32
    %c0_i32_1 = arith.constant 0 : i32
    return %c0_i32, %c0_i32_0 : i32, i32
  }
  func.func @transform_4(%arg0: i32) -> (i32, i32) {
    %c0_i32 = arith.constant 0 : i32
    %c0_i32_0 = arith.constant 0 : i32
    return %arg0, %c0_i32 : i32, i32
  }
}

module attributes {stable_mosaic.version = 11 : i64} {
  func.func @_matmul_bn_act_kernel(%arg0: i32, %arg1: memref<256x216xbf16, #tpu.memory_space<vmem>>, %arg2: memref<216x8xbf16, #tpu.memory_space<vmem>>, %arg3: memref<1x8xf32, #tpu.memory_space<vmem>>, %arg4: memref<1x8xf32, #tpu.memory_space<vmem>>, %arg5: memref<256x8xbf16, #tpu.memory_space<vmem>>, %arg6: memref<256x8xbf16, #tpu.memory_space<vmem>>) attributes {dimension_semantics = [#tpu.dimension_semantics<parallel>], iteration_bounds = array<i64: 1>, scalar_prefetch = 0 : i64, scratch_operands = 0 : i64, tpu.core_type = #tpu.core_type<tc>, window_params = [{transform_indices = @transform_0, window_bounds = array<i64: 256, 216>}, {pipeline_mode = #tpu.pipeline_mode<synchronous>, transform_indices = @transform_1, window_bounds = array<i64: 216, 8>}, {pipeline_mode = #tpu.pipeline_mode<synchronous>, transform_indices = @transform_2, window_bounds = array<i64: 1, 8>}, {pipeline_mode = #tpu.pipeline_mode<synchronous>, transform_indices = @transform_3, window_bounds = array<i64: 1, 8>}, {transform_indices = @transform_4, window_bounds = array<i64: 256, 8>}, {transform_indices = @transform_5, window_bounds = array<i64: 256, 8>}]} {
    %c0 = arith.constant 0 : index
    %c0_0 = arith.constant 0 : index
    %0 = vector.load %arg1[%c0, %c0_0] : memref<256x216xbf16, #tpu.memory_space<vmem>>, vector<256x216xbf16>
    %c0_1 = arith.constant 0 : index
    %c0_2 = arith.constant 0 : index
    %1 = vector.load %arg2[%c0_1, %c0_2] : memref<216x8xbf16, #tpu.memory_space<vmem>>, vector<216x8xbf16>
    %cst = arith.constant dense<0.000000e+00> : vector<256x8xf32>
    %2 = tpu.matmul %0, %1, %cst {dimension_numbers = #tpu.dot_dimension_numbers<[1], [0], [0], [1], [0, 0, 1, 1], [], []>} : vector<256x216xbf16>, vector<216x8xbf16>, vector<256x8xf32> -> vector<256x8xf32>
    %c0_3 = arith.constant 0 : index
    %c0_4 = arith.constant 0 : index
    %3 = vector.load %arg3[%c0_3, %c0_4] : memref<1x8xf32, #tpu.memory_space<vmem>>, vector<1x8xf32>
    %4 = vector.broadcast %3 : vector<1x8xf32> to vector<256x8xf32>
    %5 = arith.mulf %2, %4 : vector<256x8xf32>
    %c0_5 = arith.constant 0 : index
    %c0_6 = arith.constant 0 : index
    %6 = vector.load %arg4[%c0_5, %c0_6] : memref<1x8xf32, #tpu.memory_space<vmem>>, vector<1x8xf32>
    %7 = vector.broadcast %6 : vector<1x8xf32> to vector<256x8xf32>
    %8 = arith.addf %5, %7 : vector<256x8xf32>
    %c0_7 = arith.constant 0 : index
    %c0_8 = arith.constant 0 : index
    %9 = vector.load %arg5[%c0_7, %c0_8] : memref<256x8xbf16, #tpu.memory_space<vmem>>, vector<256x8xbf16>
    %10 = arith.extf %9 : vector<256x8xbf16> to vector<256x8xf32>
    %11 = arith.addf %8, %10 : vector<256x8xf32>
    %cst_9 = arith.constant 0.000000e+00 : f32
    %12 = vector.broadcast %cst_9 : f32 to vector<256x8xf32>
    %13 = arith.maximumf %11, %12 : vector<256x8xf32>
    %14 = arith.truncf %13 : vector<256x8xf32> to vector<256x8xbf16>
    %c0_10 = arith.constant 0 : index
    %c0_11 = arith.constant 0 : index
    %15 = vector.load %arg6[%c0_10, %c0_11] : memref<256x8xbf16, #tpu.memory_space<vmem>>, vector<256x8xbf16>
    tpu.vector_store %arg6[%c0_10, %c0_11], %14 {strides = array<i32>} : memref<256x8xbf16, #tpu.memory_space<vmem>>, vector<256x8xbf16>,
    return
  }
  func.func @transform_0(%arg0: i32) -> (i32, i32) {
    %c0_i32 = arith.constant 0 : i32
    %c0_i32_0 = arith.constant 0 : i32
    return %arg0, %c0_i32 : i32, i32
  }
  func.func @transform_1(%arg0: i32) -> (i32, i32) {
    %c0_i32 = arith.constant 0 : i32
    %c0_i32_0 = arith.constant 0 : i32
    %c0_i32_1 = arith.constant 0 : i32
    return %c0_i32, %c0_i32_0 : i32, i32
  }
  func.func @transform_2(%arg0: i32) -> (i32, i32) {
    %c0_i32 = arith.constant 0 : i32
    %c0_i32_0 = arith.constant 0 : i32
    %c0_i32_1 = arith.constant 0 : i32
    return %c0_i32, %c0_i32_0 : i32, i32
  }
  func.func @transform_3(%arg0: i32) -> (i32, i32) {
    %c0_i32 = arith.constant 0 : i32
    %c0_i32_0 = arith.constant 0 : i32
    %c0_i32_1 = arith.constant 0 : i32
    return %c0_i32, %c0_i32_0 : i32, i32
  }
  func.func @transform_4(%arg0: i32) -> (i32, i32) {
    %c0_i32 = arith.constant 0 : i32
    %c0_i32_0 = arith.constant 0 : i32
    return %arg0, %c0_i32 : i32, i32
  }
  func.func @transform_5(%arg0: i32) -> (i32, i32) {
    %c0_i32 = arith.constant 0 : i32
    %c0_i32_0 = arith.constant 0 : i32
    return %arg0, %c0_i32 : i32, i32
  }
}

module attributes {stable_mosaic.version = 11 : i64} {
  func.func @_matmul_bn_act_kernel(%arg0: i32, %arg1: memref<64x216xbf16, #tpu.memory_space<vmem>>, %arg2: memref<216x16xbf16, #tpu.memory_space<vmem>>, %arg3: memref<1x16xf32, #tpu.memory_space<vmem>>, %arg4: memref<1x16xf32, #tpu.memory_space<vmem>>, %arg5: memref<64x16xbf16, #tpu.memory_space<vmem>>) attributes {dimension_semantics = [#tpu.dimension_semantics<parallel>], iteration_bounds = array<i64: 1>, scalar_prefetch = 0 : i64, scratch_operands = 0 : i64, tpu.core_type = #tpu.core_type<tc>, window_params = [{transform_indices = @transform_0, window_bounds = array<i64: 64, 216>}, {pipeline_mode = #tpu.pipeline_mode<synchronous>, transform_indices = @transform_1, window_bounds = array<i64: 216, 16>}, {pipeline_mode = #tpu.pipeline_mode<synchronous>, transform_indices = @transform_2, window_bounds = array<i64: 1, 16>}, {pipeline_mode = #tpu.pipeline_mode<synchronous>, transform_indices = @transform_3, window_bounds = array<i64: 1, 16>}, {transform_indices = @transform_4, window_bounds = array<i64: 64, 16>}]} {
    %c0 = arith.constant 0 : index
    %c0_0 = arith.constant 0 : index
    %0 = vector.load %arg1[%c0, %c0_0] : memref<64x216xbf16, #tpu.memory_space<vmem>>, vector<64x216xbf16>
    %c0_1 = arith.constant 0 : index
    %c0_2 = arith.constant 0 : index
    %1 = vector.load %arg2[%c0_1, %c0_2] : memref<216x16xbf16, #tpu.memory_space<vmem>>, vector<216x16xbf16>
    %cst = arith.constant dense<0.000000e+00> : vector<64x16xf32>
    %2 = tpu.matmul %0, %1, %cst {dimension_numbers = #tpu.dot_dimension_numbers<[1], [0], [0], [1], [0, 0, 1, 1], [], []>} : vector<64x216xbf16>, vector<216x16xbf16>, vector<64x16xf32> -> vector<64x16xf32>
    %c0_3 = arith.constant 0 : index
    %c0_4 = arith.constant 0 : index
    %3 = vector.load %arg3[%c0_3, %c0_4] : memref<1x16xf32, #tpu.memory_space<vmem>>, vector<1x16xf32>
    %4 = vector.broadcast %3 : vector<1x16xf32> to vector<64x16xf32>
    %5 = arith.mulf %2, %4 : vector<64x16xf32>
    %c0_5 = arith.constant 0 : index
    %c0_6 = arith.constant 0 : index
    %6 = vector.load %arg4[%c0_5, %c0_6] : memref<1x16xf32, #tpu.memory_space<vmem>>, vector<1x16xf32>
    %7 = vector.broadcast %6 : vector<1x16xf32> to vector<64x16xf32>
    %8 = arith.addf %5, %7 : vector<64x16xf32>
    %cst_7 = arith.constant 0.000000e+00 : f32
    %9 = vector.broadcast %cst_7 : f32 to vector<64x16xf32>
    %10 = arith.maximumf %8, %9 : vector<64x16xf32>
    %11 = arith.truncf %10 : vector<64x16xf32> to vector<64x16xbf16>
    %c0_8 = arith.constant 0 : index
    %c0_9 = arith.constant 0 : index
    %12 = vector.load %arg5[%c0_8, %c0_9] : memref<64x16xbf16, #tpu.memory_space<vmem>>, vector<64x16xbf16>
    tpu.vector_store %arg5[%c0_8, %c0_9], %11 {strides = array<i32>} : memref<64x16xbf16, #tpu.memory_space<vmem>>, vector<64x16xbf16>,
    return
  }
  func.func @transform_0(%arg0: i32) -> (i32, i32) {
    %c0_i32 = arith.constant 0 : i32
    %c0_i32_0 = arith.constant 0 : i32
    return %arg0, %c0_i32 : i32, i32
  }
  func.func @transform_1(%arg0: i32) -> (i32, i32) {
    %c0_i32 = arith.constant 0 : i32
    %c0_i32_0 = arith.constant 0 : i32
    %c0_i32_1 = arith.constant 0 : i32
    return %c0_i32, %c0_i32_0 : i32, i32
  }
  func.func @transform_2(%arg0: i32) -> (i32, i32) {
    %c0_i32 = arith.constant 0 : i32
    %c0_i32_0 = arith.constant 0 : i32
    %c0_i32_1 = arith.constant 0 : i32
    return %c0_i32, %c0_i32_0 : i32, i32
  }
  func.func @transform_3(%arg0: i32) -> (i32, i32) {
    %c0_i32 = arith.constant 0 : i32
    %c0_i32_0 = arith.constant 0 : i32
    %c0_i32_1 = arith.constant 0 : i32
    return %c0_i32, %c0_i32_0 : i32, i32
  }
  func.func @transform_4(%arg0: i32) -> (i32, i32) {
    %c0_i32 = arith.constant 0 : i32
    %c0_i32_0 = arith.constant 0 : i32
    return %arg0, %c0_i32 : i32, i32
  }
}

module attributes {stable_mosaic.version = 11 : i64} {
  func.func @_matmul_bn_act_kernel(%arg0: i32, %arg1: memref<64x8xbf16, #tpu.memory_space<vmem>>, %arg2: memref<8x16xbf16, #tpu.memory_space<vmem>>, %arg3: memref<1x16xf32, #tpu.memory_space<vmem>>, %arg4: memref<1x16xf32, #tpu.memory_space<vmem>>, %arg5: memref<64x16xbf16, #tpu.memory_space<vmem>>) attributes {dimension_semantics = [#tpu.dimension_semantics<parallel>], iteration_bounds = array<i64: 1>, scalar_prefetch = 0 : i64, scratch_operands = 0 : i64, tpu.core_type = #tpu.core_type<tc>, window_params = [{transform_indices = @transform_0, window_bounds = array<i64: 64, 8>}, {pipeline_mode = #tpu.pipeline_mode<synchronous>, transform_indices = @transform_1, window_bounds = array<i64: 8, 16>}, {pipeline_mode = #tpu.pipeline_mode<synchronous>, transform_indices = @transform_2, window_bounds = array<i64: 1, 16>}, {pipeline_mode = #tpu.pipeline_mode<synchronous>, transform_indices = @transform_3, window_bounds = array<i64: 1, 16>}, {transform_indices = @transform_4, window_bounds = array<i64: 64, 16>}]} {
    %c0 = arith.constant 0 : index
    %c0_0 = arith.constant 0 : index
    %0 = vector.load %arg1[%c0, %c0_0] : memref<64x8xbf16, #tpu.memory_space<vmem>>, vector<64x8xbf16>
    %c0_1 = arith.constant 0 : index
    %c0_2 = arith.constant 0 : index
    %1 = vector.load %arg2[%c0_1, %c0_2] : memref<8x16xbf16, #tpu.memory_space<vmem>>, vector<8x16xbf16>
    %cst = arith.constant dense<0.000000e+00> : vector<64x16xf32>
    %2 = tpu.matmul %0, %1, %cst {dimension_numbers = #tpu.dot_dimension_numbers<[1], [0], [0], [1], [0, 0, 1, 1], [], []>} : vector<64x8xbf16>, vector<8x16xbf16>, vector<64x16xf32> -> vector<64x16xf32>
    %c0_3 = arith.constant 0 : index
    %c0_4 = arith.constant 0 : index
    %3 = vector.load %arg3[%c0_3, %c0_4] : memref<1x16xf32, #tpu.memory_space<vmem>>, vector<1x16xf32>
    %4 = vector.broadcast %3 : vector<1x16xf32> to vector<64x16xf32>
    %5 = arith.mulf %2, %4 : vector<64x16xf32>
    %c0_5 = arith.constant 0 : index
    %c0_6 = arith.constant 0 : index
    %6 = vector.load %arg4[%c0_5, %c0_6] : memref<1x16xf32, #tpu.memory_space<vmem>>, vector<1x16xf32>
    %7 = vector.broadcast %6 : vector<1x16xf32> to vector<64x16xf32>
    %8 = arith.addf %5, %7 : vector<64x16xf32>
    %9 = arith.truncf %8 : vector<64x16xf32> to vector<64x16xbf16>
    %c0_7 = arith.constant 0 : index
    %c0_8 = arith.constant 0 : index
    %10 = vector.load %arg5[%c0_7, %c0_8] : memref<64x16xbf16, #tpu.memory_space<vmem>>, vector<64x16xbf16>
    tpu.vector_store %arg5[%c0_7, %c0_8], %9 {strides = array<i32>} : memref<64x16xbf16, #tpu.memory_space<vmem>>, vector<64x16xbf16>,
    return
  }
  func.func @transform_0(%arg0: i32) -> (i32, i32) {
    %c0_i32 = arith.constant 0 : i32
    %c0_i32_0 = arith.constant 0 : i32
    return %arg0, %c0_i32 : i32, i32
  }
  func.func @transform_1(%arg0: i32) -> (i32, i32) {
    %c0_i32 = arith.constant 0 : i32
    %c0_i32_0 = arith.constant 0 : i32
    %c0_i32_1 = arith.constant 0 : i32
    return %c0_i32, %c0_i32_0 : i32, i32
  }
  func.func @transform_2(%arg0: i32) -> (i32, i32) {
    %c0_i32 = arith.constant 0 : i32
    %c0_i32_0 = arith.constant 0 : i32
    %c0_i32_1 = arith.constant 0 : i32
    return %c0_i32, %c0_i32_0 : i32, i32
  }
  func.func @transform_3(%arg0: i32) -> (i32, i32) {
    %c0_i32 = arith.constant 0 : i32
    %c0_i32_0 = arith.constant 0 : i32
    %c0_i32_1 = arith.constant 0 : i32
    return %c0_i32, %c0_i32_0 : i32, i32
  }
  func.func @transform_4(%arg0: i32) -> (i32, i32) {
    %c0_i32 = arith.constant 0 : i32
    %c0_i32_0 = arith.constant 0 : i32
    return %arg0, %c0_i32 : i32, i32
  }
}

module attributes {stable_mosaic.version = 11 : i64} {
  func.func @_matmul_bn_act_kernel(%arg0: i32, %arg1: memref<64x432xbf16, #tpu.memory_space<vmem>>, %arg2: memref<432x16xbf16, #tpu.memory_space<vmem>>, %arg3: memref<1x16xf32, #tpu.memory_space<vmem>>, %arg4: memref<1x16xf32, #tpu.memory_space<vmem>>, %arg5: memref<64x16xbf16, #tpu.memory_space<vmem>>, %arg6: memref<64x16xbf16, #tpu.memory_space<vmem>>) attributes {dimension_semantics = [#tpu.dimension_semantics<parallel>], iteration_bounds = array<i64: 1>, scalar_prefetch = 0 : i64, scratch_operands = 0 : i64, tpu.core_type = #tpu.core_type<tc>, window_params = [{transform_indices = @transform_0, window_bounds = array<i64: 64, 432>}, {pipeline_mode = #tpu.pipeline_mode<synchronous>, transform_indices = @transform_1, window_bounds = array<i64: 432, 16>}, {pipeline_mode = #tpu.pipeline_mode<synchronous>, transform_indices = @transform_2, window_bounds = array<i64: 1, 16>}, {pipeline_mode = #tpu.pipeline_mode<synchronous>, transform_indices = @transform_3, window_bounds = array<i64: 1, 16>}, {transform_indices = @transform_4, window_bounds = array<i64: 64, 16>}, {transform_indices = @transform_5, window_bounds = array<i64: 64, 16>}]} {
    %c0 = arith.constant 0 : index
    %c0_0 = arith.constant 0 : index
    %0 = vector.load %arg1[%c0, %c0_0] : memref<64x432xbf16, #tpu.memory_space<vmem>>, vector<64x432xbf16>
    %c0_1 = arith.constant 0 : index
    %c0_2 = arith.constant 0 : index
    %1 = vector.load %arg2[%c0_1, %c0_2] : memref<432x16xbf16, #tpu.memory_space<vmem>>, vector<432x16xbf16>
    %cst = arith.constant dense<0.000000e+00> : vector<64x16xf32>
    %2 = tpu.matmul %0, %1, %cst {dimension_numbers = #tpu.dot_dimension_numbers<[1], [0], [0], [1], [0, 0, 1, 1], [], []>} : vector<64x432xbf16>, vector<432x16xbf16>, vector<64x16xf32> -> vector<64x16xf32>
    %c0_3 = arith.constant 0 : index
    %c0_4 = arith.constant 0 : index
    %3 = vector.load %arg3[%c0_3, %c0_4] : memref<1x16xf32, #tpu.memory_space<vmem>>, vector<1x16xf32>
    %4 = vector.broadcast %3 : vector<1x16xf32> to vector<64x16xf32>
    %5 = arith.mulf %2, %4 : vector<64x16xf32>
    %c0_5 = arith.constant 0 : index
    %c0_6 = arith.constant 0 : index
    %6 = vector.load %arg4[%c0_5, %c0_6] : memref<1x16xf32, #tpu.memory_space<vmem>>, vector<1x16xf32>
    %7 = vector.broadcast %6 : vector<1x16xf32> to vector<64x16xf32>
    %8 = arith.addf %5, %7 : vector<64x16xf32>
    %c0_7 = arith.constant 0 : index
    %c0_8 = arith.constant 0 : index
    %9 = vector.load %arg5[%c0_7, %c0_8] : memref<64x16xbf16, #tpu.memory_space<vmem>>, vector<64x16xbf16>
    %10 = arith.extf %9 : vector<64x16xbf16> to vector<64x16xf32>
    %11 = arith.addf %8, %10 : vector<64x16xf32>
    %cst_9 = arith.constant 0.000000e+00 : f32
    %12 = vector.broadcast %cst_9 : f32 to vector<64x16xf32>
    %13 = arith.maximumf %11, %12 : vector<64x16xf32>
    %14 = arith.truncf %13 : vector<64x16xf32> to vector<64x16xbf16>
    %c0_10 = arith.constant 0 : index
    %c0_11 = arith.constant 0 : index
    %15 = vector.load %arg6[%c0_10, %c0_11] : memref<64x16xbf16, #tpu.memory_space<vmem>>, vector<64x16xbf16>
    tpu.vector_store %arg6[%c0_10, %c0_11], %14 {strides = array<i32>} : memref<64x16xbf16, #tpu.memory_space<vmem>>, vector<64x16xbf16>,
    return
  }
  func.func @transform_0(%arg0: i32) -> (i32, i32) {
    %c0_i32 = arith.constant 0 : i32
    %c0_i32_0 = arith.constant 0 : i32
    return %arg0, %c0_i32 : i32, i32
  }
  func.func @transform_1(%arg0: i32) -> (i32, i32) {
    %c0_i32 = arith.constant 0 : i32
    %c0_i32_0 = arith.constant 0 : i32
    %c0_i32_1 = arith.constant 0 : i32
    return %c0_i32, %c0_i32_0 : i32, i32
  }
  func.func @transform_2(%arg0: i32) -> (i32, i32) {
    %c0_i32 = arith.constant 0 : i32
    %c0_i32_0 = arith.constant 0 : i32
    %c0_i32_1 = arith.constant 0 : i32
    return %c0_i32, %c0_i32_0 : i32, i32
  }
  func.func @transform_3(%arg0: i32) -> (i32, i32) {
    %c0_i32 = arith.constant 0 : i32
    %c0_i32_0 = arith.constant 0 : i32
    %c0_i32_1 = arith.constant 0 : i32
    return %c0_i32, %c0_i32_0 : i32, i32
  }
  func.func @transform_4(%arg0: i32) -> (i32, i32) {
    %c0_i32 = arith.constant 0 : i32
    %c0_i32_0 = arith.constant 0 : i32
    return %arg0, %c0_i32 : i32, i32
  }
  func.func @transform_5(%arg0: i32) -> (i32, i32) {
    %c0_i32 = arith.constant 0 : i32
    %c0_i32_0 = arith.constant 0 : i32
    return %arg0, %c0_i32 : i32, i32
  }
}

module attributes {stable_mosaic.version = 11 : i64} {
  func.func @_matmul_bn_act_kernel(%arg0: i32, %arg1: memref<16x432xbf16, #tpu.memory_space<vmem>>, %arg2: memref<432x32xbf16, #tpu.memory_space<vmem>>, %arg3: memref<1x32xf32, #tpu.memory_space<vmem>>, %arg4: memref<1x32xf32, #tpu.memory_space<vmem>>, %arg5: memref<16x32xbf16, #tpu.memory_space<vmem>>) attributes {dimension_semantics = [#tpu.dimension_semantics<parallel>], iteration_bounds = array<i64: 1>, scalar_prefetch = 0 : i64, scratch_operands = 0 : i64, tpu.core_type = #tpu.core_type<tc>, window_params = [{transform_indices = @transform_0, window_bounds = array<i64: 16, 432>}, {pipeline_mode = #tpu.pipeline_mode<synchronous>, transform_indices = @transform_1, window_bounds = array<i64: 432, 32>}, {pipeline_mode = #tpu.pipeline_mode<synchronous>, transform_indices = @transform_2, window_bounds = array<i64: 1, 32>}, {pipeline_mode = #tpu.pipeline_mode<synchronous>, transform_indices = @transform_3, window_bounds = array<i64: 1, 32>}, {transform_indices = @transform_4, window_bounds = array<i64: 16, 32>}]} {
    %c0 = arith.constant 0 : index
    %c0_0 = arith.constant 0 : index
    %0 = vector.load %arg1[%c0, %c0_0] : memref<16x432xbf16, #tpu.memory_space<vmem>>, vector<16x432xbf16>
    %c0_1 = arith.constant 0 : index
    %c0_2 = arith.constant 0 : index
    %1 = vector.load %arg2[%c0_1, %c0_2] : memref<432x32xbf16, #tpu.memory_space<vmem>>, vector<432x32xbf16>
    %cst = arith.constant dense<0.000000e+00> : vector<16x32xf32>
    %2 = tpu.matmul %0, %1, %cst {dimension_numbers = #tpu.dot_dimension_numbers<[1], [0], [0], [1], [0, 0, 1, 1], [], []>} : vector<16x432xbf16>, vector<432x32xbf16>, vector<16x32xf32> -> vector<16x32xf32>
    %c0_3 = arith.constant 0 : index
    %c0_4 = arith.constant 0 : index
    %3 = vector.load %arg3[%c0_3, %c0_4] : memref<1x32xf32, #tpu.memory_space<vmem>>, vector<1x32xf32>
    %4 = vector.broadcast %3 : vector<1x32xf32> to vector<16x32xf32>
    %5 = arith.mulf %2, %4 : vector<16x32xf32>
    %c0_5 = arith.constant 0 : index
    %c0_6 = arith.constant 0 : index
    %6 = vector.load %arg4[%c0_5, %c0_6] : memref<1x32xf32, #tpu.memory_space<vmem>>, vector<1x32xf32>
    %7 = vector.broadcast %6 : vector<1x32xf32> to vector<16x32xf32>
    %8 = arith.addf %5, %7 : vector<16x32xf32>
    %cst_7 = arith.constant 0.000000e+00 : f32
    %9 = vector.broadcast %cst_7 : f32 to vector<16x32xf32>
    %10 = arith.maximumf %8, %9 : vector<16x32xf32>
    %11 = arith.truncf %10 : vector<16x32xf32> to vector<16x32xbf16>
    %c0_8 = arith.constant 0 : index
    %c0_9 = arith.constant 0 : index
    %12 = vector.load %arg5[%c0_8, %c0_9] : memref<16x32xbf16, #tpu.memory_space<vmem>>, vector<16x32xbf16>
    tpu.vector_store %arg5[%c0_8, %c0_9], %11 {strides = array<i32>} : memref<16x32xbf16, #tpu.memory_space<vmem>>, vector<16x32xbf16>,
    return
  }
  func.func @transform_0(%arg0: i32) -> (i32, i32) {
    %c0_i32 = arith.constant 0 : i32
    %c0_i32_0 = arith.constant 0 : i32
    return %arg0, %c0_i32 : i32, i32
  }
  func.func @transform_1(%arg0: i32) -> (i32, i32) {
    %c0_i32 = arith.constant 0 : i32
    %c0_i32_0 = arith.constant 0 : i32
    %c0_i32_1 = arith.constant 0 : i32
    return %c0_i32, %c0_i32_0 : i32, i32
  }
  func.func @transform_2(%arg0: i32) -> (i32, i32) {
    %c0_i32 = arith.constant 0 : i32
    %c0_i32_0 = arith.constant 0 : i32
    %c0_i32_1 = arith.constant 0 : i32
    return %c0_i32, %c0_i32_0 : i32, i32
  }
  func.func @transform_3(%arg0: i32) -> (i32, i32) {
    %c0_i32 = arith.constant 0 : i32
    %c0_i32_0 = arith.constant 0 : i32
    %c0_i32_1 = arith.constant 0 : i32
    return %c0_i32, %c0_i32_0 : i32, i32
  }
  func.func @transform_4(%arg0: i32) -> (i32, i32) {
    %c0_i32 = arith.constant 0 : i32
    %c0_i32_0 = arith.constant 0 : i32
    return %arg0, %c0_i32 : i32, i32
  }
}

module attributes {stable_mosaic.version = 11 : i64} {
  func.func @_matmul_bn_act_kernel(%arg0: i32, %arg1: memref<16x16xbf16, #tpu.memory_space<vmem>>, %arg2: memref<16x32xbf16, #tpu.memory_space<vmem>>, %arg3: memref<1x32xf32, #tpu.memory_space<vmem>>, %arg4: memref<1x32xf32, #tpu.memory_space<vmem>>, %arg5: memref<16x32xbf16, #tpu.memory_space<vmem>>) attributes {dimension_semantics = [#tpu.dimension_semantics<parallel>], iteration_bounds = array<i64: 1>, scalar_prefetch = 0 : i64, scratch_operands = 0 : i64, tpu.core_type = #tpu.core_type<tc>, window_params = [{transform_indices = @transform_0, window_bounds = array<i64: 16, 16>}, {pipeline_mode = #tpu.pipeline_mode<synchronous>, transform_indices = @transform_1, window_bounds = array<i64: 16, 32>}, {pipeline_mode = #tpu.pipeline_mode<synchronous>, transform_indices = @transform_2, window_bounds = array<i64: 1, 32>}, {pipeline_mode = #tpu.pipeline_mode<synchronous>, transform_indices = @transform_3, window_bounds = array<i64: 1, 32>}, {transform_indices = @transform_4, window_bounds = array<i64: 16, 32>}]} {
    %c0 = arith.constant 0 : index
    %c0_0 = arith.constant 0 : index
    %0 = vector.load %arg1[%c0, %c0_0] : memref<16x16xbf16, #tpu.memory_space<vmem>>, vector<16x16xbf16>
    %c0_1 = arith.constant 0 : index
    %c0_2 = arith.constant 0 : index
    %1 = vector.load %arg2[%c0_1, %c0_2] : memref<16x32xbf16, #tpu.memory_space<vmem>>, vector<16x32xbf16>
    %cst = arith.constant dense<0.000000e+00> : vector<16x32xf32>
    %2 = tpu.matmul %0, %1, %cst {dimension_numbers = #tpu.dot_dimension_numbers<[1], [0], [0], [1], [0, 0, 1, 1], [], []>} : vector<16x16xbf16>, vector<16x32xbf16>, vector<16x32xf32> -> vector<16x32xf32>
    %c0_3 = arith.constant 0 : index
    %c0_4 = arith.constant 0 : index
    %3 = vector.load %arg3[%c0_3, %c0_4] : memref<1x32xf32, #tpu.memory_space<vmem>>, vector<1x32xf32>
    %4 = vector.broadcast %3 : vector<1x32xf32> to vector<16x32xf32>
    %5 = arith.mulf %2, %4 : vector<16x32xf32>
    %c0_5 = arith.constant 0 : index
    %c0_6 = arith.constant 0 : index
    %6 = vector.load %arg4[%c0_5, %c0_6] : memref<1x32xf32, #tpu.memory_space<vmem>>, vector<1x32xf32>
    %7 = vector.broadcast %6 : vector<1x32xf32> to vector<16x32xf32>
    %8 = arith.addf %5, %7 : vector<16x32xf32>
    %9 = arith.truncf %8 : vector<16x32xf32> to vector<16x32xbf16>
    %c0_7 = arith.constant 0 : index
    %c0_8 = arith.constant 0 : index
    %10 = vector.load %arg5[%c0_7, %c0_8] : memref<16x32xbf16, #tpu.memory_space<vmem>>, vector<16x32xbf16>
    tpu.vector_store %arg5[%c0_7, %c0_8], %9 {strides = array<i32>} : memref<16x32xbf16, #tpu.memory_space<vmem>>, vector<16x32xbf16>,
    return
  }
  func.func @transform_0(%arg0: i32) -> (i32, i32) {
    %c0_i32 = arith.constant 0 : i32
    %c0_i32_0 = arith.constant 0 : i32
    return %arg0, %c0_i32 : i32, i32
  }
  func.func @transform_1(%arg0: i32) -> (i32, i32) {
    %c0_i32 = arith.constant 0 : i32
    %c0_i32_0 = arith.constant 0 : i32
    %c0_i32_1 = arith.constant 0 : i32
    return %c0_i32, %c0_i32_0 : i32, i32
  }
  func.func @transform_2(%arg0: i32) -> (i32, i32) {
    %c0_i32 = arith.constant 0 : i32
    %c0_i32_0 = arith.constant 0 : i32
    %c0_i32_1 = arith.constant 0 : i32
    return %c0_i32, %c0_i32_0 : i32, i32
  }
  func.func @transform_3(%arg0: i32) -> (i32, i32) {
    %c0_i32 = arith.constant 0 : i32
    %c0_i32_0 = arith.constant 0 : i32
    %c0_i32_1 = arith.constant 0 : i32
    return %c0_i32, %c0_i32_0 : i32, i32
  }
  func.func @transform_4(%arg0: i32) -> (i32, i32) {
    %c0_i32 = arith.constant 0 : i32
    %c0_i32_0 = arith.constant 0 : i32
    return %arg0, %c0_i32 : i32, i32
  }
}

module attributes {stable_mosaic.version = 11 : i64} {
  func.func @_matmul_bn_act_kernel(%arg0: i32, %arg1: memref<16x864xbf16, #tpu.memory_space<vmem>>, %arg2: memref<864x32xbf16, #tpu.memory_space<vmem>>, %arg3: memref<1x32xf32, #tpu.memory_space<vmem>>, %arg4: memref<1x32xf32, #tpu.memory_space<vmem>>, %arg5: memref<16x32xbf16, #tpu.memory_space<vmem>>, %arg6: memref<16x32xbf16, #tpu.memory_space<vmem>>) attributes {dimension_semantics = [#tpu.dimension_semantics<parallel>], iteration_bounds = array<i64: 1>, scalar_prefetch = 0 : i64, scratch_operands = 0 : i64, tpu.core_type = #tpu.core_type<tc>, window_params = [{transform_indices = @transform_0, window_bounds = array<i64: 16, 864>}, {pipeline_mode = #tpu.pipeline_mode<synchronous>, transform_indices = @transform_1, window_bounds = array<i64: 864, 32>}, {pipeline_mode = #tpu.pipeline_mode<synchronous>, transform_indices = @transform_2, window_bounds = array<i64: 1, 32>}, {pipeline_mode = #tpu.pipeline_mode<synchronous>, transform_indices = @transform_3, window_bounds = array<i64: 1, 32>}, {transform_indices = @transform_4, window_bounds = array<i64: 16, 32>}, {transform_indices = @transform_5, window_bounds = array<i64: 16, 32>}]} {
    %c0 = arith.constant 0 : index
    %c0_0 = arith.constant 0 : index
    %0 = vector.load %arg1[%c0, %c0_0] : memref<16x864xbf16, #tpu.memory_space<vmem>>, vector<16x864xbf16>
    %c0_1 = arith.constant 0 : index
    %c0_2 = arith.constant 0 : index
    %1 = vector.load %arg2[%c0_1, %c0_2] : memref<864x32xbf16, #tpu.memory_space<vmem>>, vector<864x32xbf16>
    %cst = arith.constant dense<0.000000e+00> : vector<16x32xf32>
    %2 = tpu.matmul %0, %1, %cst {dimension_numbers = #tpu.dot_dimension_numbers<[1], [0], [0], [1], [0, 0, 1, 1], [], []>} : vector<16x864xbf16>, vector<864x32xbf16>, vector<16x32xf32> -> vector<16x32xf32>
    %c0_3 = arith.constant 0 : index
    %c0_4 = arith.constant 0 : index
    %3 = vector.load %arg3[%c0_3, %c0_4] : memref<1x32xf32, #tpu.memory_space<vmem>>, vector<1x32xf32>
    %4 = vector.broadcast %3 : vector<1x32xf32> to vector<16x32xf32>
    %5 = arith.mulf %2, %4 : vector<16x32xf32>
    %c0_5 = arith.constant 0 : index
    %c0_6 = arith.constant 0 : index
    %6 = vector.load %arg4[%c0_5, %c0_6] : memref<1x32xf32, #tpu.memory_space<vmem>>, vector<1x32xf32>
    %7 = vector.broadcast %6 : vector<1x32xf32> to vector<16x32xf32>
    %8 = arith.addf %5, %7 : vector<16x32xf32>
    %c0_7 = arith.constant 0 : index
    %c0_8 = arith.constant 0 : index
    %9 = vector.load %arg5[%c0_7, %c0_8] : memref<16x32xbf16, #tpu.memory_space<vmem>>, vector<16x32xbf16>
    %10 = arith.extf %9 : vector<16x32xbf16> to vector<16x32xf32>
    %11 = arith.addf %8, %10 : vector<16x32xf32>
    %cst_9 = arith.constant 0.000000e+00 : f32
    %12 = vector.broadcast %cst_9 : f32 to vector<16x32xf32>
    %13 = arith.maximumf %11, %12 : vector<16x32xf32>
    %14 = arith.truncf %13 : vector<16x32xf32> to vector<16x32xbf16>
    %c0_10 = arith.constant 0 : index
    %c0_11 = arith.constant 0 : index
    %15 = vector.load %arg6[%c0_10, %c0_11] : memref<16x32xbf16, #tpu.memory_space<vmem>>, vector<16x32xbf16>
    tpu.vector_store %arg6[%c0_10, %c0_11], %14 {strides = array<i32>} : memref<16x32xbf16, #tpu.memory_space<vmem>>, vector<16x32xbf16>,
    return
  }
  func.func @transform_0(%arg0: i32) -> (i32, i32) {
    %c0_i32 = arith.constant 0 : i32
    %c0_i32_0 = arith.constant 0 : i32
    return %arg0, %c0_i32 : i32, i32
  }
  func.func @transform_1(%arg0: i32) -> (i32, i32) {
    %c0_i32 = arith.constant 0 : i32
    %c0_i32_0 = arith.constant 0 : i32
    %c0_i32_1 = arith.constant 0 : i32
    return %c0_i32, %c0_i32_0 : i32, i32
  }
  func.func @transform_2(%arg0: i32) -> (i32, i32) {
    %c0_i32 = arith.constant 0 : i32
    %c0_i32_0 = arith.constant 0 : i32
    %c0_i32_1 = arith.constant 0 : i32
    return %c0_i32, %c0_i32_0 : i32, i32
  }
  func.func @transform_3(%arg0: i32) -> (i32, i32) {
    %c0_i32 = arith.constant 0 : i32
    %c0_i32_0 = arith.constant 0 : i32
    %c0_i32_1 = arith.constant 0 : i32
    return %c0_i32, %c0_i32_0 : i32, i32
  }
  func.func @transform_4(%arg0: i32) -> (i32, i32) {
    %c0_i32 = arith.constant 0 : i32
    %c0_i32_0 = arith.constant 0 : i32
    return %arg0, %c0_i32 : i32, i32
  }
  func.func @transform_5(%arg0: i32) -> (i32, i32) {
    %c0_i32 = arith.constant 0 : i32
    %c0_i32_0 = arith.constant 0 : i32
    return %arg0, %c0_i32 : i32, i32
  }
}

module attributes {stable_mosaic.version = 11 : i64} {
  func.func @_matmul_bn_act_kernel(%arg0: i32, %arg1: memref<16x864xbf16, #tpu.memory_space<vmem>>, %arg2: memref<864x64xbf16, #tpu.memory_space<vmem>>, %arg3: memref<1x64xf32, #tpu.memory_space<vmem>>, %arg4: memref<1x64xf32, #tpu.memory_space<vmem>>, %arg5: memref<16x64xbf16, #tpu.memory_space<vmem>>) attributes {dimension_semantics = [#tpu.dimension_semantics<parallel>], iteration_bounds = array<i64: 1>, scalar_prefetch = 0 : i64, scratch_operands = 0 : i64, tpu.core_type = #tpu.core_type<tc>, window_params = [{transform_indices = @transform_0, window_bounds = array<i64: 16, 864>}, {pipeline_mode = #tpu.pipeline_mode<synchronous>, transform_indices = @transform_1, window_bounds = array<i64: 864, 64>}, {pipeline_mode = #tpu.pipeline_mode<synchronous>, transform_indices = @transform_2, window_bounds = array<i64: 1, 64>}, {pipeline_mode = #tpu.pipeline_mode<synchronous>, transform_indices = @transform_3, window_bounds = array<i64: 1, 64>}, {transform_indices = @transform_4, window_bounds = array<i64: 16, 64>}]} {
    %c0 = arith.constant 0 : index
    %c0_0 = arith.constant 0 : index
    %0 = vector.load %arg1[%c0, %c0_0] : memref<16x864xbf16, #tpu.memory_space<vmem>>, vector<16x864xbf16>
    %c0_1 = arith.constant 0 : index
    %c0_2 = arith.constant 0 : index
    %1 = vector.load %arg2[%c0_1, %c0_2] : memref<864x64xbf16, #tpu.memory_space<vmem>>, vector<864x64xbf16>
    %cst = arith.constant dense<0.000000e+00> : vector<16x64xf32>
    %2 = tpu.matmul %0, %1, %cst {dimension_numbers = #tpu.dot_dimension_numbers<[1], [0], [0], [1], [0, 0, 1, 1], [], []>} : vector<16x864xbf16>, vector<864x64xbf16>, vector<16x64xf32> -> vector<16x64xf32>
    %c0_3 = arith.constant 0 : index
    %c0_4 = arith.constant 0 : index
    %3 = vector.load %arg3[%c0_3, %c0_4] : memref<1x64xf32, #tpu.memory_space<vmem>>, vector<1x64xf32>
    %4 = vector.broadcast %3 : vector<1x64xf32> to vector<16x64xf32>
    %5 = arith.mulf %2, %4 : vector<16x64xf32>
    %c0_5 = arith.constant 0 : index
    %c0_6 = arith.constant 0 : index
    %6 = vector.load %arg4[%c0_5, %c0_6] : memref<1x64xf32, #tpu.memory_space<vmem>>, vector<1x64xf32>
    %7 = vector.broadcast %6 : vector<1x64xf32> to vector<16x64xf32>
    %8 = arith.addf %5, %7 : vector<16x64xf32>
    %cst_7 = arith.constant 0.000000e+00 : f32
    %9 = vector.broadcast %cst_7 : f32 to vector<16x64xf32>
    %10 = arith.maximumf %8, %9 : vector<16x64xf32>
    %11 = arith.truncf %10 : vector<16x64xf32> to vector<16x64xbf16>
    %c0_8 = arith.constant 0 : index
    %c0_9 = arith.constant 0 : index
    %12 = vector.load %arg5[%c0_8, %c0_9] : memref<16x64xbf16, #tpu.memory_space<vmem>>, vector<16x64xbf16>
    tpu.vector_store %arg5[%c0_8, %c0_9], %11 {strides = array<i32>} : memref<16x64xbf16, #tpu.memory_space<vmem>>, vector<16x64xbf16>,
    return
  }
  func.func @transform_0(%arg0: i32) -> (i32, i32) {
    %c0_i32 = arith.constant 0 : i32
    %c0_i32_0 = arith.constant 0 : i32
    return %arg0, %c0_i32 : i32, i32
  }
  func.func @transform_1(%arg0: i32) -> (i32, i32) {
    %c0_i32 = arith.constant 0 : i32
    %c0_i32_0 = arith.constant 0 : i32
    %c0_i32_1 = arith.constant 0 : i32
    return %c0_i32, %c0_i32_0 : i32, i32
  }
  func.func @transform_2(%arg0: i32) -> (i32, i32) {
    %c0_i32 = arith.constant 0 : i32
    %c0_i32_0 = arith.constant 0 : i32
    %c0_i32_1 = arith.constant 0 : i32
    return %c0_i32, %c0_i32_0 : i32, i32
  }
  func.func @transform_3(%arg0: i32) -> (i32, i32) {
    %c0_i32 = arith.constant 0 : i32
    %c0_i32_0 = arith.constant 0 : i32
    %c0_i32_1 = arith.constant 0 : i32
    return %c0_i32, %c0_i32_0 : i32, i32
  }
  func.func @transform_4(%arg0: i32) -> (i32, i32) {
    %c0_i32 = arith.constant 0 : i32
    %c0_i32_0 = arith.constant 0 : i32
    return %arg0, %c0_i32 : i32, i32
  }
}

module attributes {stable_mosaic.version = 11 : i64} {
  func.func @_matmul_bn_act_kernel(%arg0: i32, %arg1: memref<16x32xbf16, #tpu.memory_space<vmem>>, %arg2: memref<32x64xbf16, #tpu.memory_space<vmem>>, %arg3: memref<1x64xf32, #tpu.memory_space<vmem>>, %arg4: memref<1x64xf32, #tpu.memory_space<vmem>>, %arg5: memref<16x64xbf16, #tpu.memory_space<vmem>>) attributes {dimension_semantics = [#tpu.dimension_semantics<parallel>], iteration_bounds = array<i64: 1>, scalar_prefetch = 0 : i64, scratch_operands = 0 : i64, tpu.core_type = #tpu.core_type<tc>, window_params = [{transform_indices = @transform_0, window_bounds = array<i64: 16, 32>}, {pipeline_mode = #tpu.pipeline_mode<synchronous>, transform_indices = @transform_1, window_bounds = array<i64: 32, 64>}, {pipeline_mode = #tpu.pipeline_mode<synchronous>, transform_indices = @transform_2, window_bounds = array<i64: 1, 64>}, {pipeline_mode = #tpu.pipeline_mode<synchronous>, transform_indices = @transform_3, window_bounds = array<i64: 1, 64>}, {transform_indices = @transform_4, window_bounds = array<i64: 16, 64>}]} {
    %c0 = arith.constant 0 : index
    %c0_0 = arith.constant 0 : index
    %0 = vector.load %arg1[%c0, %c0_0] : memref<16x32xbf16, #tpu.memory_space<vmem>>, vector<16x32xbf16>
    %c0_1 = arith.constant 0 : index
    %c0_2 = arith.constant 0 : index
    %1 = vector.load %arg2[%c0_1, %c0_2] : memref<32x64xbf16, #tpu.memory_space<vmem>>, vector<32x64xbf16>
    %cst = arith.constant dense<0.000000e+00> : vector<16x64xf32>
    %2 = tpu.matmul %0, %1, %cst {dimension_numbers = #tpu.dot_dimension_numbers<[1], [0], [0], [1], [0, 0, 1, 1], [], []>} : vector<16x32xbf16>, vector<32x64xbf16>, vector<16x64xf32> -> vector<16x64xf32>
    %c0_3 = arith.constant 0 : index
    %c0_4 = arith.constant 0 : index
    %3 = vector.load %arg3[%c0_3, %c0_4] : memref<1x64xf32, #tpu.memory_space<vmem>>, vector<1x64xf32>
    %4 = vector.broadcast %3 : vector<1x64xf32> to vector<16x64xf32>
    %5 = arith.mulf %2, %4 : vector<16x64xf32>
    %c0_5 = arith.constant 0 : index
    %c0_6 = arith.constant 0 : index
    %6 = vector.load %arg4[%c0_5, %c0_6] : memref<1x64xf32, #tpu.memory_space<vmem>>, vector<1x64xf32>
    %7 = vector.broadcast %6 : vector<1x64xf32> to vector<16x64xf32>
    %8 = arith.addf %5, %7 : vector<16x64xf32>
    %9 = arith.truncf %8 : vector<16x64xf32> to vector<16x64xbf16>
    %c0_7 = arith.constant 0 : index
    %c0_8 = arith.constant 0 : index
    %10 = vector.load %arg5[%c0_7, %c0_8] : memref<16x64xbf16, #tpu.memory_space<vmem>>, vector<16x64xbf16>
    tpu.vector_store %arg5[%c0_7, %c0_8], %9 {strides = array<i32>} : memref<16x64xbf16, #tpu.memory_space<vmem>>, vector<16x64xbf16>,
    return
  }
  func.func @transform_0(%arg0: i32) -> (i32, i32) {
    %c0_i32 = arith.constant 0 : i32
    %c0_i32_0 = arith.constant 0 : i32
    return %arg0, %c0_i32 : i32, i32
  }
  func.func @transform_1(%arg0: i32) -> (i32, i32) {
    %c0_i32 = arith.constant 0 : i32
    %c0_i32_0 = arith.constant 0 : i32
    %c0_i32_1 = arith.constant 0 : i32
    return %c0_i32, %c0_i32_0 : i32, i32
  }
  func.func @transform_2(%arg0: i32) -> (i32, i32) {
    %c0_i32 = arith.constant 0 : i32
    %c0_i32_0 = arith.constant 0 : i32
    %c0_i32_1 = arith.constant 0 : i32
    return %c0_i32, %c0_i32_0 : i32, i32
  }
  func.func @transform_3(%arg0: i32) -> (i32, i32) {
    %c0_i32 = arith.constant 0 : i32
    %c0_i32_0 = arith.constant 0 : i32
    %c0_i32_1 = arith.constant 0 : i32
    return %c0_i32, %c0_i32_0 : i32, i32
  }
  func.func @transform_4(%arg0: i32) -> (i32, i32) {
    %c0_i32 = arith.constant 0 : i32
    %c0_i32_0 = arith.constant 0 : i32
    return %arg0, %c0_i32 : i32, i32
  }
}

module attributes {stable_mosaic.version = 11 : i64} {
  func.func @_matmul_bn_act_kernel(%arg0: i32, %arg1: memref<16x1728xbf16, #tpu.memory_space<vmem>>, %arg2: memref<1728x64xbf16, #tpu.memory_space<vmem>>, %arg3: memref<1x64xf32, #tpu.memory_space<vmem>>, %arg4: memref<1x64xf32, #tpu.memory_space<vmem>>, %arg5: memref<16x64xbf16, #tpu.memory_space<vmem>>, %arg6: memref<16x64xbf16, #tpu.memory_space<vmem>>) attributes {dimension_semantics = [#tpu.dimension_semantics<parallel>], iteration_bounds = array<i64: 1>, scalar_prefetch = 0 : i64, scratch_operands = 0 : i64, tpu.core_type = #tpu.core_type<tc>, window_params = [{transform_indices = @transform_0, window_bounds = array<i64: 16, 1728>}, {pipeline_mode = #tpu.pipeline_mode<synchronous>, transform_indices = @transform_1, window_bounds = array<i64: 1728, 64>}, {pipeline_mode = #tpu.pipeline_mode<synchronous>, transform_indices = @transform_2, window_bounds = array<i64: 1, 64>}, {pipeline_mode = #tpu.pipeline_mode<synchronous>, transform_indices = @transform_3, window_bounds = array<i64: 1, 64>}, {transform_indices = @transform_4, window_bounds = array<i64: 16, 64>}, {transform_indices = @transform_5, window_bounds = array<i64: 16, 64>}]} {
    %c0 = arith.constant 0 : index
    %c0_0 = arith.constant 0 : index
    %0 = vector.load %arg1[%c0, %c0_0] : memref<16x1728xbf16, #tpu.memory_space<vmem>>, vector<16x1728xbf16>
    %c0_1 = arith.constant 0 : index
    %c0_2 = arith.constant 0 : index
    %1 = vector.load %arg2[%c0_1, %c0_2] : memref<1728x64xbf16, #tpu.memory_space<vmem>>, vector<1728x64xbf16>
    %cst = arith.constant dense<0.000000e+00> : vector<16x64xf32>
    %2 = tpu.matmul %0, %1, %cst {dimension_numbers = #tpu.dot_dimension_numbers<[1], [0], [0], [1], [0, 0, 1, 1], [], []>} : vector<16x1728xbf16>, vector<1728x64xbf16>, vector<16x64xf32> -> vector<16x64xf32>
    %c0_3 = arith.constant 0 : index
    %c0_4 = arith.constant 0 : index
    %3 = vector.load %arg3[%c0_3, %c0_4] : memref<1x64xf32, #tpu.memory_space<vmem>>, vector<1x64xf32>
    %4 = vector.broadcast %3 : vector<1x64xf32> to vector<16x64xf32>
    %5 = arith.mulf %2, %4 : vector<16x64xf32>
    %c0_5 = arith.constant 0 : index
    %c0_6 = arith.constant 0 : index
    %6 = vector.load %arg4[%c0_5, %c0_6] : memref<1x64xf32, #tpu.memory_space<vmem>>, vector<1x64xf32>
    %7 = vector.broadcast %6 : vector<1x64xf32> to vector<16x64xf32>
    %8 = arith.addf %5, %7 : vector<16x64xf32>
    %c0_7 = arith.constant 0 : index
    %c0_8 = arith.constant 0 : index
    %9 = vector.load %arg5[%c0_7, %c0_8] : memref<16x64xbf16, #tpu.memory_space<vmem>>, vector<16x64xbf16>
    %10 = arith.extf %9 : vector<16x64xbf16> to vector<16x64xf32>
    %11 = arith.addf %8, %10 : vector<16x64xf32>
    %cst_9 = arith.constant 0.000000e+00 : f32
    %12 = vector.broadcast %cst_9 : f32 to vector<16x64xf32>
    %13 = arith.maximumf %11, %12 : vector<16x64xf32>
    %14 = arith.truncf %13 : vector<16x64xf32> to vector<16x64xbf16>
    %c0_10 = arith.constant 0 : index
    %c0_11 = arith.constant 0 : index
    %15 = vector.load %arg6[%c0_10, %c0_11] : memref<16x64xbf16, #tpu.memory_space<vmem>>, vector<16x64xbf16>
    tpu.vector_store %arg6[%c0_10, %c0_11], %14 {strides = array<i32>} : memref<16x64xbf16, #tpu.memory_space<vmem>>, vector<16x64xbf16>,
    return
  }
  func.func @transform_0(%arg0: i32) -> (i32, i32) {
    %c0_i32 = arith.constant 0 : i32
    %c0_i32_0 = arith.constant 0 : i32
    return %arg0, %c0_i32 : i32, i32
  }
  func.func @transform_1(%arg0: i32) -> (i32, i32) {
    %c0_i32 = arith.constant 0 : i32
    %c0_i32_0 = arith.constant 0 : i32
    %c0_i32_1 = arith.constant 0 : i32
    return %c0_i32, %c0_i32_0 : i32, i32
  }
  func.func @transform_2(%arg0: i32) -> (i32, i32) {
    %c0_i32 = arith.constant 0 : i32
    %c0_i32_0 = arith.constant 0 : i32
    %c0_i32_1 = arith.constant 0 : i32
    return %c0_i32, %c0_i32_0 : i32, i32
  }
  func.func @transform_3(%arg0: i32) -> (i32, i32) {
    %c0_i32 = arith.constant 0 : i32
    %c0_i32_0 = arith.constant 0 : i32
    %c0_i32_1 = arith.constant 0 : i32
    return %c0_i32, %c0_i32_0 : i32, i32
  }
  func.func @transform_4(%arg0: i32) -> (i32, i32) {
    %c0_i32 = arith.constant 0 : i32
    %c0_i32_0 = arith.constant 0 : i32
    return %arg0, %c0_i32 : i32, i32
  }
  func.func @transform_5(%arg0: i32) -> (i32, i32) {
    %c0_i32 = arith.constant 0 : i32
    %c0_i32_0 = arith.constant 0 : i32
    return %arg0, %c0_i32 : i32, i32
  }
}

</mosaic_0001>

<bundles_post_ra>
// kernel: resnet_forward.12
= control target key start
LH: loop header
LB: loop body
LE: loop exit
PB: predicated region body
PF: predicated region fallthrough
CT: control target
= control target key end

     0   :  { %s6115_s15 = smov 0   ;;  %s7434_s0 = inlined_call_operand.vmem [shape: bf16[1024,1032], index: 0, kind: input, shape index: {}]   ;;  %s7435_s1 = inlined_call_operand.vmem [shape: bf16[1032,8], index: 1, kind: input, shape index: {}]   ;;  %s7436_s2 = inlined_call_operand.vmem [shape: f32[1,8], index: 2, kind: input, shape index: {}]   ;;  %s7437_s3 = inlined_call_operand.vmem [shape: f32[1,8], index: 3, kind: input, shape index: {}]   ;;  %s7438_s4 = inlined_call_operand.vmem [shape: bf16[1024,8], index: 4, kind: output, shape index: {}]  }
   0x1 LB: > { %s4610_s16 = sadd.s32 4294967295, %s6087_s15   ;;  %p4614_p0 = scmp.ge.s32.totalorder %s6087_s15, 1  ;;  %s6087_s15 = sphi %s6115_s15, %s14_s15  }
   0x2   : > { %p164_p1 = scmp.lt.s32.totalorder %s6087_s15, 3 }
   0x4   : > { %p165_p2 = pnand %p4614_p0, %p164_p1 }
   0x6   : > { %168 = sbr.rel (%p165_p2) target bundleno = 874 (0x36a), region = 36 }
   0xd   : > { %v5598_v0 = vld [vmem:[%s7435_s1] sm:$0xff]   ;;  %v6089_v1 = vmov 0   ;;  %v5600_v3 = vld [vmem:[%s7435_s1 + $0x8] sm:$0xff]   ;;  %v5602_v5 = vld [vmem:[%s7435_s1 + $0x10] sm:$0xff]   ;;  %s4615_s11 = sshll.u32 %s4610_s16, 6  ;;  %vm2578_vm0 = vcmask 1043456  }
   0xe   : > { %2582 = vmatprep.subr.bf16.mxu1 %v6089_v1  ;;  %2871 = vmatprep.subr.bf16.mxu0 %v6089_v1  ;;  %v6131_v2 = vld [vmem:[%s7435_s1 + $0x80] sm:$0xff]   ;;  %v6141_v4 = vld [vmem:[%s7435_s1 + $0x88] sm:$0xff]   ;;  %v6152_v6 = vld [vmem:[%s7435_s1 + $0x90] sm:$0xff]   ;;  %p192_p3 = scmp.lt.s32.totalorder %s4615_s11, 127  ;;  %vm2481_vm1 = vcmask 64512   ;;  %vm4489_vm2 = vcmask 60416  }
   0xf   : > { %2583 = vmatpush1.bf16.msra.mxu1 %v5598_v0  ;;  %2872 = vmatpush1.bf16.msra.mxu0 %v6131_v2  ;;  %v5604_v7 = vld [vmem:[%s7435_s1 + $0x18] sm:$0xff]   ;;  %v5606_v9 = vld [vmem:[%s7435_s1 + $0x20] sm:$0xff]   ;;  %v5608_v11 = vld [vmem:[%s7435_s1 + $0x28] sm:$0xff]  }
  0x10   : > { %2584 = vmatprep.subr.bf16.mxu1 %v6089_v1  ;;  %2873 = vmatprep.subr.bf16.mxu0 %v6089_v1  ;;  %v6163_v8 = vld [vmem:[%s7435_s1 + $0x98] sm:$0xff]   ;;  %v6174_v10 = vld [vmem:[%s7435_s1 + $0xa0] sm:$0xff]   ;;  %v6187_v12 = vld [vmem:[%s7435_s1 + $0xa8] sm:$0xff]   ;;  %s7470_s11 = smov (!%p192_p3, %s4615_s11), 127 }
  0x11   : > { %v5610_v13 = vld [vmem:[%s7435_s1 + $0x30] sm:$0xff]   ;;  %v5612_v15 = vld [vmem:[%s7435_s1 + $0x38] sm:$0xff]   ;;  %s5588_s23 = smul.u32 36, %s7470_s11  ;;  %v5614_v17 = vld [vmem:[%s7435_s1 + $0x40] sm:$0xff]   ;;  %s4618_s13 = sshll.u32 %s7470_s11, 2 }
  0x12   : > { %v6200_v14 = vld [vmem:[%s7435_s1 + $0xb0] sm:$0xff]   ;;  %v6212_v16 = vld [vmem:[%s7435_s1 + $0xb8] sm:$0xff]   ;;  %v6228_v18 = vld [vmem:[%s7435_s1 + $0xc0] sm:$0xff]   ;;  %s7050_s16 = scalar_lea.vmem %s7438_s4, %s4618_s13 }
  0x13   : > { %2585 = vmatpush1.bf16.msra.mxu1 %v5600_v3  ;;  %2874 = vmatpush1.bf16.msra.mxu0 %v6141_v4  ;;  %s6221_s30 = scalar_lea.vmem %s7434_s0, %s5588_s23  ;;  %v5616_v20 = vld [vmem:[%s7435_s1 + $0x48] sm:$0xff]   ;;  %v5618_v23 = vld [vmem:[%s7435_s1 + $0x50] sm:$0xff]   ;;  %v5620_v25 = vld [vmem:[%s7435_s1 + $0x58] sm:$0xff]  }
  0x14   : > { %2586 = vmatprep.subr.bf16.mxu1 %v6089_v1  ;;  %2875 = vmatprep.subr.bf16.mxu0 %v6089_v1  ;;  %v5632_v19 = vld [vmem:[%s6221_s30 + $0x4] ss:$36 sps:$4 sm:$0xff]   ;;  %v5635_v21 = vld [vmem:[%s6221_s30 + $0xc] ss:$36 sps:$4 sm:$0xff]   ;;  %v6263_v26 = vld [vmem:[%s7435_s1 + $0xd8] sm:$0xff]  }
  0x15   : > { %v6241_v22 = vld [vmem:[%s7435_s1 + $0xc8] sm:$0xff]   ;;  %2614 = vmatprep.mubr.bf16.mxu1 %v5632_v19  ;;  %2903 = vmatprep.mubr.bf16.mxu0 %v5635_v21  ;;  %v6252_v24 = vld [vmem:[%s7435_s1 + $0xd0] sm:$0xff]   ;;  %v5622_v27 = vld [vmem:[%s7435_s1 + $0x60] sm:$0xff]  }
  0x16   : > { %v6274_v28 = vld [vmem:[%s7435_s1 + $0xe0] sm:$0xff]   ;;  %v5624_v29 = vld [vmem:[%s7435_s1 + $0x68] sm:$0xff]   ;;  %v5626_v31 = vld [vmem:[%s7435_s1 + $0x70] sm:$0xff]  }
  0x17   : > { %2587 = vmatpush1.bf16.msra.mxu1 %v5602_v5  ;;  %2876 = vmatpush1.bf16.msra.mxu0 %v6152_v6  ;;  %v6285_v30 = vld [vmem:[%s7435_s1 + $0xe8] sm:$0xff]   ;;  %v6296_v32 = vld [vmem:[%s7435_s1 + $0xf0] sm:$0xff]   ;;  %v5628_v33 = vld [vmem:[%s7435_s1 + $0x78] sm:$0xff]  }
  0x18   : > { %2588 = vmatprep.subr.bf16.mxu1 %v6089_v1  ;;  %2877 = vmatprep.subr.bf16.mxu0 %v6089_v1  ;;  %v6307_v34 = vld [vmem:[%s7435_s1 + $0xf8] sm:$0xff]   ;;  %v5630_v35 = vld [vmem:[%s6221_s30] ss:$36 sps:$4 sm:$0xff]   ;;  %v5633_v36 = vld [vmem:[%s6221_s30 + $0x8] ss:$36 sps:$4 sm:$0xff]  }
  0x19   : > { %v5636_v37 = vld [vmem:[%s7435_s1 + $0x100] sm:$0xff]   ;;  %v5638_v38 = vld [vmem:[%s6221_s30 + $0x4c] ss:$36 sps:$4 sm:$0xff]   ;;  %v5640_v39 = vld [vmem:[%s6221_s30 + $0x54] ss:$36 sps:$4 sm:$0xff]  }
  0x1a   : > { %v5637_v40 = vld [vmem:[%s7435_s1 + $0x108] sm:$0xff]   ;;  %v5643_v42 = vld [vmem:[%s6221_s30 + $0x50] ss:$36 sps:$4 sm:$0xff]   ;;  %v5648_v45 = vld [vmem:[%s6221_s30 + $0x9c] ss:$36 sps:$4 sm:$0xff]  }
  0x1b   : > { %2589 = vmatpush1.bf16.msra.mxu1 %v5604_v7  ;;  %2878 = vmatpush1.bf16.msra.mxu0 %v6163_v8  ;;  %v5642_v41 = vld [vmem:[%s6221_s30 + $0x48] ss:$36 sps:$4 sm:$0xff]   ;;  %v5646_v43 = vld [vmem:[%s6221_s30 + $0x94] ss:$36 sps:$4 sm:$0xff]   ;;  %v5652_v49 = vld [vmem:[%s7435_s1 + $0x120] sm:$0xff]  }
  0x1c   : > { %2590 = vmatprep.subr.bf16.mxu1 %v6089_v1  ;;  %2879 = vmatprep.subr.bf16.mxu0 %v6089_v1  ;;  %v5644_v44 = vld [vmem:[%s7435_s1 + $0x110] sm:$0xff]   ;;  %v5645_v46 = vld [vmem:[%s7435_s1 + $0x118] sm:$0xff]   ;;  %v5656_v51 = vld [vmem:[%s6221_s30 + $0xe4] ss:$36 sps:$4 sm:$0xff]  }
  0x1d   : > { %v5650_v47 = vld [vmem:[%s6221_s30 + $0x90] ss:$36 sps:$4 sm:$0xff]   ;;  %v5651_v48 = vld [vmem:[%s6221_s30 + $0x98] ss:$36 sps:$4 sm:$0xff]   ;;  %v5653_v52 = vld [vmem:[%s7435_s1 + $0x128] sm:$0xff]  }
  0x1e   : > { %v5654_v50 = vld [vmem:[%s6221_s30 + $0xdc] ss:$36 sps:$4 sm:$0xff]   ;;  %v5662_v55 = vld [vmem:[%s6221_s30 + $0x124] ss:$36 sps:$4 sm:$0xff]   ;;  %v5660_v56 = vld [vmem:[%s7435_s1 + $0x130] sm:$0xff]  }
  0x1f   : > { %2591 = vmatpush1.bf16.msra.mxu1 %v5606_v9  ;;  %2880 = vmatpush1.bf16.msra.mxu0 %v6174_v10  ;;  %v5658_v53 = vld [vmem:[%s6221_s30 + $0xd8] ss:$36 sps:$4 sm:$0xff]   ;;  %v5659_v54 = vld [vmem:[%s6221_s30 + $0xe0] ss:$36 sps:$4 sm:$0xff]   ;;  %v5664_v57 = vld [vmem:[%s6221_s30 + $0x12c] ss:$36 sps:$4 sm:$0xff]  }
  0x20   : > { %2592 = vmatprep.subr.bf16.mxu1 %v6089_v1  ;;  %2881 = vmatprep.subr.bf16.mxu0 %v6089_v1  ;;  %v5661_v58 = vld [vmem:[%s7435_s1 + $0x138] sm:$0xff]   ;;  %v5666_v59 = vld [vmem:[%s6221_s30 + $0x120] ss:$36 sps:$4 sm:$0xff]   ;;  %v5667_v60 = vld [vmem:[%s6221_s30 + $0x128] ss:$36 sps:$4 sm:$0xff]  }
  0x21   : > { %v5668_v61 = vld [vmem:[%s7435_s1 + $0x140] sm:$0xff]   ;;  %v5670_v62 = vld [vmem:[%s6221_s30 + $0x16c] ss:$36 sps:$4 sm:$0xff]   ;;  %v5672_v63 = vld [vmem:[%s6221_s30 + $0x174] ss:$36 sps:$4 sm:$0xff]  }
  0x22   : > { %v5669_v0 = vld [vmem:[%s7435_s1 + $0x148] sm:$0xff]   ;;  %v5675_v3 = vld [vmem:[%s6221_s30 + $0x170] ss:$36 sps:$4 sm:$0xff]   ;;  %v5677_v7 = vld [vmem:[%s7435_s1 + $0x158] sm:$0xff]  }
  0x23   : > { %2593 = vmatpush1.bf16.msra.mxu1 %v5608_v11  ;;  %2882 = vmatpush1.bf16.msra.mxu0 %v6187_v12  ;;  %v5676_v5 = vld [vmem:[%s7435_s1 + $0x150] sm:$0xff]   ;;  %v5683_v9 = vld [vmem:[%s6221_s30 + $0x1b8] ss:$36 sps:$4 sm:$0xff]  }
  0x24   : > { %2594 = vmatprep.subr.bf16.mxu1 %v6089_v1  ;;  %2883 = vmatprep.subr.bf16.mxu0 %v6089_v1  ;;  %v5686_v11 = vld [vmem:[%s6221_s30 + $0x1fc] ss:$36 sps:$4 sm:$0xff]   ;;  %v5696_v21 = vld [vmem:[%s6221_s30 + $0x10] ss:$36 sps:$4 sm:$0xff]  }
  0x25   : > { %v5693_v19 = vld [vmem:[%s7435_s1 + $0x178] sm:$0xff]  }
  0x27   : > { %2595 = vmatpush1.bf16.msra.mxu1 %v5610_v13  ;;  %2884 = vmatpush1.bf16.msra.mxu0 %v6200_v14  ;;  %v5685_v13 = vld [vmem:[%s7435_s1 + $0x168] sm:$0xff]  }
  0x28   : > { %2596 = vmatprep.subr.bf16.mxu1 %v6089_v1  ;;  %2885 = vmatprep.subr.bf16.mxu0 %v6089_v1 }
  0x2b   : > { %2597 = vmatpush1.bf16.msra.mxu1 %v5612_v15  ;;  %2886 = vmatpush1.bf16.msra.mxu0 %v6212_v16  ;;  %v5691_v15 = vld [vmem:[%s6221_s30 + $0x200] ss:$36 sps:$4 sm:$0xff]  }
  0x2c   : > { %2598 = vmatprep.subr.bf16.mxu1 %v6089_v1  ;;  %2887 = vmatprep.subr.bf16.mxu0 %v6089_v1 }
  0x2f   : > { %2599 = vmatpush1.bf16.msra.mxu1 %v5614_v17  ;;  %2888 = vmatpush1.bf16.msra.mxu0 %v6228_v18  ;;  %v5692_v17 = vld [vmem:[%s7435_s1 + $0x170] sm:$0xff]  }
  0x30   : > { %2600 = vmatprep.subr.bf16.mxu1 %v6089_v1  ;;  %2889 = vmatprep.subr.bf16.mxu0 %v6089_v1 }
  0x33   : > { %2601 = vmatpush1.bf16.msra.mxu1 %v5616_v20  ;;  %2890 = vmatpush1.bf16.msra.mxu0 %v6241_v22  ;;  %v5699_v20 = vld [vmem:[%s6221_s30 + $0x240] ss:$36 sps:$4 sm:$0xff]  }
  0x34   : > { %2602 = vmatprep.subr.bf16.mxu1 %v6089_v1  ;;  %2891 = vmatprep.subr.bf16.mxu0 %v6089_v1 }
  0x37   : > { %2603 = vmatpush1.bf16.msra.mxu1 %v5618_v23  ;;  %2892 = vmatpush1.bf16.msra.mxu0 %v6252_v24  ;;  %v5700_v23 = vld [vmem:[%s7435_s1 + $0x180] sm:$0xff]  }
  0x38   : > { %2604 = vmatprep.subr.bf16.mxu1 %v6089_v1  ;;  %2893 = vmatprep.subr.bf16.mxu0 %v6089_v1 }
  0x3b   : > { %2605 = vmatpush1.bf16.msra.mxu1 %v5620_v25  ;;  %2894 = vmatpush1.bf16.msra.mxu0 %v6263_v26  ;;  %v5705_v25 = vld [vmem:[%s6221_s30 + $0x288] ss:$36 sps:$4 sm:$0xff]  }
  0x3c   : > { %2606 = vmatprep.subr.bf16.mxu1 %v6089_v1  ;;  %2895 = vmatprep.subr.bf16.mxu0 %v6089_v1 }
  0x3f   : > { %2607 = vmatpush1.bf16.msra.mxu1 %v5622_v27  ;;  %2896 = vmatpush1.bf16.msra.mxu0 %v6274_v28  ;;  %v5706_v27 = vld [vmem:[%s6221_s30 + $0x58] ss:$36 sps:$4 sm:$0xff]  }
  0x40   : > { %2608 = vmatprep.subr.bf16.mxu1 %v6089_v1  ;;  %2897 = vmatprep.subr.bf16.mxu0 %v6089_v1 }
  0x43   : > { %2609 = vmatpush1.bf16.msra.mxu1 %v5624_v29  ;;  %2898 = vmatpush1.bf16.msra.mxu0 %v6285_v30  ;;  %v5709_v29 = vld [vmem:[%s6221_s30 + $0xa4] ss:$36 sps:$4 sm:$0xff]  }
  0x44   : > { %2610 = vmatprep.subr.bf16.mxu1 %v6089_v1  ;;  %2899 = vmatprep.subr.bf16.mxu0 %v6089_v1 }
  0x47   : > { %2611 = vmatpush1.bf16.msra.mxu1 %v5626_v31  ;;  %2900 = vmatpush1.bf16.msra.mxu0 %v6296_v32  ;;  %v5711_v31 = vld [vmem:[%s6221_s30 + $0x2d0] ss:$36 sps:$4 sm:$0xff]  }
  0x48   : > { %2612 = vmatprep.subr.bf16.mxu1 %v6089_v1  ;;  %2901 = vmatprep.subr.bf16.mxu0 %v6089_v1 }
  0x4b   : > { %2613 = vmatpush1.bf16.msra.mxu1 %v5628_v33  ;;  %2902 = vmatpush1.bf16.msra.mxu0 %v6307_v34  ;;  %v5712_v33 = vld [vmem:[%s6221_s30 + $0xa0] ss:$36 sps:$4 sm:$0xff]  }
  0x4c   : > { %5235 = vmatprep.subr.bf16.mxu1 %v6089_v1  ;;  %3160 = vmatprep.subr.bf16.mxu0 %v6089_v1 }
  0x4e   : > { %2615 = vmatmul.mubr.bf16.vlgmr.msra.gmra.mrb[0].mxu1 %v5630_v35  ;;  %2904 = vmatmul.mubr.bf16.vlgmr.msra.gmra.mrb[0].mxu0 %v5633_v36  ;;  %v5716_v35 = vld [vmem:[%s6221_s30 + $0xec] ss:$36 sps:$4 sm:$0xff]   ;;  %v5752_v36 = vld [vmem:[%s7435_s1 + $0x1a0] sm:$0xff]  }
  0x4f   : > { %5251 = vmatpush1.bf16.msra.mxu1 %v6131_v2  ;;  %3161 = vmatpush1.bf16.msra.mxu0 %v5636_v37  ;;  %v5674_v2 = vld [vmem:[%s6221_s30 + $0x168] ss:$36 sps:$4 sm:$0xff]  }
  0x50   : > { %2622 = vmatprep.mubr.bf16.mxu1 %v5638_v38  ;;  %3162 = vmatprep.subr.bf16.mxu0 %v6089_v1  ;;  %v5765_v37 = vld [vmem:[%s7435_s1 + $0x1a8] sm:$0xff]   ;;  %v5718_v38 = vld [vmem:[%s6221_s30 + $0x318] ss:$36 sps:$4 sm:$0xff]  }
  0x51   : > { %2911 = vmatprep.mubr.bf16.mxu0 %v5640_v39  ;;  %5236 = vmatprep.subr.bf16.mxu1 %v6089_v1  ;;  %v5719_v39 = vld [vmem:[%s6221_s30 + $0xe8] ss:$36 sps:$4 sm:$0xff]  }
  0x53   : > { %5252 = vmatpush1.bf16.msra.mxu1 %v6141_v4  ;;  %3163 = vmatpush1.bf16.msra.mxu0 %v5637_v40  ;;  %v5678_v4 = vld [vmem:[%s6221_s30 + $0x1b4] ss:$36 sps:$4 sm:$0xff]   ;;  %v5720_v40 = vld [vmem:[%s6221_s30 + $0x364] ss:$36 sps:$4 sm:$0xff]  }
  0x54   : > { %5237 = vmatprep.subr.bf16.mxu1 %v6089_v1  ;;  %3164 = vmatprep.subr.bf16.mxu0 %v6089_v1 }
  0x56   : > { %2623 = vmatmul.mubr.bf16.gmra.mrb[4].mxu1 %v5642_v41  ;;  %2912 = vmatmul.mubr.bf16.gmra.mrb[4].mxu0 %v5643_v42  ;;  %v5722_v41 = vld [vmem:[%s6221_s30 + $0x134] ss:$36 sps:$4 sm:$0xff]  }
  0x57   : > { %2630 = vmatprep.mubr.bf16.mxu1 %v5646_v43  ;;  %3165 = vmatpush1.bf16.msra.mxu0 %v5644_v44  ;;  %v5778_v42 = vld [vmem:[%s7435_s1 + $0x1b0] sm:$0xff]   ;;  %v5791_v43 = vld [vmem:[%s7435_s1 + $0x1b8] sm:$0xff]   ;;  %v5724_v44 = vld [vmem:[%s6221_s30 + $0x360] ss:$36 sps:$4 sm:$0xff]  }
  0x58   : > { %2919 = vmatprep.mubr.bf16.mxu0 %v5648_v45  ;;  %3166 = vmatprep.subr.bf16.mxu0 %v6089_v1  ;;  %v5725_v45 = vld [vmem:[%s6221_s30 + $0x130] ss:$36 sps:$4 sm:$0xff]  }
  0x59   : > { %5253 = vmatpush1.bf16.msra.mxu1 %v6152_v6  ;;  %v5680_v6 = vld [vmem:[%s6221_s30 + $0x1bc] ss:$36 sps:$4 sm:$0xff]  }
  0x5a   : > { %5238 = vmatprep.subr.bf16.mxu1 %v6089_v1 }
  0x5b   : > { %3167 = vmatpush1.bf16.msra.mxu0 %v5645_v46  ;;  %v5727_v46 = vld [vmem:[%s6221_s30 + $0x3ac] ss:$36 sps:$4 sm:$0xff]  }
  0x5c   : > { %3168 = vmatprep.subr.bf16.mxu0 %v6089_v1 }
  0x5d   : > { %5254 = vmatpush1.bf16.msra.mxu1 %v6163_v8  ;;  %v5682_v8 = vld [vmem:[%s6221_s30 + $0x1b0] ss:$36 sps:$4 sm:$0xff]  }
  0x5e   : > { %2631 = vmatmul.mubr.bf16.gmra.mrb[8].mxu1 %v5650_v47  ;;  %5239 = vmatprep.subr.bf16.mxu1 %v6089_v1  ;;  %v5729_v47 = vld [vmem:[%s6221_s30 + $0x17c] ss:$36 sps:$4 sm:$0xff]  }
  0x5f   : > { %2920 = vmatmul.mubr.bf16.gmra.mrb[8].mxu0 %v5651_v48  ;;  %2638 = vmatprep.mubr.bf16.mxu1 %v5654_v50  ;;  %v5804_v48 = vld [vmem:[%s7435_s1 + $0x1c0] sm:$0xff]   ;;  %v5731_v50 = vld [vmem:[%s6221_s30 + $0x3a8] ss:$36 sps:$4 sm:$0xff]  }
  0x60   : > { %3169 = vmatpush1.bf16.msra.mxu0 %v5652_v49  ;;  %2927 = vmatprep.mubr.bf16.mxu0 %v5656_v51  ;;  %v5817_v49 = vld [vmem:[%s7435_s1 + $0x1c8] sm:$0xff]   ;;  %v5732_v51 = vld [vmem:[%s6221_s30 + $0x178] ss:$36 sps:$4 sm:$0xff]  }
  0x61   : > { %3170 = vmatprep.subr.bf16.mxu0 %v6089_v1  ;;  %5255 = vmatpush1.bf16.msra.mxu1 %v6174_v10  ;;  %v5684_v10 = vld [vmem:[%s7435_s1 + $0x160] sm:$0xff]  }
  0x62   : > { %5240 = vmatprep.subr.bf16.mxu1 %v6089_v1 }
  0x64   : > { %3171 = vmatpush1.bf16.msra.mxu0 %v5653_v52  ;;  %v5733_v52 = vld [vmem:[%s6221_s30 + $0x3f4] ss:$36 sps:$4 sm:$0xff]  }
  0x65   : > { %3172 = vmatprep.subr.bf16.mxu0 %v6089_v1  ;;  %5256 = vmatpush1.bf16.msra.mxu1 %v6187_v12  ;;  %v5688_v12 = vld [vmem:[%s6221_s30 + $0x204] ss:$36 sps:$4 sm:$0xff]  }
  0x66   : > { %2639 = vmatmul.mubr.bf16.gmra.mrb[12].mxu1 %v5658_v53  ;;  %5241 = vmatprep.subr.bf16.mxu1 %v6089_v1  ;;  %v5735_v53 = vld [vmem:[%s6221_s30 + $0x1c4] ss:$36 sps:$4 sm:$0xff]  }
  0x67   : > { %2928 = vmatmul.mubr.bf16.gmra.mrb[12].mxu0 %v5659_v54  ;;  %2646 = vmatprep.mubr.bf16.mxu1 %v5662_v55  ;;  %v5830_v54 = vld [vmem:[%s7435_s1 + $0x1d0] sm:$0xff]  }
  0x68   : > { %3173 = vmatpush1.bf16.msra.mxu0 %v5660_v56  ;;  %2935 = vmatprep.mubr.bf16.mxu0 %v5664_v57  ;;  %v5737_v55 = vld [vmem:[%s6221_s30 + $0x3f0] ss:$36 sps:$4 sm:$0xff]   ;;  %v5738_v56 = vld [vmem:[%s6221_s30 + $0x1c0] ss:$36 sps:$4 sm:$0xff]  }
  0x69   : > { %3174 = vmatprep.subr.bf16.mxu0 %v6089_v1  ;;  %5257 = vmatpush1.bf16.msra.mxu1 %v6200_v14  ;;  %v5690_v14 = vld [vmem:[%s6221_s30 + $0x1f8] ss:$36 sps:$4 sm:$0xff]  }
  0x6a   : > { %5242 = vmatprep.subr.bf16.mxu1 %v6089_v1  ;;  %v5740_v57 = vld [vmem:[%s6221_s30 + $0x43c] ss:$36 sps:$4 sm:$0xff]  }
  0x6c   : > { %3175 = vmatpush1.bf16.msra.mxu0 %v5661_v58  ;;  %v5742_v58 = vld [vmem:[%s6221_s30 + $0x20c] ss:$36 sps:$4 sm:$0xff]  }
  0x6d   : > { %3176 = vmatprep.subr.bf16.mxu0 %v6089_v1  ;;  %5258 = vmatpush1.bf16.msra.mxu1 %v6212_v16  ;;  %v5694_v16 = vld [vmem:[%s6221_s30 + $0x244] ss:$36 sps:$4 sm:$0xff]  }
  0x6e   : > { %2647 = vmatmul.mubr.bf16.gmra.mrb[16].mxu1 %v5666_v59  ;;  %5243 = vmatprep.subr.bf16.mxu1 %v6089_v1  ;;  %v5843_v59 = vld [vmem:[%s7435_s1 + $0x1d8] sm:$0xff]  }
  0x6f   : > { %2936 = vmatmul.mubr.bf16.gmra.mrb[16].mxu0 %v5667_v60  ;;  %2654 = vmatprep.mubr.bf16.mxu1 %v5670_v62  ;;  %v5744_v60 = vld [vmem:[%s6221_s30 + $0x438] ss:$36 sps:$4 sm:$0xff]   ;;  %v5746_v62 = vld [vmem:[%s6221_s30 + $0x484] ss:$36 sps:$4 sm:$0xff]  }
  0x70   : > { %3177 = vmatpush1.bf16.msra.mxu0 %v5668_v61  ;;  %2943 = vmatprep.mubr.bf16.mxu0 %v5672_v63  ;;  %v5745_v61 = vld [vmem:[%s6221_s30 + $0x208] ss:$36 sps:$4 sm:$0xff]   ;;  %v5748_v63 = vld [vmem:[%s6221_s30 + $0x254] ss:$36 sps:$4 sm:$0xff]  }
  0x71   : > { %3178 = vmatprep.subr.bf16.mxu0 %v6089_v1  ;;  %5259 = vmatpush1.bf16.msra.mxu1 %v6228_v18  ;;  %v5698_v18 = vld [vmem:[%s6221_s30 + $0x14] ss:$36 sps:$4 sm:$0xff]  }
  0x72   : > { %5244 = vmatprep.subr.bf16.mxu1 %v6089_v1 }
  0x74   : > { %3179 = vmatpush1.bf16.msra.mxu0 %v5669_v0  ;;  %v5750_v0 = vld [vmem:[%s6221_s30 + $0x480] ss:$36 sps:$4 sm:$0xff]  }
  0x75   : > { %3180 = vmatprep.subr.bf16.mxu0 %v6089_v1  ;;  %5260 = vmatpush1.bf16.msra.mxu1 %v6241_v22  ;;  %v5701_v22 = vld [vmem:[%s6221_s30 + $0x28c] ss:$36 sps:$4 sm:$0xff]  }
  0x76   : > { %2655 = vmatmul.mubr.bf16.gmra.mrb[20].mxu1 %v5674_v2  ;;  %5245 = vmatprep.subr.bf16.mxu1 %v6089_v1  ;;  %v5751_v2 = vld [vmem:[%s6221_s30 + $0x250] ss:$36 sps:$4 sm:$0xff]  }
  0x77   : > { %2944 = vmatmul.mubr.bf16.gmra.mrb[20].mxu0 %v5675_v3  ;;  %2662 = vmatprep.mubr.bf16.mxu1 %v5678_v4  ;;  %v5753_v3 = vld [vmem:[%s6221_s30 + $0x4cc] ss:$36 sps:$4 sm:$0xff]   ;;  %v5755_v4 = vld [vmem:[%s6221_s30 + $0x29c] ss:$36 sps:$4 sm:$0xff]  }
  0x78   : > { %3181 = vmatpush1.bf16.msra.mxu0 %v5676_v5  ;;  %2951 = vmatprep.mubr.bf16.mxu0 %v5680_v6  ;;  %v5856_v5 = vld [vmem:[%s7435_s1 + $0x1e0] sm:$0xff]  }
  0x79   : > { %3182 = vmatprep.subr.bf16.mxu0 %v6089_v1  ;;  %5261 = vmatpush1.bf16.msra.mxu1 %v6252_v24  ;;  %v5703_v24 = vld [vmem:[%s6221_s30 + $0x5c] ss:$36 sps:$4 sm:$0xff]  }
  0x7a   : > { %5246 = vmatprep.subr.bf16.mxu1 %v6089_v1  ;;  %v5857_v6 = vld [vmem:[%s7435_s1 + $0x200] ss:$0 sps:$4 sm:$0xff]  }
  0x7c   : > { %3183 = vmatpush1.bf16.msra.mxu0 %v5677_v7  ;;  %v5757_v7 = vld [vmem:[%s6221_s30 + $0x4c8] ss:$36 sps:$4 sm:$0xff]  }
  0x7d   : > { %3184 = vmatprep.subr.bf16.mxu0 %v6089_v1  ;;  %5262 = vmatpush1.bf16.msra.mxu1 %v6263_v26  ;;  %v5713_v26 = vld [vmem:[%s7435_s1 + $0x188] sm:$0xff]  }
  0x7e   : > { %2663 = vmatmul.mubr.bf16.gmra.mrb[24].mxu1 %v5682_v8  ;;  %5247 = vmatprep.subr.bf16.mxu1 %v6089_v1  ;;  %v5758_v8 = vld [vmem:[%s6221_s30 + $0x298] ss:$36 sps:$4 sm:$0xff]  }
  0x7f   : > { %2952 = vmatmul.mubr.bf16.gmra.mrb[24].mxu0 %v5683_v9  ;;  %2670 = vmatprep.mubr.bf16.mxu1 %v5686_v11  ;;  %v5759_v9 = vld [vmem:[%s6221_s30 + $0x514] ss:$36 sps:$4 sm:$0xff]   ;;  %v5761_v11 = vld [vmem:[%s6221_s30 + $0x2e4] ss:$36 sps:$4 sm:$0xff]  }
  0x80   : > { %3185 = vmatpush1.bf16.msra.mxu0 %v5684_v10  ;;  %2959 = vmatprep.mubr.bf16.mxu0 %v5688_v12  ;;  %v6533_v10 = vsel %vm2578_vm0, %v5857_v6, 0  ;;  %v5763_v12 = vld [vmem:[%s6221_s30 + $0x510] ss:$36 sps:$4 sm:$0xff]  }
  0x81   : > { %3186 = vmatprep.subr.bf16.mxu0 %v6089_v1  ;;  %5263 = vmatpush1.bf16.msra.mxu1 %v6274_v28  ;;  %v5707_v28 = vld [vmem:[%s6221_s30 + $0x2d4] ss:$36 sps:$4 sm:$0xff]  }
  0x82   : > { %5248 = vmatprep.subr.bf16.mxu1 %v6089_v1 }
  0x84   : > { %3187 = vmatpush1.bf16.msra.mxu0 %v5685_v13  ;;  %v5764_v13 = vld [vmem:[%s6221_s30 + $0x2e0] ss:$36 sps:$4 sm:$0xff]  }
  0x85   : > { %3188 = vmatprep.subr.bf16.mxu0 %v6089_v1  ;;  %5264 = vmatpush1.bf16.msra.mxu1 %v6285_v30  ;;  %v5726_v30 = vld [vmem:[%s7435_s1 + $0x190] sm:$0xff]  }
  0x86   : > { %2671 = vmatmul.mubr.bf16.gmra.mrb[28].mxu1 %v5690_v14  ;;  %5249 = vmatprep.subr.bf16.mxu1 %v6089_v1  ;;  %v5766_v14 = vld [vmem:[%s6221_s30 + $0x55c] ss:$36 sps:$4 sm:$0xff]  }
  0x87   : > { %2960 = vmatmul.mubr.bf16.gmra.mrb[28].mxu0 %v5691_v15  ;;  %2678 = vmatprep.mubr.bf16.mxu1 %v5694_v16  ;;  %v5768_v15 = vld [vmem:[%s6221_s30 + $0x32c] ss:$36 sps:$4 sm:$0xff]  }
  0x88   : > { %3189 = vmatpush1.bf16.msra.mxu0 %v5692_v17  ;;  %3192 = vmatprep.mubr.bf16.mxu0 %v5698_v18  ;;  %v5870_v16 = vld [vmem:[%s7435_s1 + $0x1e8] sm:$0xff]   ;;  %v5770_v17 = vld [vmem:[%s6221_s30 + $0x558] ss:$36 sps:$4 sm:$0xff]  }
  0x89   : > { %3190 = vmatprep.subr.bf16.mxu0 %v6089_v1  ;;  %5265 = vmatpush1.bf16.msra.mxu1 %v6296_v32  ;;  %v5739_v32 = vld [vmem:[%s7435_s1 + $0x198] sm:$0xff]   ;;  %v5771_v18 = vld [vmem:[%s6221_s30 + $0x328] ss:$36 sps:$4 sm:$0xff]  }
  0x8a   : > { %5250 = vmatprep.subr.bf16.mxu1 %v6089_v1 }
  0x8c   : > { %3191 = vmatpush1.bf16.msra.mxu0 %v5693_v19  ;;  %v5772_v19 = vld [vmem:[%s6221_s30 + $0x5a4] ss:$36 sps:$4 sm:$0xff]  }
  0x8d   : > { %3449 = vmatprep.subr.bf16.mxu0 %v6089_v1  ;;  %5266 = vmatpush1.bf16.msra.mxu1 %v6307_v34  ;;  %v5714_v34 = vld [vmem:[%s6221_s30 + $0x31c] ss:$36 sps:$4 sm:$0xff]  }
  0x8e   : > { %2679 = vmatmul.mubr.bf16.gmra.mrb[32].mxu1 %v5699_v20  ;;  %5587 = vmatprep.subr.msk.bf16.mxu1 %vm2578_vm0, %v5857_v6  ;;  %v5774_v20 = vld [vmem:[%s6221_s30 + $0x374] ss:$36 sps:$4 sm:$0xff]  }
  0x8f   : > { %3193 = vmatmul.mubr.bf16.vlgmr.msra.gmra.mrb[0].mxu0 %v5696_v21  ;;  %2686 = vmatprep.mubr.bf16.mxu1 %v5701_v22  ;;  %v5776_v21 = vld [vmem:[%s6221_s30 + $0x5a0] ss:$36 sps:$4 sm:$0xff]   ;;  %v5777_v22 = vld [vmem:[%s6221_s30 + $0x370] ss:$36 sps:$4 sm:$0xff]  }
  0x90   : > { %3450 = vmatpush1.bf16.msra.mxu0 %v5700_v23  ;;  %3200 = vmatprep.mubr.bf16.mxu0 %v5703_v24  ;;  %v5779_v23 = vld [vmem:[%s6221_s30 + $0x5ec] ss:$36 sps:$4 sm:$0xff]   ;;  %v5781_v24 = vld [vmem:[%s6221_s30 + $0x3bc] ss:$36 sps:$4 sm:$0xff]  }
  0x91   : > { %3451 = vmatprep.subr.bf16.mxu0 %v6089_v1 }
  0x94   : > { %3452 = vmatpush1.bf16.msra.mxu0 %v5713_v26  ;;  %v5783_v26 = vld [vmem:[%s6221_s30 + $0x5e8] ss:$36 sps:$4 sm:$0xff]  }
  0x95   : > { %3453 = vmatprep.subr.bf16.mxu0 %v6089_v1 }
  0x96   : > { %2687 = vmatmul.mubr.bf16.gmra.mrb[36].mxu1 %v5705_v25  ;;  %v5883_v25 = vld [vmem:[%s7435_s1 + $0x1f0] sm:$0xff]  }
  0x97   : > { %3201 = vmatmul.mubr.bf16.gmra.mrb[4].mxu0 %v5706_v27  ;;  %2694 = vmatprep.mubr.bf16.mxu1 %v5707_v28  ;;  %v5784_v27 = vld [vmem:[%s6221_s30 + $0x3b8] ss:$36 sps:$4 sm:$0xff]  }
  0x98   : > { %3208 = vmatprep.mubr.bf16.mxu0 %v5709_v29  ;;  %3454 = vmatpush1.bf16.msra.mxu0 %v5726_v30  ;;  %v5785_v28 = vld [vmem:[%s6221_s30 + $0x634] ss:$36 sps:$4 sm:$0xff]   ;;  %v5787_v29 = vld [vmem:[%s6221_s30 + $0x404] ss:$36 sps:$4 sm:$0xff]  }
  0x99   : > { %3455 = vmatprep.subr.bf16.mxu0 %v6089_v1  ;;  %v5789_v30 = vld [vmem:[%s6221_s30 + $0x630] ss:$36 sps:$4 sm:$0xff]  }
  0x9c   : > { %3456 = vmatpush1.bf16.msra.mxu0 %v5739_v32  ;;  %v5792_v32 = vld [vmem:[%s6221_s30 + $0x67c] ss:$36 sps:$4 sm:$0xff]  }
  0x9d   : > { %3457 = vmatprep.subr.bf16.mxu0 %v6089_v1 }
  0x9e   : > { %2695 = vmatmul.mubr.bf16.gmra.mrb[40].mxu1 %v5711_v31  ;;  %v5790_v31 = vld [vmem:[%s6221_s30 + $0x400] ss:$36 sps:$4 sm:$0xff]  }
  0x9f   : > { %3209 = vmatmul.mubr.bf16.gmra.mrb[8].mxu0 %v5712_v33  ;;  %2702 = vmatprep.mubr.bf16.mxu1 %v5714_v34  ;;  %v5794_v33 = vld [vmem:[%s6221_s30 + $0x44c] ss:$36 sps:$4 sm:$0xff]   ;;  %v5796_v34 = vld [vmem:[%s6221_s30 + $0x678] ss:$36 sps:$4 sm:$0xff]  }
  0xa0   : > { %3216 = vmatprep.mubr.bf16.mxu0 %v5716_v35  ;;  %3458 = vmatpush1.bf16.msra.mxu0 %v5752_v36  ;;  %v5797_v35 = vld [vmem:[%s6221_s30 + $0x448] ss:$36 sps:$4 sm:$0xff]  }
  0xa1   : > { %3459 = vmatprep.subr.bf16.mxu0 %v6089_v1  ;;  %v5798_v36 = vld [vmem:[%s6221_s30 + $0x6c4] ss:$36 sps:$4 sm:$0xff]  }
  0xa4   : > { %3460 = vmatpush1.bf16.msra.mxu0 %v5765_v37  ;;  %v5800_v37 = vld [vmem:[%s6221_s30 + $0x494] ss:$36 sps:$4 sm:$0xff]  }
  0xa5   : > { %3461 = vmatprep.subr.bf16.mxu0 %v6089_v1 }
  0xa6   : > { %2703 = vmatmul.mubr.bf16.gmra.mrb[44].mxu1 %v5718_v38  ;;  %v5802_v38 = vld [vmem:[%s6221_s30 + $0x6c0] ss:$36 sps:$4 sm:$0xff]  }
  0xa7   : > { %3217 = vmatmul.mubr.bf16.gmra.mrb[12].mxu0 %v5719_v39  ;;  %2710 = vmatprep.mubr.bf16.mxu1 %v5720_v40  ;;  %v5803_v39 = vld [vmem:[%s6221_s30 + $0x490] ss:$36 sps:$4 sm:$0xff]  }
  0xa8   : > { %3224 = vmatprep.mubr.bf16.mxu0 %v5722_v41  ;;  %3462 = vmatpush1.bf16.msra.mxu0 %v5778_v42  ;;  %v5805_v40 = vld [vmem:[%s6221_s30 + $0x70c] ss:$36 sps:$4 sm:$0xff]   ;;  %v5807_v41 = vld [vmem:[%s6221_s30 + $0x4dc] ss:$36 sps:$4 sm:$0xff]  }
  0xa9   : > { %3463 = vmatprep.subr.bf16.mxu0 %v6089_v1  ;;  %v5809_v42 = vld [vmem:[%s6221_s30 + $0x708] ss:$36 sps:$4 sm:$0xff]  }
  0xac   : > { %3464 = vmatpush1.bf16.msra.mxu0 %v5791_v43  ;;  %v5810_v43 = vld [vmem:[%s6221_s30 + $0x4d8] ss:$36 sps:$4 sm:$0xff]  }
  0xad   : > { %3465 = vmatprep.subr.bf16.mxu0 %v6089_v1 }
  0xae   : > { %2711 = vmatmul.mubr.bf16.gmra.mrb[48].mxu1 %v5724_v44  ;;  %v5811_v44 = vld [vmem:[%s6221_s30 + $0x754] ss:$36 sps:$4 sm:$0xff]  }
  0xaf   : > { %3225 = vmatmul.mubr.bf16.gmra.mrb[16].mxu0 %v5725_v45  ;;  %2718 = vmatprep.mubr.bf16.mxu1 %v5727_v46  ;;  %v5813_v45 = vld [vmem:[%s6221_s30 + $0x524] ss:$36 sps:$4 sm:$0xff]   ;;  %v5815_v46 = vld [vmem:[%s6221_s30 + $0x750] ss:$36 sps:$4 sm:$0xff]  }
  0xb0   : > { %3232 = vmatprep.mubr.bf16.mxu0 %v5729_v47  ;;  %3466 = vmatpush1.bf16.msra.mxu0 %v5804_v48  ;;  %v5816_v47 = vld [vmem:[%s6221_s30 + $0x520] ss:$36 sps:$4 sm:$0xff]  }
  0xb1   : > { %3467 = vmatprep.subr.bf16.mxu0 %v6089_v1  ;;  %v5818_v48 = vld [vmem:[%s6221_s30 + $0x79c] ss:$36 sps:$4 sm:$0xff]  }
  0xb4   : > { %3468 = vmatpush1.bf16.msra.mxu0 %v5817_v49  ;;  %v5820_v49 = vld [vmem:[%s6221_s30 + $0x56c] ss:$36 sps:$4 sm:$0xff]  }
  0xb5   : > { %3469 = vmatprep.subr.bf16.mxu0 %v6089_v1 }
  0xb6   : > { %2719 = vmatmul.mubr.bf16.gmra.mrb[52].mxu1 %v5731_v50 }
  0xb7   : > { %3233 = vmatmul.mubr.bf16.gmra.mrb[20].mxu0 %v5732_v51  ;;  %2726 = vmatprep.mubr.bf16.mxu1 %v5733_v52  ;;  %v5822_v52 = vld [vmem:[%s6221_s30 + $0x798] ss:$36 sps:$4 sm:$0xff]  }
  0xb8   : > { %3240 = vmatprep.mubr.bf16.mxu0 %v5735_v53  ;;  %3470 = vmatpush1.bf16.msra.mxu0 %v5830_v54  ;;  %v5823_v54 = vld [vmem:[%s6221_s30 + $0x568] ss:$36 sps:$4 sm:$0xff]  }
  0xb9   : > { %3471 = vmatprep.subr.bf16.mxu0 %v6089_v1 }
  0xbc   : > { %3472 = vmatpush1.bf16.msra.mxu0 %v5843_v59 }
  0xbd   : > { %3473 = vmatprep.subr.bf16.mxu0 %v6089_v1 }
  0xbe   : > { %2727 = vmatmul.mubr.bf16.gmra.mrb[56].mxu1 %v5737_v55  ;;  %v5824_v55 = vld [vmem:[%s6221_s30 + $0x7e4] ss:$36 sps:$4 sm:$0xff]  }
  0xbf   : > { %3241 = vmatmul.mubr.bf16.gmra.mrb[24].mxu0 %v5738_v56  ;;  %2734 = vmatprep.mubr.bf16.mxu1 %v5740_v57  ;;  %v5826_v57 = vld [vmem:[%s6221_s30 + $0x5b4] ss:$36 sps:$4 sm:$0xff]  }
  0xc0   : > { %3248 = vmatprep.mubr.bf16.mxu0 %v5742_v58  ;;  %3474 = vmatpush1.bf16.msra.mxu0 %v5856_v5  ;;  %v5835_v5 = vld [vmem:[%s6221_s30 + $0x828] ss:$36 sps:$4 sm:$0xff]  }
  0xc1   : > { %3475 = vmatprep.subr.bf16.mxu0 %v6089_v1 }
  0xc4   : > { %3476 = vmatpush1.bf16.msra.mxu0 %v5870_v16  ;;  %v5842_v16 = vld [vmem:[%s6221_s30 + $0x640] ss:$36 sps:$4 sm:$0xff]  }
  0xc5   : > { %3477 = vmatprep.subr.bf16.mxu0 %v6089_v1 }
  0xc6   : > { %2735 = vmatmul.mubr.bf16.gmra.mrb[60].mxu1 %v5744_v60  ;;  %v5828_v60 = vld [vmem:[%s6221_s30 + $0x7e0] ss:$36 sps:$4 sm:$0xff]  }
  0xc7   : > { %3249 = vmatmul.mubr.bf16.gmra.mrb[28].mxu0 %v5745_v61  ;;  %2742 = vmatprep.mubr.bf16.mxu1 %v5746_v62  ;;  %v5829_v62 = vld [vmem:[%s6221_s30 + $0x5b0] ss:$36 sps:$4 sm:$0xff]  }
  0xc8   : > { %3256 = vmatprep.mubr.bf16.mxu0 %v5748_v63  ;;  %3478 = vmatpush1.bf16.msra.mxu0 %v5883_v25  ;;  %v5831_v63 = vld [vmem:[%s6221_s30 + $0x82c] ss:$36 sps:$4 sm:$0xff]  }
  0xc9   : > { %3479 = vmatprep.subr.bf16.mxu0 %v6089_v1  ;;  %v5896_v1 = vld [vmem:[%s7435_s1 + $0x1f8] sm:$0xff]   ;;  %v5852_v25 = vld [vmem:[%s6221_s30 + $0x24c] ss:$36 sps:$4 sm:$0xff]  }
  0xcc   : > { %3480 = vmatpush1.bf16.msra.mxu0 %v5896_v1  ;;  %v5858_v1 = vld [vmem:[%s6221_s30 + $0x294] ss:$36 sps:$4 sm:$0xff]  }
  0xce   : > { %2743 = vmatmul.mubr.bf16.gmra.mrb[64].mxu1 %v5750_v0 }
  0xcf   : > { %3257 = vmatmul.mubr.bf16.gmra.mrb[32].mxu0 %v5751_v2  ;;  %2750 = vmatprep.mubr.bf16.mxu1 %v5753_v3  ;;  %v5833_v2 = vld [vmem:[%s6221_s30 + $0x5fc] ss:$36 sps:$4 sm:$0xff]  }
  0xd0   : > { %3264 = vmatprep.mubr.bf16.mxu0 %v5755_v4 }
  0xd6   : > { %2751 = vmatmul.mubr.bf16.gmra.mrb[68].mxu1 %v5757_v7  ;;  %v5836_v7 = vld [vmem:[%s6221_s30 + $0x5f8] ss:$36 sps:$4 sm:$0xff]  }
  0xd7   : > { %3265 = vmatmul.mubr.bf16.gmra.mrb[36].mxu0 %v5758_v8  ;;  %2758 = vmatprep.mubr.bf16.mxu1 %v5759_v9  ;;  %v5837_v8 = vld [vmem:[%s6221_s30 + $0x874] ss:$36 sps:$4 sm:$0xff]  }
  0xd8   : > { %3272 = vmatprep.mubr.bf16.mxu0 %v5761_v11  ;;  %v5839_v11 = vld [vmem:[%s6221_s30 + $0x644] ss:$36 sps:$4 sm:$0xff]  }
  0xde   : > { %2759 = vmatmul.mubr.bf16.gmra.mrb[72].mxu1 %v5763_v12 }
  0xdf   : > { %3273 = vmatmul.mubr.bf16.gmra.mrb[40].mxu0 %v5764_v13  ;;  %2766 = vmatprep.mubr.bf16.mxu1 %v5766_v14  ;;  %v5841_v14 = vld [vmem:[%s6221_s30 + $0x870] ss:$36 sps:$4 sm:$0xff]  }
  0xe0   : > { %3280 = vmatprep.mubr.bf16.mxu0 %v5768_v15 }
  0xe6   : > { %2767 = vmatmul.mubr.bf16.gmra.mrb[76].mxu1 %v5770_v17  ;;  %v5844_v17 = vld [vmem:[%s6221_s30 + $0x8bc] ss:$36 sps:$4 sm:$0xff]  }
  0xe7   : > { %3281 = vmatmul.mubr.bf16.gmra.mrb[44].mxu0 %v5771_v18  ;;  %2774 = vmatprep.mubr.bf16.mxu1 %v5772_v19  ;;  %v5846_v19 = vld [vmem:[%s6221_s30 + $0x68c] ss:$36 sps:$4 sm:$0xff]  }
  0xe8   : > { %3288 = vmatprep.mubr.bf16.mxu0 %v5774_v20 }
  0xee   : > { %2775 = vmatmul.mubr.bf16.gmra.mrb[80].mxu1 %v5776_v21 }
  0xef   : > { %3289 = vmatmul.mubr.bf16.gmra.mrb[48].mxu0 %v5777_v22  ;;  %2782 = vmatprep.mubr.bf16.mxu1 %v5779_v23  ;;  %v5848_v22 = vld [vmem:[%s6221_s30 + $0x8b8] ss:$36 sps:$4 sm:$0xff]  }
  0xf0   : > { %3296 = vmatprep.mubr.bf16.mxu0 %v5781_v24  ;;  %v5849_v24 = vld [vmem:[%s6221_s30 + $0x688] ss:$36 sps:$4 sm:$0xff]  }
  0xf6   : > { %2783 = vmatmul.mubr.bf16.gmra.mrb[84].mxu1 %v5783_v26 }
  0xf7   : > { %3297 = vmatmul.mubr.bf16.gmra.mrb[52].mxu0 %v5784_v27  ;;  %2790 = vmatprep.mubr.bf16.mxu1 %v5785_v28  ;;  %v5853_v27 = vld [vmem:[%s6221_s30 + $0x6d4] ss:$36 sps:$4 sm:$0xff]  }
  0xf8   : > { %3304 = vmatprep.mubr.bf16.mxu0 %v5787_v29 }
  0xfe   : > { %2791 = vmatmul.mubr.bf16.gmra.mrb[88].mxu1 %v5789_v30  ;;  %v5850_v30 = vld [vmem:[%s6221_s30 + $0x248] ss:$36 sps:$4 sm:$0xff]  }
  0xff   : > { %3305 = vmatmul.mubr.bf16.gmra.mrb[56].mxu0 %v5790_v31  ;;  %2798 = vmatprep.mubr.bf16.mxu1 %v5792_v32  ;;  %v5855_v32 = vld [vmem:[%s6221_s30 + $0x6d0] ss:$36 sps:$4 sm:$0xff]  }
 0x100   : > { %3312 = vmatprep.mubr.bf16.mxu0 %v5794_v33 }
 0x106   : > { %2799 = vmatmul.mubr.bf16.gmra.mrb[92].mxu1 %v5796_v34  ;;  %v5860_v34 = vld [vmem:[%s6221_s30 + $0x71c] ss:$36 sps:$4 sm:$0xff]  }
 0x107   : > { %3313 = vmatmul.mubr.bf16.gmra.mrb[60].mxu0 %v5797_v35  ;;  %2806 = vmatprep.mubr.bf16.mxu1 %v5798_v36 }
 0x108   : > { %3320 = vmatprep.mubr.bf16.mxu0 %v5800_v37  ;;  %v5862_v37 = vld [vmem:[%s6221_s30 + $0x290] ss:$36 sps:$4 sm:$0xff]  }
 0x10e   : > { %2807 = vmatmul.mubr.bf16.gmra.mrb[96].mxu1 %v5802_v38 }
 0x10f   : > { %3321 = vmatmul.mubr.bf16.gmra.mrb[64].mxu0 %v5803_v39  ;;  %2814 = vmatprep.mubr.bf16.mxu1 %v5805_v40  ;;  %v5863_v39 = vld [vmem:[%s6221_s30 + $0x718] ss:$36 sps:$4 sm:$0xff]  }
 0x110   : > { %3328 = vmatprep.mubr.bf16.mxu0 %v5807_v41  ;;  %v5864_v40 = vld [vmem:[%s6221_s30 + $0x2dc] ss:$36 sps:$4 sm:$0xff]  }
 0x116   : > { %2815 = vmatmul.mubr.bf16.gmra.mrb[100].mxu1 %v5809_v42  ;;  %v5866_v42 = vld [vmem:[%s6221_s30 + $0x764] ss:$36 sps:$4 sm:$0xff]  }
 0x117   : > { %3329 = vmatmul.mubr.bf16.gmra.mrb[68].mxu0 %v5810_v43  ;;  %2822 = vmatprep.mubr.bf16.mxu1 %v5811_v44  ;;  %v5868_v44 = vld [vmem:[%s6221_s30 + $0x2d8] ss:$36 sps:$4 sm:$0xff]  }
 0x118   : > { %3336 = vmatprep.mubr.bf16.mxu0 %v5813_v45 }
 0x11e   : > { %2823 = vmatmul.mubr.bf16.gmra.mrb[104].mxu1 %v5815_v46  ;;  %v5869_v46 = vld [vmem:[%s6221_s30 + $0x760] ss:$36 sps:$4 sm:$0xff]  }
 0x11f   : > { %3337 = vmatmul.mubr.bf16.gmra.mrb[72].mxu0 %v5816_v47  ;;  %2830 = vmatprep.mubr.bf16.mxu1 %v5818_v48  ;;  %v5871_v47 = vld [vmem:[%s6221_s30 + $0x324] ss:$36 sps:$4 sm:$0xff]  }
 0x120   : > { %3344 = vmatprep.mubr.bf16.mxu0 %v5820_v49  ;;  %v5873_v49 = vld [vmem:[%s6221_s30 + $0x7ac] ss:$36 sps:$4 sm:$0xff]  }
 0x121   : > { %v6584_v50 = vpop.f32.mrb[0].mxu1 }
 0x122   : > { %v2618_v51 = vpop.f32.mrb[1].mxu1 }
 0x123   : > { %v6587_v53 = vpop.f32.mrb[2].mxu1  ;;  %v5875_v51 = vld [vmem:[%s6221_s30 + $0x320] ss:$36 sps:$4 sm:$0xff]  }
 0x124   : > { %v2621_v56 = vpop.f32.mrb[3].mxu1 }
 0x125   : > { %v5881_v56 = vld [vmem:[%s6221_s30 + $0x368] ss:$36 sps:$4 sm:$0xff]  }
 0x126   : > { %2831 = vmatmul.mubr.bf16.gmra.mrb[108].mxu1 %v5822_v52  ;;  %v5876_v52 = vld [vmem:[%s6221_s30 + $0x7a8] ss:$36 sps:$4 sm:$0xff]  }
 0x127   : > { %3345 = vmatmul.mubr.bf16.gmra.mrb[76].mxu0 %v5823_v54  ;;  %2838 = vmatprep.mubr.bf16.mxu1 %v5824_v55  ;;  %v5877_v54 = vld [vmem:[%s6221_s30 + $0x36c] ss:$36 sps:$4 sm:$0xff]   ;;  %v5879_v55 = vld [vmem:[%s6221_s30 + $0x7f4] ss:$36 sps:$4 sm:$0xff]  }
 0x128   : > { %3352 = vmatprep.mubr.bf16.mxu0 %v5826_v57  ;;  %v5882_v57 = vld [vmem:[%s6221_s30 + $0x7f0] ss:$36 sps:$4 sm:$0xff]  }
 0x129   : > { %v6592_v58 = vpop.f32.mrb[4].mxu1 }
 0x12a   : > { %v2626_v59 = vpop.f32.mrb[5].mxu1 }
 0x12b   : > { %v6595_v61 = vpop.f32.mrb[6].mxu1  ;;  %v5884_v59 = vld [vmem:[%s6221_s30 + $0x3b4] ss:$36 sps:$4 sm:$0xff]  }
 0x12c   : > { %v2629_v0 = vpop.f32.mrb[7].mxu1 }
 0x12d   : > { %v5890_v0 = vld [vmem:[%s6221_s30 + $0x3fc] ss:$36 sps:$4 sm:$0xff]  }
 0x12e   : > { %2839 = vmatmul.mubr.bf16.gmra.mrb[112].mxu1 %v5828_v60  ;;  %v5886_v60 = vld [vmem:[%s6221_s30 + $0x83c] ss:$36 sps:$4 sm:$0xff]  }
 0x12f   : > { %3353 = vmatmul.mubr.bf16.gmra.mrb[80].mxu0 %v5829_v62  ;;  %2846 = vmatprep.mubr.bf16.mxu1 %v5831_v63  ;;  %v5888_v62 = vld [vmem:[%s6221_s30 + $0x3b0] ss:$36 sps:$4 sm:$0xff]   ;;  %v5889_v63 = vld [vmem:[%s6221_s30 + $0x838] ss:$36 sps:$4 sm:$0xff]  }
 0x130   : > { %3360 = vmatprep.mubr.bf16.mxu0 %v5833_v2  ;;  %v5892_v2 = vld [vmem:[%s6221_s30 + $0x884] ss:$36 sps:$4 sm:$0xff]  }
 0x131   : > { %v6600_v3 = vpop.f32.mrb[8].mxu1 }
 0x132   : > { %v2634_v4 = vpop.f32.mrb[9].mxu1 }
 0x133   : > { %v6603_v6 = vpop.f32.mrb[10].mxu1  ;;  %v5894_v4 = vld [vmem:[%s6221_s30 + $0x3f8] ss:$36 sps:$4 sm:$0xff]  }
 0x134   : > { %v2637_v9 = vpop.f32.mrb[11].mxu1 }
 0x135   : > { %v5901_v9 = vld [vmem:[%s6221_s30 + $0x440] ss:$36 sps:$4 sm:$0xff]  }
 0x136   : > { %2847 = vmatmul.mubr.bf16.gmra.mrb[116].mxu1 %v5835_v5  ;;  %v5895_v5 = vld [vmem:[%s6221_s30 + $0x880] ss:$36 sps:$4 sm:$0xff]  }
 0x137   : > { %3361 = vmatmul.mubr.bf16.gmra.mrb[84].mxu0 %v5836_v7  ;;  %2854 = vmatprep.mubr.bf16.mxu1 %v5837_v8  ;;  %v5897_v7 = vld [vmem:[%s6221_s30 + $0x444] ss:$36 sps:$4 sm:$0xff]   ;;  %v5899_v8 = vld [vmem:[%s6221_s30 + $0x8cc] ss:$36 sps:$4 sm:$0xff]  }
 0x138   : > { %3368 = vmatprep.mubr.bf16.mxu0 %v5839_v11  ;;  %v5902_v11 = vld [vmem:[%s6221_s30 + $0x8c8] ss:$36 sps:$4 sm:$0xff]  }
 0x139   : > { %v6608_v12 = vpop.f32.mrb[12].mxu1 }
 0x13a   : > { %v2642_v13 = vpop.f32.mrb[13].mxu1 }
 0x13b   : > { %v6611_v15 = vpop.f32.mrb[14].mxu1  ;;  %v5903_v13 = vld [vmem:[%s6221_s30 + $0x48c] ss:$36 sps:$4 sm:$0xff]  }
 0x13c   : > { %v2645_v18 = vpop.f32.mrb[15].mxu1 }
 0x13d   : > { %v5909_v18 = vld [vmem:[%s6221_s30 + $0x4d4] ss:$36 sps:$4 sm:$0xff]  }
 0x13e   : > { %2855 = vmatmul.mubr.bf16.gmra.mrb[120].mxu1 %v5841_v14  ;;  %v5907_v14 = vld [vmem:[%s6221_s30 + $0x1c] ss:$36 sps:$4 sm:$0xff]  }
 0x13f   : > { %3369 = vmatmul.mubr.bf16.gmra.mrb[88].mxu0 %v5842_v16  ;;  %2862 = vmatprep.mubr.bf16.mxu1 %v5844_v17  ;;  %v5908_v16 = vld [vmem:[%s6221_s30 + $0x488] ss:$36 sps:$4 sm:$0xff]   ;;  %v5905_v17 = vld [vmem:[%s6221_s30 + $0x18] ss:$36 sps:$4 sm:$0xff]  }
 0x140   : > { %3376 = vmatprep.mubr.bf16.mxu0 %v5846_v19  ;;  %v5911_v19 = vld [vmem:[%s6221_s30 + $0x64] ss:$36 sps:$4 sm:$0xff]  }
 0x141   : > { %v6616_v20 = vpop.f32.mrb[16].mxu1 }
 0x142   : > { %v2650_v21 = vpop.f32.mrb[17].mxu1 }
 0x143   : > { %v6619_v23 = vpop.f32.mrb[18].mxu1  ;;  %v5913_v21 = vld [vmem:[%s6221_s30 + $0x4d0] ss:$36 sps:$4 sm:$0xff]  }
 0x144   : > { %v2653_v26 = vpop.f32.mrb[19].mxu1 }
 0x145   : > { %v5919_v26 = vld [vmem:[%s6221_s30 + $0x518] ss:$36 sps:$4 sm:$0xff]  }
 0x146   : > { %2863 = vmatmul.mubr.bf16.gmra.mrb[124].mxu1 %v5848_v22  ;;  %v5914_v22 = vld [vmem:[%s6221_s30 + $0x60] ss:$36 sps:$4 sm:$0xff]  }
 0x147   : > { %3377 = vmatmul.mubr.bf16.gmra.mrb[92].mxu0 %v5849_v24  ;;  %2967 = vmatprep.mubr.bf16.mxu1 %v5852_v25  ;;  %v5915_v24 = vld [vmem:[%s6221_s30 + $0x51c] ss:$36 sps:$4 sm:$0xff]   ;;  %v5917_v25 = vld [vmem:[%s6221_s30 + $0xac] ss:$36 sps:$4 sm:$0xff]  }
 0x148   : > { %3384 = vmatprep.mubr.bf16.mxu0 %v5853_v27  ;;  %v5920_v27 = vld [vmem:[%s6221_s30 + $0xa8] ss:$36 sps:$4 sm:$0xff]  }
 0x149   : > { %v6624_v28 = vpop.f32.mrb[20].mxu1 }
 0x14a   : > { %v2658_v29 = vpop.f32.mrb[21].mxu1 }
 0x14b   : > { %v6627_v31 = vpop.f32.mrb[22].mxu1  ;;  %v5921_v29 = vld [vmem:[%s6221_s30 + $0x564] ss:$36 sps:$4 sm:$0xff]  }
 0x14c   : > { %v2661_v33 = vpop.f32.mrb[23].mxu1 }
 0x14d   : > { %v5926_v33 = vld [vmem:[%s6221_s30 + $0xf0] ss:$36 sps:$4 sm:$0xff]  }
 0x14e   : > { %2968 = vmatmul.mubr.bf16.vlgmr.msra.gmra.mrb[32].mxu1 %v5850_v30  ;;  %v5923_v30 = vld [vmem:[%s6221_s30 + $0xf4] ss:$36 sps:$4 sm:$0xff]  }
 0x14f   : > { %3385 = vmatmul.mubr.bf16.gmra.mrb[96].mxu0 %v5855_v32  ;;  %5170 = vmatpush3.bf16.msra.mxu1 %v6533_v10  ;;  %v5925_v32 = vld [vmem:[%s6221_s30 + $0x560] ss:$36 sps:$4 sm:$0xff]  }
 0x150   : > { %2975 = vmatprep.mubr.bf16.mxu1 %v5858_v1  ;;  %3392 = vmatprep.mubr.bf16.mxu0 %v5860_v34  ;;  %v5927_v1 = vld [vmem:[%s6221_s30 + $0x5ac] ss:$36 sps:$4 sm:$0xff]   ;;  %v5929_v34 = vld [vmem:[%s6221_s30 + $0x13c] ss:$36 sps:$4 sm:$0xff]  }
 0x151   : > { %v6633_v35 = vpop.f32.mrb[24].mxu1 }
 0x152   : > { %v2666_v36 = vpop.f32.mrb[25].mxu1 }
 0x153   : > { %v6636_v38 = vpop.f32.mrb[26].mxu1  ;;  %v5931_v36 = vld [vmem:[%s6221_s30 + $0x5a8] ss:$36 sps:$4 sm:$0xff]  }
 0x154   : > { %v2669_v41 = vpop.f32.mrb[27].mxu1 }
 0x155   : > { %v5937_v41 = vld [vmem:[%s6221_s30 + $0x5f0] ss:$36 sps:$4 sm:$0xff]  }
 0x156   : > { %2976 = vmatmul.mubr.bf16.gmra.mrb[36].mxu1 %v5862_v37  ;;  %v5932_v37 = vld [vmem:[%s6221_s30 + $0x138] ss:$36 sps:$4 sm:$0xff]  }
 0x157   : > { %3393 = vmatmul.mubr.bf16.gmra.mrb[100].mxu0 %v5863_v39  ;;  %2983 = vmatprep.mubr.bf16.mxu1 %v5864_v40  ;;  %v5933_v39 = vld [vmem:[%s6221_s30 + $0x5f4] ss:$36 sps:$4 sm:$0xff]   ;;  %v5935_v40 = vld [vmem:[%s6221_s30 + $0x184] ss:$36 sps:$4 sm:$0xff]  }
 0x158   : > { %3400 = vmatprep.mubr.bf16.mxu0 %v5866_v42  ;;  %v5938_v42 = vld [vmem:[%s6221_s30 + $0x180] ss:$36 sps:$4 sm:$0xff]  }
 0x159   : > { %v6641_v10 = vpop.f32.mrb[28].mxu1 }
 0x15a   : > { %v2674_v43 = vpop.f32.mrb[29].mxu1 }
 0x15b   : > { %v6644_v45 = vpop.f32.mrb[30].mxu1  ;;  %v5939_v43 = vld [vmem:[%s6221_s30 + $0x63c] ss:$36 sps:$4 sm:$0xff]  }
 0x15c   : > { %v2677_v48 = vpop.f32.mrb[31].mxu1 }
 0x15d   : > { %v5945_v48 = vld [vmem:[%s6221_s30 + $0x684] ss:$36 sps:$4 sm:$0xff]  }
 0x15e   : > { %2984 = vmatmul.mubr.bf16.gmra.mrb[40].mxu1 %v5868_v44  ;;  %v5941_v44 = vld [vmem:[%s6221_s30 + $0x1cc] ss:$36 sps:$4 sm:$0xff]  }
 0x15f   : > { %3401 = vmatmul.mubr.bf16.gmra.mrb[104].mxu0 %v5869_v46  ;;  %2991 = vmatprep.mubr.bf16.mxu1 %v5871_v47  ;;  %v5943_v46 = vld [vmem:[%s6221_s30 + $0x638] ss:$36 sps:$4 sm:$0xff]   ;;  %v5944_v47 = vld [vmem:[%s6221_s30 + $0x1c8] ss:$36 sps:$4 sm:$0xff]  }
 0x160   : > { %3408 = vmatprep.mubr.bf16.mxu0 %v5873_v49  ;;  %v5947_v49 = vld [vmem:[%s6221_s30 + $0x214] ss:$36 sps:$4 sm:$0xff]  }
 0x166   : > { %2992 = vmatmul.mubr.bf16.gmra.mrb[44].mxu1 %v5875_v51  ;;  %v5949_v51 = vld [vmem:[%s6221_s30 + $0x680] ss:$36 sps:$4 sm:$0xff]  }
 0x167   : > { %3409 = vmatmul.mubr.bf16.gmra.mrb[108].mxu0 %v5876_v52  ;;  %2999 = vmatprep.mubr.bf16.mxu1 %v5877_v54  ;;  %v5950_v52 = vld [vmem:[%s6221_s30 + $0x210] ss:$36 sps:$4 sm:$0xff]  }
 0x168   : > { %3416 = vmatprep.mubr.bf16.mxu0 %v5879_v55  ;;  %v5951_v54 = vld [vmem:[%s6221_s30 + $0x6cc] ss:$36 sps:$4 sm:$0xff]   ;;  %v5953_v55 = vld [vmem:[%s6221_s30 + $0x25c] ss:$36 sps:$4 sm:$0xff]  }
 0x16e   : > { %3000 = vmatmul.mubr.bf16.gmra.mrb[48].mxu1 %v5881_v56  ;;  %v5955_v56 = vld [vmem:[%s6221_s30 + $0x6c8] ss:$36 sps:$4 sm:$0xff]  }
 0x16f   : > { %3417 = vmatmul.mubr.bf16.gmra.mrb[112].mxu0 %v5882_v57  ;;  %3007 = vmatprep.mubr.bf16.mxu1 %v5884_v59  ;;  %v5956_v57 = vld [vmem:[%s6221_s30 + $0x258] ss:$36 sps:$4 sm:$0xff]  }
 0x170   : > { %3424 = vmatprep.mubr.bf16.mxu0 %v5886_v60  ;;  %v5957_v59 = vld [vmem:[%s6221_s30 + $0x714] ss:$36 sps:$4 sm:$0xff]   ;;  %v5959_v60 = vld [vmem:[%s6221_s30 + $0x2a4] ss:$36 sps:$4 sm:$0xff]  }
 0x176   : > { %3008 = vmatmul.mubr.bf16.gmra.mrb[52].mxu1 %v5888_v62  ;;  %v5961_v62 = vld [vmem:[%s6221_s30 + $0x710] ss:$36 sps:$4 sm:$0xff]  }
 0x177   : > { %3425 = vmatmul.mubr.bf16.gmra.mrb[116].mxu0 %v5889_v63  ;;  %3015 = vmatprep.mubr.bf16.mxu1 %v5890_v0  ;;  %v5962_v63 = vld [vmem:[%s6221_s30 + $0x2a0] ss:$36 sps:$4 sm:$0xff]  }
 0x178   : > { %3432 = vmatprep.mubr.bf16.mxu0 %v5892_v2  ;;  %v5963_v0 = vld [vmem:[%s6221_s30 + $0x75c] ss:$36 sps:$4 sm:$0xff]   ;;  %v5965_v2 = vld [vmem:[%s6221_s30 + $0x2ec] ss:$36 sps:$4 sm:$0xff]  }
 0x17e   : > { %3016 = vmatmul.mubr.bf16.gmra.mrb[56].mxu1 %v5894_v4  ;;  %v5967_v4 = vld [vmem:[%s6221_s30 + $0x758] ss:$36 sps:$4 sm:$0xff]  }
 0x17f   : > { %3433 = vmatmul.mubr.bf16.gmra.mrb[120].mxu0 %v5895_v5  ;;  %3023 = vmatprep.mubr.bf16.mxu1 %v5897_v7  ;;  %v5968_v5 = vld [vmem:[%s6221_s30 + $0x2e8] ss:$36 sps:$4 sm:$0xff]  }
 0x180   : > { %3440 = vmatprep.mubr.bf16.mxu0 %v5899_v8  ;;  %v5969_v7 = vld [vmem:[%s6221_s30 + $0x7a4] ss:$36 sps:$4 sm:$0xff]   ;;  %v5971_v8 = vld [vmem:[%s6221_s30 + $0x334] ss:$36 sps:$4 sm:$0xff]  }
 0x186   : > { %3024 = vmatmul.mubr.bf16.gmra.mrb[60].mxu1 %v5901_v9  ;;  %v5973_v9 = vld [vmem:[%s6221_s30 + $0x7a0] ss:$36 sps:$4 sm:$0xff]  }
 0x187   : > { %3441 = vmatmul.mubr.bf16.gmra.mrb[124].mxu0 %v5902_v11  ;;  %3031 = vmatprep.mubr.bf16.mxu1 %v5903_v13  ;;  %v5974_v11 = vld [vmem:[%s6221_s30 + $0x330] ss:$36 sps:$4 sm:$0xff]  }
 0x188   : > { %3481 = vmatprep.mubr.bf16.mxu0 %v5907_v14  ;;  %v5975_v13 = vld [vmem:[%s6221_s30 + $0x7ec] ss:$36 sps:$4 sm:$0xff]   ;;  %v5977_v14 = vld [vmem:[%s6221_s30 + $0x37c] ss:$36 sps:$4 sm:$0xff]  }
 0x18e   : > { %3032 = vmatmul.mubr.bf16.gmra.mrb[64].mxu1 %v5908_v16  ;;  %v5979_v16 = vld [vmem:[%s6221_s30 + $0x7e8] ss:$36 sps:$4 sm:$0xff]  }
 0x18f   : > { %3482 = vmatmul.mubr.bf16.vlgmr.msra.gmra.mrb[0].mxu0 %v5905_v17  ;;  %3039 = vmatprep.mubr.bf16.mxu1 %v5909_v18  ;;  %v5980_v17 = vld [vmem:[%s6221_s30 + $0x378] ss:$36 sps:$4 sm:$0xff]  }
 0x190   : > { %3489 = vmatprep.mubr.bf16.mxu0 %v5911_v19  ;;  %v5981_v18 = vld [vmem:[%s6221_s30 + $0x834] ss:$36 sps:$4 sm:$0xff]   ;;  %v5983_v19 = vld [vmem:[%s6221_s30 + $0x3c4] ss:$36 sps:$4 sm:$0xff]  }
 0x196   : > { %3040 = vmatmul.mubr.bf16.gmra.mrb[68].mxu1 %v5913_v21  ;;  %v5985_v21 = vld [vmem:[%s6221_s30 + $0x830] ss:$36 sps:$4 sm:$0xff]  }
 0x197   : > { %3490 = vmatmul.mubr.bf16.gmra.mrb[4].mxu0 %v5914_v22  ;;  %3047 = vmatprep.mubr.bf16.mxu1 %v5915_v24  ;;  %v5986_v22 = vld [vmem:[%s6221_s30 + $0x3c0] ss:$36 sps:$4 sm:$0xff]  }
 0x198   : > { %3497 = vmatprep.mubr.bf16.mxu0 %v5917_v25  ;;  %v5987_v24 = vld [vmem:[%s6221_s30 + $0x87c] ss:$36 sps:$4 sm:$0xff]   ;;  %v5989_v25 = vld [vmem:[%s6221_s30 + $0x40c] ss:$36 sps:$4 sm:$0xff]  }
 0x19e   : > { %3048 = vmatmul.mubr.bf16.gmra.mrb[72].mxu1 %v5919_v26  ;;  %v5991_v26 = vld [vmem:[%s6221_s30 + $0x878] ss:$36 sps:$4 sm:$0xff]  }
 0x19f   : > { %3498 = vmatmul.mubr.bf16.gmra.mrb[8].mxu0 %v5920_v27  ;;  %3055 = vmatprep.mubr.bf16.mxu1 %v5921_v29  ;;  %v5992_v27 = vld [vmem:[%s6221_s30 + $0x408] ss:$36 sps:$4 sm:$0xff]  }
 0x1a0   : > { %3505 = vmatprep.mubr.bf16.mxu0 %v5923_v30  ;;  %v5993_v29 = vld [vmem:[%s6221_s30 + $0x8c4] ss:$36 sps:$4 sm:$0xff]   ;;  %v5995_v30 = vld [vmem:[%s6221_s30 + $0x454] ss:$36 sps:$4 sm:$0xff]  }
 0x1a6   : > { %3056 = vmatmul.mubr.bf16.gmra.mrb[76].mxu1 %v5925_v32  ;;  %v5997_v32 = vld [vmem:[%s6221_s30 + $0x8c0] ss:$36 sps:$4 sm:$0xff]  }
 0x1a7   : > { %3506 = vmatmul.mubr.bf16.gmra.mrb[12].mxu0 %v5926_v33  ;;  %3063 = vmatprep.mubr.bf16.mxu1 %v5927_v1  ;;  %v5998_v33 = vld [vmem:[%s6221_s30 + $0x450] ss:$36 sps:$4 sm:$0xff]   ;;  %v6001_v1 = vld [vmem:[%s6221_s30 + $0x20] ss:$36 sps:$4 sm:$0xff]  }
 0x1a8   : > { %3513 = vmatprep.mubr.bf16.mxu0 %v5929_v34  ;;  %v5999_v34 = vld [vmem:[%s6221_s30 + $0x49c] ss:$36 sps:$4 sm:$0xff]  }
 0x1ae   : > { %3064 = vmatmul.mubr.bf16.gmra.mrb[80].mxu1 %v5931_v36  ;;  %v6003_v36 = vld [vmem:[%s6221_s30 + $0x68] ss:$36 sps:$4 sm:$0xff]  }
 0x1af   : > { %3514 = vmatmul.mubr.bf16.gmra.mrb[16].mxu0 %v5932_v37  ;;  %3071 = vmatprep.mubr.bf16.mxu1 %v5933_v39  ;;  %v6002_v37 = vld [vmem:[%s6221_s30 + $0x498] ss:$36 sps:$4 sm:$0xff]   ;;  %v6006_v39 = vld [vmem:[%s6221_s30 + $0xb0] ss:$36 sps:$4 sm:$0xff]  }
 0x1b0   : > { %3521 = vmatprep.mubr.bf16.mxu0 %v5935_v40  ;;  %v6004_v40 = vld [vmem:[%s6221_s30 + $0x4e4] ss:$36 sps:$4 sm:$0xff]  }
 0x1b6   : > { %3072 = vmatmul.mubr.bf16.gmra.mrb[84].mxu1 %v5937_v41  ;;  %v6008_v41 = vld [vmem:[%s6221_s30 + $0xf8] ss:$36 sps:$4 sm:$0xff]  }
 0x1b7   : > { %3522 = vmatmul.mubr.bf16.gmra.mrb[20].mxu0 %v5938_v42  ;;  %3079 = vmatprep.mubr.bf16.mxu1 %v5939_v43  ;;  %v6007_v42 = vld [vmem:[%s6221_s30 + $0x4e0] ss:$36 sps:$4 sm:$0xff]  }
 0x1b8   : > { %3529 = vmatprep.mubr.bf16.mxu0 %v5941_v44  ;;  %v6011_v43 = vld [vmem:[%s6221_s30 + $0x140] ss:$36 sps:$4 sm:$0xff]   ;;  %v6009_v44 = vld [vmem:[%s6221_s30 + $0x52c] ss:$36 sps:$4 sm:$0xff]  }
 0x1be   : > { %3080 = vmatmul.mubr.bf16.gmra.mrb[88].mxu1 %v5943_v46  ;;  %v6013_v46 = vld [vmem:[%s6221_s30 + $0x188] ss:$36 sps:$4 sm:$0xff]  }
 0x1bf   : > { %3530 = vmatmul.mubr.bf16.gmra.mrb[24].mxu0 %v5944_v47  ;;  %3087 = vmatprep.mubr.bf16.mxu1 %v5945_v48  ;;  %v6012_v47 = vld [vmem:[%s6221_s30 + $0x528] ss:$36 sps:$4 sm:$0xff]   ;;  %v6016_v48 = vld [vmem:[%s6221_s30 + $0x1d0] ss:$36 sps:$4 sm:$0xff]  }
 0x1c0   : > { %3537 = vmatprep.mubr.bf16.mxu0 %v5947_v49  ;;  %v6014_v49 = vld [vmem:[%s6221_s30 + $0x574] ss:$36 sps:$4 sm:$0xff]  }
 0x1c6   : > { %3088 = vmatmul.mubr.bf16.gmra.mrb[92].mxu1 %v5949_v51 }
 0x1c7   : > { %3538 = vmatmul.mubr.bf16.gmra.mrb[28].mxu0 %v5950_v52  ;;  %3095 = vmatprep.mubr.bf16.mxu1 %v5951_v54  ;;  %v6018_v54 = vld [vmem:[%s6221_s30 + $0x218] ss:$36 sps:$4 sm:$0xff]  }
 0x1c8   : > { %3545 = vmatprep.mubr.bf16.mxu0 %v5953_v55 }
 0x1ce   : > { %3096 = vmatmul.mubr.bf16.gmra.mrb[96].mxu1 %v5955_v56  ;;  %v6017_v56 = vld [vmem:[%s6221_s30 + $0x570] ss:$36 sps:$4 sm:$0xff]  }
 0x1cf   : > { %3546 = vmatmul.mubr.bf16.gmra.mrb[32].mxu0 %v5956_v57  ;;  %3103 = vmatprep.mubr.bf16.mxu1 %v5957_v59  ;;  %v6021_v57 = vld [vmem:[%s6221_s30 + $0x260] ss:$36 sps:$4 sm:$0xff]  }
 0x1d0   : > { %3553 = vmatprep.mubr.bf16.mxu0 %v5959_v60  ;;  %v6019_v60 = vld [vmem:[%s6221_s30 + $0x5bc] ss:$36 sps:$4 sm:$0xff]  }
 0x1d6   : > { %3104 = vmatmul.mubr.bf16.gmra.mrb[100].mxu1 %v5961_v62 }
 0x1d7   : > { %3554 = vmatmul.mubr.bf16.gmra.mrb[36].mxu0 %v5962_v63  ;;  %3111 = vmatprep.mubr.bf16.mxu1 %v5963_v0  ;;  %v6023_v0 = vld [vmem:[%s6221_s30 + $0x2a8] ss:$36 sps:$4 sm:$0xff]  }
 0x1d8   : > { %3561 = vmatprep.mubr.bf16.mxu0 %v5965_v2 }
 0x1de   : > { %3112 = vmatmul.mubr.bf16.gmra.mrb[104].mxu1 %v5967_v4  ;;  %v6022_v4 = vld [vmem:[%s6221_s30 + $0x5b8] ss:$36 sps:$4 sm:$0xff]  }
 0x1df   : > { %3562 = vmatmul.mubr.bf16.gmra.mrb[40].mxu0 %v5968_v5  ;;  %3119 = vmatprep.mubr.bf16.mxu1 %v5969_v7  ;;  %v6026_v5 = vld [vmem:[%s6221_s30 + $0x2f0] ss:$36 sps:$4 sm:$0xff]  }
 0x1e0   : > { %3569 = vmatprep.mubr.bf16.mxu0 %v5971_v8  ;;  %v6024_v8 = vld [vmem:[%s6221_s30 + $0x604] ss:$36 sps:$4 sm:$0xff]  }
 0x1e6   : > { %3120 = vmatmul.mubr.bf16.gmra.mrb[108].mxu1 %v5973_v9 }
 0x1e7   : > { %3570 = vmatmul.mubr.bf16.gmra.mrb[44].mxu0 %v5974_v11  ;;  %3127 = vmatprep.mubr.bf16.mxu1 %v5975_v13  ;;  %v6028_v13 = vld [vmem:[%s6221_s30 + $0x338] ss:$36 sps:$4 sm:$0xff]  }
 0x1e8   : > { %3577 = vmatprep.mubr.bf16.mxu0 %v5977_v14 }
 0x1ee   : > { %3128 = vmatmul.mubr.bf16.gmra.mrb[112].mxu1 %v5979_v16  ;;  %v6027_v16 = vld [vmem:[%s6221_s30 + $0x600] ss:$36 sps:$4 sm:$0xff]  }
 0x1ef   : > { %3578 = vmatmul.mubr.bf16.gmra.mrb[48].mxu0 %v5980_v17  ;;  %3135 = vmatprep.mubr.bf16.mxu1 %v5981_v18  ;;  %v6031_v17 = vld [vmem:[%s6221_s30 + $0x380] ss:$36 sps:$4 sm:$0xff]  }
 0x1f0   : > { %3585 = vmatprep.mubr.bf16.mxu0 %v5983_v19  ;;  %v6029_v19 = vld [vmem:[%s6221_s30 + $0x64c] ss:$36 sps:$4 sm:$0xff]  }
 0x1f6   : > { %3136 = vmatmul.mubr.bf16.gmra.mrb[116].mxu1 %v5985_v21 }
 0x1f7   : > { %3586 = vmatmul.mubr.bf16.gmra.mrb[52].mxu0 %v5986_v22  ;;  %3143 = vmatprep.mubr.bf16.mxu1 %v5987_v24  ;;  %v6033_v24 = vld [vmem:[%s6221_s30 + $0x3c8] ss:$36 sps:$4 sm:$0xff]  }
 0x1f8   : > { %3593 = vmatprep.mubr.bf16.mxu0 %v5989_v25 }
 0x1fe   : > { %3144 = vmatmul.mubr.bf16.gmra.mrb[120].mxu1 %v5991_v26  ;;  %v6032_v26 = vld [vmem:[%s6221_s30 + $0x648] ss:$36 sps:$4 sm:$0xff]  }
 0x1ff   : > { %3594 = vmatmul.mubr.bf16.gmra.mrb[56].mxu0 %v5992_v27  ;;  %3151 = vmatprep.mubr.bf16.mxu1 %v5993_v29  ;;  %v6036_v27 = vld [vmem:[%s6221_s30 + $0x410] ss:$36 sps:$4 sm:$0xff]  }
 0x200   : > { %3601 = vmatprep.mubr.bf16.mxu0 %v5995_v30  ;;  %v6034_v30 = vld [vmem:[%s6221_s30 + $0x694] ss:$36 sps:$4 sm:$0xff]  }
 0x206   : > { %3152 = vmatmul.mubr.bf16.gmra.mrb[124].mxu1 %v5997_v32 }
 0x207   : > { %3602 = vmatmul.mubr.bf16.gmra.mrb[60].mxu0 %v5998_v33  ;;  %5171 = vmatprep.mubr.msk.bf16.mxu1 %vm2481_vm1, %v6001_v1  ;;  %v6038_v1 = vld [vmem:[%s6221_s30 + $0x458] ss:$36 sps:$4 sm:$0xff]  }
 0x208   : > { %3609 = vmatprep.mubr.bf16.mxu0 %v5999_v34 }
 0x20e   : > { %5172 = vmatmul.mubr.msk.bf16.vlgmr.msra.gmra.mrb[128].mxu1 %vm2481_vm1, %v6003_v36  ;;  %v6037_v36 = vld [vmem:[%s6221_s30 + $0x690] ss:$36 sps:$4 sm:$0xff]  }
 0x20f   : > { %3610 = vmatmul.mubr.bf16.gmra.mrb[64].mxu0 %v6002_v37  ;;  %5175 = vmatprep.mubr.msk.bf16.mxu1 %vm2481_vm1, %v6006_v39  ;;  %v6041_v37 = vld [vmem:[%s6221_s30 + $0x4a0] ss:$36 sps:$4 sm:$0xff]  }
 0x210   : > { %3617 = vmatprep.mubr.bf16.mxu0 %v6004_v40  ;;  %v6039_v40 = vld [vmem:[%s6221_s30 + $0x6dc] ss:$36 sps:$4 sm:$0xff]  }
 0x216   : > { %5176 = vmatmul.mubr.msk.bf16.gmra.mrb[132].mxu1 %vm2481_vm1, %v6008_v41 }
 0x217   : > { %3618 = vmatmul.mubr.bf16.gmra.mrb[68].mxu0 %v6007_v42  ;;  %5179 = vmatprep.mubr.msk.bf16.mxu1 %vm2481_vm1, %v6011_v43  ;;  %v6043_v43 = vld [vmem:[%s6221_s30 + $0x4e8] ss:$36 sps:$4 sm:$0xff]  }
 0x218   : > { %3625 = vmatprep.mubr.bf16.mxu0 %v6009_v44 }
 0x21e   : > { %5180 = vmatmul.mubr.msk.bf16.gmra.mrb[136].mxu1 %vm2481_vm1, %v6013_v46  ;;  %v6042_v46 = vld [vmem:[%s6221_s30 + $0x6d8] ss:$36 sps:$4 sm:$0xff]  }
 0x21f   : > { %3626 = vmatmul.mubr.bf16.gmra.mrb[72].mxu0 %v6012_v47  ;;  %5183 = vmatprep.mubr.msk.bf16.mxu1 %vm2481_vm1, %v6016_v48  ;;  %v6046_v47 = vld [vmem:[%s6221_s30 + $0x530] ss:$36 sps:$4 sm:$0xff]  }
 0x220   : > { %3633 = vmatprep.mubr.bf16.mxu0 %v6014_v49  ;;  %v6044_v49 = vld [vmem:[%s6221_s30 + $0x724] ss:$36 sps:$4 sm:$0xff]  }
 0x221   : > { %v6752_v51 = vpop.f32.mrb[32].mxu1 }
 0x222   : > { %v2971_v52 = vpop.f32.mrb[33].mxu1 }
 0x223   : > { %v6755_v55 = vpop.f32.mrb[34].mxu1 }
 0x224   : > { %v2974_v59 = vpop.f32.mrb[35].mxu1 }
 0x225   : > { %v6047_v59 = vld [vmem:[%s6221_s30 + $0x720] ss:$36 sps:$4 sm:$0xff]  }
 0x226   : > { %5184 = vmatmul.mubr.msk.bf16.gmra.mrb[140].mxu1 %vm2481_vm1, %v6018_v54 }
 0x227   : > { %3634 = vmatmul.mubr.bf16.gmra.mrb[76].mxu0 %v6017_v56  ;;  %5187 = vmatprep.mubr.msk.bf16.mxu1 %vm2481_vm1, %v6021_v57  ;;  %v6048_v56 = vld [vmem:[%s6221_s30 + $0x578] ss:$36 sps:$4 sm:$0xff]  }
 0x228   : > { %3641 = vmatprep.mubr.bf16.mxu0 %v6019_v60  ;;  %v6051_v60 = vld [vmem:[%s6221_s30 + $0x5c0] ss:$36 sps:$4 sm:$0xff]  }
 0x229   : > { %v6762_v62 = vpop.f32.mrb[36].mxu1 }
 0x22a   : > { %v2979_v63 = vpop.f32.mrb[37].mxu1 }
 0x22b   : > { %v6765_v2 = vpop.f32.mrb[38].mxu1 }
 0x22c   : > { %v2982_v7 = vpop.f32.mrb[39].mxu1 }
 0x22d   : > { %v6053_v7 = vld [vmem:[%s6221_s30 + $0x608] ss:$36 sps:$4 sm:$0xff]  }
 0x22e   : > { %5188 = vmatmul.mubr.msk.bf16.gmra.mrb[144].mxu1 %vm2481_vm1, %v6023_v0  ;;  %v6049_v0 = vld [vmem:[%s6221_s30 + $0x76c] ss:$36 sps:$4 sm:$0xff]  }
 0x22f   : > { %3642 = vmatmul.mubr.bf16.gmra.mrb[80].mxu0 %v6022_v4  ;;  %5191 = vmatprep.mubr.msk.bf16.mxu1 %vm2481_vm1, %v6026_v5 }
 0x230   : > { %3649 = vmatprep.mubr.bf16.mxu0 %v6024_v8 }
 0x231   : > { %v6772_v9 = vpop.f32.mrb[40].mxu1 }
 0x232   : > { %v2987_v11 = vpop.f32.mrb[41].mxu1 }
 0x233   : > { %v6775_v14 = vpop.f32.mrb[42].mxu1  ;;  %v6052_v11 = vld [vmem:[%s6221_s30 + $0x768] ss:$36 sps:$4 sm:$0xff]  }
 0x234   : > { %v2990_v18 = vpop.f32.mrb[43].mxu1 }
 0x236   : > { %5192 = vmatmul.mubr.msk.bf16.gmra.mrb[148].mxu1 %vm2481_vm1, %v6028_v13  ;;  %v6056_v13 = vld [vmem:[%s6221_s30 + $0x650] ss:$36 sps:$4 sm:$0xff]  }
 0x237   : > { %3650 = vmatmul.mubr.bf16.gmra.mrb[84].mxu0 %v6027_v16  ;;  %5195 = vmatprep.mubr.msk.bf16.mxu1 %vm2481_vm1, %v6031_v17  ;;  %v6054_v17 = vld [vmem:[%s6221_s30 + $0x7b4] ss:$36 sps:$4 sm:$0xff]  }
 0x238   : > { %3657 = vmatprep.mubr.bf16.mxu0 %v6029_v19 }
 0x239   : > { %v6782_v21 = vpop.f32.mrb[44].mxu1 }
 0x23a   : > { %v2995_v22 = vpop.f32.mrb[45].mxu1 }
 0x23b   : > { %v6785_v25 = vpop.f32.mrb[46].mxu1 }
 0x23c   : > { %v2998_v29 = vpop.f32.mrb[47].mxu1 }
 0x23e   : > { %5196 = vmatmul.mubr.msk.bf16.gmra.mrb[152].mxu1 %vm2481_vm1, %v6033_v24  ;;  %v6058_v24 = vld [vmem:[%s6221_s30 + $0x698] ss:$36 sps:$4 sm:$0xff]  }
 0x23f   : > { %3658 = vmatmul.mubr.bf16.gmra.mrb[88].mxu0 %v6032_v26  ;;  %5199 = vmatprep.mubr.msk.bf16.mxu1 %vm2481_vm1, %v6036_v27 }
 0x240   : > { %3665 = vmatprep.mubr.bf16.mxu0 %v6034_v30  ;;  %v6057_v30 = vld [vmem:[%s6221_s30 + $0x7b0] ss:$36 sps:$4 sm:$0xff]  }
 0x241   : > { %v6792_v32 = vpop.f32.mrb[48].mxu1 }
 0x242   : > { %v3003_v33 = vpop.f32.mrb[49].mxu1 }
 0x243   : > { %v6795_v34 = vpop.f32.mrb[50].mxu1  ;;  %v6061_v33 = vld [vmem:[%s6221_s30 + $0x6e0] ss:$36 sps:$4 sm:$0xff]  }
 0x244   : > { %v3006_v39 = vpop.f32.mrb[51].mxu1 }
 0x246   : > { %5200 = vmatmul.mubr.msk.bf16.gmra.mrb[156].mxu1 %vm2481_vm1, %v6038_v1 }
 0x247   : > { %3666 = vmatmul.mubr.bf16.gmra.mrb[92].mxu0 %v6037_v36  ;;  %5203 = vmatprep.mubr.msk.bf16.mxu1 %vm2481_vm1, %v6041_v37  ;;  %v6059_v37 = vld [vmem:[%s6221_s30 + $0x7fc] ss:$36 sps:$4 sm:$0xff]  }
 0x248   : > { %3673 = vmatprep.mubr.bf16.mxu0 %v6039_v40 }
 0x249   : > { %v6802_v41 = vpop.f32.mrb[52].mxu1 }
 0x24a   : > { %v3011_v42 = vpop.f32.mrb[53].mxu1 }
 0x24b   : > { %v6805_v44 = vpop.f32.mrb[54].mxu1 }
 0x24c   : > { %v3014_v48 = vpop.f32.mrb[55].mxu1 }
 0x24e   : > { %5204 = vmatmul.mubr.msk.bf16.gmra.mrb[160].mxu1 %vm2481_vm1, %v6043_v43 }
 0x24f   : > { %3674 = vmatmul.mubr.bf16.gmra.mrb[96].mxu0 %v6042_v46  ;;  %5207 = vmatprep.mubr.msk.bf16.mxu1 %vm2481_vm1, %v6046_v47  ;;  %v6063_v46 = vld [vmem:[%s6221_s30 + $0x728] ss:$36 sps:$4 sm:$0xff]  }
 0x250   : > { %3681 = vmatprep.mubr.bf16.mxu0 %v6044_v49  ;;  %v6062_v49 = vld [vmem:[%s6221_s30 + $0x7f8] ss:$36 sps:$4 sm:$0xff]  }
 0x251   : > { %v6812_v52 = vpop.f32.mrb[56].mxu1 }
 0x252   : > { %v3019_v54 = vpop.f32.mrb[57].mxu1 }
 0x253   : > { %v6815_v57 = vpop.f32.mrb[58].mxu1  ;;  %v6066_v54 = vld [vmem:[%s6221_s30 + $0x770] ss:$36 sps:$4 sm:$0xff]  }
 0x254   : > { %v3022_v63 = vpop.f32.mrb[59].mxu1 }
 0x256   : > { %5208 = vmatmul.mubr.msk.bf16.gmra.mrb[164].mxu1 %vm2481_vm1, %v6048_v56 }
 0x257   : > { %3682 = vmatmul.mubr.bf16.gmra.mrb[100].mxu0 %v6047_v59  ;;  %5211 = vmatprep.mubr.msk.bf16.mxu1 %vm2481_vm1, %v6051_v60  ;;  %v6064_v60 = vld [vmem:[%s6221_s30 + $0x844] ss:$36 sps:$4 sm:$0xff]  }
 0x258   : > { %3689 = vmatprep.mubr.bf16.mxu0 %v6049_v0 }
 0x259   : > { %v6822_v4 = vpop.f32.mrb[60].mxu1 }
 0x25a   : > { %v3027_v5 = vpop.f32.mrb[61].mxu1 }
 0x25b   : > { %v6825_v8 = vpop.f32.mrb[62].mxu1 }
 0x25c   : > { %v3030_v16 = vpop.f32.mrb[63].mxu1 }
 0x25e   : > { %5212 = vmatmul.mubr.msk.bf16.gmra.mrb[168].mxu1 %vm2481_vm1, %v6053_v7 }
 0x25f   : > { %3690 = vmatmul.mubr.bf16.gmra.mrb[104].mxu0 %v6052_v11  ;;  %5215 = vmatprep.mubr.msk.bf16.mxu1 %vm2481_vm1, %v6056_v13  ;;  %v6068_v11 = vld [vmem:[%s6221_s30 + $0x7b8] ss:$36 sps:$4 sm:$0xff]  }
 0x260   : > { %3697 = vmatprep.mubr.bf16.mxu0 %v6054_v17  ;;  %v6067_v17 = vld [vmem:[%s6221_s30 + $0x840] ss:$36 sps:$4 sm:$0xff]  }
 0x261   : > { %v6832_v18 = vpop.f32.mrb[64].mxu1 }
 0x262   : > { %v3483_v19 = vpop.f32.mrb[0].mxu0  ;;  %v3035_v22 = vpop.f32.mrb[65].mxu1 }
 0x263   : > { %v6836_v26 = vadd.f32 %v3483_v19, %v6584_v50  ;;  %v3485_v27 = vpop.f32.mrb[1].mxu0  ;;  %v6838_v29 = vpop.f32.mrb[66].mxu1  ;;  %v6071_v19 = vld [vmem:[%s6221_s30 + $0x800] ss:$36 sps:$4 sm:$0xff]  }
 0x264   : > { %v3486_v1 = vpop.f32.mrb[2].mxu0  ;;  %v3038_v36 = vpop.f32.mrb[67].mxu1  ;;  %v6069_v27 = vld [vmem:[%s6221_s30 + $0x88c] ss:$36 sps:$4 sm:$0xff]  }
 0x265   : > { %v6844_v39 = vadd.f32 %v3486_v1, %v6587_v53  ;;  %v3488_v40 = vpop.f32.mrb[3].mxu0 }
 0x266   : > { %5216 = vmatmul.mubr.msk.bf16.gmra.mrb[172].mxu1 %vm2481_vm1, %v6058_v24 }
 0x267   : > { %3698 = vmatmul.mubr.bf16.gmra.mrb[108].mxu0 %v6057_v30  ;;  %5219 = vmatprep.mubr.msk.bf16.mxu1 %vm2481_vm1, %v6061_v33 }
 0x268   : > { %3705 = vmatprep.mubr.bf16.mxu0 %v6059_v37  ;;  %v6073_v37 = vld [vmem:[%s6221_s30 + $0x848] ss:$36 sps:$4 sm:$0xff]  }
 0x269   : > { %v6848_v50 = vpop.f32.mrb[68].mxu1 }
 0x26a   : > { %v3491_v42 = vpop.f32.mrb[4].mxu0  ;;  %v3043_v43 = vpop.f32.mrb[69].mxu1 }
 0x26b   : > { %v6852_v47 = vadd.f32 %v3491_v42, %v6592_v58  ;;  %v3493_v48 = vpop.f32.mrb[5].mxu0  ;;  %v6854_v53 = vpop.f32.mrb[70].mxu1  ;;  %v6072_v43 = vld [vmem:[%s6221_s30 + $0x888] ss:$36 sps:$4 sm:$0xff]  }
 0x26c   : > { %v3494_v56 = vpop.f32.mrb[6].mxu0  ;;  %v3046_v59 = vpop.f32.mrb[71].mxu1 }
 0x26d   : > { %v6860_v63 = vadd.f32 %v3494_v56, %v6595_v61  ;;  %v3496_v0 = vpop.f32.mrb[7].mxu0 }
 0x26e   : > { %5220 = vmatmul.mubr.msk.bf16.gmra.mrb[176].mxu1 %vm2481_vm1, %v6063_v46  ;;  %v6076_v46 = vld [vmem:[%s6221_s30 + $0x890] ss:$36 sps:$4 sm:$0xff]  }
 0x26f   : > { %3706 = vmatmul.mubr.bf16.gmra.mrb[112].mxu0 %v6062_v49  ;;  %5223 = vmatprep.mubr.msk.bf16.mxu1 %vm2481_vm1, %v6066_v54  ;;  %v6074_v54 = vld [vmem:[%s6221_s30 + $0x8d4] ss:$36 sps:$4 sm:$0xff]  }
 0x270   : > { %3713 = vmatprep.mubr.bf16.mxu0 %v6064_v60 }
 0x271   : > { %v6864_v58 = vpop.f32.mrb[72].mxu1 }
 0x272   : > { %v3499_v5 = vpop.f32.mrb[8].mxu0  ;;  %v3051_v7 = vpop.f32.mrb[73].mxu1 }
 0x273   : > { %v6868_v13 = vadd.f32 %v3499_v5, %v6600_v3  ;;  %v3501_v16 = vpop.f32.mrb[9].mxu0  ;;  %v6870_v61 = vpop.f32.mrb[74].mxu1  ;;  %v6078_v5 = vld [vmem:[%s6221_s30 + $0x8d8] ss:$36 sps:$4 sm:$0xff]  }
 0x274   : > { %v3502_v22 = vpop.f32.mrb[10].mxu0  ;;  %v3054_v24 = vpop.f32.mrb[75].mxu1 }
 0x275   : > { %v6876_v30 = vadd.f32 %v3502_v22, %v6603_v6  ;;  %v3504_v33 = vpop.f32.mrb[11].mxu0 }
 0x276   : > { %5224 = vmatmul.mubr.msk.bf16.gmra.mrb[180].mxu1 %vm2481_vm1, %v6068_v11 }
 0x277   : > { %3714 = vmatmul.mubr.bf16.gmra.mrb[116].mxu0 %v6067_v17  ;;  %5227 = vmatprep.mubr.msk.bf16.mxu1 %vm2481_vm1, %v6071_v19 }
 0x278   : > { %3721 = vmatprep.mubr.bf16.mxu0 %v6069_v27 }
 0x279   : > { %v6880_v3 = vpop.f32.mrb[76].mxu1 }
 0x27a   : > { %v3507_v1 = vpop.f32.mrb[12].mxu0  ;;  %v3059_v36 = vpop.f32.mrb[77].mxu1 }
 0x27b   : > { %v6884_v40 = vadd.f32 %v3507_v1, %v6608_v12  ;;  %v3509_v42 = vpop.f32.mrb[13].mxu0  ;;  %v6886_v6 = vpop.f32.mrb[78].mxu1 }
 0x27c   : > { %v3510_v48 = vpop.f32.mrb[14].mxu0  ;;  %v3062_v49 = vpop.f32.mrb[79].mxu1 }
 0x27d   : > { %v6892_v56 = vadd.f32 %v3510_v48, %v6611_v15  ;;  %v3512_v59 = vpop.f32.mrb[15].mxu0  ;;  %v6077_v15 = vld [vmem:[%s6221_s30 + $0x8d0] ss:$36 sps:$4 sm:$0xff]  }
 0x27e   : > { %5228 = vmatmul.mubr.msk.bf16.gmra.mrb[184].mxu1 %vm2481_vm1, %v6073_v37 }
 0x27f   : > { %3722 = vmatmul.mubr.bf16.gmra.mrb[120].mxu0 %v6072_v43  ;;  %5231 = vmatprep.mubr.msk.bf16.mxu1 %vm2481_vm1, %v6076_v46 }
 0x280   : > { %3729 = vmatprep.mubr.bf16.mxu0 %v6074_v54 }
 0x281   : > { %v6896_v12 = vpop.f32.mrb[80].mxu1 }
 0x282   : > { %v3515_v60 = vpop.f32.mrb[16].mxu0  ;;  %v3067_v0 = vpop.f32.mrb[81].mxu1 }
 0x283   : > { %v6900_v7 = vadd.f32 %v3515_v60, %v6616_v20  ;;  %v3517_v11 = vpop.f32.mrb[17].mxu0  ;;  %v6902_v16 = vpop.f32.mrb[82].mxu1 }
 0x284   : > { %v3518_v17 = vpop.f32.mrb[18].mxu0  ;;  %v3070_v19 = vpop.f32.mrb[83].mxu1 }
 0x285   : > { %v6906_v22 = vadd.f32 %v3518_v17, %v6619_v23  ;;  %v3520_v24 = vpop.f32.mrb[19].mxu0 }
 0x286   : > { %5232 = vmatmul.mubr.msk.bf16.gmra.mrb[188].mxu1 %vm2481_vm1, %v6078_v5 }
 0x287   : > { %3730 = vmatmul.mubr.bf16.gmra.mrb[124].mxu0 %v6077_v15 }
 0x289   : > { %v6909_v27 = vpop.f32.mrb[84].mxu1 }
 0x28a   : > { %v3523_v33 = vpop.f32.mrb[20].mxu0  ;;  %v3075_v1 = vpop.f32.mrb[85].mxu1 }
 0x28b   : > { %v6912_v20 = vadd.f32 %v3523_v33, %v6624_v28  ;;  %v3525_v36 = vpop.f32.mrb[21].mxu0  ;;  %v6914_v37 = vpop.f32.mrb[86].mxu1 }
 0x28c   : > { %v3526_v42 = vpop.f32.mrb[22].mxu0  ;;  %v3078_v43 = vpop.f32.mrb[87].mxu1 }
 0x28d   : > { %v6917_v46 = vadd.f32 %v3526_v42, %v6627_v31  ;;  %v3528_v23 = vpop.f32.mrb[23].mxu0 }
 0x291   : > { %v6919_v48 = vpop.f32.mrb[88].mxu1 }
 0x292   : > { %v3531_v49 = vpop.f32.mrb[24].mxu0  ;;  %v3083_v54 = vpop.f32.mrb[89].mxu1 }
 0x293   : > { %v6922_v59 = vadd.f32 %v3531_v49, %v6633_v35  ;;  %v3533_v60 = vpop.f32.mrb[25].mxu0  ;;  %v6924_v0 = vpop.f32.mrb[90].mxu1 }
 0x294   : > { %v3534_v28 = vpop.f32.mrb[26].mxu0  ;;  %v3086_v5 = vpop.f32.mrb[91].mxu1 }
 0x295   : > { %v6927_v11 = vadd.f32 %v3534_v28, %v6636_v38  ;;  %v3536_v15 = vpop.f32.mrb[27].mxu0 }
 0x299   : > { %v6929_v17 = vpop.f32.mrb[92].mxu1 }
 0x29a   : > { %v3539_v31 = vpop.f32.mrb[28].mxu0  ;;  %v3091_v19 = vpop.f32.mrb[93].mxu1 }
 0x29b   : > { %v6932_v24 = vadd.f32 %v3539_v31, %v6641_v10  ;;  %v3541_v33 = vpop.f32.mrb[29].mxu0  ;;  %v6934_v1 = vpop.f32.mrb[94].mxu1 }
 0x29c   : > { %v3542_v35 = vpop.f32.mrb[30].mxu0  ;;  %v3094_v36 = vpop.f32.mrb[95].mxu1 }
 0x29d   : > { %v6937_v42 = vadd.f32 %v3542_v35, %v6644_v45  ;;  %v3544_v43 = vpop.f32.mrb[31].mxu0 }
 0x2a1   : > { %v6939_v23 = vpop.f32.mrb[96].mxu1 }
 0x2a2   : > { %v3547_v38 = vpop.f32.mrb[32].mxu0  ;;  %v3099_v49 = vpop.f32.mrb[97].mxu1 }
 0x2a3   : > { %v6942_v54 = vadd.f32 %v3547_v38, %v6752_v51  ;;  %v3549_v60 = vpop.f32.mrb[33].mxu0  ;;  %v6944_v28 = vpop.f32.mrb[98].mxu1 }
 0x2a4   : > { %7439 = vst [vmem:[#allocation2_spill] sm:$0xff] %v6944_v28  ;;  %v3550_v10 = vpop.f32.mrb[34].mxu0  ;;  %v3102_v5 = vpop.f32.mrb[99].mxu1 }
 0x2a5   : > { %v6947_v15 = vadd.f32 %v3550_v10, %v6755_v55  ;;  %v3552_v31 = vpop.f32.mrb[35].mxu0 }
 0x2a9   : > { %v6949_v19 = vpop.f32.mrb[100].mxu1 }
 0x2aa   : > { %7440 = vst [vmem:[#allocation3_spill] sm:$0xff] %v6949_v19  ;;  %v3555_v45 = vpop.f32.mrb[36].mxu0  ;;  %v3107_v33 = vpop.f32.mrb[101].mxu1 }
 0x2ab   : > { %v6952_v35 = vadd.f32 %v3555_v45, %v6762_v62  ;;  %v3557_v36 = vpop.f32.mrb[37].mxu0  ;;  %v6954_v43 = vpop.f32.mrb[102].mxu1 }
 0x2ac   : > { %7441 = vst [vmem:[#allocation4_spill] sm:$0xff] %v6954_v43  ;;  %v3558_v51 = vpop.f32.mrb[38].mxu0  ;;  %v3110_v38 = vpop.f32.mrb[103].mxu1 }
 0x2ad   : > { %v6957_v49 = vadd.f32 %v3558_v51, %v6765_v2  ;;  %v3560_v60 = vpop.f32.mrb[39].mxu0 }
 0x2b1   : > { %v6959_v5 = vpop.f32.mrb[104].mxu1 }
 0x2b2   : > { %7442 = vst [vmem:[#allocation5_spill] sm:$0xff] %v6959_v5  ;;  %v3563_v55 = vpop.f32.mrb[40].mxu0  ;;  %v3115_v10 = vpop.f32.mrb[105].mxu1 }
 0x2b3   : > { %v6962_v31 = vadd.f32 %v3563_v55, %v6772_v9  ;;  %v3565_v33 = vpop.f32.mrb[41].mxu0  ;;  %v6964_v19 = vpop.f32.mrb[106].mxu1 }
 0x2b4   : > { %7443 = vst [vmem:[#allocation6_spill] sm:$0xff] %v6964_v19  ;;  %v3566_v62 = vpop.f32.mrb[42].mxu0  ;;  %v3118_v45 = vpop.f32.mrb[107].mxu1 }
 0x2b5   : > { %v6967_v36 = vadd.f32 %v3566_v62, %v6775_v14  ;;  %v3568_v38 = vpop.f32.mrb[43].mxu0 }
 0x2b9   : > { %v6969_v43 = vpop.f32.mrb[108].mxu1 }
 0x2ba   : > { %7444 = vst [vmem:[#allocation7_spill] sm:$0xff] %v6969_v43  ;;  %v3571_v2 = vpop.f32.mrb[44].mxu0  ;;  %v3123_v51 = vpop.f32.mrb[109].mxu1 }
 0x2bb   : > { %v6972_v60 = vadd.f32 %v3571_v2, %v6782_v21  ;;  %v3573_v10 = vpop.f32.mrb[45].mxu0  ;;  %v6974_v5 = vpop.f32.mrb[110].mxu1 }
 0x2bc   : > { %7445 = vst [vmem:[#allocation8_spill] sm:$0xff] %v6974_v5  ;;  %v3574_v9 = vpop.f32.mrb[46].mxu0  ;;  %v3126_v55 = vpop.f32.mrb[111].mxu1 }
 0x2bd   : > { %v6977_v33 = vadd.f32 %v3574_v9, %v6785_v25  ;;  %v3576_v45 = vpop.f32.mrb[47].mxu0 }
 0x2c1   : > { %v6979_v19 = vpop.f32.mrb[112].mxu1 }
 0x2c2   : > { %7446 = vst [vmem:[#allocation9_spill] sm:$0xff] %v6979_v19  ;;  %v3579_v14 = vpop.f32.mrb[48].mxu0  ;;  %v3131_v62 = vpop.f32.mrb[113].mxu1 }
 0x2c3   : > { %v6982_v38 = vadd.f32 %v3579_v14, %v6792_v32  ;;  %v3581_v51 = vpop.f32.mrb[49].mxu0  ;;  %v6984_v43 = vpop.f32.mrb[114].mxu1 }
 0x2c4   : > { %7447 = vst [vmem:[#allocation10_spill] sm:$0xff] %v6984_v43  ;;  %v3582_v21 = vpop.f32.mrb[50].mxu0  ;;  %v3134_v2 = vpop.f32.mrb[115].mxu1 }
 0x2c5   : > { %v6987_v10 = vadd.f32 %v3582_v21, %v6795_v34  ;;  %v3584_v55 = vpop.f32.mrb[51].mxu0 }
 0x2c9   : > { %v6989_v5 = vpop.f32.mrb[116].mxu1 }
 0x2ca   : > { %7448 = vst [vmem:[#allocation11_spill] sm:$0xff] %v6989_v5  ;;  %v3587_v25 = vpop.f32.mrb[52].mxu0  ;;  %v3139_v9 = vpop.f32.mrb[117].mxu1 }
 0x2cb   : > { %v6992_v45 = vadd.f32 %v3587_v25, %v6802_v41  ;;  %v3589_v62 = vpop.f32.mrb[53].mxu0  ;;  %v6994_v19 = vpop.f32.mrb[118].mxu1 }
 0x2cc   : > { %7449 = vst [vmem:[#allocation12_spill] sm:$0xff] %v6994_v19  ;;  %v3590_v32 = vpop.f32.mrb[54].mxu0  ;;  %v3142_v14 = vpop.f32.mrb[119].mxu1 }
 0x2cd   : > { %v6997_v51 = vadd.f32 %v3590_v32, %v6805_v44  ;;  %v3592_v2 = vpop.f32.mrb[55].mxu0 }
 0x2d1   : > { %v6999_v43 = vpop.f32.mrb[120].mxu1 }
 0x2d2   : > { %7450 = vst [vmem:[#allocation13_spill] sm:$0xff] %v6999_v43  ;;  %v3595_v34 = vpop.f32.mrb[56].mxu0  ;;  %v3147_v21 = vpop.f32.mrb[121].mxu1 }
 0x2d3   : > { %v7002_v55 = vadd.f32 %v3595_v34, %v6812_v52  ;;  %v3597_v9 = vpop.f32.mrb[57].mxu0  ;;  %v7004_v5 = vpop.f32.mrb[122].mxu1 }
 0x2d4   : > { %7451 = vst [vmem:[#allocation14_spill] sm:$0xff] %v7004_v5  ;;  %v3598_v41 = vpop.f32.mrb[58].mxu0  ;;  %v3150_v25 = vpop.f32.mrb[123].mxu1 }
 0x2d5   : > { %v7007_v62 = vadd.f32 %v3598_v41, %v6815_v57  ;;  %v3600_v14 = vpop.f32.mrb[59].mxu0  ;;  %v7022_v57 = vld [vmem:[%s7436_s2] ss:$0 sm:$0xff] }
 0x2d9   : > { %v7009_v19 = vpop.f32.mrb[124].mxu1 }
 0x2da   : > { %7452 = vst [vmem:[#allocation15_spill] sm:$0xff] %v7009_v19  ;;  %v3603_v44 = vpop.f32.mrb[60].mxu0  ;;  %v3155_v32 = vpop.f32.mrb[125].mxu1 }
 0x2db   : > { %v7012_v2 = vadd.f32 %v3603_v44, %v6822_v4  ;;  %v3605_v21 = vpop.f32.mrb[61].mxu0  ;;  %v7014_v43 = vpop.f32.mrb[126].mxu1 }
 0x2dc   : > { %7453 = vst [vmem:[#allocation16_spill] sm:$0xff] %v7014_v43  ;;  %v3606_v52 = vpop.f32.mrb[62].mxu0  ;;  %v3158_v34 = vpop.f32.mrb[127].mxu1 }
 0x2dd   : > { %v7017_v9 = vadd.f32 %v3606_v52, %v6825_v8  ;;  %v3608_v25 = vpop.f32.mrb[63].mxu0  ;;  %v7031_v8 = vld [vmem:[%s7437_s3] ss:$0 sm:$0xff] }
 0x2e1   : > { %v5173_v5 = vpop.f32.mrb[128].mxu1 }
 0x2e2   : > { %v3611_v41 = vpop.f32.mrb[64].mxu0  ;;  %v3781_v4 = vadd.f32 %v6852_v47, %v5173_v5  ;;  %v3772_v14 = vpop.f32.mrb[129].mxu1 }
 0x2e3   : > { %v7026_v44 = vadd.f32 %v3611_v41, %v6832_v18  ;;  %v3613_v32 = vpop.f32.mrb[65].mxu0  ;;  %v3773_v21 = vadd.f32 %v6836_v26, %v3772_v14  ;;  %v5174_v52 = vpop.f32.mrb[130].mxu1 }
 0x2e4   : > { %v4036_v34 = vmul.f32 %v7022_v57, %v3781_v4  ;;  %v3614_v25 = vpop.f32.mrb[66].mxu0  ;;  %v3784_v43 = vadd.f32 %v6860_v63, %v5174_v52  ;;  %v3775_v19 = vpop.f32.mrb[131].mxu1 }
 0x2e5   : > { %v4034_v47 = vmul.f32 %v7022_v57, %v3773_v21  ;;  %v7038_v18 = vadd.f32 %v3614_v25, %v6838_v29  ;;  %v3616_v5 = vpop.f32.mrb[67].mxu0  ;;  %v3776_v41 = vadd.f32 %v6844_v39, %v3775_v19 }
 0x2e6   : > { %v4107_v32 = vadd.f32 %v7031_v8, %v4036_v34  ;;  %v4037_v26 = vmul.f32 %v7022_v57, %v3784_v43 }
 0x2e7   : > { %v4105_v14 = vadd.f32 %v7031_v8, %v4034_v47  ;;  %v4035_v4 = vmul.f32 %v7022_v57, %v3776_v41 }
 0x2e8   : > { %v4171_v28 = vmax.f32 %v4107_v32, 0.0  ;;  %v4108_v63 = vadd.f32 %v7031_v8, %v4037_v26 }
 0x2e9   : > { %v4169_v29 = vmax.f32 %v4105_v14, 0.0  ;;  %v4106_v39 = vadd.f32 %v7031_v8, %v4035_v4  ;;  %v5177_v19 = vpop.f32.mrb[132].mxu1 }
 0x2ea   : > { %v5074_v21 = vpack.c.bf16 %v4171_v28, %v4171_v28  ;;  %v4172_v43 = vmax.f32 %v4108_v63, 0.0  ;;  %v3619_v52 = vpop.f32.mrb[68].mxu0  ;;  %v3797_v34 = vadd.f32 %v6884_v40, %v5177_v19  ;;  %v3788_v25 = vpop.f32.mrb[133].mxu1 }
 0x2eb   : > { %v5072_v47 = vpack.c.bf16 %v4169_v29, %v4169_v29  ;;  %v4170_v5 = vmax.f32 %v4106_v39, 0.0  ;;  %v7055_v41 = vadd.f32 %v3619_v52, %v6848_v50  ;;  %v3621_v32 = vpop.f32.mrb[69].mxu0  ;;  %v3789_v26 = vadd.f32 %v6868_v13, %v3788_v25  ;;  %v5178_v14 = vpop.f32.mrb[134].mxu1 }
 0x2ec   : > { %4492 = vst.msk [vmem:[%s7050_s16 + $0x8] sm:$0xf] %vm4489_vm2, %v5074_v21  ;;  %v5075_v28 = vpack.c.bf16 %v4172_v43, %v4172_v43  ;;  %v4040_v4 = vmul.f32 %v7022_v57, %v3797_v34  ;;  %v3622_v63 = vpop.f32.mrb[70].mxu0  ;;  %v3800_v40 = vadd.f32 %v6892_v56, %v5178_v14  ;;  %v3791_v19 = vpop.f32.mrb[135].mxu1 }
 0x2ed   : > { %4490 = vst.msk [vmem:[%s7050_s16] sm:$0xf] %vm4489_vm2, %v5072_v47  ;;  %v5073_v29 = vpack.c.bf16 %v4170_v5, %v4170_v5  ;;  %v4038_v50 = vmul.f32 %v7022_v57, %v3789_v26  ;;  %v7066_v39 = vadd.f32 %v3622_v63, %v6854_v53  ;;  %v3624_v13 = vpop.f32.mrb[71].mxu0  ;;  %v3792_v52 = vadd.f32 %v6876_v30, %v3791_v19 }
 0x2ee   : > { %4493 = vst.msk [vmem:[%s7050_s16 + $0xc] sm:$0xf] %vm4489_vm2, %v5075_v28  ;;  %v4111_v21 = vadd.f32 %v7031_v8, %v4040_v4  ;;  %v4041_v43 = vmul.f32 %v7022_v57, %v3800_v40 }
 0x2ef   : > { %4491 = vst.msk [vmem:[%s7050_s16 + $0x4] sm:$0xf] %vm4489_vm2, %v5073_v29  ;;  %v4109_v56 = vadd.f32 %v7031_v8, %v4038_v50  ;;  %v4039_v34 = vmul.f32 %v7022_v57, %v3792_v52 }
 0x2f0   : > { %v4175_v25 = vmax.f32 %v4111_v21, 0.0  ;;  %v4112_v53 = vadd.f32 %v7031_v8, %v4041_v43 }
 0x2f1   : > { %v4173_v47 = vmax.f32 %v4109_v56, 0.0  ;;  %v4110_v5 = vadd.f32 %v7031_v8, %v4039_v34  ;;  %v5181_v30 = vpop.f32.mrb[136].mxu1 }
 0x2f2   : > { %v5078_v32 = vpack.c.bf16 %v4175_v25, %v4175_v25  ;;  %v4176_v26 = vmax.f32 %v4112_v53, 0.0  ;;  %v3627_v14 = vpop.f32.mrb[72].mxu0  ;;  %v3813_v28 = vadd.f32 %v6912_v20, %v5181_v30  ;;  %v3804_v4 = vpop.f32.mrb[137].mxu1 }
 0x2f3   : > { %v5076_v63 = vpack.c.bf16 %v4173_v47, %v4173_v47  ;;  %v4174_v40 = vmax.f32 %v4110_v5, 0.0  ;;  %v7081_v19 = vadd.f32 %v3627_v14, %v6864_v58  ;;  %v3629_v29 = vpop.f32.mrb[73].mxu0  ;;  %v3805_v50 = vadd.f32 %v6900_v7, %v3804_v4  ;;  %v5182_v13 = vpop.f32.mrb[138].mxu1 }
 0x2f4   : > { %4496 = vst.msk [vmem:[%s7050_s16 + $0x18] sm:$0xf] %vm4489_vm2, %v5078_v32  ;;  %v5079_v52 = vpack.c.bf16 %v4176_v26, %v4176_v26  ;;  %v4044_v21 = vmul.f32 %v7022_v57, %v3813_v28  ;;  %v3630_v43 = vpop.f32.mrb[74].mxu0  ;;  %v3816_v20 = vadd.f32 %v6917_v46, %v5182_v13  ;;  %v3807_v56 = vpop.f32.mrb[139].mxu1 }
 0x2f5   : > { %4494 = vst.msk [vmem:[%s7050_s16 + $0x10] sm:$0xf] %vm4489_vm2, %v5076_v63  ;;  %v5077_v34 = vpack.c.bf16 %v4174_v40, %v4174_v40  ;;  %v4042_v58 = vmul.f32 %v7022_v57, %v3805_v50  ;;  %v7092_v25 = vadd.f32 %v3630_v43, %v6870_v61  ;;  %v3632_v7 = vpop.f32.mrb[75].mxu0  ;;  %v3808_v53 = vadd.f32 %v6906_v22, %v3807_v56 }
 0x2f6   : > { %4497 = vst.msk [vmem:[%s7050_s16 + $0x1c] sm:$0xf] %vm4489_vm2, %v5079_v52  ;;  %v4115_v47 = vadd.f32 %v7031_v8, %v4044_v21  ;;  %v4045_v5 = vmul.f32 %v7022_v57, %v3816_v20 }
 0x2f7   : > { %4495 = vst.msk [vmem:[%s7050_s16 + $0x14] sm:$0xf] %vm4489_vm2, %v5077_v34  ;;  %v4113_v46 = vadd.f32 %v7031_v8, %v4042_v58  ;;  %v4043_v30 = vmul.f32 %v7022_v57, %v3808_v53 }
 0x2f8   : > { %v4179_v32 = vmax.f32 %v4115_v47, 0.0  ;;  %v4116_v61 = vadd.f32 %v7031_v8, %v4045_v5 }
 0x2f9   : > { %v4177_v26 = vmax.f32 %v4113_v46, 0.0  ;;  %v4114_v14 = vadd.f32 %v7031_v8, %v4043_v30  ;;  %v5185_v22 = vpop.f32.mrb[140].mxu1 }
 0x2fa   : > { %v5082_v28 = vpack.c.bf16 %v4179_v32, %v4179_v32  ;;  %v4180_v4 = vmax.f32 %v4116_v61, 0.0  ;;  %v3635_v63 = vpop.f32.mrb[76].mxu0  ;;  %v3829_v40 = vadd.f32 %v6932_v24, %v5185_v22  ;;  %v3820_v29 = vpop.f32.mrb[141].mxu1 }
 0x2fb   : > { %v5080_v50 = vpack.c.bf16 %v4177_v26, %v4177_v26  ;;  %v4178_v13 = vmax.f32 %v4114_v14, 0.0  ;;  %v7107_v52 = vadd.f32 %v3635_v63, %v6880_v3  ;;  %v3637_v21 = vpop.f32.mrb[77].mxu0  ;;  %v3821_v43 = vadd.f32 %v6922_v59, %v3820_v29  ;;  %v5186_v20 = vpop.f32.mrb[142].mxu1 }
 0x2fc   : > { %4500 = vst.msk [vmem:[%s7050_s16 + $0x28] sm:$0xf] %vm4489_vm2, %v5082_v28  ;;  %v5083_v56 = vpack.c.bf16 %v4180_v4, %v4180_v4  ;;  %v4048_v34 = vmul.f32 %v7022_v57, %v3829_v40  ;;  %v3638_v58 = vpop.f32.mrb[78].mxu0  ;;  %v3832_v24 = vadd.f32 %v6937_v42, %v5186_v20  ;;  %v3823_v7 = vpop.f32.mrb[143].mxu1 }
 0x2fd   : > { %4498 = vst.msk [vmem:[%s7050_s16 + $0x20] sm:$0xf] %vm4489_vm2, %v5080_v50  ;;  %v5081_v53 = vpack.c.bf16 %v4178_v13, %v4178_v13  ;;  %v4046_v3 = vmul.f32 %v7022_v57, %v3821_v43  ;;  %v7118_v47 = vadd.f32 %v3638_v58, %v6886_v6  ;;  %v3640_v59 = vpop.f32.mrb[79].mxu0  ;;  %v3824_v5 = vadd.f32 %v6927_v11, %v3823_v7 }
 0x2fe   : > { %4501 = vst.msk [vmem:[%s7050_s16 + $0x2c] sm:$0xf] %vm4489_vm2, %v5083_v56  ;;  %v4119_v46 = vadd.f32 %v7031_v8, %v4048_v34  ;;  %v4049_v30 = vmul.f32 %v7022_v57, %v3832_v24 }
 0x2ff   : > { %4499 = vst.msk [vmem:[%s7050_s16 + $0x24] sm:$0xf] %vm4489_vm2, %v5081_v53  ;;  %v4117_v42 = vadd.f32 %v7031_v8, %v4046_v3  ;;  %v4047_v32 = vmul.f32 %v7022_v57, %v3824_v5 }
 0x300   : > { %v4183_v61 = vmax.f32 %v4119_v46, 0.0  ;;  %v4120_v6 = vadd.f32 %v7031_v8, %v4049_v30 }
 0x301   : > { %v4181_v26 = vmax.f32 %v4117_v42, 0.0  ;;  %v4118_v14 = vadd.f32 %v7031_v8, %v4047_v32  ;;  %v5189_v11 = vpop.f32.mrb[144].mxu1 }
 0x302   : > { %v5086_v22 = vpack.c.bf16 %v4183_v61, %v4183_v61  ;;  %v4184_v28 = vmax.f32 %v4120_v6, 0.0  ;;  %v3643_v4 = vpop.f32.mrb[80].mxu0  ;;  %v3845_v63 = vadd.f32 %v6952_v35, %v5189_v11  ;;  %v3836_v40 = vpop.f32.mrb[145].mxu1 }
 0x303   : > { %v5084_v29 = vpack.c.bf16 %v4181_v26, %v4181_v26  ;;  %v4182_v50 = vmax.f32 %v4118_v14, 0.0  ;;  %v7133_v13 = vadd.f32 %v3643_v4, %v6896_v12  ;;  %v3645_v21 = vpop.f32.mrb[81].mxu0  ;;  %v3837_v43 = vadd.f32 %v6942_v54, %v3836_v40  ;;  %v5190_v20 = vpop.f32.mrb[146].mxu1 }
 0x304   : > { %4504 = vst.msk [vmem:[%s7050_s16 + $0x38] sm:$0xf] %vm4489_vm2, %v5086_v22  ;;  %v5087_v56 = vpack.c.bf16 %v4184_v28, %v4184_v28  ;;  %v4052_v34 = vmul.f32 %v7022_v57, %v3845_v63  ;;  %v3646_v58 = vpop.f32.mrb[82].mxu0  ;;  %v3848_v35 = vadd.f32 %v6957_v49, %v5190_v20  ;;  %v3839_v24 = vpop.f32.mrb[147].mxu1 }
 0x305   : > { %4502 = vst.msk [vmem:[%s7050_s16 + $0x30] sm:$0xf] %vm4489_vm2, %v5084_v29  ;;  %v5085_v7 = vpack.c.bf16 %v4182_v50, %v4182_v50  ;;  %v4050_v12 = vmul.f32 %v7022_v57, %v3837_v43  ;;  %v7144_v53 = vadd.f32 %v3646_v58, %v6902_v16  ;;  %v3648_v54 = vpop.f32.mrb[83].mxu0  ;;  %v3840_v3 = vadd.f32 %v6947_v15, %v3839_v24 }
 0x306   : > { %4505 = vst.msk [vmem:[%s7050_s16 + $0x3c] sm:$0xf] %vm4489_vm2, %v5087_v56  ;;  %v4123_v59 = vadd.f32 %v7031_v8, %v4052_v34  ;;  %v4053_v5 = vmul.f32 %v7022_v57, %v3848_v35 }
 0x307   : > { %4503 = vst.msk [vmem:[%s7050_s16 + $0x34] sm:$0xf] %vm4489_vm2, %v5085_v7  ;;  %v4121_v49 = vadd.f32 %v7031_v8, %v4050_v12  ;;  %v4051_v46 = vmul.f32 %v7022_v57, %v3840_v3 }
 0x308   : > { %v4187_v30 = vmax.f32 %v4123_v59, 0.0  ;;  %v4124_v16 = vadd.f32 %v7031_v8, %v4053_v5 }
 0x309   : > { %v4185_v42 = vmax.f32 %v4121_v49, 0.0  ;;  %v4122_v32 = vadd.f32 %v7031_v8, %v4051_v46  ;;  %v5193_v15 = vpop.f32.mrb[148].mxu1 }
 0x30a   : > { %v5090_v61 = vpack.c.bf16 %v4187_v30, %v4187_v30  ;;  %v4188_v6 = vmax.f32 %v4124_v16, 0.0  ;;  %v3651_v26 = vpop.f32.mrb[84].mxu0  ;;  %v3861_v14 = vadd.f32 %v6972_v60, %v5193_v15  ;;  %v3852_v11 = vpop.f32.mrb[149].mxu1 }
 0x30b   : > { %v5088_v22 = vpack.c.bf16 %v4185_v42, %v4185_v42  ;;  %v4186_v28 = vmax.f32 %v4122_v32, 0.0  ;;  %v7159_v4 = vadd.f32 %v3651_v26, %v6909_v27  ;;  %v3653_v63 = vpop.f32.mrb[85].mxu0  ;;  %v3853_v40 = vadd.f32 %v6962_v31, %v3852_v11  ;;  %v5194_v29 = vpop.f32.mrb[150].mxu1 }
 0x30c   : > { %4508 = vst.msk [vmem:[%s7050_s16 + $0x48] sm:$0xf] %vm4489_vm2, %v5090_v61  ;;  %v5091_v50 = vpack.c.bf16 %v4188_v6, %v4188_v6  ;;  %v4056_v21 = vmul.f32 %v7022_v57, %v3861_v14  ;;  %v3654_v43 = vpop.f32.mrb[86].mxu0  ;;  %v3864_v60 = vadd.f32 %v6977_v33, %v5194_v29  ;;  %v3855_v20 = vpop.f32.mrb[151].mxu1 }
 0x30d   : > { %4506 = vst.msk [vmem:[%s7050_s16 + $0x40] sm:$0xf] %vm4489_vm2, %v5088_v22  ;;  %v5089_v56 = vpack.c.bf16 %v4186_v28, %v4186_v28  ;;  %v4054_v27 = vmul.f32 %v7022_v57, %v3853_v40  ;;  %v7170_v34 = vadd.f32 %v3654_v43, %v6914_v37  ;;  %v3656_v31 = vpop.f32.mrb[87].mxu0  ;;  %v3856_v58 = vadd.f32 %v6967_v36, %v3855_v20 }
 0x30e   : > { %4509 = vst.msk [vmem:[%s7050_s16 + $0x4c] sm:$0xf] %vm4489_vm2, %v5091_v50  ;;  %v4127_v35 = vadd.f32 %v7031_v8, %v4056_v21  ;;  %v4057_v24 = vmul.f32 %v7022_v57, %v3864_v60 }
 0x30f   : > { %4507 = vst.msk [vmem:[%s7050_s16 + $0x44] sm:$0xf] %vm4489_vm2, %v5089_v56  ;;  %v4125_v33 = vadd.f32 %v7031_v8, %v4054_v27  ;;  %v4055_v7 = vmul.f32 %v7022_v57, %v3856_v58 }
 0x310   : > { %v4191_v12 = vmax.f32 %v4127_v35, 0.0  ;;  %v4128_v37 = vadd.f32 %v7031_v8, %v4057_v24 }
 0x311   : > { %v4189_v54 = vmax.f32 %v4125_v33, 0.0  ;;  %v4126_v3 = vadd.f32 %v7031_v8, %v4055_v7  ;;  %v5197_v36 = vpop.f32.mrb[152].mxu1 }
 0x312   : > { %v5094_v59 = vpack.c.bf16 %v4191_v12, %v4191_v12  ;;  %v4192_v5 = vmax.f32 %v4128_v37, 0.0  ;;  %v3659_v49 = vpop.f32.mrb[88].mxu0  ;;  %v3877_v46 = vadd.f32 %v6992_v45, %v5197_v36  ;;  %v3868_v30 = vpop.f32.mrb[153].mxu1 }
 0x313   : > { %v5092_v16 = vpack.c.bf16 %v4189_v54, %v4189_v54  ;;  %v4190_v42 = vmax.f32 %v4126_v3, 0.0  ;;  %v7185_v32 = vadd.f32 %v3659_v49, %v6919_v48  ;;  %v3661_v15 = vpop.f32.mrb[89].mxu0  ;;  %v3869_v61 = vadd.f32 %v6982_v38, %v3868_v30  ;;  %v5198_v6 = vpop.f32.mrb[154].mxu1 }
 0x314   : > { %4512 = vst.msk [vmem:[%s7050_s16 + $0x58] sm:$0xf] %vm4489_vm2, %v5094_v59  ;;  %v5095_v26 = vpack.c.bf16 %v4192_v5, %v4192_v5  ;;  %v4060_v14 = vmul.f32 %v7022_v57, %v3877_v46  ;;  %v3662_v11 = vpop.f32.mrb[90].mxu0  ;;  %v3880_v45 = vadd.f32 %v6997_v51, %v5198_v6  ;;  %v3871_v22 = vpop.f32.mrb[155].mxu1 }
 0x315   : > { %4510 = vst.msk [vmem:[%s7050_s16 + $0x50] sm:$0xf] %vm4489_vm2, %v5092_v16  ;;  %v5093_v28 = vpack.c.bf16 %v4190_v42, %v4190_v42  ;;  %v4058_v48 = vmul.f32 %v7022_v57, %v3869_v61  ;;  %v7196_v63 = vadd.f32 %v3662_v11, %v6924_v0  ;;  %v3664_v38 = vpop.f32.mrb[91].mxu0  ;;  %v3872_v40 = vadd.f32 %v6987_v10, %v3871_v22 }
 0x316   : > { %4513 = vst.msk [vmem:[%s7050_s16 + $0x5c] sm:$0xf] %vm4489_vm2, %v5095_v26  ;;  %v4131_v29 = vadd.f32 %v7031_v8, %v4060_v14  ;;  %v4061_v50 = vmul.f32 %v7022_v57, %v3880_v45 }
 0x317   : > { %4511 = vst.msk [vmem:[%s7050_s16 + $0x54] sm:$0xf] %vm4489_vm2, %v5093_v28  ;;  %v4129_v51 = vadd.f32 %v7031_v8, %v4058_v48  ;;  %v4059_v21 = vmul.f32 %v7022_v57, %v3872_v40 }
 0x318   : > { %v4195_v43 = vmax.f32 %v4131_v29, 0.0  ;;  %v4132_v0 = vadd.f32 %v7031_v8, %v4061_v50 }
 0x319   : > { %v4193_v60 = vmax.f32 %v4129_v51, 0.0  ;;  %v4130_v20 = vadd.f32 %v7031_v8, %v4059_v21  ;;  %v5201_v10 = vpop.f32.mrb[156].mxu1 }
 0x31a   : > { %v5098_v56 = vpack.c.bf16 %v4195_v43, %v4195_v43  ;;  %v4196_v27 = vmax.f32 %v4132_v0, 0.0  ;;  %v3667_v31 = vpop.f32.mrb[92].mxu0  ;;  %v3893_v58 = vadd.f32 %v7012_v2, %v5201_v10  ;;  %v3884_v35 = vpop.f32.mrb[157].mxu1  ;;  %v7454_v10 = vld [vmem:[#allocation2_spill] sm:$0xff] }
 0x31b   : > { %v5096_v24 = vpack.c.bf16 %v4193_v60, %v4193_v60  ;;  %v4194_v33 = vmax.f32 %v4130_v20, 0.0  ;;  %v7211_v7 = vadd.f32 %v3667_v31, %v6929_v17  ;;  %v3669_v12 = vpop.f32.mrb[93].mxu0  ;;  %v3885_v37 = vadd.f32 %v7002_v55, %v3884_v35  ;;  %v5202_v54 = vpop.f32.mrb[158].mxu1 }
 0x31c   : > { %4516 = vst.msk [vmem:[%s7050_s16 + $0x68] sm:$0xf] %vm4489_vm2, %v5098_v56  ;;  %v5099_v3 = vpack.c.bf16 %v4196_v27, %v4196_v27  ;;  %v4064_v36 = vmul.f32 %v7022_v57, %v3893_v58  ;;  %v3670_v59 = vpop.f32.mrb[94].mxu0  ;;  %v3896_v2 = vadd.f32 %v7017_v9, %v5202_v54  ;;  %v3887_v5 = vpop.f32.mrb[159].mxu1 }
 0x31d   : > { %4514 = vst.msk [vmem:[%s7050_s16 + $0x60] sm:$0xf] %vm4489_vm2, %v5096_v24  ;;  %v5097_v49 = vpack.c.bf16 %v4194_v33, %v4194_v33  ;;  %v4062_v17 = vmul.f32 %v7022_v57, %v3885_v37  ;;  %v7222_v46 = vadd.f32 %v3670_v59, %v6934_v1  ;;  %v3672_v55 = vpop.f32.mrb[95].mxu0  ;;  %v3888_v30 = vadd.f32 %v7007_v62, %v3887_v5 }
 0x31e   : > { %4517 = vst.msk [vmem:[%s7050_s16 + $0x6c] sm:$0xf] %vm4489_vm2, %v5099_v3  ;;  %v4135_v16 = vadd.f32 %v7031_v8, %v4064_v36  ;;  %v4065_v42 = vmul.f32 %v7022_v57, %v3896_v2 }
 0x31f   : > { %4515 = vst.msk [vmem:[%s7050_s16 + $0x64] sm:$0xf] %vm4489_vm2, %v5097_v49  ;;  %v4133_v9 = vadd.f32 %v7031_v8, %v4062_v17  ;;  %v4063_v15 = vmul.f32 %v7022_v57, %v3888_v30  ;;  %v7455_v17 = vld [vmem:[#allocation3_spill] sm:$0xff] }
 0x320   : > { %v4199_v61 = vmax.f32 %v4135_v16, 0.0  ;;  %v4136_v1 = vadd.f32 %v7031_v8, %v4065_v42 }
 0x321   : > { %v4197_v6 = vmax.f32 %v4133_v9, 0.0  ;;  %v4134_v26 = vadd.f32 %v7031_v8, %v4063_v15  ;;  %v5205_v62 = vpop.f32.mrb[160].mxu1 }
 0x322   : > { %v5102_v14 = vpack.c.bf16 %v4199_v61, %v4199_v61  ;;  %v4200_v11 = vmax.f32 %v4136_v1, 0.0  ;;  %v3675_v45 = vpop.f32.mrb[96].mxu0  ;;  %v3909_v22 = vadd.f32 %v7055_v41, %v5205_v62  ;;  %v3900_v28 = vpop.f32.mrb[161].mxu1  ;;  %v7456_v62 = vld [vmem:[#allocation4_spill] sm:$0xff] }
 0x323   : > { %v5100_v48 = vpack.c.bf16 %v4197_v6, %v4197_v6  ;;  %v4198_v38 = vmax.f32 %v4134_v26, 0.0  ;;  %v7237_v40 = vadd.f32 %v3675_v45, %v6939_v23  ;;  %v3677_v29 = vpop.f32.mrb[97].mxu0  ;;  %v3901_v50 = vadd.f32 %v7026_v44, %v3900_v28  ;;  %v5206_v51 = vpop.f32.mrb[162].mxu1 }
 0x324   : > { %4520 = vst.msk [vmem:[%s7050_s16 + $0x78] sm:$0xf] %vm4489_vm2, %v5102_v14  ;;  %v5103_v21 = vpack.c.bf16 %v4200_v11, %v4200_v11  ;;  %v4068_v43 = vmul.f32 %v7022_v57, %v3909_v22  ;;  %v3678_v0 = vpop.f32.mrb[98].mxu0  ;;  %v3912_v41 = vadd.f32 %v7066_v39, %v5206_v51  ;;  %v3903_v60 = vpop.f32.mrb[163].mxu1 }
 0x325   : > { %4518 = vst.msk [vmem:[%s7050_s16 + $0x70] sm:$0xf] %vm4489_vm2, %v5100_v48  ;;  %v5101_v20 = vpack.c.bf16 %v4198_v38, %v4198_v38  ;;  %v4066_v23 = vmul.f32 %v7022_v57, %v3901_v50  ;;  %v7248_v56 = vadd.f32 %v3678_v0, %v7454_v10  ;;  %v3680_v44 = vpop.f32.mrb[99].mxu0  ;;  %v3904_v27 = vadd.f32 %v7038_v18, %v3903_v60 }
 0x326   : > { %4521 = vst.msk [vmem:[%s7050_s16 + $0x7c] sm:$0xf] %vm4489_vm2, %v5103_v21  ;;  %v4139_v31 = vadd.f32 %v7031_v8, %v4068_v43  ;;  %v4069_v58 = vmul.f32 %v7022_v57, %v3912_v41 }
 0x327   : > { %4519 = vst.msk [vmem:[%s7050_s16 + $0x74] sm:$0xf] %vm4489_vm2, %v5101_v20  ;;  %v4137_v39 = vadd.f32 %v7031_v8, %v4066_v23  ;;  %v4067_v35 = vmul.f32 %v7022_v57, %v3904_v27  ;;  %v7457_v23 = vld [vmem:[#allocation5_spill] sm:$0xff] }
 0x328   : > { %v4203_v24 = vmax.f32 %v4139_v31, 0.0  ;;  %v4140_v33 = vadd.f32 %v7031_v8, %v4069_v58 }
 0x329   : > { %v4201_v12 = vmax.f32 %v4137_v39, 0.0  ;;  %v4138_v37 = vadd.f32 %v7031_v8, %v4067_v35  ;;  %v5209_v18 = vpop.f32.mrb[164].mxu1 }
 0x32a   : > { %v5106_v54 = vpack.c.bf16 %v4203_v24, %v4203_v24  ;;  %v4204_v3 = vmax.f32 %v4140_v33, 0.0  ;;  %v3683_v36 = vpop.f32.mrb[100].mxu0  ;;  %v3925_v59 = vadd.f32 %v7107_v52, %v5209_v18  ;;  %v3916_v2 = vpop.f32.mrb[165].mxu1 }
 0x32b   : > { %v5104_v5 = vpack.c.bf16 %v4201_v12, %v4201_v12  ;;  %v4202_v49 = vmax.f32 %v4138_v37, 0.0  ;;  %v7263_v55 = vadd.f32 %v3683_v36, %v7455_v17  ;;  %v3685_v30 = vpop.f32.mrb[101].mxu0  ;;  %v3917_v16 = vadd.f32 %v7081_v19, %v3916_v2  ;;  %v5210_v42 = vpop.f32.mrb[166].mxu1  ;;  %v7458_v37 = vld [vmem:[#allocation6_spill] sm:$0xff] }
 0x32c   : > { %4524 = vst.msk [vmem:[%s7050_s16 + $0x88] sm:$0xf] %vm4489_vm2, %v5106_v54  ;;  %v5107_v9 = vpack.c.bf16 %v4204_v3, %v4204_v3  ;;  %v4072_v15 = vmul.f32 %v7022_v57, %v3925_v59  ;;  %v3686_v61 = vpop.f32.mrb[102].mxu0  ;;  %v3928_v52 = vadd.f32 %v7118_v47, %v5210_v42  ;;  %v3919_v1 = vpop.f32.mrb[167].mxu1 }
 0x32d   : > { %4522 = vst.msk [vmem:[%s7050_s16 + $0x80] sm:$0xf] %vm4489_vm2, %v5104_v5  ;;  %v5105_v6 = vpack.c.bf16 %v4202_v49, %v4202_v49  ;;  %v4070_v26 = vmul.f32 %v7022_v57, %v3917_v16  ;;  %v7274_v14 = vadd.f32 %v3686_v61, %v7456_v62  ;;  %v3688_v19 = vpop.f32.mrb[103].mxu0  ;;  %v3920_v11 = vadd.f32 %v7092_v25, %v3919_v1  ;;  %v7459_v1 = vld [vmem:[#allocation7_spill] sm:$0xff] }
 0x32e   : > { %4525 = vst.msk [vmem:[%s7050_s16 + $0x8c] sm:$0xf] %vm4489_vm2, %v5107_v9  ;;  %v4143_v45 = vadd.f32 %v7031_v8, %v4072_v15  ;;  %v4073_v22 = vmul.f32 %v7022_v57, %v3928_v52 }
 0x32f   : > { %4523 = vst.msk [vmem:[%s7050_s16 + $0x84] sm:$0xf] %vm4489_vm2, %v5105_v6  ;;  %v4141_v47 = vadd.f32 %v7031_v8, %v4070_v26  ;;  %v4071_v28 = vmul.f32 %v7022_v57, %v3920_v11 }
 0x330   : > { %v4207_v48 = vmax.f32 %v4143_v45, 0.0  ;;  %v4144_v38 = vadd.f32 %v7031_v8, %v4073_v22 }
 0x331   : > { %v4205_v29 = vmax.f32 %v4141_v47, 0.0  ;;  %v4142_v50 = vadd.f32 %v7031_v8, %v4071_v28  ;;  %v5213_v25 = vpop.f32.mrb[168].mxu1 }
 0x332   : > { %v5110_v51 = vpack.c.bf16 %v4207_v48, %v4207_v48  ;;  %v4208_v21 = vmax.f32 %v4144_v38, 0.0  ;;  %v3691_v43 = vpop.f32.mrb[104].mxu0  ;;  %v3941_v0 = vadd.f32 %v7159_v4, %v5213_v25  ;;  %v3932_v41 = vpop.f32.mrb[169].mxu1  ;;  %v7460_v38 = vld [vmem:[#allocation8_spill] sm:$0xff] }
 0x333   : > { %v5108_v60 = vpack.c.bf16 %v4205_v29, %v4205_v29  ;;  %v4206_v20 = vmax.f32 %v4142_v50, 0.0  ;;  %v7289_v10 = vadd.f32 %v3691_v43, %v7457_v23  ;;  %v3693_v44 = vpop.f32.mrb[105].mxu0  ;;  %v3933_v27 = vadd.f32 %v7133_v13, %v3932_v41  ;;  %v5214_v31 = vpop.f32.mrb[170].mxu1 }
 0x334   : > { %4528 = vst.msk [vmem:[%s7050_s16 + $0x98] sm:$0xf] %vm4489_vm2, %v5110_v51  ;;  %v5111_v58 = vpack.c.bf16 %v4208_v21, %v4208_v21  ;;  %v4076_v39 = vmul.f32 %v7022_v57, %v3941_v0  ;;  %v3694_v35 = vpop.f32.mrb[106].mxu0  ;;  %v3944_v4 = vadd.f32 %v7170_v34, %v5214_v31  ;;  %v3935_v24 = vpop.f32.mrb[171].mxu1 }
 0x335   : > { %4526 = vst.msk [vmem:[%s7050_s16 + $0x90] sm:$0xf] %vm4489_vm2, %v5108_v60  ;;  %v5109_v33 = vpack.c.bf16 %v4206_v20, %v4206_v20  ;;  %v4074_v12 = vmul.f32 %v7022_v57, %v3933_v27  ;;  %v7300_v18 = vadd.f32 %v3694_v35, %v7458_v37  ;;  %v3696_v13 = vpop.f32.mrb[107].mxu0  ;;  %v3936_v54 = vadd.f32 %v7144_v53, %v3935_v24  ;;  %v7461_v35 = vld [vmem:[#allocation9_spill] sm:$0xff] }
 0x336   : > { %4529 = vst.msk [vmem:[%s7050_s16 + $0x9c] sm:$0xf] %vm4489_vm2, %v5111_v58  ;;  %v4147_v3 = vadd.f32 %v7031_v8, %v4076_v39  ;;  %v4077_v36 = vmul.f32 %v7022_v57, %v3944_v4 }
 0x337   : > { %4527 = vst.msk [vmem:[%s7050_s16 + $0x94] sm:$0xf] %vm4489_vm2, %v5109_v33  ;;  %v4145_v34 = vadd.f32 %v7031_v8, %v4074_v12  ;;  %v4075_v59 = vmul.f32 %v7022_v57, %v3936_v54 }
 0x338   : > { %v4211_v2 = vmax.f32 %v4147_v3, 0.0  ;;  %v4148_v5 = vadd.f32 %v7031_v8, %v4077_v36 }
 0x339   : > { %v4209_v49 = vmax.f32 %v4145_v34, 0.0  ;;  %v4146_v17 = vadd.f32 %v7031_v8, %v4075_v59  ;;  %v5217_v53 = vpop.f32.mrb[172].mxu1  ;;  %v7462_v59 = vld [vmem:[#allocation10_spill] sm:$0xff] }
 0x33a   : > { %v5114_v30 = vpack.c.bf16 %v4211_v2, %v4211_v2  ;;  %v4212_v16 = vmax.f32 %v4148_v5, 0.0  ;;  %v3699_v42 = vpop.f32.mrb[108].mxu0  ;;  %v3957_v9 = vadd.f32 %v7211_v7, %v5217_v53  ;;  %v3948_v15 = vpop.f32.mrb[173].mxu1 }
 0x33b   : > { %v5112_v61 = vpack.c.bf16 %v4209_v49, %v4209_v49  ;;  %v4210_v52 = vmax.f32 %v4146_v17, 0.0  ;;  %v7315_v6 = vadd.f32 %v3699_v42, %v7459_v1  ;;  %v3701_v26 = vpop.f32.mrb[109].mxu0  ;;  %v3949_v62 = vadd.f32 %v7185_v32, %v3948_v15  ;;  %v5218_v19 = vpop.f32.mrb[174].mxu1 }
 0x33c   : > { %4532 = vst.msk [vmem:[%s7050_s16 + $0xa8] sm:$0xf] %vm4489_vm2, %v5114_v30  ;;  %v5115_v11 = vpack.c.bf16 %v4212_v16, %v4212_v16  ;;  %v4080_v45 = vmul.f32 %v7022_v57, %v3957_v9  ;;  %v3702_v22 = vpop.f32.mrb[110].mxu0  ;;  %v3960_v7 = vadd.f32 %v7222_v46, %v5218_v19  ;;  %v3951_v47 = vpop.f32.mrb[175].mxu1 }
 0x33d   : > { %4530 = vst.msk [vmem:[%s7050_s16 + $0xa0] sm:$0xf] %vm4489_vm2, %v5112_v61  ;;  %v5113_v28 = vpack.c.bf16 %v4210_v52, %v4210_v52  ;;  %v4078_v48 = vmul.f32 %v7022_v57, %v3949_v62  ;;  %v7326_v29 = vadd.f32 %v3702_v22, %v7460_v38  ;;  %v3704_v32 = vpop.f32.mrb[111].mxu0  ;;  %v3952_v50 = vadd.f32 %v7196_v63, %v3951_v47 }
 0x33e   : > { %4533 = vst.msk [vmem:[%s7050_s16 + $0xac] sm:$0xf] %vm4489_vm2, %v5115_v11  ;;  %v4151_v25 = vadd.f32 %v7031_v8, %v4080_v45  ;;  %v4081_v51 = vmul.f32 %v7022_v57, %v3960_v7  ;;  %v7463_v11 = vld [vmem:[#allocation11_spill] sm:$0xff] }
 0x33f   : > { %4531 = vst.msk [vmem:[%s7050_s16 + $0xa4] sm:$0xf] %vm4489_vm2, %v5113_v28  ;;  %v4149_v46 = vadd.f32 %v7031_v8, %v4078_v48  ;;  %v4079_v21 = vmul.f32 %v7022_v57, %v3952_v50 }
 0x340   : > { %v4215_v43 = vmax.f32 %v4151_v25, 0.0  ;;  %v4152_v0 = vadd.f32 %v7031_v8, %v4081_v51  ;;  %v7464_v51 = vld [vmem:[#allocation12_spill] sm:$0xff] }
 0x341   : > { %v4213_v41 = vmax.f32 %v4149_v46, 0.0  ;;  %v4150_v60 = vadd.f32 %v7031_v8, %v4079_v21  ;;  %v5221_v63 = vpop.f32.mrb[176].mxu1 }
 0x342   : > { %v5118_v20 = vpack.c.bf16 %v4215_v43, %v4215_v43  ;;  %v4216_v23 = vmax.f32 %v4152_v0, 0.0  ;;  %v3707_v44 = vpop.f32.mrb[112].mxu0  ;;  %v3973_v27 = vadd.f32 %v7263_v55, %v5221_v63  ;;  %v3964_v31 = vpop.f32.mrb[177].mxu1 }
 0x343   : > { %v5116_v58 = vpack.c.bf16 %v4213_v41, %v4213_v41  ;;  %v4214_v39 = vmax.f32 %v4150_v60, 0.0  ;;  %v7341_v4 = vadd.f32 %v3707_v44, %v7461_v35  ;;  %v3709_v24 = vpop.f32.mrb[113].mxu0  ;;  %v3965_v33 = vadd.f32 %v7237_v40, %v3964_v31  ;;  %v5222_v12 = vpop.f32.mrb[178].mxu1 }
 0x344   : > { %4536 = vst.msk [vmem:[%s7050_s16 + $0xb8] sm:$0xf] %vm4489_vm2, %v5118_v20  ;;  %v5119_v37 = vpack.c.bf16 %v4216_v23, %v4216_v23  ;;  %v4084_v13 = vmul.f32 %v7022_v57, %v3973_v27  ;;  %v3710_v54 = vpop.f32.mrb[114].mxu0  ;;  %v3976_v55 = vadd.f32 %v7274_v14, %v5222_v12  ;;  %v3967_v3 = vpop.f32.mrb[179].mxu1 }
 0x345   : > { %4534 = vst.msk [vmem:[%s7050_s16 + $0xb0] sm:$0xf] %vm4489_vm2, %v5116_v58  ;;  %v5117_v36 = vpack.c.bf16 %v4214_v39, %v4214_v39  ;;  %v4082_v34 = vmul.f32 %v7022_v57, %v3965_v33  ;;  %v7352_v2 = vadd.f32 %v3710_v54, %v7462_v59  ;;  %v3712_v40 = vpop.f32.mrb[115].mxu0  ;;  %v3968_v5 = vadd.f32 %v7248_v56, %v3967_v3  ;;  %v7465_v33 = vld [vmem:[#allocation13_spill] sm:$0xff] }
 0x346   : > { %4537 = vst.msk [vmem:[%s7050_s16 + $0xbc] sm:$0xf] %vm4489_vm2, %v5119_v37  ;;  %v4155_v49 = vadd.f32 %v7031_v8, %v4084_v13  ;;  %v4085_v17 = vmul.f32 %v7022_v57, %v3976_v55 }
 0x347   : > { %4535 = vst.msk [vmem:[%s7050_s16 + $0xb4] sm:$0xf] %vm4489_vm2, %v5117_v36  ;;  %v4153_v14 = vadd.f32 %v7031_v8, %v4082_v34  ;;  %v4083_v53 = vmul.f32 %v7022_v57, %v3968_v5 }
 0x348   : > { %v4219_v30 = vmax.f32 %v4155_v49, 0.0  ;;  %v4156_v16 = vadd.f32 %v7031_v8, %v4085_v17  ;;  %v7466_v49 = vld [vmem:[#allocation14_spill] sm:$0xff] }
 0x349   : > { %v4217_v42 = vmax.f32 %v4153_v14, 0.0  ;;  %v4154_v9 = vadd.f32 %v7031_v8, %v4083_v53  ;;  %v5225_v56 = vpop.f32.mrb[180].mxu1 }
 0x34a   : > { %v5122_v15 = vpack.c.bf16 %v4219_v30, %v4219_v30  ;;  %v4220_v61 = vmax.f32 %v4156_v16, 0.0  ;;  %v3715_v52 = vpop.f32.mrb[116].mxu0  ;;  %v3989_v1 = vadd.f32 %v7315_v6, %v5225_v56  ;;  %v3980_v26 = vpop.f32.mrb[181].mxu1 }
 0x34b   : > { %v5120_v62 = vpack.c.bf16 %v4217_v42, %v4217_v42  ;;  %v4218_v19 = vmax.f32 %v4154_v9, 0.0  ;;  %v5325_v45 = vadd.f32 %v3715_v52, %v7463_v11  ;;  %v3717_v22 = vpop.f32.mrb[117].mxu0  ;;  %v3981_v7 = vadd.f32 %v7289_v10, %v3980_v26  ;;  %v5226_v47 = vpop.f32.mrb[182].mxu1 }
 0x34c   : > { %4540 = vst.msk [vmem:[%s7050_s16 + $0xc8] sm:$0xf] %vm4489_vm2, %v5122_v15  ;;  %v5123_v28 = vpack.c.bf16 %v4220_v61, %v4220_v61  ;;  %v4088_v48 = vmul.f32 %v7022_v57, %v3989_v1  ;;  %v3718_v38 = vpop.f32.mrb[118].mxu0  ;;  %v3992_v32 = vadd.f32 %v7326_v29, %v5226_v47  ;;  %v3983_v6 = vpop.f32.mrb[183].mxu1 }
 0x34d   : > { %4538 = vst.msk [vmem:[%s7050_s16 + $0xc0] sm:$0xf] %vm4489_vm2, %v5120_v62  ;;  %v5121_v50 = vpack.c.bf16 %v4218_v19, %v4218_v19  ;;  %v4086_v25 = vmul.f32 %v7022_v57, %v3981_v7  ;;  %v5326_v46 = vadd.f32 %v3718_v38, %v7464_v51  ;;  %v3720_v21 = vpop.f32.mrb[119].mxu0  ;;  %v3984_v10 = vadd.f32 %v7300_v18, %v3983_v6  ;;  %v6079_v6 = vld [vmem:[%s7436_s2] ss:$0 sm:$0xff] }
 0x34e   : > { %4541 = vst.msk [vmem:[%s7050_s16 + $0xcc] sm:$0xf] %vm4489_vm2, %v5123_v28  ;;  %v4159_v43 = vadd.f32 %v7031_v8, %v4088_v48  ;;  %v4089_v0 = vmul.f32 %v7022_v57, %v3992_v32 }
 0x34f   : > { %4539 = vst.msk [vmem:[%s7050_s16 + $0xc4] sm:$0xf] %vm4489_vm2, %v5121_v50  ;;  %v4157_v29 = vadd.f32 %v7031_v8, %v4086_v25  ;;  %v4087_v41 = vmul.f32 %v7022_v57, %v3984_v10  ;;  %v7468_v25 = vld [vmem:[#allocation16_spill] sm:$0xff] }
 0x350   : > { %v4223_v60 = vmax.f32 %v4159_v43, 0.0  ;;  %v4160_v63 = vadd.f32 %v7031_v8, %v4089_v0  ;;  %v6080_v43 = vld [vmem:[%s7437_s3] ss:$0 sm:$0xff] }
 0x351   : > { %v4221_v20 = vmax.f32 %v4157_v29, 0.0  ;;  %v4158_v23 = vadd.f32 %v7031_v8, %v4087_v41  ;;  %v5229_v18 = vpop.f32.mrb[184].mxu1 }
 0x352   : > { %v5126_v44 = vpack.c.bf16 %v4223_v60, %v4223_v60  ;;  %v4224_v27 = vmax.f32 %v4160_v63, 0.0  ;;  %v3723_v31 = vpop.f32.mrb[120].mxu0  ;;  %v4005_v58 = vadd.f32 %v5325_v45, %v5229_v18  ;;  %v3996_v39 = vpop.f32.mrb[185].mxu1  ;;  %v7467_v45 = vld [vmem:[#allocation15_spill] sm:$0xff] }
 0x353   : > { %v5124_v35 = vpack.c.bf16 %v4221_v20, %v4221_v20  ;;  %v4222_v24 = vmax.f32 %v4158_v23, 0.0  ;;  %v5327_v12 = vadd.f32 %v3723_v31, %v7465_v33  ;;  %v3725_v37 = vpop.f32.mrb[121].mxu0  ;;  %v3997_v13 = vadd.f32 %v7341_v4, %v3996_v39  ;;  %v5230_v54 = vpop.f32.mrb[186].mxu1 }
 0x354   : > { %4544 = vst.msk [vmem:[%s7050_s16 + $0xd8] sm:$0xf] %vm4489_vm2, %v5126_v44  ;;  %v5127_v55 = vpack.c.bf16 %v4224_v27, %v4224_v27  ;;  %v4092_v3 = vmul.f32 %v7022_v57, %v4005_v58  ;;  %v3726_v36 = vpop.f32.mrb[122].mxu0  ;;  %v4008_v34 = vadd.f32 %v5326_v46, %v5230_v54  ;;  %v3999_v59 = vpop.f32.mrb[187].mxu1 }
 0x355   : > { %4542 = vst.msk [vmem:[%s7050_s16 + $0xd0] sm:$0xf] %vm4489_vm2, %v5124_v35  ;;  %v5125_v40 = vpack.c.bf16 %v4222_v24, %v4222_v24  ;;  %v4090_v5 = vmul.f32 %v7022_v57, %v3997_v13  ;;  %v5328_v17 = vadd.f32 %v3726_v36, %v7466_v49  ;;  %v3728_v14 = vpop.f32.mrb[123].mxu0  ;;  %v4000_v4 = vadd.f32 %v7352_v2, %v3999_v59 }
 0x356   : > { %4545 = vst.msk [vmem:[%s7050_s16 + $0xdc] sm:$0xf] %vm4489_vm2, %v5127_v55  ;;  %v4163_v53 = vadd.f32 %v7031_v8, %v4092_v3  ;;  %v4093_v30 = vmul.f32 %v7022_v57, %v4008_v34 }
 0x357   : > { %4543 = vst.msk [vmem:[%s7050_s16 + $0xd4] sm:$0xf] %vm4489_vm2, %v5125_v40  ;;  %v4161_v16 = vadd.f32 %v7031_v8, %v4090_v5  ;;  %v4091_v42 = vmul.f32 %v7022_v57, %v4000_v4 }
 0x358   : > { %v4227_v9 = vmax.f32 %v4163_v53, 0.0  ;;  %v4164_v56 = vadd.f32 %v7031_v8, %v4093_v30 }
 0x359   : > { %v4225_v15 = vmax.f32 %v4161_v16, 0.0  ;;  %v4162_v61 = vadd.f32 %v7031_v8, %v4091_v42  ;;  %v5233_v2 = vpop.f32.mrb[188].mxu1 }
 0x35a   : > { %v5130_v52 = vpack.c.bf16 %v4227_v9, %v4227_v9  ;;  %v4228_v1 = vmax.f32 %v4164_v56, 0.0  ;;  %v3731_v26 = vpop.f32.mrb[124].mxu0  ;;  %v4012_v62 = vpop.f32.mrb[189].mxu1 }
 0x35b   : > { %v5128_v19 = vpack.c.bf16 %v4225_v15, %v4225_v15  ;;  %v4226_v11 = vmax.f32 %v4162_v61, 0.0  ;;  %v5329_v22 = vadd.f32 %v3731_v26, %v7467_v45  ;;  %v3733_v7 = vpop.f32.mrb[125].mxu0  ;;  %v4013_v57 = vadd.f32 %v5327_v12, %v4012_v62  ;;  %v5234_v47 = vpop.f32.mrb[190].mxu1 }
 0x35c   : > { %4548 = vst.msk [vmem:[%s7050_s16 + $0xe8] sm:$0xf] %vm4489_vm2, %v5130_v52  ;;  %v5131_v28 = vpack.c.bf16 %v4228_v1, %v4228_v1  ;;  %v3734_v48 = vpop.f32.mrb[126].mxu0  ;;  %v4015_v8 = vpop.f32.mrb[191].mxu1 }
 0x35d   : > { %4546 = vst.msk [vmem:[%s7050_s16 + $0xe0] sm:$0xf] %vm4489_vm2, %v5128_v19  ;;  %v5129_v38 = vpack.c.bf16 %v4226_v11, %v4226_v11  ;;  %v4021_v32 = vadd.f32 %v5329_v22, %v5233_v2  ;;  %v4094_v50 = vmul.f32 %v6079_v6, %v4013_v57  ;;  %v5330_v51 = vadd.f32 %v3734_v48, %v7468_v25  ;;  %v3736_v46 = vpop.f32.mrb[127].mxu0 }
 0x35e   : > { %4549 = vst.msk [vmem:[%s7050_s16 + $0xec] sm:$0xf] %vm4489_vm2, %v5131_v28  ;;  %v4016_v21 = vadd.f32 %v5328_v17, %v4015_v8 }
 0x35f   : > { %4547 = vst.msk [vmem:[%s7050_s16 + $0xe4] sm:$0xf] %vm4489_vm2, %v5129_v38  ;;  %v4096_v10 = vmul.f32 %v6079_v6, %v4021_v32  ;;  %v4165_v0 = vadd.f32 %v6080_v43, %v4094_v50  ;;  %v4024_v29 = vadd.f32 %v5330_v51, %v5234_v47 }
 0x360   : > { %v4095_v41 = vmul.f32 %v6079_v6, %v4016_v21 }
 0x361   : > { %v4167_v60 = vadd.f32 %v6080_v43, %v4096_v10  ;;  %v4229_v63 = vmax.f32 %v4165_v0, 0.0  ;;  %v4097_v20 = vmul.f32 %v6079_v6, %v4024_v29 }
 0x362   : > { %v4166_v23 = vadd.f32 %v6080_v43, %v4095_v41 }
 0x363   : > { %v4231_v18 = vmax.f32 %v4167_v60, 0.0  ;;  %v5132_v44 = vpack.c.bf16 %v4229_v63, %v4229_v63  ;;  %v4168_v27 = vadd.f32 %v6080_v43, %v4097_v20 }
 0x364   : > { %v4230_v31 = vmax.f32 %v4166_v23, 0.0 }
 0x365   : > { %v5134_v58 = vpack.c.bf16 %v4231_v18, %v4231_v18  ;;  %4550 = vst.msk [vmem:[%s7050_s16 + $0xf0] sm:$0xf] %vm4489_vm2, %v5132_v44  ;;  %v4232_v39 = vmax.f32 %v4168_v27, 0.0 }
 0x366   : > { %v5133_v35 = vpack.c.bf16 %v4230_v31, %v4230_v31 }
 0x367   : > { %4552 = vst.msk [vmem:[%s7050_s16 + $0xf8] sm:$0xf] %vm4489_vm2, %v5134_v58  ;;  %v5135_v24 = vpack.c.bf16 %v4232_v39, %v4232_v39 }
 0x368   : > { %4551 = vst.msk [vmem:[%s7050_s16 + $0xf4] sm:$0xf] %vm4489_vm2, %v5133_v35 }
 0x369   : > { %4553 = vst.msk [vmem:[%s7050_s16 + $0xfc] sm:$0xf] %vm4489_vm2, %v5135_v24 }
 0x36a PF: > { %s14_s15 = sadd.s32 1, %s6087_s15  }
 0x36b   : > { %p11_p4 = scmp.ge.s32.totalorder %s14_s15, 4  }
 0x36d   :  { %13 = sbr.rel (!%p11_p4) target bundleno = 1 (0x1), region = 66 }

// kernel: resnet_forward.13
= control target key start
LH: loop header
LB: loop body
LE: loop exit
PB: predicated region body
PF: predicated region fallthrough
CT: control target
= control target key end

     0   :  { %v1010_v0 = vmov 0   ;;  %vm302_vm0 = vcmask 719872   ;;  %vm351_vm1 = vcmask 1043456   ;;  %vm754_vm2 = vcmask 60416   ;;  %s1420_s1 = inlined_call_operand.vmem [shape: bf16[216,8], index: 1, kind: input, shape index: {}]   ;;  %s1421_s0 = inlined_call_operand.vmem [shape: bf16[256,216], index: 0, kind: input, shape index: {}]   ;;  %s1422_s2 = inlined_call_operand.vmem [shape: f32[1,8], index: 2, kind: input, shape index: {}]   ;;  %s1423_s3 = inlined_call_operand.vmem [shape: f32[1,8], index: 3, kind: input, shape index: {}]   ;;  %s1424_s4 = inlined_call_operand.vmem [shape: bf16[256,8], index: 4, kind: output, shape index: {}]  }
   0x1   :  { %355 = vmatprep.subr.bf16.mxu0 %v1010_v0  ;;  %919 = vmatprep.subr.bf16.mxu1 %v1010_v0  ;;  %v948_v1 = vld [vmem:[%s1420_s1] sm:$0xff]   ;;  %v949_v2 = vld [vmem:[%s1420_s1 + $0x8] sm:$0xff]   ;;  %v950_v3 = vld [vmem:[%s1420_s1 + $0x10] sm:$0xff]  }
   0x2   :  { %356 = vmatpush1.bf16.msra.mxu0 %v948_v1  ;;  %933 = vmatpush1.bf16.msra.mxu1 %v948_v1  ;;  %v951_v4 = vld [vmem:[%s1420_s1 + $0x18] sm:$0xff]   ;;  %v952_v5 = vld [vmem:[%s1420_s1 + $0x20] sm:$0xff]   ;;  %v953_v8 = vld [vmem:[%s1420_s1 + $0x28] sm:$0xff]  }
   0x3   :  { %357 = vmatprep.subr.bf16.mxu0 %v1010_v0  ;;  %920 = vmatprep.subr.bf16.mxu1 %v1010_v0  ;;  %v964_v6 = vld [vmem:[%s1421_s0 + $0x4] ss:$8 sps:$4 sm:$0xff]   ;;  %v954_v9 = vld [vmem:[%s1420_s1 + $0x30] sm:$0xff]   ;;  %v955_v10 = vld [vmem:[%s1420_s1 + $0x38] sm:$0xff]  }
   0x4   :  { %837 = vmatprep.mubr.msk.bf16.mxu0 %vm302_vm0, %v964_v6  ;;  %v967_v7 = vld [vmem:[%s1421_s0 + $0x84] ss:$8 sps:$4 sm:$0xff]   ;;  %v958_v13 = vld [vmem:[%s1420_s1 + $0x50] sm:$0xff]   ;;  %v959_v14 = vld [vmem:[%s1420_s1 + $0x58] sm:$0xff]  }
   0x5   :  { %845 = vmatprep.mubr.msk.bf16.mxu1 %vm302_vm0, %v967_v7  ;;  %v956_v11 = vld [vmem:[%s1420_s1 + $0x40] sm:$0xff]   ;;  %v957_v12 = vld [vmem:[%s1420_s1 + $0x48] sm:$0xff]   ;;  %v968_v20 = vld [vmem:[%s1421_s0 + $0x14] ss:$8 sps:$4 sm:$0xff]  }
   0x6   :  { %358 = vmatpush1.bf16.msra.mxu0 %v949_v2  ;;  %934 = vmatpush1.bf16.msra.mxu1 %v949_v2  ;;  %v960_v15 = vld [vmem:[%s1420_s1 + $0x60] sm:$0xff]   ;;  %v961_v16 = vld [vmem:[%s1420_s1 + $0x68] ss:$0 sps:$4 sm:$0xff]   ;;  %v970_v21 = vld [vmem:[%s1421_s0 + $0x94] ss:$8 sps:$4 sm:$0xff]  }
   0x7   :  { %359 = vmatprep.subr.bf16.mxu0 %v1010_v0  ;;  %921 = vmatprep.subr.bf16.mxu1 %v1010_v0  ;;  %v353_v17 = vsel %vm351_vm1, %v961_v16, 0  ;;  %v962_v18 = vld [vmem:[%s1421_s0] ss:$8 sps:$4 sm:$0xff]   ;;  %v972_v22 = vld [vmem:[%s1421_s0 + $0x10] ss:$8 sps:$4 sm:$0xff]  }
   0x8   :  { %v965_v19 = vld [vmem:[%s1421_s0 + $0x80] ss:$8 sps:$4 sm:$0xff]   ;;  %v973_v23 = vld [vmem:[%s1421_s0 + $0x90] ss:$8 sps:$4 sm:$0xff]   ;;  %v974_v24 = vld [vmem:[%s1421_s0 + $0x24] ss:$8 sps:$4 sm:$0xff]  }
   0x9   :  { %v976_v25 = vld [vmem:[%s1421_s0 + $0xa4] ss:$8 sps:$4 sm:$0xff]   ;;  %v978_v26 = vld [vmem:[%s1421_s0 + $0x20] ss:$8 sps:$4 sm:$0xff]   ;;  %v980_v28 = vld [vmem:[%s1421_s0 + $0x34] ss:$8 sps:$4 sm:$0xff]  }
   0xa   :  { %360 = vmatpush1.bf16.msra.mxu0 %v950_v3  ;;  %935 = vmatpush1.bf16.msra.mxu1 %v950_v3  ;;  %v979_v27 = vld [vmem:[%s1421_s0 + $0xa0] ss:$8 sps:$4 sm:$0xff]   ;;  %v982_v29 = vld [vmem:[%s1421_s0 + $0xb4] ss:$8 sps:$4 sm:$0xff]   ;;  %v984_v30 = vld [vmem:[%s1421_s0 + $0x30] ss:$8 sps:$4 sm:$0xff]  }
   0xb   :  { %361 = vmatprep.subr.bf16.mxu0 %v1010_v0  ;;  %922 = vmatprep.subr.bf16.mxu1 %v1010_v0  ;;  %v985_v31 = vld [vmem:[%s1421_s0 + $0xb0] ss:$8 sps:$4 sm:$0xff]   ;;  %v986_v32 = vld [vmem:[%s1421_s0 + $0x44] ss:$8 sps:$4 sm:$0xff]   ;;  %v990_v34 = vld [vmem:[%s1421_s0 + $0x40] ss:$8 sps:$4 sm:$0xff]  }
   0xc   :  { %v988_v33 = vld [vmem:[%s1421_s0 + $0xc4] ss:$8 sps:$4 sm:$0xff]   ;;  %v991_v35 = vld [vmem:[%s1421_s0 + $0xc0] ss:$8 sps:$4 sm:$0xff]   ;;  %v992_v36 = vld [vmem:[%s1421_s0 + $0x54] ss:$8 sps:$4 sm:$0xff]  }
   0xd   :  { %v994_v37 = vld [vmem:[%s1421_s0 + $0xd4] ss:$8 sps:$4 sm:$0xff]   ;;  %v996_v38 = vld [vmem:[%s1421_s0 + $0x50] ss:$8 sps:$4 sm:$0xff]   ;;  %v998_v40 = vld [vmem:[%s1421_s0 + $0x64] ss:$8 sps:$4 sm:$0xff]  }
   0xe   :  { %362 = vmatpush1.bf16.msra.mxu0 %v951_v4  ;;  %936 = vmatpush1.bf16.msra.mxu1 %v951_v4  ;;  %v997_v39 = vld [vmem:[%s1421_s0 + $0xd0] ss:$8 sps:$4 sm:$0xff]   ;;  %v1000_v41 = vld [vmem:[%s1421_s0 + $0xe4] ss:$8 sps:$4 sm:$0xff]   ;;  %v1002_v42 = vld [vmem:[%s1421_s0 + $0x60] ss:$8 sps:$4 sm:$0xff]  }
   0xf   :  { %363 = vmatprep.subr.bf16.mxu0 %v1010_v0  ;;  %923 = vmatprep.subr.bf16.mxu1 %v1010_v0  ;;  %v1003_v43 = vld [vmem:[%s1421_s0 + $0xe0] ss:$8 sps:$4 sm:$0xff]   ;;  %v1004_v44 = vld [vmem:[%s1421_s0 + $0x74] ss:$8 sps:$4 sm:$0xff]   ;;  %v1008_v46 = vld [vmem:[%s1421_s0 + $0x70] ss:$8 sps:$4 sm:$0xff]  }
  0x10   :  { %v1006_v45 = vld [vmem:[%s1421_s0 + $0xf4] ss:$8 sps:$4 sm:$0xff]   ;;  %v1009_v47 = vld [vmem:[%s1421_s0 + $0xf0] ss:$8 sps:$4 sm:$0xff]   ;;  %v1221_v48 = vld [vmem:[%s1422_s2] ss:$0 sm:$0xff] }
  0x11   :  { %v1226_v50 = vld [vmem:[%s1423_s3] ss:$0 sm:$0xff] }
  0x12   :  { %364 = vmatpush1.bf16.msra.mxu0 %v952_v5  ;;  %937 = vmatpush1.bf16.msra.mxu1 %v952_v5 }
  0x13   :  { %365 = vmatprep.subr.bf16.mxu0 %v1010_v0  ;;  %924 = vmatprep.subr.bf16.mxu1 %v1010_v0 }
  0x16   :  { %366 = vmatpush1.bf16.msra.mxu0 %v953_v8  ;;  %938 = vmatpush1.bf16.msra.mxu1 %v953_v8 }
  0x17   :  { %367 = vmatprep.subr.bf16.mxu0 %v1010_v0  ;;  %925 = vmatprep.subr.bf16.mxu1 %v1010_v0 }
  0x1a   :  { %368 = vmatpush1.bf16.msra.mxu0 %v954_v9  ;;  %939 = vmatpush1.bf16.msra.mxu1 %v954_v9 }
  0x1b   :  { %369 = vmatprep.subr.bf16.mxu0 %v1010_v0  ;;  %926 = vmatprep.subr.bf16.mxu1 %v1010_v0 }
  0x1e   :  { %370 = vmatpush1.bf16.msra.mxu0 %v955_v10  ;;  %940 = vmatpush1.bf16.msra.mxu1 %v955_v10 }
  0x1f   :  { %371 = vmatprep.subr.bf16.mxu0 %v1010_v0  ;;  %927 = vmatprep.subr.bf16.mxu1 %v1010_v0 }
  0x22   :  { %372 = vmatpush1.bf16.msra.mxu0 %v956_v11  ;;  %941 = vmatpush1.bf16.msra.mxu1 %v956_v11 }
  0x23   :  { %373 = vmatprep.subr.bf16.mxu0 %v1010_v0  ;;  %928 = vmatprep.subr.bf16.mxu1 %v1010_v0 }
  0x26   :  { %374 = vmatpush1.bf16.msra.mxu0 %v957_v12  ;;  %942 = vmatpush1.bf16.msra.mxu1 %v957_v12 }
  0x27   :  { %375 = vmatprep.subr.bf16.mxu0 %v1010_v0  ;;  %929 = vmatprep.subr.bf16.mxu1 %v1010_v0 }
  0x2a   :  { %376 = vmatpush1.bf16.msra.mxu0 %v958_v13  ;;  %943 = vmatpush1.bf16.msra.mxu1 %v958_v13 }
  0x2b   :  { %377 = vmatprep.subr.bf16.mxu0 %v1010_v0  ;;  %930 = vmatprep.subr.bf16.mxu1 %v1010_v0 }
  0x2e   :  { %378 = vmatpush1.bf16.msra.mxu0 %v959_v14  ;;  %944 = vmatpush1.bf16.msra.mxu1 %v959_v14 }
  0x2f   :  { %379 = vmatprep.subr.bf16.mxu0 %v1010_v0  ;;  %931 = vmatprep.subr.bf16.mxu1 %v1010_v0 }
  0x32   :  { %380 = vmatpush1.bf16.msra.mxu0 %v960_v15  ;;  %945 = vmatpush1.bf16.msra.mxu1 %v960_v15 }
  0x33   :  { %381 = vmatprep.subr.bf16.mxu0 %v1010_v0  ;;  %932 = vmatprep.subr.bf16.mxu1 %v1010_v0 }
  0x36   :  { %382 = vmatpush1.bf16.msra.mxu0 %v353_v17  ;;  %946 = vmatpush1.bf16.msra.mxu1 %v353_v17 }
  0x39   :  { %388 = vmatmul.mubr.bf16.vlgmr.msra.gmra.mrb[0].mxu0 %v962_v18  ;;  %452 = vmatmul.mubr.bf16.vlgmr.msra.gmra.mrb[0].mxu1 %v965_v19 }
  0x3a   :  { %838 = vmatprep.mubr.msk.bf16.mxu0 %vm302_vm0, %v968_v20  ;;  %846 = vmatprep.mubr.msk.bf16.mxu1 %vm302_vm0, %v970_v21 }
  0x41   :  { %396 = vmatmul.mubr.bf16.gmra.mrb[4].mxu0 %v972_v22  ;;  %460 = vmatmul.mubr.bf16.gmra.mrb[4].mxu1 %v973_v23 }
  0x42   :  { %839 = vmatprep.mubr.msk.bf16.mxu0 %vm302_vm0, %v974_v24  ;;  %847 = vmatprep.mubr.msk.bf16.mxu1 %vm302_vm0, %v976_v25 }
  0x49   :  { %404 = vmatmul.mubr.bf16.gmra.mrb[8].mxu0 %v978_v26  ;;  %468 = vmatmul.mubr.bf16.gmra.mrb[8].mxu1 %v979_v27 }
  0x4a   :  { %840 = vmatprep.mubr.msk.bf16.mxu0 %vm302_vm0, %v980_v28  ;;  %848 = vmatprep.mubr.msk.bf16.mxu1 %vm302_vm0, %v982_v29 }
  0x51   :  { %412 = vmatmul.mubr.bf16.gmra.mrb[12].mxu0 %v984_v30  ;;  %476 = vmatmul.mubr.bf16.gmra.mrb[12].mxu1 %v985_v31 }
  0x52   :  { %841 = vmatprep.mubr.msk.bf16.mxu0 %vm302_vm0, %v986_v32  ;;  %849 = vmatprep.mubr.msk.bf16.mxu1 %vm302_vm0, %v988_v33 }
  0x59   :  { %420 = vmatmul.mubr.bf16.gmra.mrb[16].mxu0 %v990_v34  ;;  %484 = vmatmul.mubr.bf16.gmra.mrb[16].mxu1 %v991_v35 }
  0x5a   :  { %842 = vmatprep.mubr.msk.bf16.mxu0 %vm302_vm0, %v992_v36  ;;  %850 = vmatprep.mubr.msk.bf16.mxu1 %vm302_vm0, %v994_v37 }
  0x61   :  { %428 = vmatmul.mubr.bf16.gmra.mrb[20].mxu0 %v996_v38  ;;  %492 = vmatmul.mubr.bf16.gmra.mrb[20].mxu1 %v997_v39 }
  0x62   :  { %843 = vmatprep.mubr.msk.bf16.mxu0 %vm302_vm0, %v998_v40  ;;  %851 = vmatprep.mubr.msk.bf16.mxu1 %vm302_vm0, %v1000_v41 }
  0x69   :  { %436 = vmatmul.mubr.bf16.gmra.mrb[24].mxu0 %v1002_v42  ;;  %500 = vmatmul.mubr.bf16.gmra.mrb[24].mxu1 %v1003_v43 }
  0x6a   :  { %844 = vmatprep.mubr.msk.bf16.mxu0 %vm302_vm0, %v1004_v44  ;;  %852 = vmatprep.mubr.msk.bf16.mxu1 %vm302_vm0, %v1006_v45 }
  0x71   :  { %444 = vmatmul.mubr.bf16.gmra.mrb[28].mxu0 %v1008_v46  ;;  %508 = vmatmul.mubr.bf16.gmra.mrb[28].mxu1 %v1009_v47 }
 0x10c   :  { %v389_v49 = vpop.f32.mrb[0].mxu0  ;;  %v453_v51 = vpop.f32.mrb[0].mxu1 }
 0x10d   :  { %v523_v52 = vmul.f32 %v1221_v48, %v389_v49  ;;  %v539_v53 = vmul.f32 %v1221_v48, %v453_v51  ;;  %v391_v54 = vpop.f32.mrb[1].mxu0  ;;  %v455_v55 = vpop.f32.mrb[1].mxu1 }
 0x10e   :  { %v392_v56 = vpop.f32.mrb[2].mxu0  ;;  %v456_v57 = vpop.f32.mrb[2].mxu1 }
 0x10f   :  { %v562_v58 = vadd.f32 %v1226_v50, %v523_v52  ;;  %v578_v59 = vadd.f32 %v1226_v50, %v539_v53  ;;  %v524_v60 = vmul.f32 %v1221_v48, %v392_v56  ;;  %v540_v61 = vmul.f32 %v1221_v48, %v456_v57  ;;  %v394_v62 = vpop.f32.mrb[3].mxu0  ;;  %v458_v63 = vpop.f32.mrb[3].mxu1 }
 0x111   :  { %v594_v0 = vmax.f32 %v562_v58, 0.0  ;;  %v610_v1 = vmax.f32 %v578_v59, 0.0  ;;  %v563_v2 = vadd.f32 %v1226_v50, %v524_v60  ;;  %v579_v3 = vadd.f32 %v1226_v50, %v540_v61 }
 0x113   :  { %v887_v4 = vpack.c.bf16 %v594_v0, %v594_v0  ;;  %v903_v5 = vpack.c.bf16 %v610_v1, %v610_v1  ;;  %v595_v6 = vmax.f32 %v563_v2, 0.0  ;;  %v611_v7 = vmax.f32 %v579_v3, 0.0 }
 0x114   :  { %v397_v8 = vpop.f32.mrb[4].mxu0  ;;  %v461_v9 = vpop.f32.mrb[4].mxu1 }
 0x115   :  { %755 = vst.msk [vmem:[%s1424_s4] sm:$0xf] %vm754_vm2, %v887_v4  ;;  %771 = vst.msk [vmem:[%s1424_s4 + $0x40] sm:$0xf] %vm754_vm2, %v903_v5  ;;  %v888_v10 = vpack.c.bf16 %v595_v6, %v595_v6  ;;  %v904_v11 = vpack.c.bf16 %v611_v7, %v611_v7  ;;  %v525_v12 = vmul.f32 %v1221_v48, %v397_v8  ;;  %v399_v14 = vpop.f32.mrb[5].mxu0  ;;  %v463_v15 = vpop.f32.mrb[5].mxu1 }
 0x116   :  { %v541_v13 = vmul.f32 %v1221_v48, %v461_v9  ;;  %v400_v16 = vpop.f32.mrb[6].mxu0  ;;  %v464_v17 = vpop.f32.mrb[6].mxu1 }
 0x117   :  { %756 = vst.msk [vmem:[%s1424_s4 + $0x4] sm:$0xf] %vm754_vm2, %v888_v10  ;;  %772 = vst.msk [vmem:[%s1424_s4 + $0x44] sm:$0xf] %vm754_vm2, %v904_v11  ;;  %v564_v18 = vadd.f32 %v1226_v50, %v525_v12  ;;  %v526_v20 = vmul.f32 %v1221_v48, %v400_v16  ;;  %v542_v21 = vmul.f32 %v1221_v48, %v464_v17  ;;  %v402_v22 = vpop.f32.mrb[7].mxu0  ;;  %v466_v23 = vpop.f32.mrb[7].mxu1 }
 0x118   :  { %v580_v19 = vadd.f32 %v1226_v50, %v541_v13 }
 0x119   :  { %v596_v24 = vmax.f32 %v564_v18, 0.0  ;;  %v565_v26 = vadd.f32 %v1226_v50, %v526_v20  ;;  %v581_v27 = vadd.f32 %v1226_v50, %v542_v21 }
 0x11a   :  { %v612_v25 = vmax.f32 %v580_v19, 0.0 }
 0x11b   :  { %v889_v28 = vpack.c.bf16 %v596_v24, %v596_v24  ;;  %v597_v30 = vmax.f32 %v565_v26, 0.0  ;;  %v613_v31 = vmax.f32 %v581_v27, 0.0 }
 0x11c   :  { %v905_v29 = vpack.c.bf16 %v612_v25, %v612_v25  ;;  %v405_v32 = vpop.f32.mrb[8].mxu0  ;;  %v469_v33 = vpop.f32.mrb[8].mxu1 }
 0x11d   :  { %757 = vst.msk [vmem:[%s1424_s4 + $0x8] sm:$0xf] %vm754_vm2, %v889_v28  ;;  %v890_v34 = vpack.c.bf16 %v597_v30, %v597_v30  ;;  %v906_v35 = vpack.c.bf16 %v613_v31, %v613_v31  ;;  %v527_v36 = vmul.f32 %v1221_v48, %v405_v32  ;;  %v543_v37 = vmul.f32 %v1221_v48, %v469_v33  ;;  %v407_v38 = vpop.f32.mrb[9].mxu0  ;;  %v471_v39 = vpop.f32.mrb[9].mxu1 }
 0x11e   :  { %773 = vst.msk [vmem:[%s1424_s4 + $0x48] sm:$0xf] %vm754_vm2, %v905_v29  ;;  %v408_v40 = vpop.f32.mrb[10].mxu0  ;;  %v472_v41 = vpop.f32.mrb[10].mxu1 }
 0x11f   :  { %758 = vst.msk [vmem:[%s1424_s4 + $0xc] sm:$0xf] %vm754_vm2, %v890_v34  ;;  %774 = vst.msk [vmem:[%s1424_s4 + $0x4c] sm:$0xf] %vm754_vm2, %v906_v35  ;;  %v566_v42 = vadd.f32 %v1226_v50, %v527_v36  ;;  %v582_v43 = vadd.f32 %v1226_v50, %v543_v37  ;;  %v528_v44 = vmul.f32 %v1221_v48, %v408_v40  ;;  %v410_v46 = vpop.f32.mrb[11].mxu0  ;;  %v474_v47 = vpop.f32.mrb[11].mxu1 }
 0x120   :  { %v544_v45 = vmul.f32 %v1221_v48, %v472_v41 }
 0x121   :  { %v598_v49 = vmax.f32 %v566_v42, 0.0  ;;  %v614_v51 = vmax.f32 %v582_v43, 0.0  ;;  %v567_v52 = vadd.f32 %v1226_v50, %v528_v44 }
 0x122   :  { %v583_v53 = vadd.f32 %v1226_v50, %v544_v45 }
 0x123   :  { %v891_v54 = vpack.c.bf16 %v598_v49, %v598_v49  ;;  %v907_v55 = vpack.c.bf16 %v614_v51, %v614_v51  ;;  %v599_v56 = vmax.f32 %v567_v52, 0.0 }
 0x124   :  { %v615_v57 = vmax.f32 %v583_v53, 0.0  ;;  %v413_v58 = vpop.f32.mrb[12].mxu0  ;;  %v477_v59 = vpop.f32.mrb[12].mxu1 }
 0x125   :  { %759 = vst.msk [vmem:[%s1424_s4 + $0x10] sm:$0xf] %vm754_vm2, %v891_v54  ;;  %775 = vst.msk [vmem:[%s1424_s4 + $0x50] sm:$0xf] %vm754_vm2, %v907_v55  ;;  %v892_v60 = vpack.c.bf16 %v599_v56, %v599_v56  ;;  %v529_v62 = vmul.f32 %v1221_v48, %v413_v58  ;;  %v545_v63 = vmul.f32 %v1221_v48, %v477_v59  ;;  %v415_v0 = vpop.f32.mrb[13].mxu0  ;;  %v479_v1 = vpop.f32.mrb[13].mxu1 }
 0x126   :  { %v908_v61 = vpack.c.bf16 %v615_v57, %v615_v57  ;;  %v416_v2 = vpop.f32.mrb[14].mxu0  ;;  %v480_v3 = vpop.f32.mrb[14].mxu1 }
 0x127   :  { %760 = vst.msk [vmem:[%s1424_s4 + $0x14] sm:$0xf] %vm754_vm2, %v892_v60  ;;  %v568_v4 = vadd.f32 %v1226_v50, %v529_v62  ;;  %v584_v5 = vadd.f32 %v1226_v50, %v545_v63  ;;  %v530_v6 = vmul.f32 %v1221_v48, %v416_v2  ;;  %v546_v7 = vmul.f32 %v1221_v48, %v480_v3  ;;  %v418_v8 = vpop.f32.mrb[15].mxu0  ;;  %v482_v9 = vpop.f32.mrb[15].mxu1 }
 0x128   :  { %776 = vst.msk [vmem:[%s1424_s4 + $0x54] sm:$0xf] %vm754_vm2, %v908_v61 }
 0x129   :  { %v600_v10 = vmax.f32 %v568_v4, 0.0  ;;  %v616_v11 = vmax.f32 %v584_v5, 0.0  ;;  %v569_v12 = vadd.f32 %v1226_v50, %v530_v6  ;;  %v585_v13 = vadd.f32 %v1226_v50, %v546_v7 }
 0x12b   :  { %v893_v14 = vpack.c.bf16 %v600_v10, %v600_v10  ;;  %v909_v15 = vpack.c.bf16 %v616_v11, %v616_v11  ;;  %v601_v16 = vmax.f32 %v569_v12, 0.0  ;;  %v617_v17 = vmax.f32 %v585_v13, 0.0 }
 0x12c   :  { %v421_v18 = vpop.f32.mrb[16].mxu0  ;;  %v485_v19 = vpop.f32.mrb[16].mxu1 }
 0x12d   :  { %761 = vst.msk [vmem:[%s1424_s4 + $0x18] sm:$0xf] %vm754_vm2, %v893_v14  ;;  %777 = vst.msk [vmem:[%s1424_s4 + $0x58] sm:$0xf] %vm754_vm2, %v909_v15  ;;  %v894_v20 = vpack.c.bf16 %v601_v16, %v601_v16  ;;  %v910_v21 = vpack.c.bf16 %v617_v17, %v617_v17  ;;  %v531_v22 = vmul.f32 %v1221_v48, %v421_v18  ;;  %v423_v24 = vpop.f32.mrb[17].mxu0  ;;  %v487_v25 = vpop.f32.mrb[17].mxu1 }
 0x12e   :  { %v547_v23 = vmul.f32 %v1221_v48, %v485_v19  ;;  %v424_v26 = vpop.f32.mrb[18].mxu0  ;;  %v488_v27 = vpop.f32.mrb[18].mxu1 }
 0x12f   :  { %762 = vst.msk [vmem:[%s1424_s4 + $0x1c] sm:$0xf] %vm754_vm2, %v894_v20  ;;  %778 = vst.msk [vmem:[%s1424_s4 + $0x5c] sm:$0xf] %vm754_vm2, %v910_v21  ;;  %v570_v28 = vadd.f32 %v1226_v50, %v531_v22  ;;  %v532_v30 = vmul.f32 %v1221_v48, %v424_v26  ;;  %v548_v31 = vmul.f32 %v1221_v48, %v488_v27  ;;  %v426_v32 = vpop.f32.mrb[19].mxu0  ;;  %v490_v33 = vpop.f32.mrb[19].mxu1 }
 0x130   :  { %v586_v29 = vadd.f32 %v1226_v50, %v547_v23 }
 0x131   :  { %v602_v34 = vmax.f32 %v570_v28, 0.0  ;;  %v571_v36 = vadd.f32 %v1226_v50, %v532_v30  ;;  %v587_v37 = vadd.f32 %v1226_v50, %v548_v31 }
 0x132   :  { %v618_v35 = vmax.f32 %v586_v29, 0.0 }
 0x133   :  { %v895_v38 = vpack.c.bf16 %v602_v34, %v602_v34  ;;  %v603_v40 = vmax.f32 %v571_v36, 0.0  ;;  %v619_v41 = vmax.f32 %v587_v37, 0.0 }
 0x134   :  { %v911_v39 = vpack.c.bf16 %v618_v35, %v618_v35  ;;  %v429_v42 = vpop.f32.mrb[20].mxu0  ;;  %v493_v43 = vpop.f32.mrb[20].mxu1 }
 0x135   :  { %763 = vst.msk [vmem:[%s1424_s4 + $0x20] sm:$0xf] %vm754_vm2, %v895_v38  ;;  %v896_v44 = vpack.c.bf16 %v603_v40, %v603_v40  ;;  %v912_v45 = vpack.c.bf16 %v619_v41, %v619_v41  ;;  %v533_v46 = vmul.f32 %v1221_v48, %v429_v42  ;;  %v549_v47 = vmul.f32 %v1221_v48, %v493_v43  ;;  %v431_v49 = vpop.f32.mrb[21].mxu0  ;;  %v495_v51 = vpop.f32.mrb[21].mxu1 }
 0x136   :  { %779 = vst.msk [vmem:[%s1424_s4 + $0x60] sm:$0xf] %vm754_vm2, %v911_v39  ;;  %v432_v52 = vpop.f32.mrb[22].mxu0  ;;  %v496_v53 = vpop.f32.mrb[22].mxu1 }
 0x137   :  { %764 = vst.msk [vmem:[%s1424_s4 + $0x24] sm:$0xf] %vm754_vm2, %v896_v44  ;;  %780 = vst.msk [vmem:[%s1424_s4 + $0x64] sm:$0xf] %vm754_vm2, %v912_v45  ;;  %v572_v54 = vadd.f32 %v1226_v50, %v533_v46  ;;  %v588_v55 = vadd.f32 %v1226_v50, %v549_v47  ;;  %v534_v56 = vmul.f32 %v1221_v48, %v432_v52  ;;  %v434_v58 = vpop.f32.mrb[23].mxu0  ;;  %v498_v59 = vpop.f32.mrb[23].mxu1 }
 0x138   :  { %v550_v57 = vmul.f32 %v1221_v48, %v496_v53 }
 0x139   :  { %v604_v60 = vmax.f32 %v572_v54, 0.0  ;;  %v620_v61 = vmax.f32 %v588_v55, 0.0  ;;  %v573_v62 = vadd.f32 %v1226_v50, %v534_v56 }
 0x13a   :  { %v589_v63 = vadd.f32 %v1226_v50, %v550_v57 }
 0x13b   :  { %v897_v0 = vpack.c.bf16 %v604_v60, %v604_v60  ;;  %v913_v1 = vpack.c.bf16 %v620_v61, %v620_v61  ;;  %v605_v2 = vmax.f32 %v573_v62, 0.0 }
 0x13c   :  { %v621_v3 = vmax.f32 %v589_v63, 0.0  ;;  %v437_v4 = vpop.f32.mrb[24].mxu0  ;;  %v501_v5 = vpop.f32.mrb[24].mxu1 }
 0x13d   :  { %765 = vst.msk [vmem:[%s1424_s4 + $0x28] sm:$0xf] %vm754_vm2, %v897_v0  ;;  %781 = vst.msk [vmem:[%s1424_s4 + $0x68] sm:$0xf] %vm754_vm2, %v913_v1  ;;  %v898_v6 = vpack.c.bf16 %v605_v2, %v605_v2  ;;  %v535_v8 = vmul.f32 %v1221_v48, %v437_v4  ;;  %v551_v9 = vmul.f32 %v1221_v48, %v501_v5  ;;  %v439_v10 = vpop.f32.mrb[25].mxu0  ;;  %v503_v11 = vpop.f32.mrb[25].mxu1 }
 0x13e   :  { %v914_v7 = vpack.c.bf16 %v621_v3, %v621_v3  ;;  %v440_v12 = vpop.f32.mrb[26].mxu0  ;;  %v504_v13 = vpop.f32.mrb[26].mxu1 }
 0x13f   :  { %766 = vst.msk [vmem:[%s1424_s4 + $0x2c] sm:$0xf] %vm754_vm2, %v898_v6  ;;  %v574_v14 = vadd.f32 %v1226_v50, %v535_v8  ;;  %v590_v15 = vadd.f32 %v1226_v50, %v551_v9  ;;  %v536_v16 = vmul.f32 %v1221_v48, %v440_v12  ;;  %v552_v17 = vmul.f32 %v1221_v48, %v504_v13  ;;  %v442_v18 = vpop.f32.mrb[27].mxu0  ;;  %v506_v19 = vpop.f32.mrb[27].mxu1 }
 0x140   :  { %782 = vst.msk [vmem:[%s1424_s4 + $0x6c] sm:$0xf] %vm754_vm2, %v914_v7 }
 0x141   :  { %v606_v20 = vmax.f32 %v574_v14, 0.0  ;;  %v622_v21 = vmax.f32 %v590_v15, 0.0  ;;  %v575_v22 = vadd.f32 %v1226_v50, %v536_v16  ;;  %v591_v23 = vadd.f32 %v1226_v50, %v552_v17 }
 0x143   :  { %v899_v24 = vpack.c.bf16 %v606_v20, %v606_v20  ;;  %v915_v25 = vpack.c.bf16 %v622_v21, %v622_v21  ;;  %v607_v26 = vmax.f32 %v575_v22, 0.0  ;;  %v623_v27 = vmax.f32 %v591_v23, 0.0 }
 0x144   :  { %v445_v28 = vpop.f32.mrb[28].mxu0  ;;  %v509_v29 = vpop.f32.mrb[28].mxu1 }
 0x145   :  { %767 = vst.msk [vmem:[%s1424_s4 + $0x30] sm:$0xf] %vm754_vm2, %v899_v24  ;;  %783 = vst.msk [vmem:[%s1424_s4 + $0x70] sm:$0xf] %vm754_vm2, %v915_v25  ;;  %v900_v30 = vpack.c.bf16 %v607_v26, %v607_v26  ;;  %v916_v31 = vpack.c.bf16 %v623_v27, %v623_v27  ;;  %v537_v32 = vmul.f32 %v1221_v48, %v445_v28  ;;  %v447_v34 = vpop.f32.mrb[29].mxu0  ;;  %v511_v35 = vpop.f32.mrb[29].mxu1 }
 0x146   :  { %v553_v33 = vmul.f32 %v1221_v48, %v509_v29  ;;  %v448_v36 = vpop.f32.mrb[30].mxu0  ;;  %v512_v37 = vpop.f32.mrb[30].mxu1 }
 0x147   :  { %768 = vst.msk [vmem:[%s1424_s4 + $0x34] sm:$0xf] %vm754_vm2, %v900_v30  ;;  %784 = vst.msk [vmem:[%s1424_s4 + $0x74] sm:$0xf] %vm754_vm2, %v916_v31  ;;  %v576_v38 = vadd.f32 %v1226_v50, %v537_v32  ;;  %v538_v40 = vmul.f32 %v1221_v48, %v448_v36  ;;  %v554_v41 = vmul.f32 %v1221_v48, %v512_v37  ;;  %v450_v42 = vpop.f32.mrb[31].mxu0  ;;  %v514_v43 = vpop.f32.mrb[31].mxu1 }
 0x148   :  { %v592_v39 = vadd.f32 %v1226_v50, %v553_v33 }
 0x149   :  { %v608_v44 = vmax.f32 %v576_v38, 0.0  ;;  %v577_v46 = vadd.f32 %v1226_v50, %v538_v40  ;;  %v593_v47 = vadd.f32 %v1226_v50, %v554_v41 }
 0x14a   :  { %v624_v45 = vmax.f32 %v592_v39, 0.0 }
 0x14b   :  { %v901_v49 = vpack.c.bf16 %v608_v44, %v608_v44  ;;  %v609_v52 = vmax.f32 %v577_v46, 0.0  ;;  %v625_v53 = vmax.f32 %v593_v47, 0.0 }
 0x14c   :  { %v917_v51 = vpack.c.bf16 %v624_v45, %v624_v45 }
 0x14d   :  { %769 = vst.msk [vmem:[%s1424_s4 + $0x38] sm:$0xf] %vm754_vm2, %v901_v49  ;;  %v902_v48 = vpack.c.bf16 %v609_v52, %v609_v52  ;;  %v918_v54 = vpack.c.bf16 %v625_v53, %v625_v53 }
 0x14e   :  { %785 = vst.msk [vmem:[%s1424_s4 + $0x78] sm:$0xf] %vm754_vm2, %v917_v51 }
 0x14f   :  { %770 = vst.msk [vmem:[%s1424_s4 + $0x3c] sm:$0xf] %vm754_vm2, %v902_v48  ;;  %786 = vst.msk [vmem:[%s1424_s4 + $0x7c] sm:$0xf] %vm754_vm2, %v918_v54 }

// kernel: resnet_forward.14
= control target key start
LH: loop header
LB: loop body
LE: loop exit
PB: predicated region body
PF: predicated region fallthrough
CT: control target
= control target key end

     0   :  { %v1188_v0 = vmov 0   ;;  %vm305_vm0 = vcmask 719872   ;;  %vm354_vm1 = vcmask 1043456   ;;  %vm853_vm2 = vcmask 60416   ;;  %s1651_s1 = inlined_call_operand.vmem [shape: bf16[216,8], index: 1, kind: input, shape index: {}]   ;;  %s1652_s0 = inlined_call_operand.vmem [shape: bf16[256,216], index: 0, kind: input, shape index: {}]   ;;  %s1653_s2 = inlined_call_operand.vmem [shape: f32[1,8], index: 2, kind: input, shape index: {}]   ;;  %s1654_s4 = inlined_call_operand.vmem [shape: bf16[256,8], index: 4, kind: input, shape index: {}]   ;;  %s1655_s3 = inlined_call_operand.vmem [shape: f32[1,8], index: 3, kind: input, shape index: {}]   ;;  %s1656_s5 = inlined_call_operand.vmem [shape: bf16[256,8], index: 5, kind: output, shape index: {}]  }
   0x1   :  { %358 = vmatprep.subr.bf16.mxu0 %v1188_v0  ;;  %1097 = vmatprep.subr.bf16.mxu1 %v1188_v0  ;;  %v1126_v1 = vld [vmem:[%s1651_s1] sm:$0xff]   ;;  %v1127_v2 = vld [vmem:[%s1651_s1 + $0x8] sm:$0xff]   ;;  %v1128_v3 = vld [vmem:[%s1651_s1 + $0x10] sm:$0xff]  }
   0x2   :  { %359 = vmatpush1.bf16.msra.mxu0 %v1126_v1  ;;  %1111 = vmatpush1.bf16.msra.mxu1 %v1126_v1  ;;  %v1129_v4 = vld [vmem:[%s1651_s1 + $0x18] sm:$0xff]   ;;  %v1130_v5 = vld [vmem:[%s1651_s1 + $0x20] sm:$0xff]   ;;  %v1131_v8 = vld [vmem:[%s1651_s1 + $0x28] sm:$0xff]  }
   0x3   :  { %360 = vmatprep.subr.bf16.mxu0 %v1188_v0  ;;  %1098 = vmatprep.subr.bf16.mxu1 %v1188_v0  ;;  %v1142_v6 = vld [vmem:[%s1652_s0 + $0x4] ss:$8 sps:$4 sm:$0xff]   ;;  %v1132_v9 = vld [vmem:[%s1651_s1 + $0x30] sm:$0xff]   ;;  %v1133_v10 = vld [vmem:[%s1651_s1 + $0x38] sm:$0xff]  }
   0x4   :  { %936 = vmatprep.mubr.msk.bf16.mxu0 %vm305_vm0, %v1142_v6  ;;  %v1145_v7 = vld [vmem:[%s1652_s0 + $0x84] ss:$8 sps:$4 sm:$0xff]   ;;  %v1136_v13 = vld [vmem:[%s1651_s1 + $0x50] sm:$0xff]   ;;  %v1137_v14 = vld [vmem:[%s1651_s1 + $0x58] sm:$0xff]  }
   0x5   :  { %944 = vmatprep.mubr.msk.bf16.mxu1 %vm305_vm0, %v1145_v7  ;;  %v1134_v11 = vld [vmem:[%s1651_s1 + $0x40] sm:$0xff]   ;;  %v1135_v12 = vld [vmem:[%s1651_s1 + $0x48] sm:$0xff]   ;;  %v1146_v20 = vld [vmem:[%s1652_s0 + $0x14] ss:$8 sps:$4 sm:$0xff]  }
   0x6   :  { %361 = vmatpush1.bf16.msra.mxu0 %v1127_v2  ;;  %1112 = vmatpush1.bf16.msra.mxu1 %v1127_v2  ;;  %v1138_v15 = vld [vmem:[%s1651_s1 + $0x60] sm:$0xff]   ;;  %v1139_v16 = vld [vmem:[%s1651_s1 + $0x68] ss:$0 sps:$4 sm:$0xff]   ;;  %v1148_v21 = vld [vmem:[%s1652_s0 + $0x94] ss:$8 sps:$4 sm:$0xff]  }
   0x7   :  { %362 = vmatprep.subr.bf16.mxu0 %v1188_v0  ;;  %1099 = vmatprep.subr.bf16.mxu1 %v1188_v0  ;;  %v356_v17 = vsel %vm354_vm1, %v1139_v16, 0  ;;  %v1140_v18 = vld [vmem:[%s1652_s0] ss:$8 sps:$4 sm:$0xff]   ;;  %v1150_v22 = vld [vmem:[%s1652_s0 + $0x10] ss:$8 sps:$4 sm:$0xff]  }
   0x8   :  { %v1143_v19 = vld [vmem:[%s1652_s0 + $0x80] ss:$8 sps:$4 sm:$0xff]   ;;  %v1151_v23 = vld [vmem:[%s1652_s0 + $0x90] ss:$8 sps:$4 sm:$0xff]   ;;  %v1152_v24 = vld [vmem:[%s1652_s0 + $0x24] ss:$8 sps:$4 sm:$0xff]  }
   0x9   :  { %v1154_v25 = vld [vmem:[%s1652_s0 + $0xa4] ss:$8 sps:$4 sm:$0xff]   ;;  %v1156_v26 = vld [vmem:[%s1652_s0 + $0x20] ss:$8 sps:$4 sm:$0xff]   ;;  %v1158_v28 = vld [vmem:[%s1652_s0 + $0x34] ss:$8 sps:$4 sm:$0xff]  }
   0xa   :  { %363 = vmatpush1.bf16.msra.mxu0 %v1128_v3  ;;  %1113 = vmatpush1.bf16.msra.mxu1 %v1128_v3  ;;  %v1157_v27 = vld [vmem:[%s1652_s0 + $0xa0] ss:$8 sps:$4 sm:$0xff]   ;;  %v1160_v29 = vld [vmem:[%s1652_s0 + $0xb4] ss:$8 sps:$4 sm:$0xff]   ;;  %v1162_v30 = vld [vmem:[%s1652_s0 + $0x30] ss:$8 sps:$4 sm:$0xff]  }
   0xb   :  { %364 = vmatprep.subr.bf16.mxu0 %v1188_v0  ;;  %1100 = vmatprep.subr.bf16.mxu1 %v1188_v0  ;;  %v1163_v31 = vld [vmem:[%s1652_s0 + $0xb0] ss:$8 sps:$4 sm:$0xff]   ;;  %v1164_v32 = vld [vmem:[%s1652_s0 + $0x44] ss:$8 sps:$4 sm:$0xff]   ;;  %v1168_v34 = vld [vmem:[%s1652_s0 + $0x40] ss:$8 sps:$4 sm:$0xff]  }
   0xc   :  { %v1166_v33 = vld [vmem:[%s1652_s0 + $0xc4] ss:$8 sps:$4 sm:$0xff]   ;;  %v1169_v35 = vld [vmem:[%s1652_s0 + $0xc0] ss:$8 sps:$4 sm:$0xff]   ;;  %v1170_v36 = vld [vmem:[%s1652_s0 + $0x54] ss:$8 sps:$4 sm:$0xff]  }
   0xd   :  { %v1172_v37 = vld [vmem:[%s1652_s0 + $0xd4] ss:$8 sps:$4 sm:$0xff]   ;;  %v1174_v38 = vld [vmem:[%s1652_s0 + $0x50] ss:$8 sps:$4 sm:$0xff]   ;;  %v1176_v40 = vld [vmem:[%s1652_s0 + $0x64] ss:$8 sps:$4 sm:$0xff]  }
   0xe   :  { %365 = vmatpush1.bf16.msra.mxu0 %v1129_v4  ;;  %1114 = vmatpush1.bf16.msra.mxu1 %v1129_v4  ;;  %v1175_v39 = vld [vmem:[%s1652_s0 + $0xd0] ss:$8 sps:$4 sm:$0xff]   ;;  %v1178_v41 = vld [vmem:[%s1652_s0 + $0xe4] ss:$8 sps:$4 sm:$0xff]   ;;  %v1180_v42 = vld [vmem:[%s1652_s0 + $0x60] ss:$8 sps:$4 sm:$0xff]  }
   0xf   :  { %366 = vmatprep.subr.bf16.mxu0 %v1188_v0  ;;  %1101 = vmatprep.subr.bf16.mxu1 %v1188_v0  ;;  %v1181_v43 = vld [vmem:[%s1652_s0 + $0xe0] ss:$8 sps:$4 sm:$0xff]   ;;  %v1182_v44 = vld [vmem:[%s1652_s0 + $0x74] ss:$8 sps:$4 sm:$0xff]   ;;  %v1186_v46 = vld [vmem:[%s1652_s0 + $0x70] ss:$8 sps:$4 sm:$0xff]  }
  0x10   :  { %v1184_v45 = vld [vmem:[%s1652_s0 + $0xf4] ss:$8 sps:$4 sm:$0xff]   ;;  %v1187_v47 = vld [vmem:[%s1652_s0 + $0xf0] ss:$8 sps:$4 sm:$0xff]   ;;  %v1404_v48 = vld [vmem:[%s1653_s2] ss:$0 sm:$0xff] }
  0x11   :  { %v1019_v49 = vld [vmem:[%s1654_s4] sm:$0xff]  }
  0x12   :  { %367 = vmatpush1.bf16.msra.mxu0 %v1130_v5  ;;  %1115 = vmatpush1.bf16.msra.mxu1 %v1130_v5  ;;  %v1089_v50 = vld [vmem:[%s1654_s4 + $0x40] sm:$0xff]   ;;  %v1020_v55 = vunpack.c.l.bf16 %v1019_v49  ;;  %v1021_v61 = vunpack.c.h.bf16 %v1019_v49 }
  0x13   :  { %368 = vmatprep.subr.bf16.mxu0 %v1188_v0  ;;  %1102 = vmatprep.subr.bf16.mxu1 %v1188_v0  ;;  %v1415_v52 = vld [vmem:[%s1655_s3] ss:$0 sm:$0xff]  ;;  %v1052_v57 = vunpack.c.l.bf16 %v1089_v50  ;;  %v1053_v63 = vunpack.c.h.bf16 %v1089_v50 }
  0x16   :  { %369 = vmatpush1.bf16.msra.mxu0 %v1131_v8  ;;  %1116 = vmatpush1.bf16.msra.mxu1 %v1131_v8 }
  0x17   :  { %370 = vmatprep.subr.bf16.mxu0 %v1188_v0  ;;  %1103 = vmatprep.subr.bf16.mxu1 %v1188_v0 }
  0x1a   :  { %371 = vmatpush1.bf16.msra.mxu0 %v1132_v9  ;;  %1117 = vmatpush1.bf16.msra.mxu1 %v1132_v9 }
  0x1b   :  { %372 = vmatprep.subr.bf16.mxu0 %v1188_v0  ;;  %1104 = vmatprep.subr.bf16.mxu1 %v1188_v0 }
  0x1e   :  { %373 = vmatpush1.bf16.msra.mxu0 %v1133_v10  ;;  %1118 = vmatpush1.bf16.msra.mxu1 %v1133_v10  ;;  %v1082_v10 = vld [vmem:[%s1654_s4 + $0x8] sm:$0xff]  }
  0x1f   :  { %374 = vmatprep.subr.bf16.mxu0 %v1188_v0  ;;  %1105 = vmatprep.subr.bf16.mxu1 %v1188_v0 }
  0x22   :  { %375 = vmatpush1.bf16.msra.mxu0 %v1134_v11  ;;  %1119 = vmatpush1.bf16.msra.mxu1 %v1134_v11  ;;  %v1090_v11 = vld [vmem:[%s1654_s4 + $0x48] sm:$0xff]  }
  0x23   :  { %376 = vmatprep.subr.bf16.mxu0 %v1188_v0  ;;  %1106 = vmatprep.subr.bf16.mxu1 %v1188_v0 }
  0x26   :  { %377 = vmatpush1.bf16.msra.mxu0 %v1135_v12  ;;  %1120 = vmatpush1.bf16.msra.mxu1 %v1135_v12 }
  0x27   :  { %378 = vmatprep.subr.bf16.mxu0 %v1188_v0  ;;  %1107 = vmatprep.subr.bf16.mxu1 %v1188_v0 }
  0x2a   :  { %379 = vmatpush1.bf16.msra.mxu0 %v1136_v13  ;;  %1121 = vmatpush1.bf16.msra.mxu1 %v1136_v13 }
  0x2b   :  { %380 = vmatprep.subr.bf16.mxu0 %v1188_v0  ;;  %1108 = vmatprep.subr.bf16.mxu1 %v1188_v0 }
  0x2e   :  { %381 = vmatpush1.bf16.msra.mxu0 %v1137_v14  ;;  %1122 = vmatpush1.bf16.msra.mxu1 %v1137_v14 }
  0x2f   :  { %382 = vmatprep.subr.bf16.mxu0 %v1188_v0  ;;  %1109 = vmatprep.subr.bf16.mxu1 %v1188_v0 }
  0x32   :  { %383 = vmatpush1.bf16.msra.mxu0 %v1138_v15  ;;  %1123 = vmatpush1.bf16.msra.mxu1 %v1138_v15 }
  0x33   :  { %384 = vmatprep.subr.bf16.mxu0 %v1188_v0  ;;  %1110 = vmatprep.subr.bf16.mxu1 %v1188_v0 }
  0x36   :  { %385 = vmatpush1.bf16.msra.mxu0 %v356_v17  ;;  %1124 = vmatpush1.bf16.msra.mxu1 %v356_v17  ;;  %v1024_v17 = vunpack.c.l.bf16 %v1082_v10 }
  0x39   :  { %391 = vmatmul.mubr.bf16.vlgmr.msra.gmra.mrb[0].mxu0 %v1140_v18  ;;  %455 = vmatmul.mubr.bf16.vlgmr.msra.gmra.mrb[0].mxu1 %v1143_v19  ;;  %v1056_v19 = vunpack.c.l.bf16 %v1090_v11 }
  0x3a   :  { %937 = vmatprep.mubr.msk.bf16.mxu0 %vm305_vm0, %v1146_v20  ;;  %945 = vmatprep.mubr.msk.bf16.mxu1 %vm305_vm0, %v1148_v21 }
  0x41   :  { %399 = vmatmul.mubr.bf16.gmra.mrb[4].mxu0 %v1150_v22  ;;  %463 = vmatmul.mubr.bf16.gmra.mrb[4].mxu1 %v1151_v23 }
  0x42   :  { %938 = vmatprep.mubr.msk.bf16.mxu0 %vm305_vm0, %v1152_v24  ;;  %946 = vmatprep.mubr.msk.bf16.mxu1 %vm305_vm0, %v1154_v25 }
  0x49   :  { %407 = vmatmul.mubr.bf16.gmra.mrb[8].mxu0 %v1156_v26  ;;  %471 = vmatmul.mubr.bf16.gmra.mrb[8].mxu1 %v1157_v27 }
  0x4a   :  { %939 = vmatprep.mubr.msk.bf16.mxu0 %vm305_vm0, %v1158_v28  ;;  %947 = vmatprep.mubr.msk.bf16.mxu1 %vm305_vm0, %v1160_v29  ;;  %v1025_v29 = vunpack.c.h.bf16 %v1082_v10 }
  0x51   :  { %415 = vmatmul.mubr.bf16.gmra.mrb[12].mxu0 %v1162_v30  ;;  %479 = vmatmul.mubr.bf16.gmra.mrb[12].mxu1 %v1163_v31  ;;  %v1057_v31 = vunpack.c.h.bf16 %v1090_v11 }
  0x52   :  { %940 = vmatprep.mubr.msk.bf16.mxu0 %vm305_vm0, %v1164_v32  ;;  %948 = vmatprep.mubr.msk.bf16.mxu1 %vm305_vm0, %v1166_v33 }
  0x59   :  { %423 = vmatmul.mubr.bf16.gmra.mrb[16].mxu0 %v1168_v34  ;;  %487 = vmatmul.mubr.bf16.gmra.mrb[16].mxu1 %v1169_v35 }
  0x5a   :  { %941 = vmatprep.mubr.msk.bf16.mxu0 %vm305_vm0, %v1170_v36  ;;  %949 = vmatprep.mubr.msk.bf16.mxu1 %vm305_vm0, %v1172_v37 }
  0x61   :  { %431 = vmatmul.mubr.bf16.gmra.mrb[20].mxu0 %v1174_v38  ;;  %495 = vmatmul.mubr.bf16.gmra.mrb[20].mxu1 %v1175_v39 }
  0x62   :  { %942 = vmatprep.mubr.msk.bf16.mxu0 %vm305_vm0, %v1176_v40  ;;  %950 = vmatprep.mubr.msk.bf16.mxu1 %vm305_vm0, %v1178_v41 }
  0x69   :  { %439 = vmatmul.mubr.bf16.gmra.mrb[24].mxu0 %v1180_v42  ;;  %503 = vmatmul.mubr.bf16.gmra.mrb[24].mxu1 %v1181_v43  ;;  %v1083_v42 = vld [vmem:[%s1654_s4 + $0x10] sm:$0xff]  }
  0x6a   :  { %943 = vmatprep.mubr.msk.bf16.mxu0 %vm305_vm0, %v1182_v44  ;;  %951 = vmatprep.mubr.msk.bf16.mxu1 %vm305_vm0, %v1184_v45  ;;  %v1091_v43 = vld [vmem:[%s1654_s4 + $0x50] sm:$0xff]  }
  0x6b   :  { %v1061_v11 = vunpack.c.h.bf16 %v1091_v43 }
  0x71   :  { %447 = vmatmul.mubr.bf16.gmra.mrb[28].mxu0 %v1186_v46  ;;  %511 = vmatmul.mubr.bf16.gmra.mrb[28].mxu1 %v1187_v47 }
 0x10c   :  { %v392_v51 = vpop.f32.mrb[0].mxu0  ;;  %v456_v53 = vpop.f32.mrb[0].mxu1 }
 0x10d   :  { %v526_v54 = vmul.f32 %v1404_v48, %v392_v51  ;;  %v542_v56 = vmul.f32 %v1404_v48, %v456_v53  ;;  %v394_v58 = vpop.f32.mrb[1].mxu0  ;;  %v458_v59 = vpop.f32.mrb[1].mxu1  ;;  %v1028_v53 = vunpack.c.l.bf16 %v1083_v42 }
 0x10e   :  { %v395_v60 = vpop.f32.mrb[2].mxu0  ;;  %v459_v62 = vpop.f32.mrb[2].mxu1 }
 0x10f   :  { %v565_v0 = vadd.f32 %v1415_v52, %v526_v54  ;;  %v581_v1 = vadd.f32 %v1415_v52, %v542_v56  ;;  %v527_v2 = vmul.f32 %v1404_v48, %v395_v60  ;;  %v543_v3 = vmul.f32 %v1404_v48, %v459_v62  ;;  %v397_v4 = vpop.f32.mrb[3].mxu0  ;;  %v461_v5 = vpop.f32.mrb[3].mxu1 }
 0x111   :  { %v661_v6 = vadd.f32 %v1020_v55, %v565_v0  ;;  %v677_v7 = vadd.f32 %v1052_v57, %v581_v1  ;;  %v566_v8 = vadd.f32 %v1415_v52, %v527_v2  ;;  %v582_v9 = vadd.f32 %v1415_v52, %v543_v3 }
 0x112   :  { %v1060_v55 = vunpack.c.l.bf16 %v1091_v43 }
 0x113   :  { %v693_v12 = vmax.f32 %v661_v6, 0.0  ;;  %v709_v13 = vmax.f32 %v677_v7, 0.0  ;;  %v662_v14 = vadd.f32 %v1021_v61, %v566_v8  ;;  %v678_v15 = vadd.f32 %v1053_v63, %v582_v9 }
 0x114   :  { %v400_v16 = vpop.f32.mrb[4].mxu0  ;;  %v464_v18 = vpop.f32.mrb[4].mxu1  ;;  %v1029_v9 = vunpack.c.h.bf16 %v1083_v42 }
 0x115   :  { %v986_v20 = vpack.c.bf16 %v693_v12, %v693_v12  ;;  %v1002_v21 = vpack.c.bf16 %v709_v13, %v709_v13  ;;  %v694_v22 = vmax.f32 %v662_v14, 0.0  ;;  %v710_v23 = vmax.f32 %v678_v15, 0.0  ;;  %v402_v24 = vpop.f32.mrb[5].mxu0  ;;  %v466_v25 = vpop.f32.mrb[5].mxu1  ;;  %v1084_v14 = vld [vmem:[%s1654_s4 + $0x18] sm:$0xff]  }
 0x116   :  { %v528_v26 = vmul.f32 %v1404_v48, %v400_v16  ;;  %v544_v27 = vmul.f32 %v1404_v48, %v464_v18  ;;  %v403_v28 = vpop.f32.mrb[6].mxu0  ;;  %v467_v30 = vpop.f32.mrb[6].mxu1  ;;  %v1092_v15 = vld [vmem:[%s1654_s4 + $0x58] sm:$0xff]  }
 0x117   :  { %854 = vst.msk [vmem:[%s1656_s5] sm:$0xf] %vm853_vm2, %v986_v20  ;;  %870 = vst.msk [vmem:[%s1656_s5 + $0x40] sm:$0xf] %vm853_vm2, %v1002_v21  ;;  %v987_v32 = vpack.c.bf16 %v694_v22, %v694_v22  ;;  %v1003_v33 = vpack.c.bf16 %v710_v23, %v710_v23  ;;  %v529_v34 = vmul.f32 %v1404_v48, %v403_v28  ;;  %v405_v36 = vpop.f32.mrb[7].mxu0  ;;  %v469_v37 = vpop.f32.mrb[7].mxu1  ;;  %v1032_v23 = vunpack.c.l.bf16 %v1084_v14 }
 0x118   :  { %v545_v35 = vmul.f32 %v1404_v48, %v467_v30  ;;  %v567_v38 = vadd.f32 %v1415_v52, %v528_v26  ;;  %v583_v39 = vadd.f32 %v1415_v52, %v544_v27  ;;  %v1064_v25 = vunpack.c.l.bf16 %v1092_v15 }
 0x119   :  { %855 = vst.msk [vmem:[%s1656_s5 + $0x4] sm:$0xf] %vm853_vm2, %v987_v32  ;;  %871 = vst.msk [vmem:[%s1656_s5 + $0x44] sm:$0xf] %vm853_vm2, %v1003_v33  ;;  %v568_v40 = vadd.f32 %v1415_v52, %v529_v34  ;;  %v1065_v37 = vunpack.c.h.bf16 %v1092_v15 }
 0x11a   :  { %v584_v41 = vadd.f32 %v1415_v52, %v545_v35  ;;  %v663_v44 = vadd.f32 %v1024_v17, %v567_v38  ;;  %v679_v45 = vadd.f32 %v1056_v19, %v583_v39  ;;  %v1033_v35 = vunpack.c.h.bf16 %v1084_v14 }
 0x11b   :  { %v664_v46 = vadd.f32 %v1025_v29, %v568_v40 }
 0x11c   :  { %v680_v47 = vadd.f32 %v1057_v31, %v584_v41  ;;  %v695_v49 = vmax.f32 %v663_v44, 0.0  ;;  %v711_v50 = vmax.f32 %v679_v45, 0.0  ;;  %v408_v51 = vpop.f32.mrb[8].mxu0  ;;  %v472_v54 = vpop.f32.mrb[8].mxu1 }
 0x11d   :  { %v696_v56 = vmax.f32 %v664_v46, 0.0  ;;  %v530_v58 = vmul.f32 %v1404_v48, %v408_v51  ;;  %v546_v59 = vmul.f32 %v1404_v48, %v472_v54  ;;  %v410_v60 = vpop.f32.mrb[9].mxu0  ;;  %v474_v61 = vpop.f32.mrb[9].mxu1  ;;  %v1085_v51 = vld [vmem:[%s1654_s4 + $0x20] sm:$0xff]  }
 0x11e   :  { %v712_v57 = vmax.f32 %v680_v47, 0.0  ;;  %v988_v62 = vpack.c.bf16 %v695_v49, %v695_v49  ;;  %v1004_v63 = vpack.c.bf16 %v711_v50, %v711_v50  ;;  %v411_v0 = vpop.f32.mrb[10].mxu0  ;;  %v475_v1 = vpop.f32.mrb[10].mxu1 }
 0x11f   :  { %v989_v2 = vpack.c.bf16 %v696_v56, %v696_v56  ;;  %v569_v4 = vadd.f32 %v1415_v52, %v530_v58  ;;  %v585_v5 = vadd.f32 %v1415_v52, %v546_v59  ;;  %v413_v6 = vpop.f32.mrb[11].mxu0  ;;  %v477_v7 = vpop.f32.mrb[11].mxu1  ;;  %v531_v8 = vmul.f32 %v1404_v48, %v411_v0 }
 0x120   :  { %v1005_v3 = vpack.c.bf16 %v712_v57, %v712_v57  ;;  %856 = vst.msk [vmem:[%s1656_s5 + $0x8] sm:$0xf] %vm853_vm2, %v988_v62  ;;  %872 = vst.msk [vmem:[%s1656_s5 + $0x48] sm:$0xf] %vm853_vm2, %v1004_v63  ;;  %v547_v10 = vmul.f32 %v1404_v48, %v475_v1  ;;  %v1036_v59 = vunpack.c.l.bf16 %v1085_v51  ;;  %v1037_v7 = vunpack.c.h.bf16 %v1085_v51 }
 0x121   :  { %857 = vst.msk [vmem:[%s1656_s5 + $0xc] sm:$0xf] %vm853_vm2, %v989_v2  ;;  %v665_v12 = vadd.f32 %v1028_v53, %v569_v4  ;;  %v681_v13 = vadd.f32 %v1060_v55, %v585_v5  ;;  %v570_v16 = vadd.f32 %v1415_v52, %v531_v8  ;;  %v1093_v53 = vld [vmem:[%s1654_s4 + $0x60] sm:$0xff]  }
 0x122   :  { %873 = vst.msk [vmem:[%s1656_s5 + $0x4c] sm:$0xf] %vm853_vm2, %v1005_v3  ;;  %v586_v17 = vadd.f32 %v1415_v52, %v547_v10  ;;  %v1068_v61 = vunpack.c.l.bf16 %v1093_v53 }
 0x123   :  { %v697_v18 = vmax.f32 %v665_v12, 0.0  ;;  %v713_v19 = vmax.f32 %v681_v13, 0.0  ;;  %v666_v20 = vadd.f32 %v1029_v9, %v570_v16  ;;  %v1069_v9 = vunpack.c.h.bf16 %v1093_v53 }
 0x124   :  { %v682_v21 = vadd.f32 %v1061_v11, %v586_v17  ;;  %v416_v22 = vpop.f32.mrb[12].mxu0  ;;  %v480_v24 = vpop.f32.mrb[12].mxu1 }
 0x125   :  { %v990_v26 = vpack.c.bf16 %v697_v18, %v697_v18  ;;  %v1006_v27 = vpack.c.bf16 %v713_v19, %v713_v19  ;;  %v532_v28 = vmul.f32 %v1404_v48, %v416_v22  ;;  %v548_v29 = vmul.f32 %v1404_v48, %v480_v24  ;;  %v418_v30 = vpop.f32.mrb[13].mxu0  ;;  %v482_v31 = vpop.f32.mrb[13].mxu1 }
 0x126   :  { %v698_v32 = vmax.f32 %v666_v20, 0.0  ;;  %v714_v33 = vmax.f32 %v682_v21, 0.0  ;;  %v419_v34 = vpop.f32.mrb[14].mxu0  ;;  %v483_v36 = vpop.f32.mrb[14].mxu1  ;;  %v1086_v20 = vld [vmem:[%s1654_s4 + $0x28] sm:$0xff]  }
 0x127   :  { %858 = vst.msk [vmem:[%s1656_s5 + $0x10] sm:$0xf] %vm853_vm2, %v990_v26  ;;  %874 = vst.msk [vmem:[%s1656_s5 + $0x50] sm:$0xf] %vm853_vm2, %v1006_v27  ;;  %v571_v38 = vadd.f32 %v1415_v52, %v532_v28  ;;  %v587_v39 = vadd.f32 %v1415_v52, %v548_v29  ;;  %v533_v40 = vmul.f32 %v1404_v48, %v419_v34  ;;  %v421_v42 = vpop.f32.mrb[15].mxu0  ;;  %v485_v43 = vpop.f32.mrb[15].mxu1  ;;  %v1040_v29 = vunpack.c.l.bf16 %v1086_v20 }
 0x128   :  { %v549_v41 = vmul.f32 %v1404_v48, %v483_v36  ;;  %v991_v44 = vpack.c.bf16 %v698_v32, %v698_v32  ;;  %v1007_v45 = vpack.c.bf16 %v714_v33, %v714_v33  ;;  %v1094_v21 = vld [vmem:[%s1654_s4 + $0x68] sm:$0xff]  }
 0x129   :  { %v667_v46 = vadd.f32 %v1032_v23, %v571_v38  ;;  %v683_v47 = vadd.f32 %v1064_v25, %v587_v39  ;;  %v572_v49 = vadd.f32 %v1415_v52, %v533_v40  ;;  %v1072_v31 = vunpack.c.l.bf16 %v1094_v21 }
 0x12a   :  { %v588_v50 = vadd.f32 %v1415_v52, %v549_v41  ;;  %859 = vst.msk [vmem:[%s1656_s5 + $0x14] sm:$0xf] %vm853_vm2, %v991_v44  ;;  %875 = vst.msk [vmem:[%s1656_s5 + $0x54] sm:$0xf] %vm853_vm2, %v1007_v45  ;;  %v1073_v53 = vunpack.c.h.bf16 %v1094_v21 }
 0x12b   :  { %v699_v54 = vmax.f32 %v667_v46, 0.0  ;;  %v715_v55 = vmax.f32 %v683_v47, 0.0  ;;  %v668_v56 = vadd.f32 %v1033_v35, %v572_v49 }
 0x12c   :  { %v684_v57 = vadd.f32 %v1065_v37, %v588_v50  ;;  %v424_v58 = vpop.f32.mrb[16].mxu0  ;;  %v488_v60 = vpop.f32.mrb[16].mxu1  ;;  %v1041_v50 = vunpack.c.h.bf16 %v1086_v20 }
 0x12d   :  { %v992_v62 = vpack.c.bf16 %v699_v54, %v699_v54  ;;  %v1008_v63 = vpack.c.bf16 %v715_v55, %v715_v55  ;;  %v700_v0 = vmax.f32 %v668_v56, 0.0  ;;  %v426_v2 = vpop.f32.mrb[17].mxu0  ;;  %v490_v3 = vpop.f32.mrb[17].mxu1  ;;  %v534_v4 = vmul.f32 %v1404_v48, %v424_v58  ;;  %v1087_v56 = vld [vmem:[%s1654_s4 + $0x30] sm:$0xff]  }
 0x12e   :  { %v716_v1 = vmax.f32 %v684_v57, 0.0  ;;  %v550_v5 = vmul.f32 %v1404_v48, %v488_v60  ;;  %v427_v6 = vpop.f32.mrb[18].mxu0  ;;  %v491_v8 = vpop.f32.mrb[18].mxu1  ;;  %v1095_v57 = vld [vmem:[%s1654_s4 + $0x70] sm:$0xff]  }
 0x12f   :  { %860 = vst.msk [vmem:[%s1656_s5 + $0x18] sm:$0xf] %vm853_vm2, %v992_v62  ;;  %876 = vst.msk [vmem:[%s1656_s5 + $0x58] sm:$0xf] %vm853_vm2, %v1008_v63  ;;  %v993_v10 = vpack.c.bf16 %v700_v0, %v700_v0  ;;  %v535_v12 = vmul.f32 %v1404_v48, %v427_v6  ;;  %v551_v13 = vmul.f32 %v1404_v48, %v491_v8  ;;  %v429_v14 = vpop.f32.mrb[19].mxu0  ;;  %v493_v15 = vpop.f32.mrb[19].mxu1  ;;  %v1076_v3 = vunpack.c.l.bf16 %v1095_v57 }
 0x130   :  { %v1009_v11 = vpack.c.bf16 %v716_v1, %v716_v1  ;;  %v573_v16 = vadd.f32 %v1415_v52, %v534_v4  ;;  %v589_v17 = vadd.f32 %v1415_v52, %v550_v5  ;;  %v1044_v1 = vunpack.c.l.bf16 %v1087_v56 }
 0x131   :  { %861 = vst.msk [vmem:[%s1656_s5 + $0x1c] sm:$0xf] %vm853_vm2, %v993_v10  ;;  %v574_v18 = vadd.f32 %v1415_v52, %v535_v12  ;;  %v590_v19 = vadd.f32 %v1415_v52, %v551_v13  ;;  %v1045_v13 = vunpack.c.h.bf16 %v1087_v56  ;;  %v1077_v15 = vunpack.c.h.bf16 %v1095_v57 }
 0x132   :  { %877 = vst.msk [vmem:[%s1656_s5 + $0x5c] sm:$0xf] %vm853_vm2, %v1009_v11  ;;  %v669_v22 = vadd.f32 %v1036_v59, %v573_v16  ;;  %v685_v23 = vadd.f32 %v1068_v61, %v589_v17 }
 0x133   :  { %v670_v24 = vadd.f32 %v1037_v7, %v574_v18  ;;  %v686_v25 = vadd.f32 %v1069_v9, %v590_v19 }
 0x134   :  { %v701_v26 = vmax.f32 %v669_v22, 0.0  ;;  %v717_v27 = vmax.f32 %v685_v23, 0.0  ;;  %v432_v28 = vpop.f32.mrb[20].mxu0  ;;  %v496_v30 = vpop.f32.mrb[20].mxu1 }
 0x135   :  { %v702_v32 = vmax.f32 %v670_v24, 0.0  ;;  %v718_v33 = vmax.f32 %v686_v25, 0.0  ;;  %v536_v34 = vmul.f32 %v1404_v48, %v432_v28  ;;  %v552_v35 = vmul.f32 %v1404_v48, %v496_v30  ;;  %v434_v36 = vpop.f32.mrb[21].mxu0  ;;  %v498_v37 = vpop.f32.mrb[21].mxu1  ;;  %v1088_v28 = vld [vmem:[%s1654_s4 + $0x38] sm:$0xff]  }
 0x136   :  { %v994_v38 = vpack.c.bf16 %v701_v26, %v701_v26  ;;  %v1010_v39 = vpack.c.bf16 %v717_v27, %v717_v27  ;;  %v435_v40 = vpop.f32.mrb[22].mxu0  ;;  %v499_v41 = vpop.f32.mrb[22].mxu1 }
 0x137   :  { %v995_v42 = vpack.c.bf16 %v702_v32, %v702_v32  ;;  %v1011_v43 = vpack.c.bf16 %v718_v33, %v718_v33  ;;  %v575_v44 = vadd.f32 %v1415_v52, %v536_v34  ;;  %v591_v45 = vadd.f32 %v1415_v52, %v552_v35  ;;  %v437_v46 = vpop.f32.mrb[23].mxu0  ;;  %v501_v47 = vpop.f32.mrb[23].mxu1 }
 0x138   :  { %862 = vst.msk [vmem:[%s1656_s5 + $0x20] sm:$0xf] %vm853_vm2, %v994_v38  ;;  %878 = vst.msk [vmem:[%s1656_s5 + $0x60] sm:$0xf] %vm853_vm2, %v1010_v39  ;;  %v537_v49 = vmul.f32 %v1404_v48, %v435_v40  ;;  %v553_v51 = vmul.f32 %v1404_v48, %v499_v41  ;;  %v1048_v35 = vunpack.c.l.bf16 %v1088_v28  ;;  %v1049_v47 = vunpack.c.h.bf16 %v1088_v28 }
 0x139   :  { %863 = vst.msk [vmem:[%s1656_s5 + $0x24] sm:$0xf] %vm853_vm2, %v995_v42  ;;  %879 = vst.msk [vmem:[%s1656_s5 + $0x64] sm:$0xf] %vm853_vm2, %v1011_v43  ;;  %v671_v54 = vadd.f32 %v1040_v29, %v575_v44  ;;  %v687_v55 = vadd.f32 %v1072_v31, %v591_v45  ;;  %v1096_v29 = vld [vmem:[%s1654_s4 + $0x78] sm:$0xff]  }
 0x13a   :  { %v576_v58 = vadd.f32 %v1415_v52, %v537_v49  ;;  %v592_v59 = vadd.f32 %v1415_v52, %v553_v51  ;;  %v1080_v37 = vunpack.c.l.bf16 %v1096_v29 }
 0x13b   :  { %v703_v60 = vmax.f32 %v671_v54, 0.0  ;;  %v719_v61 = vmax.f32 %v687_v55, 0.0 }
 0x13c   :  { %v672_v62 = vadd.f32 %v1041_v50, %v576_v58  ;;  %v688_v63 = vadd.f32 %v1073_v53, %v592_v59  ;;  %v440_v0 = vpop.f32.mrb[24].mxu0  ;;  %v504_v2 = vpop.f32.mrb[24].mxu1  ;;  %v1081_v50 = vunpack.c.h.bf16 %v1096_v29 }
 0x13d   :  { %v996_v4 = vpack.c.bf16 %v703_v60, %v703_v60  ;;  %v1012_v5 = vpack.c.bf16 %v719_v61, %v719_v61  ;;  %v538_v6 = vmul.f32 %v1404_v48, %v440_v0  ;;  %v554_v7 = vmul.f32 %v1404_v48, %v504_v2  ;;  %v442_v8 = vpop.f32.mrb[25].mxu0  ;;  %v506_v9 = vpop.f32.mrb[25].mxu1 }
 0x13e   :  { %v704_v10 = vmax.f32 %v672_v62, 0.0  ;;  %v720_v11 = vmax.f32 %v688_v63, 0.0  ;;  %v443_v12 = vpop.f32.mrb[26].mxu0  ;;  %v507_v14 = vpop.f32.mrb[26].mxu1 }
 0x13f   :  { %864 = vst.msk [vmem:[%s1656_s5 + $0x28] sm:$0xf] %vm853_vm2, %v996_v4  ;;  %880 = vst.msk [vmem:[%s1656_s5 + $0x68] sm:$0xf] %vm853_vm2, %v1012_v5  ;;  %v577_v16 = vadd.f32 %v1415_v52, %v538_v6  ;;  %v593_v17 = vadd.f32 %v1415_v52, %v554_v7  ;;  %v539_v18 = vmul.f32 %v1404_v48, %v443_v12  ;;  %v445_v20 = vpop.f32.mrb[27].mxu0  ;;  %v509_v21 = vpop.f32.mrb[27].mxu1 }
 0x140   :  { %v555_v19 = vmul.f32 %v1404_v48, %v507_v14  ;;  %v997_v22 = vpack.c.bf16 %v704_v10, %v704_v10  ;;  %v1013_v23 = vpack.c.bf16 %v720_v11, %v720_v11 }
 0x141   :  { %v673_v24 = vadd.f32 %v1044_v1, %v577_v16  ;;  %v689_v25 = vadd.f32 %v1076_v3, %v593_v17  ;;  %v578_v26 = vadd.f32 %v1415_v52, %v539_v18 }
 0x142   :  { %v594_v27 = vadd.f32 %v1415_v52, %v555_v19  ;;  %865 = vst.msk [vmem:[%s1656_s5 + $0x2c] sm:$0xf] %vm853_vm2, %v997_v22  ;;  %881 = vst.msk [vmem:[%s1656_s5 + $0x6c] sm:$0xf] %vm853_vm2, %v1013_v23 }
 0x143   :  { %v705_v30 = vmax.f32 %v673_v24, 0.0  ;;  %v721_v31 = vmax.f32 %v689_v25, 0.0  ;;  %v674_v32 = vadd.f32 %v1045_v13, %v578_v26 }
 0x144   :  { %v690_v33 = vadd.f32 %v1077_v15, %v594_v27  ;;  %v448_v34 = vpop.f32.mrb[28].mxu0  ;;  %v512_v36 = vpop.f32.mrb[28].mxu1 }
 0x145   :  { %v998_v38 = vpack.c.bf16 %v705_v30, %v705_v30  ;;  %v1014_v39 = vpack.c.bf16 %v721_v31, %v721_v31  ;;  %v706_v40 = vmax.f32 %v674_v32, 0.0  ;;  %v450_v42 = vpop.f32.mrb[29].mxu0  ;;  %v514_v43 = vpop.f32.mrb[29].mxu1  ;;  %v540_v44 = vmul.f32 %v1404_v48, %v448_v34 }
 0x146   :  { %v722_v41 = vmax.f32 %v690_v33, 0.0  ;;  %v556_v45 = vmul.f32 %v1404_v48, %v512_v36  ;;  %v451_v46 = vpop.f32.mrb[30].mxu0  ;;  %v515_v49 = vpop.f32.mrb[30].mxu1 }
 0x147   :  { %866 = vst.msk [vmem:[%s1656_s5 + $0x30] sm:$0xf] %vm853_vm2, %v998_v38  ;;  %882 = vst.msk [vmem:[%s1656_s5 + $0x70] sm:$0xf] %vm853_vm2, %v1014_v39  ;;  %v999_v51 = vpack.c.bf16 %v706_v40, %v706_v40  ;;  %v541_v54 = vmul.f32 %v1404_v48, %v451_v46  ;;  %v557_v55 = vmul.f32 %v1404_v48, %v515_v49  ;;  %v453_v56 = vpop.f32.mrb[31].mxu0  ;;  %v517_v57 = vpop.f32.mrb[31].mxu1 }
 0x148   :  { %v1015_v53 = vpack.c.bf16 %v722_v41, %v722_v41  ;;  %v579_v58 = vadd.f32 %v1415_v52, %v540_v44  ;;  %v595_v59 = vadd.f32 %v1415_v52, %v556_v45 }
 0x149   :  { %867 = vst.msk [vmem:[%s1656_s5 + $0x34] sm:$0xf] %vm853_vm2, %v999_v51  ;;  %v580_v60 = vadd.f32 %v1415_v52, %v541_v54  ;;  %v596_v48 = vadd.f32 %v1415_v52, %v557_v55 }
 0x14a   :  { %883 = vst.msk [vmem:[%s1656_s5 + $0x74] sm:$0xf] %vm853_vm2, %v1015_v53  ;;  %v675_v61 = vadd.f32 %v1048_v35, %v579_v58  ;;  %v691_v62 = vadd.f32 %v1080_v37, %v595_v59 }
 0x14b   :  { %v676_v63 = vadd.f32 %v1049_v47, %v580_v60  ;;  %v692_v0 = vadd.f32 %v1081_v50, %v596_v48 }
 0x14c   :  { %v707_v1 = vmax.f32 %v675_v61, 0.0  ;;  %v723_v2 = vmax.f32 %v691_v62, 0.0 }
 0x14d   :  { %v708_v3 = vmax.f32 %v676_v63, 0.0  ;;  %v724_v4 = vmax.f32 %v692_v0, 0.0 }
 0x14e   :  { %v1000_v5 = vpack.c.bf16 %v707_v1, %v707_v1  ;;  %v1016_v6 = vpack.c.bf16 %v723_v2, %v723_v2 }
 0x14f   :  { %v1001_v7 = vpack.c.bf16 %v708_v3, %v708_v3  ;;  %v1017_v8 = vpack.c.bf16 %v724_v4, %v724_v4 }
 0x150   :  { %868 = vst.msk [vmem:[%s1656_s5 + $0x38] sm:$0xf] %vm853_vm2, %v1000_v5  ;;  %884 = vst.msk [vmem:[%s1656_s5 + $0x78] sm:$0xf] %vm853_vm2, %v1016_v6 }
 0x151   :  { %869 = vst.msk [vmem:[%s1656_s5 + $0x3c] sm:$0xf] %vm853_vm2, %v1001_v7  ;;  %885 = vst.msk [vmem:[%s1656_s5 + $0x7c] sm:$0xf] %vm853_vm2, %v1017_v8 }

// kernel: resnet_forward.16
= control target key start
LH: loop header
LB: loop body
LE: loop exit
PB: predicated region body
PF: predicated region fallthrough
CT: control target
= control target key end

     0   :  { %v434_v0 = vmov 0   ;;  %vm170_vm0 = vcmask 719872   ;;  %vm183_vm1 = vcmask 1043456   ;;  %vm322_vm2 = vcmask 125952   ;;  %s596_s1 = inlined_call_operand.vmem [shape: bf16[216,16], index: 1, kind: input, shape index: {}]   ;;  %s597_s0 = inlined_call_operand.vmem [shape: bf16[64,216], index: 0, kind: input, shape index: {}]   ;;  %s598_s2 = inlined_call_operand.vmem [shape: f32[1,16], index: 2, kind: input, shape index: {}]   ;;  %s599_s3 = inlined_call_operand.vmem [shape: f32[1,16], index: 3, kind: input, shape index: {}]   ;;  %s600_s4 = inlined_call_operand.vmem [shape: bf16[64,16], index: 4, kind: output, shape index: {}]  }
   0x1   :  { %187 = vmatprep.subr.bf16.mxu0 %v434_v0  ;;  %379 = vmatprep.subr.bf16.mxu1 %v434_v0  ;;  %v408_v1 = vld [vmem:[%s596_s1] sm:$0xff]   ;;  %v409_v2 = vld [vmem:[%s596_s1 + $0x8] sm:$0xff]   ;;  %v410_v3 = vld [vmem:[%s596_s1 + $0x10] sm:$0xff]  }
   0x2   :  { %188 = vmatpush1.bf16.msra.mxu0 %v408_v1  ;;  %393 = vmatpush1.bf16.msra.mxu1 %v408_v1  ;;  %v411_v4 = vld [vmem:[%s596_s1 + $0x18] sm:$0xff]   ;;  %v412_v5 = vld [vmem:[%s596_s1 + $0x20] sm:$0xff]   ;;  %v413_v8 = vld [vmem:[%s596_s1 + $0x28] sm:$0xff]  }
   0x3   :  { %189 = vmatprep.subr.bf16.mxu0 %v434_v0  ;;  %380 = vmatprep.subr.bf16.mxu1 %v434_v0  ;;  %v424_v6 = vld [vmem:[%s597_s0 + $0x4] ss:$8 sps:$4 sm:$0xff]   ;;  %v414_v9 = vld [vmem:[%s596_s1 + $0x30] sm:$0xff]   ;;  %v415_v10 = vld [vmem:[%s596_s1 + $0x38] sm:$0xff]  }
   0x4   :  { %357 = vmatprep.mubr.msk.bf16.mxu0 %vm170_vm0, %v424_v6  ;;  %v427_v7 = vld [vmem:[%s597_s0 + $0x24] ss:$8 sps:$4 sm:$0xff]   ;;  %v418_v13 = vld [vmem:[%s596_s1 + $0x50] sm:$0xff]   ;;  %v419_v14 = vld [vmem:[%s596_s1 + $0x58] sm:$0xff]  }
   0x5   :  { %359 = vmatprep.mubr.msk.bf16.mxu1 %vm170_vm0, %v427_v7  ;;  %v416_v11 = vld [vmem:[%s596_s1 + $0x40] sm:$0xff]   ;;  %v417_v12 = vld [vmem:[%s596_s1 + $0x48] sm:$0xff]   ;;  %v428_v20 = vld [vmem:[%s597_s0 + $0x14] ss:$8 sps:$4 sm:$0xff]  }
   0x6   :  { %190 = vmatpush1.bf16.msra.mxu0 %v409_v2  ;;  %394 = vmatpush1.bf16.msra.mxu1 %v409_v2  ;;  %v420_v15 = vld [vmem:[%s596_s1 + $0x60] sm:$0xff]   ;;  %v421_v16 = vld [vmem:[%s596_s1 + $0x68] ss:$0 sps:$4 sm:$0xff]   ;;  %v430_v21 = vld [vmem:[%s597_s0 + $0x34] ss:$8 sps:$4 sm:$0xff]  }
   0x7   :  { %191 = vmatprep.subr.bf16.mxu0 %v434_v0  ;;  %381 = vmatprep.subr.bf16.mxu1 %v434_v0  ;;  %v185_v17 = vsel %vm183_vm1, %v421_v16, 0  ;;  %v422_v18 = vld [vmem:[%s597_s0] ss:$8 sps:$4 sm:$0xff]   ;;  %v432_v22 = vld [vmem:[%s597_s0 + $0x10] ss:$8 sps:$4 sm:$0xff]  }
   0x8   :  { %v425_v19 = vld [vmem:[%s597_s0 + $0x20] ss:$8 sps:$4 sm:$0xff]   ;;  %v433_v23 = vld [vmem:[%s597_s0 + $0x30] ss:$8 sps:$4 sm:$0xff]  }
   0x9   :  { %v361_v24 = vld [vmem:[%s598_s2] ss:$0 sm:$0xff] }
   0xa   :  { %192 = vmatpush1.bf16.msra.mxu0 %v410_v3  ;;  %395 = vmatpush1.bf16.msra.mxu1 %v410_v3  ;;  %v362_v26 = vld [vmem:[%s599_s3] ss:$0 sm:$0xff] }
   0xb   :  { %193 = vmatprep.subr.bf16.mxu0 %v434_v0  ;;  %382 = vmatprep.subr.bf16.mxu1 %v434_v0 }
   0xe   :  { %194 = vmatpush1.bf16.msra.mxu0 %v411_v4  ;;  %396 = vmatpush1.bf16.msra.mxu1 %v411_v4 }
   0xf   :  { %195 = vmatprep.subr.bf16.mxu0 %v434_v0  ;;  %383 = vmatprep.subr.bf16.mxu1 %v434_v0 }
  0x12   :  { %196 = vmatpush1.bf16.msra.mxu0 %v412_v5  ;;  %397 = vmatpush1.bf16.msra.mxu1 %v412_v5 }
  0x13   :  { %197 = vmatprep.subr.bf16.mxu0 %v434_v0  ;;  %384 = vmatprep.subr.bf16.mxu1 %v434_v0 }
  0x16   :  { %198 = vmatpush1.bf16.msra.mxu0 %v413_v8  ;;  %398 = vmatpush1.bf16.msra.mxu1 %v413_v8 }
  0x17   :  { %199 = vmatprep.subr.bf16.mxu0 %v434_v0  ;;  %385 = vmatprep.subr.bf16.mxu1 %v434_v0 }
  0x1a   :  { %200 = vmatpush1.bf16.msra.mxu0 %v414_v9  ;;  %399 = vmatpush1.bf16.msra.mxu1 %v414_v9 }
  0x1b   :  { %201 = vmatprep.subr.bf16.mxu0 %v434_v0  ;;  %386 = vmatprep.subr.bf16.mxu1 %v434_v0 }
  0x1e   :  { %202 = vmatpush1.bf16.msra.mxu0 %v415_v10  ;;  %400 = vmatpush1.bf16.msra.mxu1 %v415_v10 }
  0x1f   :  { %203 = vmatprep.subr.bf16.mxu0 %v434_v0  ;;  %387 = vmatprep.subr.bf16.mxu1 %v434_v0 }
  0x22   :  { %204 = vmatpush1.bf16.msra.mxu0 %v416_v11  ;;  %401 = vmatpush1.bf16.msra.mxu1 %v416_v11 }
  0x23   :  { %205 = vmatprep.subr.bf16.mxu0 %v434_v0  ;;  %388 = vmatprep.subr.bf16.mxu1 %v434_v0 }
  0x26   :  { %206 = vmatpush1.bf16.msra.mxu0 %v417_v12  ;;  %402 = vmatpush1.bf16.msra.mxu1 %v417_v12 }
  0x27   :  { %207 = vmatprep.subr.bf16.mxu0 %v434_v0  ;;  %389 = vmatprep.subr.bf16.mxu1 %v434_v0 }
  0x2a   :  { %208 = vmatpush1.bf16.msra.mxu0 %v418_v13  ;;  %403 = vmatpush1.bf16.msra.mxu1 %v418_v13 }
  0x2b   :  { %209 = vmatprep.subr.bf16.mxu0 %v434_v0  ;;  %390 = vmatprep.subr.bf16.mxu1 %v434_v0 }
  0x2e   :  { %210 = vmatpush1.bf16.msra.mxu0 %v419_v14  ;;  %404 = vmatpush1.bf16.msra.mxu1 %v419_v14 }
  0x2f   :  { %211 = vmatprep.subr.bf16.mxu0 %v434_v0  ;;  %391 = vmatprep.subr.bf16.mxu1 %v434_v0 }
  0x32   :  { %212 = vmatpush1.bf16.msra.mxu0 %v420_v15  ;;  %405 = vmatpush1.bf16.msra.mxu1 %v420_v15 }
  0x33   :  { %213 = vmatprep.subr.bf16.mxu0 %v434_v0  ;;  %392 = vmatprep.subr.bf16.mxu1 %v434_v0 }
  0x36   :  { %214 = vmatpush1.bf16.msra.mxu0 %v185_v17  ;;  %406 = vmatpush1.bf16.msra.mxu1 %v185_v17 }
  0x39   :  { %220 = vmatmul.mubr.bf16.vlgmr.msra.gmra.mrb[0].mxu0 %v422_v18  ;;  %236 = vmatmul.mubr.bf16.vlgmr.msra.gmra.mrb[0].mxu1 %v425_v19 }
  0x3a   :  { %358 = vmatprep.mubr.msk.bf16.mxu0 %vm170_vm0, %v428_v20  ;;  %360 = vmatprep.mubr.msk.bf16.mxu1 %vm170_vm0, %v430_v21 }
  0x41   :  { %228 = vmatmul.mubr.bf16.gmra.mrb[4].mxu0 %v432_v22  ;;  %244 = vmatmul.mubr.bf16.gmra.mrb[4].mxu1 %v433_v23 }
 0x10c   :  { %v221_v25 = vpop.f32.mrb[0].mxu0  ;;  %v237_v27 = vpop.f32.mrb[0].mxu1 }
 0x10d   :  { %v259_v28 = vmul.f32 %v361_v24, %v221_v25  ;;  %v263_v29 = vmul.f32 %v361_v24, %v237_v27  ;;  %v223_v30 = vpop.f32.mrb[1].mxu0  ;;  %v239_v31 = vpop.f32.mrb[1].mxu1 }
 0x10e   :  { %v224_v32 = vpop.f32.mrb[2].mxu0  ;;  %v240_v33 = vpop.f32.mrb[2].mxu1 }
 0x10f   :  { %v274_v34 = vadd.f32 %v362_v26, %v259_v28  ;;  %v278_v35 = vadd.f32 %v362_v26, %v263_v29  ;;  %v260_v36 = vmul.f32 %v361_v24, %v224_v32  ;;  %v264_v37 = vmul.f32 %v361_v24, %v240_v33  ;;  %v226_v38 = vpop.f32.mrb[3].mxu0  ;;  %v242_v39 = vpop.f32.mrb[3].mxu1 }
 0x111   :  { %v282_v40 = vmax.f32 %v274_v34, 0.0  ;;  %v286_v41 = vmax.f32 %v278_v35, 0.0  ;;  %v275_v42 = vadd.f32 %v362_v26, %v260_v36  ;;  %v279_v43 = vadd.f32 %v362_v26, %v264_v37 }
 0x113   :  { %v371_v44 = vpack.c.bf16 %v282_v40, %v282_v40  ;;  %v375_v45 = vpack.c.bf16 %v286_v41, %v286_v41  ;;  %v283_v46 = vmax.f32 %v275_v42, 0.0  ;;  %v287_v47 = vmax.f32 %v279_v43, 0.0 }
 0x114   :  { %v229_v48 = vpop.f32.mrb[4].mxu0  ;;  %v245_v49 = vpop.f32.mrb[4].mxu1 }
 0x115   :  { %323 = vst.msk [vmem:[%s600_s4] sm:$0xf] %vm322_vm2, %v371_v44  ;;  %327 = vst.msk [vmem:[%s600_s4 + $0x10] sm:$0xf] %vm322_vm2, %v375_v45  ;;  %v372_v50 = vpack.c.bf16 %v283_v46, %v283_v46  ;;  %v376_v51 = vpack.c.bf16 %v287_v47, %v287_v47  ;;  %v261_v52 = vmul.f32 %v361_v24, %v229_v48  ;;  %v231_v54 = vpop.f32.mrb[5].mxu0  ;;  %v247_v55 = vpop.f32.mrb[5].mxu1 }
 0x116   :  { %v265_v53 = vmul.f32 %v361_v24, %v245_v49  ;;  %v232_v56 = vpop.f32.mrb[6].mxu0  ;;  %v248_v57 = vpop.f32.mrb[6].mxu1 }
 0x117   :  { %324 = vst.msk [vmem:[%s600_s4 + $0x4] sm:$0xf] %vm322_vm2, %v372_v50  ;;  %328 = vst.msk [vmem:[%s600_s4 + $0x14] sm:$0xf] %vm322_vm2, %v376_v51  ;;  %v276_v58 = vadd.f32 %v362_v26, %v261_v52  ;;  %v262_v60 = vmul.f32 %v361_v24, %v232_v56  ;;  %v266_v61 = vmul.f32 %v361_v24, %v248_v57  ;;  %v234_v62 = vpop.f32.mrb[7].mxu0  ;;  %v250_v63 = vpop.f32.mrb[7].mxu1 }
 0x118   :  { %v280_v59 = vadd.f32 %v362_v26, %v265_v53 }
 0x119   :  { %v284_v0 = vmax.f32 %v276_v58, 0.0  ;;  %v277_v2 = vadd.f32 %v362_v26, %v262_v60  ;;  %v281_v3 = vadd.f32 %v362_v26, %v266_v61 }
 0x11a   :  { %v288_v1 = vmax.f32 %v280_v59, 0.0 }
 0x11b   :  { %v373_v4 = vpack.c.bf16 %v284_v0, %v284_v0  ;;  %v285_v6 = vmax.f32 %v277_v2, 0.0  ;;  %v289_v7 = vmax.f32 %v281_v3, 0.0 }
 0x11c   :  { %v377_v5 = vpack.c.bf16 %v288_v1, %v288_v1 }
 0x11d   :  { %325 = vst.msk [vmem:[%s600_s4 + $0x8] sm:$0xf] %vm322_vm2, %v373_v4  ;;  %v374_v8 = vpack.c.bf16 %v285_v6, %v285_v6  ;;  %v378_v9 = vpack.c.bf16 %v289_v7, %v289_v7 }
 0x11e   :  { %329 = vst.msk [vmem:[%s600_s4 + $0x18] sm:$0xf] %vm322_vm2, %v377_v5 }
 0x11f   :  { %326 = vst.msk [vmem:[%s600_s4 + $0xc] sm:$0xf] %vm322_vm2, %v374_v8  ;;  %330 = vst.msk [vmem:[%s600_s4 + $0x1c] sm:$0xf] %vm322_vm2, %v378_v9 }

// kernel: resnet_forward.15
= control target key start
LH: loop header
LB: loop body
LE: loop exit
PB: predicated region body
PF: predicated region fallthrough
CT: control target
= control target key end

     0   :  { %vm60_vm0 = vcmask 1043456   ;;  %vm47_vm1 = vcmask 64512   ;;  %vm191_vm2 = vcmask 125952   ;;  %s331_s1 = inlined_call_operand.vmem [shape: bf16[8,16], index: 1, kind: input, shape index: {}]   ;;  %s332_s0 = inlined_call_operand.vmem [shape: bf16[64,8], index: 0, kind: input, shape index: {}]   ;;  %s333_s2 = inlined_call_operand.vmem [shape: f32[1,16], index: 2, kind: input, shape index: {}]   ;;  %s334_s3 = inlined_call_operand.vmem [shape: f32[1,16], index: 3, kind: input, shape index: {}]   ;;  %s335_s4 = inlined_call_operand.vmem [shape: bf16[64,16], index: 4, kind: output, shape index: {}]  }
   0x1   :  { %v26_v0 = vld [vmem:[%s331_s1] sm:$0xf]  ;;  %v250_v3 = vld [vmem:[%s332_s0 + $0x10] sm:$0xff]   ;;  %v251_v4 = vld [vmem:[%s332_s0 + $0x8] sm:$0xff]  }
   0x2   :  { %247 = vmatprep.subr.msk.bf16.mxu0 %vm60_vm0, %v26_v0  ;;  %248 = vmatprep.subr.msk.bf16.mxu1 %vm60_vm0, %v26_v0  ;;  %v62_v1 = vsel %vm60_vm0, %v26_v0, 0  ;;  %v249_v2 = vld [vmem:[%s332_s0] sm:$0xff]   ;;  %v252_v5 = vld [vmem:[%s332_s0 + $0x18] sm:$0xff]  }
   0x3   :  { %236 = vmatpush3.bf16.msra.mxu0 %v62_v1  ;;  %246 = vmatpush3.bf16.msra.mxu1 %v62_v1  ;;  %v212_v6 = vld [vmem:[%s333_s2] ss:$0 sm:$0xff] }
   0x4   :  { %237 = vmatprep.mubr.msk.bf16.mxu0 %vm47_vm1, %v249_v2  ;;  %241 = vmatprep.mubr.msk.bf16.mxu1 %vm47_vm1, %v250_v3  ;;  %v213_v8 = vld [vmem:[%s334_s3] ss:$0 sm:$0xff] }
   0x6   :  { %238 = vmatmul.mubr.msk.bf16.vlgmr.msra.gmra.mrb[0].mxu0 %vm47_vm1, %v251_v4  ;;  %242 = vmatmul.mubr.msk.bf16.vlgmr.msra.gmra.mrb[0].mxu1 %vm47_vm1, %v252_v5 }
  0xd9   :  { %v239_v7 = vpop.f32.mrb[0].mxu0  ;;  %v243_v10 = vpop.f32.mrb[0].mxu1 }
  0xda   :  { %v138_v9 = vmul.f32 %v239_v7, %v212_v6  ;;  %v98_v11 = vpop.f32.mrb[1].mxu0  ;;  %v142_v12 = vmul.f32 %v243_v10, %v212_v6  ;;  %v114_v14 = vpop.f32.mrb[1].mxu1 }
  0xdb   :  { %v136_v13 = vmul.f32 %v212_v6, %v98_v11  ;;  %v240_v15 = vpop.f32.mrb[2].mxu0  ;;  %v140_v17 = vmul.f32 %v212_v6, %v114_v14  ;;  %v244_v19 = vpop.f32.mrb[2].mxu1 }
  0xdc   :  { %v153_v16 = vadd.f32 %v213_v8, %v138_v9  ;;  %v139_v18 = vmul.f32 %v240_v15, %v212_v6  ;;  %v101_v20 = vpop.f32.mrb[3].mxu0  ;;  %v157_v21 = vadd.f32 %v213_v8, %v142_v12  ;;  %v143_v23 = vmul.f32 %v244_v19, %v212_v6  ;;  %v117_v25 = vpop.f32.mrb[3].mxu1 }
  0xdd   :  { %v151_v22 = vadd.f32 %v213_v8, %v136_v13  ;;  %v137_v24 = vmul.f32 %v212_v6, %v101_v20  ;;  %v155_v27 = vadd.f32 %v213_v8, %v140_v17  ;;  %v141_v29 = vmul.f32 %v212_v6, %v117_v25 }
  0xde   :  { %v224_v26 = vpack.c.bf16 %v153_v16, %v153_v16  ;;  %v154_v28 = vadd.f32 %v213_v8, %v139_v18  ;;  %v228_v30 = vpack.c.bf16 %v157_v21, %v157_v21  ;;  %v158_v32 = vadd.f32 %v213_v8, %v143_v23 }
  0xdf   :  { %v222_v31 = vpack.c.bf16 %v151_v22, %v151_v22  ;;  %v152_v33 = vadd.f32 %v213_v8, %v137_v24  ;;  %v226_v34 = vpack.c.bf16 %v155_v27, %v155_v27  ;;  %v156_v36 = vadd.f32 %v213_v8, %v141_v29 }
  0xe0   :  { %194 = vst.msk [vmem:[%s335_s4 + $0x8] sm:$0xf] %vm191_vm2, %v224_v26  ;;  %v225_v35 = vpack.c.bf16 %v154_v28, %v154_v28  ;;  %198 = vst.msk [vmem:[%s335_s4 + $0x18] sm:$0xf] %vm191_vm2, %v228_v30  ;;  %v229_v37 = vpack.c.bf16 %v158_v32, %v158_v32 }
  0xe1   :  { %192 = vst.msk [vmem:[%s335_s4] sm:$0xf] %vm191_vm2, %v222_v31  ;;  %v223_v38 = vpack.c.bf16 %v152_v33, %v152_v33  ;;  %196 = vst.msk [vmem:[%s335_s4 + $0x10] sm:$0xf] %vm191_vm2, %v226_v34  ;;  %v227_v39 = vpack.c.bf16 %v156_v36, %v156_v36 }
  0xe2   :  { %195 = vst.msk [vmem:[%s335_s4 + $0xc] sm:$0xf] %vm191_vm2, %v225_v35  ;;  %199 = vst.msk [vmem:[%s335_s4 + $0x1c] sm:$0xf] %vm191_vm2, %v229_v37 }
  0xe3   :  { %193 = vst.msk [vmem:[%s335_s4 + $0x4] sm:$0xf] %vm191_vm2, %v223_v38  ;;  %197 = vst.msk [vmem:[%s335_s4 + $0x14] sm:$0xf] %vm191_vm2, %v227_v39 }

// kernel: resnet_forward.17
= control target key start
LH: loop header
LB: loop body
LE: loop exit
PB: predicated region body
PF: predicated region fallthrough
CT: control target
= control target key end

     0   :  { %v755_v0 = vmov 0   ;;  %vm329_vm0 = vcmask 392192   ;;  %vm566_vm1 = vcmask 125952   ;;  %s1000_s1 = inlined_call_operand.vmem [shape: bf16[432,16], index: 1, kind: input, shape index: {}]   ;;  %s1001_s0 = inlined_call_operand.vmem [shape: bf16[64,432], index: 0, kind: input, shape index: {}]   ;;  %s1002_s2 = inlined_call_operand.vmem [shape: f32[1,16], index: 2, kind: input, shape index: {}]   ;;  %s1003_s4 = inlined_call_operand.vmem [shape: bf16[64,16], index: 4, kind: input, shape index: {}]   ;;  %s1004_s3 = inlined_call_operand.vmem [shape: f32[1,16], index: 3, kind: input, shape index: {}]   ;;  %s1005_s5 = inlined_call_operand.vmem [shape: bf16[64,16], index: 5, kind: output, shape index: {}]  }
   0x1   :  { %407 = vmatprep.subr.bf16.mxu1 %v755_v0  ;;  %v704_v1 = vld [vmem:[%s1000_s1 + $0x80] sm:$0xff]   ;;  %v705_v2 = vld [vmem:[%s1000_s1 + $0x88] sm:$0xff]   ;;  %v708_v5 = vld [vmem:[%s1000_s1 + $0x90] sm:$0xff]  }
   0x2   :  { %408 = vmatpush1.bf16.msra.mxu1 %v704_v1  ;;  %v706_v3 = vld [vmem:[%s1000_s1 + $0x40] sm:$0xff]   ;;  %v709_v6 = vld [vmem:[%s1000_s1 + $0x48] sm:$0xff]   ;;  %v712_v8 = vld [vmem:[%s1000_s1 + $0x50] sm:$0xff]  }
   0x3   :  { %409 = vmatprep.subr.bf16.mxu1 %v755_v0  ;;  %v707_v4 = vld [vmem:[%s1000_s1] sm:$0xff]   ;;  %663 = vmatprep.subr.bf16.mxu0 %v706_v3  ;;  %v710_v7 = vld [vmem:[%s1000_s1 + $0x8] sm:$0xff]   ;;  %v713_v9 = vld [vmem:[%s1000_s1 + $0x10] sm:$0xff]  }
   0x4   :  { %664 = vmatpush3.bf16.msra.mxu0 %v707_v4  ;;  %v711_v10 = vld [vmem:[%s1000_s1 + $0x98] sm:$0xff]   ;;  %v714_v12 = vld [vmem:[%s1000_s1 + $0xa0] sm:$0xff]   ;;  %v717_v15 = vld [vmem:[%s1000_s1 + $0xa8] sm:$0xff]  }
   0x5   :  { %665 = vmatprep.subr.bf16.mxu0 %v709_v6  ;;  %v715_v11 = vld [vmem:[%s1000_s1 + $0x58] sm:$0xff]   ;;  %v718_v14 = vld [vmem:[%s1000_s1 + $0x60] sm:$0xff]   ;;  %v721_v17 = vld [vmem:[%s1000_s1 + $0x68] sm:$0xff]  }
   0x6   :  { %410 = vmatpush1.bf16.msra.mxu1 %v705_v2  ;;  %v716_v13 = vld [vmem:[%s1000_s1 + $0x18] sm:$0xff]   ;;  %v719_v16 = vld [vmem:[%s1000_s1 + $0x20] sm:$0xff]   ;;  %v720_v18 = vld [vmem:[%s1000_s1 + $0xb0] sm:$0xff]  }
   0x7   :  { %411 = vmatprep.subr.bf16.mxu1 %v755_v0  ;;  %v722_v19 = vld [vmem:[%s1000_s1 + $0x28] sm:$0xff]   ;;  %v724_v20 = vld [vmem:[%s1000_s1 + $0x70] sm:$0xff]   ;;  %v723_v21 = vld [vmem:[%s1000_s1 + $0xb8] sm:$0xff]  }
   0x8   :  { %666 = vmatpush3.bf16.msra.mxu0 %v710_v7  ;;  %v725_v22 = vld [vmem:[%s1000_s1 + $0x30] sm:$0xff]   ;;  %v727_v23 = vld [vmem:[%s1000_s1 + $0x78] sm:$0xff]   ;;  %v726_v27 = vld [vmem:[%s1000_s1 + $0xc0] sm:$0xff]  }
   0x9   :  { %667 = vmatprep.subr.bf16.mxu0 %v712_v8  ;;  %v731_v24 = vld [vmem:[%s1001_s0 + $0x4] ss:$16 sps:$4 sm:$0xff]   ;;  %v728_v25 = vld [vmem:[%s1000_s1 + $0x38] sm:$0xff]   ;;  %v729_v28 = vld [vmem:[%s1001_s0] ss:$16 sps:$4 sm:$0xff]  }
   0xa   :  { %412 = vmatpush1.bf16.msra.mxu1 %v708_v5  ;;  %374 = vmatprep.mubr.bf16.mxu0 %v731_v24  ;;  %v736_v26 = vld [vmem:[%s1001_s0 + $0xc] ss:$16 sps:$4 sm:$0xff]   ;;  %v737_v29 = vld [vmem:[%s1001_s0 + $0x24] ss:$16 sps:$4 sm:$0xff]   ;;  %v739_v32 = vld [vmem:[%s1001_s0 + $0x20] ss:$16 sps:$4 sm:$0xff]  }
   0xb   :  { %413 = vmatprep.subr.bf16.mxu1 %v755_v0  ;;  %622 = vmatprep.mubr.msk.bf16.mxu1 %vm329_vm0, %v736_v26  ;;  %v732_v30 = vld [vmem:[%s1000_s1 + $0xc8] sm:$0xff]   ;;  %v733_v31 = vld [vmem:[%s1000_s1 + $0xd0] sm:$0xff]   ;;  %v933_v52 = vld [vmem:[%s1002_s2] ss:$0 sm:$0xff] }
   0xc   :  { %668 = vmatpush3.bf16.msra.mxu0 %v713_v9  ;;  %v734_v33 = vld [vmem:[%s1001_s0 + $0x8] ss:$16 sps:$4 sm:$0xff]   ;;  %v743_v34 = vld [vmem:[%s1001_s0 + $0x44] ss:$16 sps:$4 sm:$0xff]   ;;  %v740_v35 = vld [vmem:[%s1001_s0 + $0x2c] ss:$16 sps:$4 sm:$0xff]  }
   0xd   :  { %669 = vmatprep.subr.bf16.mxu0 %v715_v11  ;;  %v745_v36 = vld [vmem:[%s1001_s0 + $0x40] ss:$16 sps:$4 sm:$0xff]   ;;  %v742_v37 = vld [vmem:[%s1001_s0 + $0x28] ss:$16 sps:$4 sm:$0xff]   ;;  %v749_v38 = vld [vmem:[%s1001_s0 + $0x64] ss:$16 sps:$4 sm:$0xff]  }
   0xe   :  { %414 = vmatpush1.bf16.msra.mxu1 %v711_v10  ;;  %v746_v39 = vld [vmem:[%s1001_s0 + $0x4c] ss:$16 sps:$4 sm:$0xff]   ;;  %v751_v40 = vld [vmem:[%s1001_s0 + $0x60] ss:$16 sps:$4 sm:$0xff]   ;;  %v748_v41 = vld [vmem:[%s1001_s0 + $0x48] ss:$16 sps:$4 sm:$0xff]  }
   0xf   :  { %415 = vmatprep.subr.bf16.mxu1 %v755_v0  ;;  %v752_v42 = vld [vmem:[%s1001_s0 + $0x6c] ss:$16 sps:$4 sm:$0xff]   ;;  %v754_v43 = vld [vmem:[%s1001_s0 + $0x68] ss:$16 sps:$4 sm:$0xff]   ;;  %v645_v53 = vld [vmem:[%s1003_s4] sm:$0xff]  }
  0x10   :  { %670 = vmatpush3.bf16.msra.mxu0 %v716_v13  ;;  %v941_v59 = vld [vmem:[%s1004_s3] ss:$0 sm:$0xff]  ;;  %v646_v63 = vunpack.c.l.bf16 %v645_v53  ;;  %v647_v5 = vunpack.c.h.bf16 %v645_v53  ;;  %v660_v8 = vld [vmem:[%s1003_s4 + $0x8] sm:$0xff]  }
  0x11   :  { %671 = vmatprep.subr.bf16.mxu0 %v718_v14 }
  0x12   :  { %416 = vmatpush1.bf16.msra.mxu1 %v714_v12 }
  0x13   :  { %417 = vmatprep.subr.bf16.mxu1 %v755_v0 }
  0x14   :  { %672 = vmatpush3.bf16.msra.mxu0 %v719_v16 }
  0x15   :  { %673 = vmatprep.subr.bf16.mxu0 %v721_v17 }
  0x16   :  { %418 = vmatpush1.bf16.msra.mxu1 %v717_v15 }
  0x17   :  { %419 = vmatprep.subr.bf16.mxu1 %v755_v0 }
  0x18   :  { %674 = vmatpush3.bf16.msra.mxu0 %v722_v19 }
  0x19   :  { %675 = vmatprep.subr.bf16.mxu0 %v724_v20 }
  0x1a   :  { %420 = vmatpush1.bf16.msra.mxu1 %v720_v18  ;;  %v650_v18 = vunpack.c.l.bf16 %v660_v8 }
  0x1b   :  { %421 = vmatprep.subr.bf16.mxu1 %v755_v0 }
  0x1c   :  { %676 = vmatpush3.bf16.msra.mxu0 %v725_v22 }
  0x1d   :  { %677 = vmatprep.subr.bf16.mxu0 %v727_v23 }
  0x1e   :  { %422 = vmatpush1.bf16.msra.mxu1 %v723_v21 }
  0x1f   :  { %423 = vmatprep.subr.bf16.mxu1 %v755_v0 }
  0x20   :  { %678 = vmatpush3.bf16.msra.mxu0 %v728_v25 }
  0x22   :  { %424 = vmatpush1.bf16.msra.mxu1 %v726_v27 }
  0x23   :  { %425 = vmatprep.subr.bf16.mxu1 %v755_v0  ;;  %375 = vmatmul.mubr.bf16.vlgmr.msra.gmra.mrb[0].mxu0 %v729_v28 }
  0x24   :  { %382 = vmatprep.mubr.bf16.mxu0 %v737_v29 }
  0x26   :  { %426 = vmatpush1.bf16.msra.mxu1 %v732_v30  ;;  %v651_v30 = vunpack.c.h.bf16 %v660_v8 }
  0x27   :  { %427 = vmatprep.subr.bf16.mxu1 %v755_v0 }
  0x2a   :  { %428 = vmatpush1.bf16.msra.mxu1 %v733_v31 }
  0x2b   :  { %383 = vmatmul.mubr.bf16.gmra.mrb[4].mxu0 %v739_v32 }
  0x2c   :  { %390 = vmatprep.mubr.bf16.mxu0 %v743_v34 }
  0x2d   :  { %440 = vmatmul.mubr.bf16.vlgmr.msra.gmra.mrb[0].mxu1 %v734_v33  ;;  %v661_v33 = vld [vmem:[%s1003_s4 + $0x10] sm:$0xff]  }
  0x2e   :  { %623 = vmatprep.mubr.msk.bf16.mxu1 %vm329_vm0, %v740_v35 }
  0x33   :  { %391 = vmatmul.mubr.bf16.gmra.mrb[8].mxu0 %v745_v36 }
  0x34   :  { %398 = vmatprep.mubr.bf16.mxu0 %v749_v38 }
  0x35   :  { %448 = vmatmul.mubr.bf16.gmra.mrb[4].mxu1 %v742_v37 }
  0x36   :  { %624 = vmatprep.mubr.msk.bf16.mxu1 %vm329_vm0, %v746_v39 }
  0x3b   :  { %399 = vmatmul.mubr.bf16.gmra.mrb[12].mxu0 %v751_v40 }
  0x3d   :  { %456 = vmatmul.mubr.bf16.gmra.mrb[8].mxu1 %v748_v41 }
  0x3e   :  { %625 = vmatprep.mubr.msk.bf16.mxu1 %vm329_vm0, %v752_v42 }
  0x45   :  { %464 = vmatmul.mubr.bf16.gmra.mrb[12].mxu1 %v754_v43  ;;  %v654_v43 = vunpack.c.l.bf16 %v661_v33 }
  0xf6   :  { %v679_v44 = vpop.f32.mrb[0].mxu0 }
  0xf7   :  { %v680_v45 = vpop.f32.mrb[1].mxu0 }
  0xf8   :  { %v681_v46 = vadd.f32 %v680_v45, %v679_v44  ;;  %v682_v47 = vpop.f32.mrb[2].mxu0 }
  0xf9   :  { %v683_v48 = vpop.f32.mrb[3].mxu0 }
  0xfa   :  { %v684_v49 = vadd.f32 %v683_v48, %v682_v47 }
  0xfe   :  { %v685_v50 = vpop.f32.mrb[4].mxu0 }
  0xff   :  { %v686_v54 = vpop.f32.mrb[5].mxu0 }
 0x100   :  { %v441_v51 = vpop.f32.mrb[0].mxu1  ;;  %v687_v57 = vadd.f32 %v686_v54, %v685_v50  ;;  %v688_v58 = vpop.f32.mrb[6].mxu0 }
 0x101   :  { %v442_v55 = vadd.f32 %v681_v46, %v441_v51  ;;  %v443_v56 = vpop.f32.mrb[1].mxu1  ;;  %v689_v61 = vpop.f32.mrb[7].mxu0 }
 0x102   :  { %v444_v60 = vpop.f32.mrb[2].mxu1  ;;  %v690_v2 = vadd.f32 %v689_v61, %v688_v58  ;;  %v655_v56 = vunpack.c.h.bf16 %v661_v33 }
 0x103   :  { %v479_v62 = vmul.f32 %v933_v52, %v442_v55  ;;  %v445_v0 = vadd.f32 %v684_v49, %v444_v60  ;;  %v446_v1 = vpop.f32.mrb[3].mxu1  ;;  %v662_v60 = vld [vmem:[%s1003_s4 + $0x18] sm:$0xff]  }
 0x105   :  { %v494_v3 = vadd.f32 %v941_v59, %v479_v62  ;;  %v480_v4 = vmul.f32 %v933_v52, %v445_v0 }
 0x106   :  { %v691_v9 = vpop.f32.mrb[8].mxu0 }
 0x107   :  { %v518_v6 = vadd.f32 %v646_v63, %v494_v3  ;;  %v495_v7 = vadd.f32 %v941_v59, %v480_v4  ;;  %v692_v11 = vpop.f32.mrb[9].mxu0 }
 0x108   :  { %v449_v10 = vpop.f32.mrb[4].mxu1  ;;  %v693_v16 = vadd.f32 %v692_v11, %v691_v9  ;;  %v694_v17 = vpop.f32.mrb[10].mxu0 }
 0x109   :  { %v526_v12 = vmax.f32 %v518_v6, 0.0  ;;  %v519_v13 = vadd.f32 %v647_v5, %v495_v7  ;;  %v450_v14 = vadd.f32 %v687_v57, %v449_v10  ;;  %v451_v15 = vpop.f32.mrb[5].mxu1  ;;  %v695_v20 = vpop.f32.mrb[11].mxu0 }
 0x10a   :  { %v452_v19 = vpop.f32.mrb[6].mxu1  ;;  %v696_v26 = vadd.f32 %v695_v20, %v694_v17 }
 0x10b   :  { %v636_v21 = vpack.c.bf16 %v526_v12, %v526_v12  ;;  %v527_v22 = vmax.f32 %v519_v13, 0.0  ;;  %v481_v23 = vmul.f32 %v933_v52, %v450_v14  ;;  %v453_v24 = vadd.f32 %v690_v2, %v452_v19  ;;  %v454_v25 = vpop.f32.mrb[7].mxu1 }
 0x10c   :  { %v658_v2 = vunpack.c.l.bf16 %v662_v60  ;;  %v659_v12 = vunpack.c.h.bf16 %v662_v60 }
 0x10d   :  { %567 = vst.msk [vmem:[%s1005_s5] sm:$0xf] %vm566_vm1, %v636_v21  ;;  %v637_v27 = vpack.c.bf16 %v527_v22, %v527_v22  ;;  %v496_v28 = vadd.f32 %v941_v59, %v481_v23  ;;  %v482_v29 = vmul.f32 %v933_v52, %v453_v24 }
 0x10e   :  { %v697_v34 = vpop.f32.mrb[12].mxu0 }
 0x10f   :  { %568 = vst.msk [vmem:[%s1005_s5 + $0x4] sm:$0xf] %vm566_vm1, %v637_v27  ;;  %v520_v31 = vadd.f32 %v650_v18, %v496_v28  ;;  %v497_v32 = vadd.f32 %v941_v59, %v482_v29  ;;  %v698_v36 = vpop.f32.mrb[13].mxu0 }
 0x110   :  { %v457_v35 = vpop.f32.mrb[8].mxu1  ;;  %v699_v41 = vadd.f32 %v698_v36, %v697_v34  ;;  %v700_v42 = vpop.f32.mrb[14].mxu0 }
 0x111   :  { %v528_v37 = vmax.f32 %v520_v31, 0.0  ;;  %v521_v38 = vadd.f32 %v651_v30, %v497_v32  ;;  %v458_v39 = vadd.f32 %v693_v16, %v457_v35  ;;  %v459_v40 = vpop.f32.mrb[9].mxu1  ;;  %v701_v45 = vpop.f32.mrb[15].mxu0 }
 0x112   :  { %v460_v44 = vpop.f32.mrb[10].mxu1  ;;  %v702_v51 = vadd.f32 %v701_v45, %v700_v42 }
 0x113   :  { %v638_v46 = vpack.c.bf16 %v528_v37, %v528_v37  ;;  %v529_v47 = vmax.f32 %v521_v38, 0.0  ;;  %v483_v48 = vmul.f32 %v933_v52, %v458_v39  ;;  %v461_v49 = vadd.f32 %v696_v26, %v460_v44  ;;  %v462_v50 = vpop.f32.mrb[11].mxu1 }
 0x115   :  { %569 = vst.msk [vmem:[%s1005_s5 + $0x8] sm:$0xf] %vm566_vm1, %v638_v46  ;;  %v639_v53 = vpack.c.bf16 %v529_v47, %v529_v47  ;;  %v498_v54 = vadd.f32 %v941_v59, %v483_v48  ;;  %v484_v55 = vmul.f32 %v933_v52, %v461_v49 }
 0x117   :  { %570 = vst.msk [vmem:[%s1005_s5 + $0xc] sm:$0xf] %vm566_vm1, %v639_v53  ;;  %v522_v57 = vadd.f32 %v654_v43, %v498_v54  ;;  %v499_v58 = vadd.f32 %v941_v59, %v484_v55 }
 0x118   :  { %v465_v61 = vpop.f32.mrb[12].mxu1 }
 0x119   :  { %v530_v62 = vmax.f32 %v522_v57, 0.0  ;;  %v523_v63 = vadd.f32 %v655_v56, %v499_v58  ;;  %v466_v0 = vadd.f32 %v699_v41, %v465_v61  ;;  %v467_v1 = vpop.f32.mrb[13].mxu1 }
 0x11a   :  { %v468_v3 = vpop.f32.mrb[14].mxu1 }
 0x11b   :  { %v640_v4 = vpack.c.bf16 %v530_v62, %v530_v62  ;;  %v531_v5 = vmax.f32 %v523_v63, 0.0  ;;  %v485_v6 = vmul.f32 %v933_v52, %v466_v0  ;;  %v469_v7 = vadd.f32 %v702_v51, %v468_v3  ;;  %v470_v8 = vpop.f32.mrb[15].mxu1 }
 0x11d   :  { %571 = vst.msk [vmem:[%s1005_s5 + $0x10] sm:$0xf] %vm566_vm1, %v640_v4  ;;  %v641_v9 = vpack.c.bf16 %v531_v5, %v531_v5  ;;  %v500_v10 = vadd.f32 %v941_v59, %v485_v6  ;;  %v486_v11 = vmul.f32 %v933_v52, %v469_v7 }
 0x11f   :  { %572 = vst.msk [vmem:[%s1005_s5 + $0x14] sm:$0xf] %vm566_vm1, %v641_v9  ;;  %v524_v13 = vadd.f32 %v658_v2, %v500_v10  ;;  %v501_v14 = vadd.f32 %v941_v59, %v486_v11 }
 0x121   :  { %v532_v15 = vmax.f32 %v524_v13, 0.0  ;;  %v525_v16 = vadd.f32 %v659_v12, %v501_v14 }
 0x123   :  { %v642_v17 = vpack.c.bf16 %v532_v15, %v532_v15  ;;  %v533_v18 = vmax.f32 %v525_v16, 0.0 }
 0x125   :  { %573 = vst.msk [vmem:[%s1005_s5 + $0x18] sm:$0xf] %vm566_vm1, %v642_v17  ;;  %v643_v19 = vpack.c.bf16 %v533_v18, %v533_v18 }
 0x127   :  { %574 = vst.msk [vmem:[%s1005_s5 + $0x1c] sm:$0xf] %vm566_vm1, %v643_v19 }

// kernel: resnet_forward.19
= control target key start
LH: loop header
LB: loop body
LE: loop exit
PB: predicated region body
PF: predicated region fallthrough
CT: control target
= control target key end

     0   :  { %v472_v0 = vmov 0   ;;  %vm257_vm0 = vcmask 392192   ;;  %vm371_vm1 = vcmask 257024   ;;  %s614_s1 = inlined_call_operand.vmem [shape: bf16[432,32], index: 1, kind: input, shape index: {}]   ;;  %s615_s0 = inlined_call_operand.vmem [shape: bf16[16,432], index: 0, kind: input, shape index: {}]   ;;  %s616_s2 = inlined_call_operand.vmem [shape: f32[1,32], index: 2, kind: input, shape index: {}]   ;;  %s617_s3 = inlined_call_operand.vmem [shape: f32[1,32], index: 3, kind: input, shape index: {}]   ;;  %s618_s4 = inlined_call_operand.vmem [shape: bf16[16,32], index: 4, kind: output, shape index: {}]  }
   0x1   :  { %302 = vmatprep.subr.bf16.mxu1 %v472_v0  ;;  %v439_v1 = vld [vmem:[%s614_s1 + $0x80] sm:$0xff]   ;;  %v440_v2 = vld [vmem:[%s614_s1 + $0x88] sm:$0xff]   ;;  %v443_v5 = vld [vmem:[%s614_s1 + $0x90] sm:$0xff]  }
   0x2   :  { %303 = vmatpush1.bf16.msra.mxu1 %v439_v1  ;;  %v441_v3 = vld [vmem:[%s614_s1 + $0x40] sm:$0xff]   ;;  %v444_v6 = vld [vmem:[%s614_s1 + $0x48] sm:$0xff]   ;;  %v447_v8 = vld [vmem:[%s614_s1 + $0x50] sm:$0xff]  }
   0x3   :  { %304 = vmatprep.subr.bf16.mxu1 %v472_v0  ;;  %v442_v4 = vld [vmem:[%s614_s1] sm:$0xff]   ;;  %416 = vmatprep.subr.bf16.mxu0 %v441_v3  ;;  %v445_v7 = vld [vmem:[%s614_s1 + $0x8] sm:$0xff]   ;;  %v448_v9 = vld [vmem:[%s614_s1 + $0x10] sm:$0xff]  }
   0x4   :  { %417 = vmatpush3.bf16.msra.mxu0 %v442_v4  ;;  %v446_v10 = vld [vmem:[%s614_s1 + $0x98] sm:$0xff]   ;;  %v449_v12 = vld [vmem:[%s614_s1 + $0xa0] sm:$0xff]   ;;  %v452_v15 = vld [vmem:[%s614_s1 + $0xa8] sm:$0xff]  }
   0x5   :  { %418 = vmatprep.subr.bf16.mxu0 %v444_v6  ;;  %v450_v11 = vld [vmem:[%s614_s1 + $0x58] sm:$0xff]   ;;  %v453_v14 = vld [vmem:[%s614_s1 + $0x60] sm:$0xff]   ;;  %v456_v17 = vld [vmem:[%s614_s1 + $0x68] sm:$0xff]  }
   0x6   :  { %305 = vmatpush1.bf16.msra.mxu1 %v440_v2  ;;  %v451_v13 = vld [vmem:[%s614_s1 + $0x18] sm:$0xff]   ;;  %v454_v16 = vld [vmem:[%s614_s1 + $0x20] sm:$0xff]   ;;  %v455_v18 = vld [vmem:[%s614_s1 + $0xb0] sm:$0xff]  }
   0x7   :  { %306 = vmatprep.subr.bf16.mxu1 %v472_v0  ;;  %v457_v19 = vld [vmem:[%s614_s1 + $0x28] sm:$0xff]   ;;  %v459_v20 = vld [vmem:[%s614_s1 + $0x70] sm:$0xff]   ;;  %v458_v21 = vld [vmem:[%s614_s1 + $0xb8] sm:$0xff]  }
   0x8   :  { %419 = vmatpush3.bf16.msra.mxu0 %v445_v7  ;;  %v460_v22 = vld [vmem:[%s614_s1 + $0x30] sm:$0xff]   ;;  %v462_v23 = vld [vmem:[%s614_s1 + $0x78] sm:$0xff]   ;;  %v461_v27 = vld [vmem:[%s614_s1 + $0xc0] sm:$0xff]  }
   0x9   :  { %420 = vmatprep.subr.bf16.mxu0 %v447_v8  ;;  %v466_v24 = vld [vmem:[%s615_s0 + $0x4] ss:$16 sps:$4 sm:$0xff]   ;;  %v463_v25 = vld [vmem:[%s614_s1 + $0x38] sm:$0xff]   ;;  %v464_v28 = vld [vmem:[%s615_s0] ss:$16 sps:$4 sm:$0xff]  }
   0xa   :  { %307 = vmatpush1.bf16.msra.mxu1 %v443_v5  ;;  %293 = vmatprep.mubr.bf16.mxu0 %v466_v24  ;;  %v471_v26 = vld [vmem:[%s615_s0 + $0xc] ss:$16 sps:$4 sm:$0xff]   ;;  %v468_v30 = vld [vmem:[%s614_s1 + $0xd0] sm:$0xff]   ;;  %v469_v31 = vld [vmem:[%s615_s0 + $0x8] ss:$16 sps:$4 sm:$0xff]  }
   0xb   :  { %308 = vmatprep.subr.bf16.mxu1 %v472_v0  ;;  %409 = vmatprep.mubr.msk.bf16.mxu1 %vm257_vm0, %v471_v26  ;;  %v467_v29 = vld [vmem:[%s614_s1 + $0xc8] sm:$0xff]   ;;  %v410_v39 = vld [vmem:[%s616_s2] ss:$0 sm:$0xff] }
   0xc   :  { %421 = vmatpush3.bf16.msra.mxu0 %v448_v9  ;;  %v411_v42 = vld [vmem:[%s617_s3] ss:$0 sm:$0xff] }
   0xd   :  { %422 = vmatprep.subr.bf16.mxu0 %v450_v11 }
   0xe   :  { %309 = vmatpush1.bf16.msra.mxu1 %v446_v10 }
   0xf   :  { %310 = vmatprep.subr.bf16.mxu1 %v472_v0 }
  0x10   :  { %423 = vmatpush3.bf16.msra.mxu0 %v451_v13 }
  0x11   :  { %424 = vmatprep.subr.bf16.mxu0 %v453_v14 }
  0x12   :  { %311 = vmatpush1.bf16.msra.mxu1 %v449_v12 }
  0x13   :  { %312 = vmatprep.subr.bf16.mxu1 %v472_v0 }
  0x14   :  { %425 = vmatpush3.bf16.msra.mxu0 %v454_v16 }
  0x15   :  { %426 = vmatprep.subr.bf16.mxu0 %v456_v17 }
  0x16   :  { %313 = vmatpush1.bf16.msra.mxu1 %v452_v15 }
  0x17   :  { %314 = vmatprep.subr.bf16.mxu1 %v472_v0 }
  0x18   :  { %427 = vmatpush3.bf16.msra.mxu0 %v457_v19 }
  0x19   :  { %428 = vmatprep.subr.bf16.mxu0 %v459_v20 }
  0x1a   :  { %315 = vmatpush1.bf16.msra.mxu1 %v455_v18 }
  0x1b   :  { %316 = vmatprep.subr.bf16.mxu1 %v472_v0 }
  0x1c   :  { %429 = vmatpush3.bf16.msra.mxu0 %v460_v22 }
  0x1d   :  { %430 = vmatprep.subr.bf16.mxu0 %v462_v23 }
  0x1e   :  { %317 = vmatpush1.bf16.msra.mxu1 %v458_v21 }
  0x1f   :  { %318 = vmatprep.subr.bf16.mxu1 %v472_v0 }
  0x20   :  { %431 = vmatpush3.bf16.msra.mxu0 %v463_v25 }
  0x22   :  { %319 = vmatpush1.bf16.msra.mxu1 %v461_v27 }
  0x23   :  { %320 = vmatprep.subr.bf16.mxu1 %v472_v0  ;;  %294 = vmatmul.mubr.bf16.vlgmr.msra.gmra.mrb[0].mxu0 %v464_v28 }
  0x26   :  { %321 = vmatpush1.bf16.msra.mxu1 %v467_v29 }
  0x27   :  { %322 = vmatprep.subr.bf16.mxu1 %v472_v0 }
  0x2a   :  { %323 = vmatpush1.bf16.msra.mxu1 %v468_v30 }
  0x2d   :  { %335 = vmatmul.mubr.bf16.vlgmr.msra.gmra.mrb[0].mxu1 %v469_v31 }
  0xf6   :  { %v432_v32 = vpop.f32.mrb[0].mxu0 }
  0xf7   :  { %v433_v33 = vpop.f32.mrb[1].mxu0 }
  0xf8   :  { %v434_v34 = vadd.f32 %v433_v33, %v432_v32  ;;  %v435_v35 = vpop.f32.mrb[2].mxu0 }
  0xf9   :  { %v436_v36 = vpop.f32.mrb[3].mxu0 }
  0xfa   :  { %v437_v37 = vadd.f32 %v436_v36, %v435_v35 }
 0x100   :  { %v336_v38 = vpop.f32.mrb[0].mxu1 }
 0x101   :  { %v337_v40 = vadd.f32 %v434_v34, %v336_v38  ;;  %v338_v41 = vpop.f32.mrb[1].mxu1 }
 0x102   :  { %v339_v43 = vpop.f32.mrb[2].mxu1 }
 0x103   :  { %v350_v44 = vmul.f32 %v410_v39, %v337_v40  ;;  %v340_v45 = vadd.f32 %v437_v37, %v339_v43  ;;  %v341_v46 = vpop.f32.mrb[3].mxu1 }
 0x105   :  { %v359_v47 = vadd.f32 %v411_v42, %v350_v44  ;;  %v351_v48 = vmul.f32 %v410_v39, %v340_v45 }
 0x107   :  { %v361_v49 = vmax.f32 %v359_v47, 0.0  ;;  %v360_v50 = vadd.f32 %v411_v42, %v351_v48 }
 0x109   :  { %v414_v51 = vpack.c.bf16 %v361_v49, %v361_v49  ;;  %v362_v52 = vmax.f32 %v360_v50, 0.0 }
 0x10b   :  { %372 = vst.msk [vmem:[%s618_s4] sm:$0xf] %vm371_vm1, %v414_v51  ;;  %v415_v53 = vpack.c.bf16 %v362_v52, %v362_v52 }
 0x10d   :  { %373 = vst.msk [vmem:[%s618_s4 + $0x4] sm:$0xf] %vm371_vm1, %v415_v53 }

// kernel: resnet_forward.18
= control target key start
LH: loop header
LB: loop body
LE: loop exit
PB: predicated region body
PF: predicated region fallthrough
CT: control target
= control target key end

     0   :  { %v132_v0 = vmov 0.0   ;;  %vm133_vm0 = vmmov 0   ;;  %vm33_vm1 = vcmask 130048   ;;  %vm104_vm2 = vcmask 257024   ;;  %s177_s1 = inlined_call_operand.vmem [shape: bf16[16,32], index: 1, kind: input, shape index: {}]   ;;  %s178_s0 = inlined_call_operand.vmem [shape: bf16[16,16], index: 0, kind: input, shape index: {}]   ;;  %s179_s2 = inlined_call_operand.vmem [shape: f32[1,32], index: 2, kind: input, shape index: {}]   ;;  %s180_s3 = inlined_call_operand.vmem [shape: f32[1,32], index: 3, kind: input, shape index: {}]   ;;  %s181_s4 = inlined_call_operand.vmem [shape: bf16[16,32], index: 4, kind: output, shape index: {}]  }
   0x1   :  { %122 = vmatprep.subr.bf16.mxu0 %v132_v0  ;;  %v130_v1 = vld [vmem:[%s177_s1] sm:$0xff]   ;;  %124 = vmatprep.mubr.msk.bf16.mxu0 %vm133_vm0, %v132_v0 }
   0x2   :  { %v131_v2 = vld [vmem:[%s178_s0] sm:$0xff]   ;;  %123 = vmatpush3.bf16.msra.mxu0 %v130_v1 }
   0x3   :  { %v114_v3 = vld [vmem:[%s179_s2] ss:$0 sm:$0xff] }
   0x4   :  { %v115_v5 = vld [vmem:[%s180_s3] ss:$0 sm:$0xff] }
   0x5   :  { %125 = vmatmul.mubr.msk.bf16.vlgmr.msra.gmra.mrb[0].mxu0 %vm33_vm1, %v131_v2 }
  0xd8   :  { %v71_v4 = vpop.f32.mrb[0].mxu0 }
  0xd9   :  { %v85_v6 = vmul.f32 %v114_v3, %v71_v4  ;;  %v126_v7 = vpop.f32.mrb[1].mxu0 }
  0xda   :  { %v74_v8 = vpop.f32.mrb[2].mxu0 }
  0xdb   :  { %v94_v9 = vadd.f32 %v115_v5, %v85_v6  ;;  %v86_v10 = vmul.f32 %v114_v3, %v74_v8  ;;  %v127_v11 = vpop.f32.mrb[3].mxu0 }
  0xdd   :  { %v118_v12 = vpack.c.bf16 %v94_v9, %v94_v9  ;;  %v95_v13 = vadd.f32 %v115_v5, %v86_v10 }
  0xdf   :  { %105 = vst.msk [vmem:[%s181_s4] sm:$0xf] %vm104_vm2, %v118_v12  ;;  %v119_v14 = vpack.c.bf16 %v95_v13, %v95_v13 }
  0xe1   :  { %106 = vst.msk [vmem:[%s181_s4 + $0x4] sm:$0xf] %vm104_vm2, %v119_v14 }

// kernel: resnet_forward.20
= control target key start
LH: loop header
LB: loop body
LE: loop exit
PB: predicated region body
PF: predicated region fallthrough
CT: control target
= control target key end

     0   :  { %v932_v36 = vmov 0.0   ;;  %vm933_vm0 = vmmov 0   ;;  %vm496_vm1 = vcmask 785408   ;;  %vm698_vm2 = vcmask 257024   ;;  %s1162_s1 = inlined_call_operand.vmem [shape: bf16[864,32], index: 1, kind: input, shape index: {}]   ;;  %s1163_s0 = inlined_call_operand.vmem [shape: bf16[16,864], index: 0, kind: input, shape index: {}]   ;;  %s1164_s2 = inlined_call_operand.vmem [shape: f32[1,32], index: 2, kind: input, shape index: {}]   ;;  %s1165_s4 = inlined_call_operand.vmem [shape: bf16[16,32], index: 4, kind: input, shape index: {}]   ;;  %s1166_s3 = inlined_call_operand.vmem [shape: f32[1,32], index: 3, kind: input, shape index: {}]   ;;  %s1167_s5 = inlined_call_operand.vmem [shape: bf16[16,32], index: 5, kind: output, shape index: {}]  }
   0x1   :  { %v868_v0 = vld [vmem:[%s1162_s1 + $0x40] sm:$0xff]   ;;  %v872_v4 = vld [vmem:[%s1162_s1 + $0x48] sm:$0xff]   ;;  %v876_v8 = vld [vmem:[%s1162_s1 + $0x50] sm:$0xff]  }
   0x2   :  { %v869_v1 = vld [vmem:[%s1162_s1 + $0xc0] sm:$0xff]   ;;  %777 = vmatprep.subr.bf16.mxu0 %v868_v0  ;;  %v873_v5 = vld [vmem:[%s1162_s1 + $0xc8] sm:$0xff]   ;;  %v877_v9 = vld [vmem:[%s1162_s1 + $0xd0] sm:$0xff]  }
   0x3   :  { %v870_v2 = vld [vmem:[%s1162_s1] sm:$0xff]   ;;  %799 = vmatprep.subr.bf16.mxu1 %v869_v1  ;;  %v874_v6 = vld [vmem:[%s1162_s1 + $0x8] sm:$0xff]   ;;  %v878_v10 = vld [vmem:[%s1162_s1 + $0x10] sm:$0xff]  }
   0x4   :  { %v871_v3 = vld [vmem:[%s1162_s1 + $0x80] sm:$0xff]   ;;  %778 = vmatpush3.bf16.msra.mxu0 %v870_v2  ;;  %v875_v7 = vld [vmem:[%s1162_s1 + $0x88] sm:$0xff]   ;;  %v879_v11 = vld [vmem:[%s1162_s1 + $0x90] sm:$0xff]  }
   0x5   :  { %800 = vmatpush3.bf16.msra.mxu1 %v871_v3  ;;  %779 = vmatprep.subr.bf16.mxu0 %v872_v4  ;;  %v880_v12 = vld [vmem:[%s1162_s1 + $0x58] sm:$0xff]   ;;  %v884_v16 = vld [vmem:[%s1162_s1 + $0x60] sm:$0xff]   ;;  %v888_v20 = vld [vmem:[%s1162_s1 + $0x68] sm:$0xff]  }
   0x6   :  { %801 = vmatprep.subr.bf16.mxu1 %v873_v5  ;;  %v881_v13 = vld [vmem:[%s1162_s1 + $0xd8] sm:$0xff]   ;;  %v885_v17 = vld [vmem:[%s1162_s1 + $0xe0] sm:$0xff]   ;;  %v889_v21 = vld [vmem:[%s1162_s1 + $0xe8] sm:$0xff]  }
   0x7   :  { %v882_v14 = vld [vmem:[%s1162_s1 + $0x18] sm:$0xff]   ;;  %v886_v18 = vld [vmem:[%s1162_s1 + $0x20] sm:$0xff]   ;;  %v890_v22 = vld [vmem:[%s1162_s1 + $0x28] sm:$0xff]  }
   0x8   :  { %780 = vmatpush3.bf16.msra.mxu0 %v874_v6  ;;  %v883_v15 = vld [vmem:[%s1162_s1 + $0x98] sm:$0xff]   ;;  %v887_v19 = vld [vmem:[%s1162_s1 + $0xa0] sm:$0xff]   ;;  %v891_v23 = vld [vmem:[%s1162_s1 + $0xa8] sm:$0xff]  }
   0x9   :  { %802 = vmatpush3.bf16.msra.mxu1 %v875_v7  ;;  %781 = vmatprep.subr.bf16.mxu0 %v876_v8  ;;  %v892_v24 = vld [vmem:[%s1162_s1 + $0x70] sm:$0xff]   ;;  %v896_v28 = vld [vmem:[%s1162_s1 + $0x78] sm:$0xff]   ;;  %v902_v33 = vld [vmem:[%s1163_s0 + $0x4] ss:$28 sps:$4 sm:$0xff]  }
   0xa   :  { %803 = vmatprep.subr.bf16.mxu1 %v877_v9  ;;  %v893_v25 = vld [vmem:[%s1162_s1 + $0xf0] sm:$0xff]   ;;  %v897_v29 = vld [vmem:[%s1162_s1 + $0xf8] sm:$0xff]   ;;  %v903_v34 = vld [vmem:[%s1163_s0 + $0x8] ss:$28 sps:$4 sm:$0xff]   ;;  %532 = vmatprep.mubr.bf16.mxu0 %v902_v33 }
   0xb   :  { %v894_v26 = vld [vmem:[%s1162_s1 + $0x30] sm:$0xff]   ;;  %v898_v30 = vld [vmem:[%s1162_s1 + $0x38] sm:$0xff]   ;;  %v905_v35 = vld [vmem:[%s1163_s0 + $0xc] ss:$28 sps:$4 sm:$0xff]  }
   0xc   :  { %782 = vmatpush3.bf16.msra.mxu0 %v878_v10  ;;  %v895_v27 = vld [vmem:[%s1162_s1 + $0xb0] sm:$0xff]   ;;  %v899_v31 = vld [vmem:[%s1162_s1 + $0xb8] sm:$0xff]   ;;  %v906_v37 = vld [vmem:[%s1162_s1 + $0x140] sm:$0xff]   ;;  %573 = vmatprep.mubr.bf16.mxu1 %v905_v35 }
   0xd   :  { %804 = vmatpush3.bf16.msra.mxu1 %v879_v11  ;;  %783 = vmatprep.subr.bf16.mxu0 %v880_v12  ;;  %v900_v32 = vld [vmem:[%s1163_s0] ss:$28 sps:$4 sm:$0xff]   ;;  %v908_v39 = vld [vmem:[%s1162_s1 + $0x148] sm:$0xff]   ;;  %v910_v41 = vld [vmem:[%s1162_s1 + $0x150] sm:$0xff]  }
   0xe   :  { %805 = vmatprep.subr.bf16.mxu1 %v881_v13  ;;  %v907_v38 = vld [vmem:[%s1162_s1 + $0x100] sm:$0xff]   ;;  %v909_v40 = vld [vmem:[%s1162_s1 + $0x108] sm:$0xff]   ;;  %v911_v43 = vld [vmem:[%s1162_s1 + $0x110] sm:$0xff]  }
   0xf   :  { %v912_v42 = vld [vmem:[%s1162_s1 + $0x180] sm:$0xff]   ;;  %v913_v44 = vld [vmem:[%s1162_s1 + $0x158] sm:$0xff]   ;;  %v915_v45 = vld [vmem:[%s1162_s1 + $0x188] sm:$0xff]  }
  0x10   :  { %784 = vmatpush3.bf16.msra.mxu0 %v882_v14  ;;  %v914_v46 = vld [vmem:[%s1162_s1 + $0x118] sm:$0xff]   ;;  %v916_v47 = vld [vmem:[%s1162_s1 + $0x160] sm:$0xff]   ;;  %v918_v48 = vld [vmem:[%s1162_s1 + $0x190] sm:$0xff]  }
  0x11   :  { %806 = vmatpush3.bf16.msra.mxu1 %v883_v15  ;;  %785 = vmatprep.subr.bf16.mxu0 %v884_v16  ;;  %v917_v49 = vld [vmem:[%s1162_s1 + $0x120] sm:$0xff]   ;;  %v919_v50 = vld [vmem:[%s1162_s1 + $0x168] sm:$0xff]   ;;  %v921_v51 = vld [vmem:[%s1162_s1 + $0x198] sm:$0xff]  }
  0x12   :  { %807 = vmatprep.subr.bf16.mxu1 %v885_v17  ;;  %v920_v52 = vld [vmem:[%s1162_s1 + $0x128] sm:$0xff]   ;;  %v922_v53 = vld [vmem:[%s1162_s1 + $0x170] sm:$0xff]   ;;  %v924_v54 = vld [vmem:[%s1162_s1 + $0x1a0] sm:$0xff]  }
  0x13   :  { %v929_v55 = vld [vmem:[%s1163_s0 + $0x14] ss:$28 sps:$4 sm:$0xff]   ;;  %v925_v57 = vld [vmem:[%s1162_s1 + $0x178] sm:$0xff]   ;;  %v930_v58 = vld [vmem:[%s1162_s1 + $0x1a8] sm:$0xff]  }
  0x14   :  { %786 = vmatpush3.bf16.msra.mxu0 %v886_v18  ;;  %v923_v56 = vld [vmem:[%s1162_s1 + $0x130] sm:$0xff]   ;;  %v926_v59 = vld [vmem:[%s1162_s1 + $0x138] sm:$0xff]  }
  0x15   :  { %808 = vmatpush3.bf16.msra.mxu1 %v887_v19  ;;  %787 = vmatprep.subr.bf16.mxu0 %v888_v20  ;;  %v931_v60 = vld [vmem:[%s1163_s0 + $0x18] ss:$28 sps:$4 sm:$0xff]   ;;  %v927_v61 = vld [vmem:[%s1163_s0 + $0x10] ss:$28 sps:$4 sm:$0xff]  }
  0x16   :  { %809 = vmatprep.subr.bf16.mxu1 %v889_v21 }
  0x18   :  { %788 = vmatpush3.bf16.msra.mxu0 %v890_v22 }
  0x19   :  { %810 = vmatpush3.bf16.msra.mxu1 %v891_v23  ;;  %789 = vmatprep.subr.bf16.mxu0 %v892_v24  ;;  %v767_v23 = vld [vmem:[%s1164_s2] ss:$0 sm:$0xff] }
  0x1a   :  { %811 = vmatprep.subr.bf16.mxu1 %v893_v25  ;;  %v774_v24 = vld [vmem:[%s1165_s4] sm:$0xff]  }
  0x1b   :  { %v776_v33 = vunpack.c.h.bf16 %v774_v24 }
  0x1c   :  { %790 = vmatpush3.bf16.msra.mxu0 %v894_v26 }
  0x1d   :  { %812 = vmatpush3.bf16.msra.mxu1 %v895_v27  ;;  %791 = vmatprep.subr.bf16.mxu0 %v896_v28  ;;  %v768_v27 = vld [vmem:[%s1166_s3] ss:$0 sm:$0xff] }
  0x1e   :  { %813 = vmatprep.subr.bf16.mxu1 %v897_v29  ;;  %v775_v29 = vunpack.c.l.bf16 %v774_v24 }
  0x20   :  { %792 = vmatpush3.bf16.msra.mxu0 %v898_v30 }
  0x21   :  { %814 = vmatpush3.bf16.msra.mxu1 %v899_v31  ;;  %821 = vmatprep.subr.bf16.mxu0 %v906_v37 }
  0x22   :  { %850 = vmatprep.subr.bf16.mxu1 %v932_v36 }
  0x23   :  { %533 = vmatmul.mubr.bf16.vlgmr.msra.gmra.mrb[0].mxu0 %v900_v32 }
  0x24   :  { %574 = vmatmul.mubr.bf16.vlgmr.msra.gmra.mrb[0].mxu1 %v903_v34  ;;  %822 = vmatpush3.bf16.msra.mxu0 %v907_v38 }
  0x25   :  { %862 = vmatprep.mubr.msk.bf16.mxu1 %vm933_vm0, %v932_v36  ;;  %823 = vmatprep.subr.bf16.mxu0 %v908_v39 }
  0x26   :  { %851 = vmatpush3.bf16.msra.mxu1 %v912_v42  ;;  %614 = vmatprep.mubr.bf16.mxu0 %v929_v55 }
  0x27   :  { %852 = vmatprep.subr.bf16.mxu1 %v932_v36 }
  0x28   :  { %824 = vmatpush3.bf16.msra.mxu0 %v909_v40 }
  0x29   :  { %825 = vmatprep.subr.bf16.mxu0 %v910_v41 }
  0x2a   :  { %853 = vmatpush3.bf16.msra.mxu1 %v915_v45 }
  0x2b   :  { %854 = vmatprep.subr.bf16.mxu1 %v932_v36 }
  0x2c   :  { %826 = vmatpush3.bf16.msra.mxu0 %v911_v43 }
  0x2d   :  { %827 = vmatprep.subr.bf16.mxu0 %v913_v44 }
  0x2e   :  { %855 = vmatpush3.bf16.msra.mxu1 %v918_v48 }
  0x2f   :  { %856 = vmatprep.subr.bf16.mxu1 %v932_v36 }
  0x30   :  { %828 = vmatpush3.bf16.msra.mxu0 %v914_v46 }
  0x31   :  { %829 = vmatprep.subr.bf16.mxu0 %v916_v47 }
  0x32   :  { %857 = vmatpush3.bf16.msra.mxu1 %v921_v51 }
  0x33   :  { %858 = vmatprep.subr.bf16.mxu1 %v932_v36 }
  0x34   :  { %830 = vmatpush3.bf16.msra.mxu0 %v917_v49 }
  0x35   :  { %831 = vmatprep.subr.bf16.mxu0 %v919_v50 }
  0x36   :  { %859 = vmatpush3.bf16.msra.mxu1 %v924_v54 }
  0x37   :  { %860 = vmatprep.subr.bf16.mxu1 %v932_v36 }
  0x38   :  { %832 = vmatpush3.bf16.msra.mxu0 %v920_v52 }
  0x39   :  { %833 = vmatprep.subr.bf16.mxu0 %v922_v53 }
  0x3a   :  { %861 = vmatpush3.bf16.msra.mxu1 %v930_v58 }
  0x3c   :  { %834 = vmatpush3.bf16.msra.mxu0 %v923_v56 }
  0x3d   :  { %835 = vmatprep.subr.bf16.mxu0 %v925_v57  ;;  %863 = vmatmul.mubr.msk.bf16.vlgmr.msra.gmra.mrb[4].mxu1 %vm496_vm1, %v931_v60 }
  0x40   :  { %836 = vmatpush3.bf16.msra.mxu0 %v926_v59 }
  0x43   :  { %615 = vmatmul.mubr.bf16.vlgmr.msra.gmra.mrb[4].mxu0 %v927_v61 }
  0xf6   :  { %v793_v62 = vpop.f32.mrb[0].mxu0 }
  0xf7   :  { %v815_v63 = vpop.f32.mrb[0].mxu1  ;;  %v794_v0 = vpop.f32.mrb[1].mxu0 }
  0xf8   :  { %v795_v1 = vadd.f32 %v794_v0, %v793_v62  ;;  %v816_v2 = vpop.f32.mrb[1].mxu1  ;;  %v796_v3 = vpop.f32.mrb[2].mxu0 }
  0xf9   :  { %v817_v4 = vadd.f32 %v816_v2, %v815_v63  ;;  %v818_v5 = vpop.f32.mrb[2].mxu1  ;;  %v797_v6 = vpop.f32.mrb[3].mxu0 }
  0xfa   :  { %v798_v7 = vadd.f32 %v797_v6, %v796_v3  ;;  %v819_v8 = vpop.f32.mrb[3].mxu1 }
  0xfb   :  { %v576_v9 = vadd.f32 %v817_v4, %v795_v1  ;;  %v820_v10 = vadd.f32 %v819_v8, %v818_v5 }
  0xfd   :  { %v579_v11 = vadd.f32 %v820_v10, %v798_v7 }
 0x110   :  { %v657_v12 = vpop.f32.mrb[4].mxu1 }
 0x111   :  { %v864_v13 = vpop.f32.mrb[5].mxu1 }
 0x112   :  { %v660_v14 = vpop.f32.mrb[6].mxu1 }
 0x113   :  { %v865_v16 = vpop.f32.mrb[7].mxu1 }
 0x116   :  { %v837_v15 = vpop.f32.mrb[4].mxu0 }
 0x117   :  { %v838_v17 = vpop.f32.mrb[5].mxu0 }
 0x118   :  { %v839_v18 = vadd.f32 %v838_v17, %v837_v15  ;;  %v840_v19 = vpop.f32.mrb[6].mxu0 }
 0x119   :  { %v841_v20 = vpop.f32.mrb[7].mxu0 }
 0x11a   :  { %v617_v21 = vadd.f32 %v839_v18, %v576_v9  ;;  %v842_v22 = vadd.f32 %v841_v20, %v840_v19 }
 0x11c   :  { %v658_v25 = vadd.f32 %v657_v12, %v617_v21  ;;  %v620_v26 = vadd.f32 %v842_v22, %v579_v11 }
 0x11e   :  { %v671_v28 = vmul.f32 %v767_v23, %v658_v25  ;;  %v661_v30 = vadd.f32 %v660_v14, %v620_v26 }
 0x120   :  { %v680_v31 = vadd.f32 %v768_v27, %v671_v28  ;;  %v672_v32 = vmul.f32 %v767_v23, %v661_v30 }
 0x122   :  { %v686_v34 = vadd.f32 %v775_v29, %v680_v31  ;;  %v681_v35 = vadd.f32 %v768_v27, %v672_v32 }
 0x124   :  { %v688_v36 = vmax.f32 %v686_v34, 0.0  ;;  %v687_v37 = vadd.f32 %v776_v33, %v681_v35 }
 0x126   :  { %v771_v38 = vpack.c.bf16 %v688_v36, %v688_v36  ;;  %v689_v39 = vmax.f32 %v687_v37, 0.0 }
 0x128   :  { %699 = vst.msk [vmem:[%s1167_s5] sm:$0xf] %vm698_vm2, %v771_v38  ;;  %v772_v40 = vpack.c.bf16 %v689_v39, %v689_v39 }
 0x12a   :  { %700 = vst.msk [vmem:[%s1167_s5 + $0x4] sm:$0xf] %vm698_vm2, %v772_v40 }

// kernel: resnet_forward.21
= control target key start
LH: loop header
LB: loop body
LE: loop exit
PB: predicated region body
PF: predicated region fallthrough
CT: control target
= control target key end

     0   :  { %v145_v0 = vmov 0.0   ;;  %vm146_vm0 = vmmov 0   ;;  %vm41_vm1 = vcmask 261120   ;;  %vm112_vm2 = vcmask 519168   ;;  %s193_s1 = inlined_call_operand.vmem [shape: bf16[32,64], index: 1, kind: input, shape index: {}]   ;;  %s194_s0 = inlined_call_operand.vmem [shape: bf16[16,32], index: 0, kind: input, shape index: {}]   ;;  %s195_s2 = inlined_call_operand.vmem [shape: f32[1,64], index: 2, kind: input, shape index: {}]   ;;  %s196_s3 = inlined_call_operand.vmem [shape: f32[1,64], index: 3, kind: input, shape index: {}]   ;;  %s197_s4 = inlined_call_operand.vmem [shape: bf16[16,64], index: 4, kind: output, shape index: {}]  }
   0x1   :  { %132 = vmatprep.subr.bf16.mxu0 %v145_v0  ;;  %v142_v1 = vld [vmem:[%s193_s1] sm:$0xff]   ;;  %136 = vmatprep.mubr.msk.bf16.mxu0 %vm146_vm0, %v145_v0  ;;  %v143_v2 = vld [vmem:[%s193_s1 + $0x8] sm:$0xff]  }
   0x2   :  { %133 = vmatpush3.bf16.msra.mxu0 %v142_v1  ;;  %v144_v3 = vld [vmem:[%s194_s0] sm:$0xff]  }
   0x3   :  { %134 = vmatprep.subr.bf16.mxu0 %v145_v0  ;;  %v123_v4 = vld [vmem:[%s195_s2] ss:$0 sm:$0xff] }
   0x4   :  { %v124_v6 = vld [vmem:[%s196_s3] ss:$0 sm:$0xff] }
   0x6   :  { %135 = vmatpush3.bf16.msra.mxu0 %v143_v2 }
   0x9   :  { %137 = vmatmul.mubr.msk.bf16.vlgmr.msra.gmra.mrb[0].mxu0 %vm41_vm1, %v144_v3 }
  0xdc   :  { %v79_v5 = vpop.f32.mrb[0].mxu0 }
  0xdd   :  { %v93_v7 = vmul.f32 %v123_v4, %v79_v5  ;;  %v138_v8 = vpop.f32.mrb[1].mxu0 }
  0xde   :  { %v82_v9 = vpop.f32.mrb[2].mxu0 }
  0xdf   :  { %v102_v10 = vadd.f32 %v124_v6, %v93_v7  ;;  %v94_v11 = vmul.f32 %v123_v4, %v82_v9  ;;  %v139_v12 = vpop.f32.mrb[3].mxu0 }
  0xe1   :  { %v127_v13 = vpack.c.bf16 %v102_v10, %v102_v10  ;;  %v103_v14 = vadd.f32 %v124_v6, %v94_v11 }
  0xe3   :  { %113 = vst.msk [vmem:[%s197_s4] sm:$0xf] %vm112_vm2, %v127_v13  ;;  %v128_v15 = vpack.c.bf16 %v103_v14, %v103_v14 }
  0xe5   :  { %114 = vst.msk [vmem:[%s197_s4 + $0x4] sm:$0xf] %vm112_vm2, %v128_v15 }

// kernel: resnet_forward.22
= control target key start
LH: loop header
LB: loop body
LE: loop exit
PB: predicated region body
PF: predicated region fallthrough
CT: control target
= control target key end

     0   :  { %v919_v36 = vmov 0.0   ;;  %vm920_vm0 = vmmov 0   ;;  %vm493_vm1 = vcmask 785408   ;;  %vm689_vm2 = vcmask 519168   ;;  %s1141_s1 = inlined_call_operand.vmem [shape: bf16[864,64], index: 1, kind: input, shape index: {}]   ;;  %s1142_s0 = inlined_call_operand.vmem [shape: bf16[16,864], index: 0, kind: input, shape index: {}]   ;;  %s1143_s2 = inlined_call_operand.vmem [shape: f32[1,64], index: 2, kind: input, shape index: {}]   ;;  %s1144_s3 = inlined_call_operand.vmem [shape: f32[1,64], index: 3, kind: input, shape index: {}]   ;;  %s1145_s4 = inlined_call_operand.vmem [shape: bf16[16,64], index: 4, kind: output, shape index: {}]  }
   0x1   :  { %v855_v0 = vld [vmem:[%s1141_s1 + $0x40] sm:$0xff]   ;;  %v859_v4 = vld [vmem:[%s1141_s1 + $0x48] sm:$0xff]   ;;  %v863_v8 = vld [vmem:[%s1141_s1 + $0x50] sm:$0xff]  }
   0x2   :  { %v856_v1 = vld [vmem:[%s1141_s1 + $0xc0] sm:$0xff]   ;;  %764 = vmatprep.subr.bf16.mxu0 %v855_v0  ;;  %v860_v5 = vld [vmem:[%s1141_s1 + $0xc8] sm:$0xff]   ;;  %v864_v9 = vld [vmem:[%s1141_s1 + $0xd0] sm:$0xff]  }
   0x3   :  { %v857_v2 = vld [vmem:[%s1141_s1] sm:$0xff]   ;;  %786 = vmatprep.subr.bf16.mxu1 %v856_v1  ;;  %v861_v6 = vld [vmem:[%s1141_s1 + $0x8] sm:$0xff]   ;;  %v865_v10 = vld [vmem:[%s1141_s1 + $0x10] sm:$0xff]  }
   0x4   :  { %v858_v3 = vld [vmem:[%s1141_s1 + $0x80] sm:$0xff]   ;;  %765 = vmatpush3.bf16.msra.mxu0 %v857_v2  ;;  %v862_v7 = vld [vmem:[%s1141_s1 + $0x88] sm:$0xff]   ;;  %v866_v11 = vld [vmem:[%s1141_s1 + $0x90] sm:$0xff]  }
   0x5   :  { %787 = vmatpush3.bf16.msra.mxu1 %v858_v3  ;;  %766 = vmatprep.subr.bf16.mxu0 %v859_v4  ;;  %v867_v12 = vld [vmem:[%s1141_s1 + $0x58] sm:$0xff]   ;;  %v871_v16 = vld [vmem:[%s1141_s1 + $0x60] sm:$0xff]   ;;  %v875_v20 = vld [vmem:[%s1141_s1 + $0x68] sm:$0xff]  }
   0x6   :  { %788 = vmatprep.subr.bf16.mxu1 %v860_v5  ;;  %v868_v13 = vld [vmem:[%s1141_s1 + $0xd8] sm:$0xff]   ;;  %v872_v17 = vld [vmem:[%s1141_s1 + $0xe0] sm:$0xff]   ;;  %v876_v21 = vld [vmem:[%s1141_s1 + $0xe8] sm:$0xff]  }
   0x7   :  { %v869_v14 = vld [vmem:[%s1141_s1 + $0x18] sm:$0xff]   ;;  %v873_v18 = vld [vmem:[%s1141_s1 + $0x20] sm:$0xff]   ;;  %v877_v22 = vld [vmem:[%s1141_s1 + $0x28] sm:$0xff]  }
   0x8   :  { %767 = vmatpush3.bf16.msra.mxu0 %v861_v6  ;;  %v870_v15 = vld [vmem:[%s1141_s1 + $0x98] sm:$0xff]   ;;  %v874_v19 = vld [vmem:[%s1141_s1 + $0xa0] sm:$0xff]   ;;  %v878_v23 = vld [vmem:[%s1141_s1 + $0xa8] sm:$0xff]  }
   0x9   :  { %789 = vmatpush3.bf16.msra.mxu1 %v862_v7  ;;  %768 = vmatprep.subr.bf16.mxu0 %v863_v8  ;;  %v879_v24 = vld [vmem:[%s1141_s1 + $0x70] sm:$0xff]   ;;  %v883_v28 = vld [vmem:[%s1141_s1 + $0x78] sm:$0xff]   ;;  %v889_v33 = vld [vmem:[%s1142_s0 + $0x4] ss:$28 sps:$4 sm:$0xff]  }
   0xa   :  { %790 = vmatprep.subr.bf16.mxu1 %v864_v9  ;;  %v880_v25 = vld [vmem:[%s1141_s1 + $0xf0] sm:$0xff]   ;;  %v884_v29 = vld [vmem:[%s1141_s1 + $0xf8] sm:$0xff]   ;;  %v890_v34 = vld [vmem:[%s1142_s0 + $0x8] ss:$28 sps:$4 sm:$0xff]   ;;  %529 = vmatprep.mubr.bf16.mxu0 %v889_v33 }
   0xb   :  { %v881_v26 = vld [vmem:[%s1141_s1 + $0x30] sm:$0xff]   ;;  %v885_v30 = vld [vmem:[%s1141_s1 + $0x38] sm:$0xff]   ;;  %v892_v35 = vld [vmem:[%s1142_s0 + $0xc] ss:$28 sps:$4 sm:$0xff]  }
   0xc   :  { %769 = vmatpush3.bf16.msra.mxu0 %v865_v10  ;;  %v882_v27 = vld [vmem:[%s1141_s1 + $0xb0] sm:$0xff]   ;;  %v886_v31 = vld [vmem:[%s1141_s1 + $0xb8] sm:$0xff]   ;;  %v893_v37 = vld [vmem:[%s1141_s1 + $0x140] sm:$0xff]   ;;  %570 = vmatprep.mubr.bf16.mxu1 %v892_v35 }
   0xd   :  { %791 = vmatpush3.bf16.msra.mxu1 %v866_v11  ;;  %770 = vmatprep.subr.bf16.mxu0 %v867_v12  ;;  %v887_v32 = vld [vmem:[%s1142_s0] ss:$28 sps:$4 sm:$0xff]   ;;  %v895_v39 = vld [vmem:[%s1141_s1 + $0x148] sm:$0xff]   ;;  %v897_v41 = vld [vmem:[%s1141_s1 + $0x150] sm:$0xff]  }
   0xe   :  { %792 = vmatprep.subr.bf16.mxu1 %v868_v13  ;;  %v894_v38 = vld [vmem:[%s1141_s1 + $0x100] sm:$0xff]   ;;  %v896_v40 = vld [vmem:[%s1141_s1 + $0x108] sm:$0xff]   ;;  %v898_v43 = vld [vmem:[%s1141_s1 + $0x110] sm:$0xff]  }
   0xf   :  { %v899_v42 = vld [vmem:[%s1141_s1 + $0x180] sm:$0xff]   ;;  %v900_v44 = vld [vmem:[%s1141_s1 + $0x158] sm:$0xff]   ;;  %v902_v45 = vld [vmem:[%s1141_s1 + $0x188] sm:$0xff]  }
  0x10   :  { %771 = vmatpush3.bf16.msra.mxu0 %v869_v14  ;;  %v901_v46 = vld [vmem:[%s1141_s1 + $0x118] sm:$0xff]   ;;  %v903_v47 = vld [vmem:[%s1141_s1 + $0x160] sm:$0xff]   ;;  %v905_v48 = vld [vmem:[%s1141_s1 + $0x190] sm:$0xff]  }
  0x11   :  { %793 = vmatpush3.bf16.msra.mxu1 %v870_v15  ;;  %772 = vmatprep.subr.bf16.mxu0 %v871_v16  ;;  %v904_v49 = vld [vmem:[%s1141_s1 + $0x120] sm:$0xff]   ;;  %v906_v50 = vld [vmem:[%s1141_s1 + $0x168] sm:$0xff]   ;;  %v908_v51 = vld [vmem:[%s1141_s1 + $0x198] sm:$0xff]  }
  0x12   :  { %794 = vmatprep.subr.bf16.mxu1 %v872_v17  ;;  %v907_v52 = vld [vmem:[%s1141_s1 + $0x128] sm:$0xff]   ;;  %v909_v53 = vld [vmem:[%s1141_s1 + $0x170] sm:$0xff]   ;;  %v911_v54 = vld [vmem:[%s1141_s1 + $0x1a0] sm:$0xff]  }
  0x13   :  { %v916_v55 = vld [vmem:[%s1142_s0 + $0x14] ss:$28 sps:$4 sm:$0xff]   ;;  %v912_v57 = vld [vmem:[%s1141_s1 + $0x178] sm:$0xff]   ;;  %v917_v58 = vld [vmem:[%s1141_s1 + $0x1a8] sm:$0xff]  }
  0x14   :  { %773 = vmatpush3.bf16.msra.mxu0 %v873_v18  ;;  %v910_v56 = vld [vmem:[%s1141_s1 + $0x130] sm:$0xff]   ;;  %v913_v59 = vld [vmem:[%s1141_s1 + $0x138] sm:$0xff]  }
  0x15   :  { %795 = vmatpush3.bf16.msra.mxu1 %v874_v19  ;;  %774 = vmatprep.subr.bf16.mxu0 %v875_v20  ;;  %v918_v60 = vld [vmem:[%s1142_s0 + $0x18] ss:$28 sps:$4 sm:$0xff]   ;;  %v914_v61 = vld [vmem:[%s1142_s0 + $0x10] ss:$28 sps:$4 sm:$0xff]  }
  0x16   :  { %796 = vmatprep.subr.bf16.mxu1 %v876_v21 }
  0x18   :  { %775 = vmatpush3.bf16.msra.mxu0 %v877_v22 }
  0x19   :  { %797 = vmatpush3.bf16.msra.mxu1 %v878_v23  ;;  %776 = vmatprep.subr.bf16.mxu0 %v879_v24  ;;  %v758_v23 = vld [vmem:[%s1143_s2] ss:$0 sm:$0xff] }
  0x1a   :  { %798 = vmatprep.subr.bf16.mxu1 %v880_v25 }
  0x1c   :  { %777 = vmatpush3.bf16.msra.mxu0 %v881_v26  ;;  %v759_v26 = vld [vmem:[%s1144_s3] ss:$0 sm:$0xff] }
  0x1d   :  { %799 = vmatpush3.bf16.msra.mxu1 %v882_v27  ;;  %778 = vmatprep.subr.bf16.mxu0 %v883_v28 }
  0x1e   :  { %800 = vmatprep.subr.bf16.mxu1 %v884_v29 }
  0x20   :  { %779 = vmatpush3.bf16.msra.mxu0 %v885_v30 }
  0x21   :  { %801 = vmatpush3.bf16.msra.mxu1 %v886_v31  ;;  %808 = vmatprep.subr.bf16.mxu0 %v893_v37 }
  0x22   :  { %837 = vmatprep.subr.bf16.mxu1 %v919_v36 }
  0x23   :  { %530 = vmatmul.mubr.bf16.vlgmr.msra.gmra.mrb[0].mxu0 %v887_v32 }
  0x24   :  { %571 = vmatmul.mubr.bf16.vlgmr.msra.gmra.mrb[0].mxu1 %v890_v34  ;;  %809 = vmatpush3.bf16.msra.mxu0 %v894_v38 }
  0x25   :  { %849 = vmatprep.mubr.msk.bf16.mxu1 %vm920_vm0, %v919_v36  ;;  %810 = vmatprep.subr.bf16.mxu0 %v895_v39 }
  0x26   :  { %838 = vmatpush3.bf16.msra.mxu1 %v899_v42  ;;  %611 = vmatprep.mubr.bf16.mxu0 %v916_v55 }
  0x27   :  { %839 = vmatprep.subr.bf16.mxu1 %v919_v36 }
  0x28   :  { %811 = vmatpush3.bf16.msra.mxu0 %v896_v40 }
  0x29   :  { %812 = vmatprep.subr.bf16.mxu0 %v897_v41 }
  0x2a   :  { %840 = vmatpush3.bf16.msra.mxu1 %v902_v45 }
  0x2b   :  { %841 = vmatprep.subr.bf16.mxu1 %v919_v36 }
  0x2c   :  { %813 = vmatpush3.bf16.msra.mxu0 %v898_v43 }
  0x2d   :  { %814 = vmatprep.subr.bf16.mxu0 %v900_v44 }
  0x2e   :  { %842 = vmatpush3.bf16.msra.mxu1 %v905_v48 }
  0x2f   :  { %843 = vmatprep.subr.bf16.mxu1 %v919_v36 }
  0x30   :  { %815 = vmatpush3.bf16.msra.mxu0 %v901_v46 }
  0x31   :  { %816 = vmatprep.subr.bf16.mxu0 %v903_v47 }
  0x32   :  { %844 = vmatpush3.bf16.msra.mxu1 %v908_v51 }
  0x33   :  { %845 = vmatprep.subr.bf16.mxu1 %v919_v36 }
  0x34   :  { %817 = vmatpush3.bf16.msra.mxu0 %v904_v49 }
  0x35   :  { %818 = vmatprep.subr.bf16.mxu0 %v906_v50 }
  0x36   :  { %846 = vmatpush3.bf16.msra.mxu1 %v911_v54 }
  0x37   :  { %847 = vmatprep.subr.bf16.mxu1 %v919_v36 }
  0x38   :  { %819 = vmatpush3.bf16.msra.mxu0 %v907_v52 }
  0x39   :  { %820 = vmatprep.subr.bf16.mxu0 %v909_v53 }
  0x3a   :  { %848 = vmatpush3.bf16.msra.mxu1 %v917_v58 }
  0x3c   :  { %821 = vmatpush3.bf16.msra.mxu0 %v910_v56 }
  0x3d   :  { %822 = vmatprep.subr.bf16.mxu0 %v912_v57  ;;  %850 = vmatmul.mubr.msk.bf16.vlgmr.msra.gmra.mrb[4].mxu1 %vm493_vm1, %v918_v60 }
  0x40   :  { %823 = vmatpush3.bf16.msra.mxu0 %v913_v59 }
  0x43   :  { %612 = vmatmul.mubr.bf16.vlgmr.msra.gmra.mrb[4].mxu0 %v914_v61 }
  0xf6   :  { %v780_v62 = vpop.f32.mrb[0].mxu0 }
  0xf7   :  { %v802_v63 = vpop.f32.mrb[0].mxu1  ;;  %v781_v0 = vpop.f32.mrb[1].mxu0 }
  0xf8   :  { %v782_v1 = vadd.f32 %v781_v0, %v780_v62  ;;  %v803_v2 = vpop.f32.mrb[1].mxu1  ;;  %v783_v3 = vpop.f32.mrb[2].mxu0 }
  0xf9   :  { %v804_v4 = vadd.f32 %v803_v2, %v802_v63  ;;  %v805_v5 = vpop.f32.mrb[2].mxu1  ;;  %v784_v6 = vpop.f32.mrb[3].mxu0 }
  0xfa   :  { %v785_v7 = vadd.f32 %v784_v6, %v783_v3  ;;  %v806_v8 = vpop.f32.mrb[3].mxu1 }
  0xfb   :  { %v573_v9 = vadd.f32 %v804_v4, %v782_v1  ;;  %v807_v10 = vadd.f32 %v806_v8, %v805_v5 }
  0xfd   :  { %v576_v11 = vadd.f32 %v807_v10, %v785_v7 }
 0x110   :  { %v654_v12 = vpop.f32.mrb[4].mxu1 }
 0x111   :  { %v851_v13 = vpop.f32.mrb[5].mxu1 }
 0x112   :  { %v657_v14 = vpop.f32.mrb[6].mxu1 }
 0x113   :  { %v852_v16 = vpop.f32.mrb[7].mxu1 }
 0x116   :  { %v824_v15 = vpop.f32.mrb[4].mxu0 }
 0x117   :  { %v825_v17 = vpop.f32.mrb[5].mxu0 }
 0x118   :  { %v826_v18 = vadd.f32 %v825_v17, %v824_v15  ;;  %v827_v19 = vpop.f32.mrb[6].mxu0 }
 0x119   :  { %v828_v20 = vpop.f32.mrb[7].mxu0 }
 0x11a   :  { %v614_v21 = vadd.f32 %v826_v18, %v573_v9  ;;  %v829_v22 = vadd.f32 %v828_v20, %v827_v19 }
 0x11c   :  { %v655_v24 = vadd.f32 %v654_v12, %v614_v21  ;;  %v617_v25 = vadd.f32 %v829_v22, %v576_v11 }
 0x11e   :  { %v668_v27 = vmul.f32 %v758_v23, %v655_v24  ;;  %v658_v28 = vadd.f32 %v657_v14, %v617_v25 }
 0x120   :  { %v677_v29 = vadd.f32 %v759_v26, %v668_v27  ;;  %v669_v30 = vmul.f32 %v758_v23, %v658_v28 }
 0x122   :  { %v679_v31 = vmax.f32 %v677_v29, 0.0  ;;  %v678_v32 = vadd.f32 %v759_v26, %v669_v30 }
 0x124   :  { %v762_v33 = vpack.c.bf16 %v679_v31, %v679_v31  ;;  %v680_v34 = vmax.f32 %v678_v32, 0.0 }
 0x126   :  { %690 = vst.msk [vmem:[%s1145_s4] sm:$0xf] %vm689_vm2, %v762_v33  ;;  %v763_v35 = vpack.c.bf16 %v680_v34, %v680_v34 }
 0x128   :  { %691 = vst.msk [vmem:[%s1145_s4 + $0x4] sm:$0xf] %vm689_vm2, %v763_v35 }

// kernel: resnet_forward.23
= control target key start
LH: loop header
LB: loop body
LE: loop exit
PB: predicated region body
PF: predicated region fallthrough
CT: control target
= control target key end

     0   :  { %vm968_vm0 = vcmask 523264   ;;  %vm1293_vm1 = vcmask 519168   ;;  %s2119_s1 = inlined_call_operand.vmem [shape: bf16[1728,64], index: 1, kind: input, shape index: {}]   ;;  %s2120_s0 = inlined_call_operand.vmem [shape: bf16[16,1728], index: 0, kind: input, shape index: {}]   ;;  %s2121_s2 = inlined_call_operand.vmem [shape: f32[1,64], index: 2, kind: input, shape index: {}]   ;;  %s2122_s4 = inlined_call_operand.vmem [shape: bf16[16,64], index: 4, kind: input, shape index: {}]   ;;  %s2123_s3 = inlined_call_operand.vmem [shape: f32[1,64], index: 3, kind: input, shape index: {}]   ;;  %s2124_s5 = inlined_call_operand.vmem [shape: bf16[16,64], index: 5, kind: output, shape index: {}]  }
   0x1   :  { %v1566_v0 = vld [vmem:[%s2119_s1 + $0x40] sm:$0xff]   ;;  %v1568_v2 = vld [vmem:[%s2119_s1 + $0x48] sm:$0xff]   ;;  %v1570_v4 = vld [vmem:[%s2119_s1 + $0x50] sm:$0xff]  }
   0x2   :  { %v1567_v1 = vld [vmem:[%s2119_s1] sm:$0xff]   ;;  %1433 = vmatprep.subr.bf16.mxu1 %v1566_v0  ;;  %v1569_v3 = vld [vmem:[%s2119_s1 + $0x8] sm:$0xff]   ;;  %v1571_v5 = vld [vmem:[%s2119_s1 + $0x10] sm:$0xff]  }
   0x3   :  { %1434 = vmatpush3.bf16.msra.mxu1 %v1567_v1  ;;  %v1572_v6 = vld [vmem:[%s2119_s1 + $0x58] sm:$0xff]   ;;  %v1576_v8 = vld [vmem:[%s2119_s1 + $0x140] sm:$0xff]   ;;  %v1580_v12 = vld [vmem:[%s2119_s1 + $0x148] sm:$0xff]  }
   0x4   :  { %1435 = vmatprep.subr.bf16.mxu1 %v1568_v2  ;;  %v1573_v7 = vld [vmem:[%s2119_s1 + $0x18] sm:$0xff]   ;;  %v1577_v9 = vld [vmem:[%s2119_s1 + $0x100] sm:$0xff]   ;;  %1477 = vmatprep.subr.bf16.mxu0 %v1576_v8  ;;  %v1581_v13 = vld [vmem:[%s2119_s1 + $0x108] sm:$0xff]  }
   0x5   :  { %v1574_v10 = vld [vmem:[%s2119_s1 + $0x60] sm:$0xff]   ;;  %1478 = vmatpush3.bf16.msra.mxu0 %v1577_v9  ;;  %v1578_v14 = vld [vmem:[%s2119_s1 + $0x68] sm:$0xff]   ;;  %v1584_v16 = vld [vmem:[%s2119_s1 + $0x150] sm:$0xff]  }
   0x6   :  { %v1575_v11 = vld [vmem:[%s2119_s1 + $0x20] sm:$0xff]   ;;  %1479 = vmatprep.subr.bf16.mxu0 %v1580_v12  ;;  %v1579_v15 = vld [vmem:[%s2119_s1 + $0x28] sm:$0xff]   ;;  %v1585_v17 = vld [vmem:[%s2119_s1 + $0x110] sm:$0xff]  }
   0x7   :  { %1436 = vmatpush3.bf16.msra.mxu1 %v1569_v3  ;;  %v1582_v18 = vld [vmem:[%s2119_s1 + $0x70] sm:$0xff]   ;;  %v1588_v20 = vld [vmem:[%s2119_s1 + $0x158] sm:$0xff]   ;;  %v1593_v25 = vld [vmem:[%s2119_s1 + $0xc0] sm:$0xff]  }
   0x8   :  { %1437 = vmatprep.subr.bf16.mxu1 %v1570_v4  ;;  %v1583_v19 = vld [vmem:[%s2119_s1 + $0x30] sm:$0xff]   ;;  %v1586_v21 = vld [vmem:[%s2119_s1 + $0x78] sm:$0xff]   ;;  %v1595_v27 = vld [vmem:[%s2119_s1 + $0x160] sm:$0xff]  }
   0x9   :  { %1480 = vmatpush3.bf16.msra.mxu0 %v1581_v13  ;;  %v1591_v22 = vld [vmem:[%s2120_s0 + $0x4] ss:$56 sps:$4 sm:$0xff]   ;;  %v1589_v26 = vld [vmem:[%s2120_s0] ss:$56 sps:$4 sm:$0xff]   ;;  %v1597_v30 = vld [vmem:[%s2119_s1 + $0xc8] sm:$0xff]  }
   0xa   :  { %1481 = vmatprep.subr.bf16.mxu0 %v1584_v16  ;;  %v1592_v23 = vld [vmem:[%s2119_s1 + $0x118] sm:$0xff]   ;;  %1004 = vmatprep.mubr.bf16.mxu1 %v1591_v22  ;;  %v1596_v28 = vld [vmem:[%s2119_s1 + $0x120] sm:$0xff]   ;;  %v1599_v31 = vld [vmem:[%s2119_s1 + $0x168] sm:$0xff]  }
   0xb   :  { %1438 = vmatpush3.bf16.msra.mxu1 %v1571_v5  ;;  %v1587_v24 = vld [vmem:[%s2119_s1 + $0x38] sm:$0xff]   ;;  %v1594_v29 = vld [vmem:[%s2119_s1 + $0x80] sm:$0xff]   ;;  %v1600_v32 = vld [vmem:[%s2119_s1 + $0x128] sm:$0xff]  }
   0xc   :  { %1439 = vmatprep.subr.bf16.mxu1 %v1572_v6  ;;  %v1598_v33 = vld [vmem:[%s2119_s1 + $0x88] sm:$0xff]   ;;  %v1601_v34 = vld [vmem:[%s2119_s1 + $0xd0] sm:$0xff]   ;;  %v1605_v38 = vld [vmem:[%s2119_s1 + $0xd8] sm:$0xff]  }
   0xd   :  { %1482 = vmatpush3.bf16.msra.mxu0 %v1585_v17  ;;  %v1603_v35 = vld [vmem:[%s2119_s1 + $0x170] sm:$0xff]   ;;  %v1607_v39 = vld [vmem:[%s2119_s1 + $0x178] sm:$0xff]   ;;  %v1609_v42 = vld [vmem:[%s2119_s1 + $0xe0] sm:$0xff]   ;;  %v1695_v17 = vmov 0  }
   0xe   :  { %1483 = vmatprep.subr.bf16.mxu0 %v1588_v20  ;;  %v1604_v36 = vld [vmem:[%s2119_s1 + $0x130] sm:$0xff]   ;;  %v1608_v40 = vld [vmem:[%s2119_s1 + $0x138] sm:$0xff]   ;;  %v1614_v45 = vld [vmem:[%s2119_s1 + $0x240] sm:$0xff]  }
   0xf   :  { %1440 = vmatpush3.bf16.msra.mxu1 %v1573_v7  ;;  %v1602_v37 = vld [vmem:[%s2119_s1 + $0x90] sm:$0xff]   ;;  %v1606_v41 = vld [vmem:[%s2119_s1 + $0x98] sm:$0xff]   ;;  %v1615_v46 = vld [vmem:[%s2119_s1 + $0x200] sm:$0xff]  }
  0x10   :  { %1441 = vmatprep.subr.bf16.mxu1 %v1574_v10  ;;  %v1611_v43 = vld [vmem:[%s2120_s0 + $0x10] ss:$56 sps:$4 sm:$0xff]   ;;  %v1613_v44 = vld [vmem:[%s2120_s0 + $0x14] ss:$56 sps:$4 sm:$0xff]   ;;  %v1610_v47 = vld [vmem:[%s2119_s1 + $0xa0] sm:$0xff]  }
  0x11   :  { %1484 = vmatpush3.bf16.msra.mxu0 %v1592_v23  ;;  %1086 = vmatprep.mubr.bf16.mxu0 %v1613_v44  ;;  %v1616_v48 = vld [vmem:[%s2119_s1 + $0xe8] sm:$0xff]   ;;  %v1620_v52 = vld [vmem:[%s2119_s1 + $0xf0] sm:$0xff]   ;;  %v1624_v56 = vld [vmem:[%s2119_s1 + $0xf8] sm:$0xff]  }
  0x12   :  { %1485 = vmatprep.subr.bf16.mxu0 %v1595_v27  ;;  %v1618_v49 = vld [vmem:[%s2119_s1 + $0x248] sm:$0xff]   ;;  %v1622_v53 = vld [vmem:[%s2119_s1 + $0x250] sm:$0xff]   ;;  %v1626_v57 = vld [vmem:[%s2119_s1 + $0x258] sm:$0xff]  }
  0x13   :  { %1442 = vmatpush3.bf16.msra.mxu1 %v1575_v11  ;;  %v1619_v50 = vld [vmem:[%s2119_s1 + $0x208] sm:$0xff]   ;;  %v1623_v54 = vld [vmem:[%s2119_s1 + $0x210] sm:$0xff]   ;;  %v1625_v58 = vld [vmem:[%s2119_s1 + $0xb8] sm:$0xff]  }
  0x14   :  { %1443 = vmatprep.subr.bf16.mxu1 %v1578_v14  ;;  %v1617_v51 = vld [vmem:[%s2119_s1 + $0xa8] sm:$0xff]   ;;  %v1621_v55 = vld [vmem:[%s2119_s1 + $0xb0] sm:$0xff]   ;;  %v1630_v60 = vld [vmem:[%s2119_s1 + $0x218] sm:$0xff]  }
  0x15   :  { %1486 = vmatpush3.bf16.msra.mxu0 %v1596_v28  ;;  %v1629_v59 = vld [vmem:[%s2120_s0 + $0xc] ss:$56 sps:$4 sm:$0xff]   ;;  %v1627_v61 = vld [vmem:[%s2120_s0 + $0x8] ss:$56 sps:$4 sm:$0xff]   ;;  %v1639_v6 = vld [vmem:[%s2119_s1 + $0x1d0] sm:$0xff]  }
  0x16   :  { %1487 = vmatprep.subr.bf16.mxu0 %v1599_v31  ;;  %v1631_v62 = vld [vmem:[%s2119_s1 + $0x1c0] sm:$0xff]   ;;  %v1635_v2 = vld [vmem:[%s2119_s1 + $0x1c8] sm:$0xff]   ;;  %v1640_v7 = vld [vmem:[%s2119_s1 + $0x190] sm:$0xff]  }
  0x17   :  { %1444 = vmatpush3.bf16.msra.mxu1 %v1579_v15  ;;  %v1632_v63 = vld [vmem:[%s2119_s1 + $0x180] sm:$0xff]   ;;  %v1636_v3 = vld [vmem:[%s2119_s1 + $0x188] sm:$0xff]   ;;  %v1641_v8 = vld [vmem:[%s2119_s1 + $0x270] sm:$0xff]  }
  0x18   :  { %1445 = vmatprep.subr.bf16.mxu1 %v1582_v18  ;;  %v1633_v0 = vld [vmem:[%s2119_s1 + $0x260] sm:$0xff]   ;;  %v1637_v4 = vld [vmem:[%s2119_s1 + $0x268] sm:$0xff]   ;;  %v1642_v9 = vld [vmem:[%s2119_s1 + $0x230] sm:$0xff]  }
  0x19   :  { %1488 = vmatpush3.bf16.msra.mxu0 %v1600_v32  ;;  %v1634_v1 = vld [vmem:[%s2119_s1 + $0x220] sm:$0xff]   ;;  %v1638_v5 = vld [vmem:[%s2119_s1 + $0x228] sm:$0xff]   ;;  %v1643_v10 = vld [vmem:[%s2119_s1 + $0x1d8] sm:$0xff]  }
  0x1a   :  { %1489 = vmatprep.subr.bf16.mxu0 %v1603_v35  ;;  %v1644_v11 = vld [vmem:[%s2119_s1 + $0x198] sm:$0xff]   ;;  %v1647_v14 = vld [vmem:[%s2119_s1 + $0x1e0] sm:$0xff]   ;;  %v1653_v20 = vld [vmem:[%s2119_s1 + $0x1e8] sm:$0xff]  }
  0x1b   :  { %1446 = vmatpush3.bf16.msra.mxu1 %v1583_v19  ;;  %v1645_v12 = vld [vmem:[%s2119_s1 + $0x278] sm:$0xff]   ;;  %v1648_v15 = vld [vmem:[%s2119_s1 + $0x1a0] sm:$0xff]   ;;  %v1655_v22 = vld [vmem:[%s2119_s1 + $0x308] sm:$0xff]  }
  0x1c   :  { %1447 = vmatprep.subr.bf16.mxu1 %v1586_v21  ;;  %v1646_v13 = vld [vmem:[%s2119_s1 + $0x238] sm:$0xff]   ;;  %v1652_v19 = vld [vmem:[%s2119_s1 + $0x300] sm:$0xff]   ;;  %v1654_v21 = vld [vmem:[%s2119_s1 + $0x1a8] sm:$0xff]  }
  0x1d   :  { %1490 = vmatpush3.bf16.msra.mxu0 %v1604_v36  ;;  %v1649_v16 = vld [vmem:[%s2120_s0 + $0x20] ss:$56 sps:$4 sm:$0xff]   ;;  %v1651_v18 = vld [vmem:[%s2120_s0 + $0x24] ss:$56 sps:$4 sm:$0xff]   ;;  %v1656_v23 = vld [vmem:[%s2119_s1 + $0x1f0] sm:$0xff]  }
  0x1e   :  { %1491 = vmatprep.subr.bf16.mxu0 %v1607_v39  ;;  %v1663_v27 = vld [vmem:[%s2120_s0 + $0x1c] ss:$56 sps:$4 sm:$0xff]   ;;  %v1661_v31 = vld [vmem:[%s2120_s0 + $0x18] ss:$56 sps:$4 sm:$0xff]   ;;  %v1666_v32 = vld [vmem:[%s2119_s1 + $0x280] sm:$0xff]  }
  0x1f   :  { %1448 = vmatpush3.bf16.msra.mxu1 %v1587_v24  ;;  %v1657_v24 = vld [vmem:[%s2119_s1 + $0x1b0] sm:$0xff]   ;;  %v1660_v28 = vld [vmem:[%s2119_s1 + $0x1b8] sm:$0xff]   ;;  %v1669_v35 = vld [vmem:[%s2119_s1 + $0x288] sm:$0xff]  }
  0x20   :  { %1455 = vmatprep.subr.bf16.mxu1 %v1593_v25  ;;  %v1658_v25 = vld [vmem:[%s2119_s1 + $0x310] sm:$0xff]   ;;  %v1670_v36 = vld [vmem:[%s2119_s1 + $0x328] sm:$0xff]   ;;  %v1678_v44 = vld [vmem:[%s2119_s1 + $0x2a0] sm:$0xff]  }
  0x21   :  { %1492 = vmatpush3.bf16.msra.mxu0 %v1608_v40  ;;  %v1673_v39 = vld [vmem:[%s2119_s1 + $0x330] sm:$0xff]   ;;  %v1674_v40 = vld [vmem:[%s2119_s1 + $0x2d8] sm:$0xff]  }
  0x22   :  { %1005 = vmatmul.mubr.bf16.vlgmr.msra.gmra.mrb[0].mxu1 %v1589_v26  ;;  %1521 = vmatprep.subr.bf16.mxu0 %v1614_v45  ;;  %v1659_v26 = vld [vmem:[%s2119_s1 + $0x1f8] sm:$0xff]   ;;  %v1679_v45 = vld [vmem:[%s2119_s1 + $0x340] sm:$0xff]  }
  0x23   :  { %1456 = vmatpush3.bf16.msra.mxu1 %v1594_v29  ;;  %1045 = vmatprep.mubr.bf16.mxu1 %v1629_v59  ;;  %v1664_v29 = vld [vmem:[%s2119_s1 + $0x318] sm:$0xff]  }
  0x24   :  { %1457 = vmatprep.subr.bf16.mxu1 %v1597_v30  ;;  %1087 = vmatmul.mubr.bf16.vlgmr.msra.gmra.mrb[0].mxu0 %v1611_v43  ;;  %v1665_v30 = vld [vmem:[%s2119_s1 + $0x2c0] sm:$0xff]  }
  0x25   :  { %1522 = vmatpush3.bf16.msra.mxu0 %v1615_v46  ;;  %1168 = vmatprep.mubr.bf16.mxu0 %v1651_v18  ;;  %v1677_v43 = vld [vmem:[%s2119_s1 + $0x2e0] sm:$0xff]   ;;  %v1680_v46 = vld [vmem:[%s2119_s1 + $0x2e8] sm:$0xff]  }
  0x26   :  { %1523 = vmatprep.subr.bf16.mxu0 %v1618_v49  ;;  %v1690_v49 = vld [vmem:[%s2120_s0 + $0x2c] ss:$56 sps:$4 sm:$0xff]  }
  0x27   :  { %1458 = vmatpush3.bf16.msra.mxu1 %v1598_v33  ;;  %v1667_v33 = vld [vmem:[%s2119_s1 + $0x320] sm:$0xff]  }
  0x28   :  { %1459 = vmatprep.subr.bf16.mxu1 %v1601_v34  ;;  %v1668_v34 = vld [vmem:[%s2119_s1 + $0x2c8] sm:$0xff]  }
  0x29   :  { %1524 = vmatpush3.bf16.msra.mxu0 %v1619_v50  ;;  %v1683_v50 = vld [vmem:[%s2119_s1 + $0x2f0] sm:$0xff]  }
  0x2a   :  { %1525 = vmatprep.subr.bf16.mxu0 %v1622_v53  ;;  %v1685_v53 = vld [vmem:[%s2119_s1 + $0x350] sm:$0xff]  }
  0x2b   :  { %1460 = vmatpush3.bf16.msra.mxu1 %v1602_v37  ;;  %v1671_v37 = vld [vmem:[%s2119_s1 + $0x2d0] sm:$0xff]  }
  0x2c   :  { %1461 = vmatprep.subr.bf16.mxu1 %v1605_v38  ;;  %v1672_v38 = vld [vmem:[%s2119_s1 + $0x290] sm:$0xff]  }
  0x2d   :  { %1526 = vmatpush3.bf16.msra.mxu0 %v1623_v54  ;;  %v1686_v54 = vld [vmem:[%s2119_s1 + $0x2f8] sm:$0xff]  }
  0x2e   :  { %1527 = vmatprep.subr.bf16.mxu0 %v1626_v57  ;;  %v1688_v57 = vld [vmem:[%s2120_s0 + $0x28] ss:$56 sps:$4 sm:$0xff]  }
  0x2f   :  { %1462 = vmatpush3.bf16.msra.mxu1 %v1606_v41  ;;  %v1675_v41 = vld [vmem:[%s2119_s1 + $0x298] sm:$0xff]  }
  0x30   :  { %1463 = vmatprep.subr.bf16.mxu1 %v1609_v42  ;;  %v1676_v42 = vld [vmem:[%s2119_s1 + $0x338] sm:$0xff]  }
  0x31   :  { %1528 = vmatpush3.bf16.msra.mxu0 %v1630_v60 }
  0x32   :  { %1529 = vmatprep.subr.bf16.mxu0 %v1633_v0 }
  0x33   :  { %1464 = vmatpush3.bf16.msra.mxu1 %v1610_v47  ;;  %v1681_v47 = vld [vmem:[%s2119_s1 + $0x2a8] sm:$0xff]  }
  0x34   :  { %1465 = vmatprep.subr.bf16.mxu1 %v1616_v48  ;;  %v1682_v48 = vld [vmem:[%s2119_s1 + $0x348] sm:$0xff]  }
  0x35   :  { %1530 = vmatpush3.bf16.msra.mxu0 %v1634_v1 }
  0x36   :  { %1531 = vmatprep.subr.bf16.mxu0 %v1637_v4 }
  0x37   :  { %1466 = vmatpush3.bf16.msra.mxu1 %v1617_v51  ;;  %v1692_v51 = vld [vmem:[%s2120_s0 + $0x34] ss:$56 sps:$4 sm:$0xff]  }
  0x38   :  { %1467 = vmatprep.subr.bf16.mxu1 %v1620_v52  ;;  %v1684_v52 = vld [vmem:[%s2119_s1 + $0x2b0] sm:$0xff]  }
  0x39   :  { %1532 = vmatpush3.bf16.msra.mxu0 %v1638_v5 }
  0x3a   :  { %1533 = vmatprep.subr.bf16.mxu0 %v1641_v8 }
  0x3b   :  { %1468 = vmatpush3.bf16.msra.mxu1 %v1621_v55  ;;  %v1687_v55 = vld [vmem:[%s2119_s1 + $0x2b8] sm:$0xff]  }
  0x3c   :  { %1469 = vmatprep.subr.bf16.mxu1 %v1624_v56  ;;  %v1691_v56 = vld [vmem:[%s2119_s1 + $0x358] sm:$0xff]  }
  0x3d   :  { %1534 = vmatpush3.bf16.msra.mxu0 %v1642_v9 }
  0x3e   :  { %1535 = vmatprep.subr.bf16.mxu0 %v1645_v12 }
  0x3f   :  { %1470 = vmatpush3.bf16.msra.mxu1 %v1625_v58  ;;  %v1694_v58 = vld [vmem:[%s2120_s0 + $0x30] ss:$56 sps:$4 sm:$0xff]  }
  0x40   :  { %1499 = vmatprep.subr.bf16.mxu1 %v1631_v62 }
  0x41   :  { %1536 = vmatpush3.bf16.msra.mxu0 %v1646_v13 }
  0x42   :  { %1046 = vmatmul.mubr.bf16.vlgmr.msra.gmra.mrb[4].mxu1 %v1627_v61  ;;  %1218 = vmatprep.subr.bf16.mxu0 %v1695_v17 }
  0x43   :  { %1500 = vmatpush3.bf16.msra.mxu1 %v1632_v63  ;;  %1127 = vmatprep.mubr.bf16.mxu1 %v1663_v27 }
  0x44   :  { %1501 = vmatprep.subr.bf16.mxu1 %v1635_v2  ;;  %1169 = vmatmul.mubr.bf16.vlgmr.msra.gmra.mrb[4].mxu0 %v1649_v16 }
  0x45   :  { %1219 = vmatpush1.bf16.msra.mxu0 %v1652_v19  ;;  %1422 = vmatprep.mubr.msk.bf16.mxu0 %vm968_vm0, %v1692_v51 }
  0x46   :  { %1220 = vmatprep.subr.bf16.mxu0 %v1695_v17 }
  0x47   :  { %1502 = vmatpush3.bf16.msra.mxu1 %v1636_v3 }
  0x48   :  { %1503 = vmatprep.subr.bf16.mxu1 %v1639_v6 }
  0x49   :  { %1221 = vmatpush1.bf16.msra.mxu0 %v1655_v22 }
  0x4a   :  { %1222 = vmatprep.subr.bf16.mxu0 %v1695_v17 }
  0x4b   :  { %1504 = vmatpush3.bf16.msra.mxu1 %v1640_v7 }
  0x4c   :  { %1505 = vmatprep.subr.bf16.mxu1 %v1643_v10 }
  0x4d   :  { %1223 = vmatpush1.bf16.msra.mxu0 %v1658_v25 }
  0x4e   :  { %1224 = vmatprep.subr.bf16.mxu0 %v1695_v17 }
  0x4f   :  { %1506 = vmatpush3.bf16.msra.mxu1 %v1644_v11 }
  0x50   :  { %1507 = vmatprep.subr.bf16.mxu1 %v1647_v14 }
  0x51   :  { %1225 = vmatpush1.bf16.msra.mxu0 %v1664_v29 }
  0x52   :  { %1226 = vmatprep.subr.bf16.mxu0 %v1695_v17 }
  0x53   :  { %1508 = vmatpush3.bf16.msra.mxu1 %v1648_v15 }
  0x54   :  { %1509 = vmatprep.subr.bf16.mxu1 %v1653_v20 }
  0x55   :  { %1227 = vmatpush1.bf16.msra.mxu0 %v1667_v33 }
  0x56   :  { %1228 = vmatprep.subr.bf16.mxu0 %v1695_v17 }
  0x57   :  { %1510 = vmatpush3.bf16.msra.mxu1 %v1654_v21 }
  0x58   :  { %1511 = vmatprep.subr.bf16.mxu1 %v1656_v23 }
  0x59   :  { %1229 = vmatpush1.bf16.msra.mxu0 %v1670_v36 }
  0x5a   :  { %1230 = vmatprep.subr.bf16.mxu0 %v1695_v17 }
  0x5b   :  { %1512 = vmatpush3.bf16.msra.mxu1 %v1657_v24 }
  0x5c   :  { %1513 = vmatprep.subr.bf16.mxu1 %v1659_v26 }
  0x5d   :  { %1231 = vmatpush1.bf16.msra.mxu0 %v1673_v39 }
  0x5e   :  { %1232 = vmatprep.subr.bf16.mxu0 %v1695_v17 }
  0x5f   :  { %1514 = vmatpush3.bf16.msra.mxu1 %v1660_v28 }
  0x60   :  { %1543 = vmatprep.subr.bf16.mxu1 %v1665_v30 }
  0x61   :  { %1233 = vmatpush1.bf16.msra.mxu0 %v1676_v42 }
  0x62   :  { %1128 = vmatmul.mubr.bf16.vlgmr.msra.gmra.mrb[8].mxu1 %v1661_v31  ;;  %1234 = vmatprep.subr.bf16.mxu0 %v1695_v17 }
  0x63   :  { %1544 = vmatpush3.bf16.msra.mxu1 %v1666_v32  ;;  %1209 = vmatprep.mubr.bf16.mxu1 %v1690_v49 }
  0x64   :  { %1545 = vmatprep.subr.bf16.mxu1 %v1668_v34 }
  0x65   :  { %1235 = vmatpush1.bf16.msra.mxu0 %v1679_v45  ;;  %v1430_v45 = vld [vmem:[%s2122_s4] sm:$0xff]  }
  0x66   :  { %1236 = vmatprep.subr.bf16.mxu0 %v1695_v17 }
  0x67   :  { %1546 = vmatpush3.bf16.msra.mxu1 %v1669_v35 }
  0x68   :  { %1547 = vmatprep.subr.bf16.mxu1 %v1671_v37 }
  0x69   :  { %1237 = vmatpush1.bf16.msra.mxu0 %v1682_v48  ;;  %v1424_v48 = vld [vmem:[%s2123_s3] ss:$0 sm:$0xff] }
  0x6a   :  { %1238 = vmatprep.subr.bf16.mxu0 %v1695_v17 }
  0x6b   :  { %1548 = vmatpush3.bf16.msra.mxu1 %v1672_v38 }
  0x6c   :  { %1549 = vmatprep.subr.bf16.mxu1 %v1674_v40 }
  0x6d   :  { %1239 = vmatpush1.bf16.msra.mxu0 %v1685_v53 }
  0x6e   :  { %1240 = vmatprep.subr.bf16.mxu0 %v1695_v17 }
  0x6f   :  { %1550 = vmatpush3.bf16.msra.mxu1 %v1675_v41 }
  0x70   :  { %1551 = vmatprep.subr.bf16.mxu1 %v1677_v43 }
  0x71   :  { %1241 = vmatpush1.bf16.msra.mxu0 %v1691_v56 }
  0x73   :  { %1552 = vmatpush3.bf16.msra.mxu1 %v1678_v44  ;;  %v1423_v44 = vld [vmem:[%s2121_s2] ss:$0 sm:$0xff] }
  0x74   :  { %1553 = vmatprep.subr.bf16.mxu1 %v1680_v46  ;;  %1251 = vmatmul.mubr.bf16.vlgmr.msra.gmra.mrb[8].mxu0 %v1694_v58 }
  0x77   :  { %1554 = vmatpush3.bf16.msra.mxu1 %v1681_v47 }
  0x78   :  { %1555 = vmatprep.subr.bf16.mxu1 %v1683_v50  ;;  %v1431_v50 = vunpack.c.l.bf16 %v1430_v45 }
  0x7b   :  { %1556 = vmatpush3.bf16.msra.mxu1 %v1684_v52 }
  0x7c   :  { %1557 = vmatprep.subr.bf16.mxu1 %v1686_v54  ;;  %v1432_v54 = vunpack.c.h.bf16 %v1430_v45 }
  0x7f   :  { %1558 = vmatpush3.bf16.msra.mxu1 %v1687_v55 }
  0x82   :  { %1210 = vmatmul.mubr.bf16.vlgmr.msra.gmra.mrb[12].mxu1 %v1688_v57 }
  0xf5   :  { %v1449_v59 = vpop.f32.mrb[0].mxu1 }
  0xf6   :  { %v1450_v60 = vpop.f32.mrb[1].mxu1 }
  0xf7   :  { %v1451_v61 = vadd.f32 %v1450_v60, %v1449_v59  ;;  %v1452_v62 = vpop.f32.mrb[2].mxu1  ;;  %v1493_v1 = vpop.f32.mrb[0].mxu0 }
  0xf8   :  { %v1453_v63 = vpop.f32.mrb[3].mxu1  ;;  %v1494_v2 = vpop.f32.mrb[1].mxu0 }
  0xf9   :  { %v1454_v0 = vadd.f32 %v1453_v63, %v1452_v62  ;;  %v1495_v3 = vadd.f32 %v1494_v2, %v1493_v1  ;;  %v1496_v4 = vpop.f32.mrb[2].mxu0 }
  0xfa   :  { %v1497_v5 = vpop.f32.mrb[3].mxu0 }
  0xfb   :  { %v1498_v6 = vadd.f32 %v1497_v5, %v1496_v4 }
 0x115   :  { %v1471_v7 = vpop.f32.mrb[4].mxu1 }
 0x116   :  { %v1472_v8 = vpop.f32.mrb[5].mxu1 }
 0x117   :  { %v1473_v9 = vadd.f32 %v1472_v8, %v1471_v7  ;;  %v1474_v10 = vpop.f32.mrb[6].mxu1  ;;  %v1537_v17 = vpop.f32.mrb[4].mxu0 }
 0x118   :  { %v1475_v11 = vpop.f32.mrb[7].mxu1  ;;  %v1538_v18 = vpop.f32.mrb[5].mxu0 }
 0x119   :  { %v1048_v12 = vadd.f32 %v1473_v9, %v1451_v61  ;;  %v1476_v13 = vadd.f32 %v1475_v11, %v1474_v10  ;;  %v1539_v19 = vadd.f32 %v1538_v18, %v1537_v17  ;;  %v1540_v20 = vpop.f32.mrb[6].mxu0 }
 0x11a   :  { %v1541_v21 = vpop.f32.mrb[7].mxu0 }
 0x11b   :  { %v1051_v14 = vadd.f32 %v1476_v13, %v1454_v0  ;;  %v1089_v15 = vadd.f32 %v1495_v3, %v1048_v12  ;;  %v1542_v22 = vadd.f32 %v1541_v21, %v1540_v20 }
 0x11d   :  { %v1092_v16 = vadd.f32 %v1498_v6, %v1051_v14 }
 0x135   :  { %v1515_v23 = vpop.f32.mrb[8].mxu1 }
 0x136   :  { %v1516_v24 = vpop.f32.mrb[9].mxu1 }
 0x137   :  { %v1517_v25 = vadd.f32 %v1516_v24, %v1515_v23  ;;  %v1518_v26 = vpop.f32.mrb[10].mxu1 }
 0x138   :  { %v1519_v27 = vpop.f32.mrb[11].mxu1 }
 0x139   :  { %v1130_v28 = vadd.f32 %v1517_v25, %v1089_v15  ;;  %v1520_v29 = vadd.f32 %v1519_v27, %v1518_v26 }
 0x13b   :  { %v1133_v30 = vadd.f32 %v1520_v29, %v1092_v16  ;;  %v1171_v31 = vadd.f32 %v1539_v19, %v1130_v28 }
 0x13d   :  { %v1174_v32 = vadd.f32 %v1542_v22, %v1133_v30 }
 0x147   :  { %v1252_v34 = vpop.f32.mrb[8].mxu0 }
 0x148   :  { %v1254_v36 = vpop.f32.mrb[9].mxu0 }
 0x149   :  { %v1255_v39 = vpop.f32.mrb[10].mxu0 }
 0x14a   :  { %v1257_v41 = vpop.f32.mrb[11].mxu0 }
 0x155   :  { %v1559_v33 = vpop.f32.mrb[12].mxu1 }
 0x156   :  { %v1560_v35 = vpop.f32.mrb[13].mxu1 }
 0x157   :  { %v1561_v37 = vadd.f32 %v1560_v35, %v1559_v33  ;;  %v1562_v38 = vpop.f32.mrb[14].mxu1 }
 0x158   :  { %v1563_v40 = vpop.f32.mrb[15].mxu1 }
 0x159   :  { %v1212_v42 = vadd.f32 %v1561_v37, %v1171_v31  ;;  %v1564_v43 = vadd.f32 %v1563_v40, %v1562_v38 }
 0x15b   :  { %v1253_v46 = vadd.f32 %v1252_v34, %v1212_v42  ;;  %v1215_v47 = vadd.f32 %v1564_v43, %v1174_v32 }
 0x15d   :  { %v1266_v49 = vmul.f32 %v1423_v44, %v1253_v46  ;;  %v1256_v51 = vadd.f32 %v1255_v39, %v1215_v47 }
 0x15f   :  { %v1275_v52 = vadd.f32 %v1424_v48, %v1266_v49  ;;  %v1267_v53 = vmul.f32 %v1423_v44, %v1256_v51 }
 0x161   :  { %v1281_v55 = vadd.f32 %v1431_v50, %v1275_v52  ;;  %v1276_v56 = vadd.f32 %v1424_v48, %v1267_v53 }
 0x163   :  { %v1283_v57 = vmax.f32 %v1281_v55, 0.0  ;;  %v1282_v58 = vadd.f32 %v1432_v54, %v1276_v56 }
 0x165   :  { %v1427_v59 = vpack.c.bf16 %v1283_v57, %v1283_v57  ;;  %v1284_v60 = vmax.f32 %v1282_v58, 0.0 }
 0x167   :  { %1294 = vst.msk [vmem:[%s2124_s5] sm:$0xf] %vm1293_vm1, %v1427_v59  ;;  %v1428_v61 = vpack.c.bf16 %v1284_v60, %v1284_v60 }
 0x169   :  { %1295 = vst.msk [vmem:[%s2124_s5 + $0x4] sm:$0xf] %vm1293_vm1, %v1428_v61 }

</bundles_post_ra>
